<compile_context>
chip_gen: v7x
topology: tpu7x:2x2x1
jax: 0.10.0
libtpu: 0.0.40
codegen_flags: <defaults>
</compile_context>

<pallas_src>
import functools

import jax
import jax.numpy as jnp
from jax.experimental import pallas as pl
from jax.experimental.pallas import tpu as pltpu

TAU = 0.04
LRELU_SLOPE = 0.1
CH = 4  # hidden channels of the synthetic discriminators


def _round_up(x, m):
    return ((x + m - 1) // m) * m


def _tile_t(t_out):
    return 512 if t_out >= 512 else _round_up(t_out, 128)


# ----------------------------------------------------------------------------
# Pallas kernels
# ----------------------------------------------------------------------------
def _conv_pair_kernel(wb_ref, p_ref, o_ref, fm_ref, *, slope):
    """VPU conv for real+generated batch, fused feature-matching partial sum.

    p_ref : (K, 2, NB, TILE_T) f32 patches (K = k*Cin), time on lanes.
    wb_ref: SMEM f32 (K*N + N,) = [w (K,N) row-major | bias (N,)].
    o_ref : (N, 2, NB, TILE_T) f32 activations.
    fm_ref: (1,1) f32 accumulator of sum |out_real - out_gen| across the grid.
    """
    K = p_ref.shape[0]
    N = o_ref.shape[0]

    @pl.when(pl.program_id(0) == 0)
    def _():
        fm_ref[...] = jnp.zeros_like(fm_ref)

    slab = p_ref.shape[1:]  # (2, NB, TILE_T)
    accs = [jnp.full(slab, wb_ref[K * N + n], jnp.float32) for n in range(N)]
    for k in range(K):
        xk = p_ref[k]  # (2, NB, TILE_T)
        for n in range(N):
            accs[n] = accs[n] + wb_ref[k * N + n] * xk

    fm_part = jnp.float32(0.0)
    for n in range(N):
        a = accs[n]
        if slope is not None:
            a = jnp.where(a >= 0.0, a, slope * a)
        o_ref[n] = a
        fm_part = fm_part + jnp.sum(jnp.abs(a[0] - a[1]))
    fm_ref[...] += fm_part


def _final_losses_kernel(m_ref, n_ref, dg_ref, diff_ref, gen_ref, rel_ref):
    """Fused LSGAN-generator + TPRLS loss over all discriminator final outputs.

    Grid axis t walks the stacked tensors; accumulators are resident (1,1) outputs.
    dg_ref/diff_ref blocks: (1, R, 128); pads are masked by an index mask (idx < n).
    """
    t = pl.program_id(0)

    @pl.when(t == 0)
    def _():
        gen_ref[...] = jnp.zeros_like(gen_ref)
        rel_ref[...] = jnp.zeros_like(rel_ref)

    n = n_ref[t]
    m = m_ref[t]
    dg = dg_ref[0]
    d = diff_ref[0]

    rows = jax.lax.broadcasted_iota(jnp.int32, dg.shape, 0)
    cols = jax.lax.broadcasted_iota(jnp.int32, dg.shape, 1)
    valid = rows * 128 + cols < n
    nf = n.astype(jnp.float32)

    # LSGAN generator loss: mean (dg - 1)^2 over valid elements.
    e = dg - 1.0
    gen_ref[...] += jnp.sum(jnp.where(valid, e * e, 0.0)) / nf

    # TPRLS: mask = (dr < dg + m) <=> (diff < m); masked mean of (diff - m)^2, hinged at TAU.
    mask = jnp.logical_and(valid, d < m)
    sq = (d - m) * (d - m)
    num = jnp.sum(jnp.where(mask, sq, 0.0))
    cnt = jnp.sum(jnp.where(mask, 1.0, 0.0))
    l_rel = num / jnp.maximum(cnt, 1.0)
    rel_ref[...] += jnp.where(cnt > 0.0, TAU - jnp.maximum(TAU - l_rel, 0.0), 0.0)


# ----------------------------------------------------------------------------
# Pallas wrappers
# ----------------------------------------------------------------------------
def _conv_pair_pallas(P, w, b, slope):
    """P: (K, 2, NB, T_out) f32 patches.  Returns ((N,2,NB,T_out) activations, fm_sum)."""
    K, two, NB, T_out = P.shape
    N = w.shape[1]
    tile_t = _tile_t(T_out)
    Tp = _round_up(T_out, tile_t)
    Pp = jnp.pad(P, ((0, 0), (0, 0), (0, 0), (0, Tp - T_out)))
    wb = jnp.concatenate([w.reshape(-1), b.reshape(-1)]).astype(jnp.float32)

    out, fm = pl.pallas_call(
        functools.partial(_conv_pair_kernel, slope=slope),
        out_shape=(
            jax.ShapeDtypeStruct((N, two, NB, Tp), jnp.float32),
            jax.ShapeDtypeStruct((1, 1), jnp.float32),
        ),
        grid=(Tp // tile_t,),
        in_specs=[
            pl.BlockSpec(memory_space=pltpu.MemorySpace.SMEM),  # weights + bias (flat)
            pl.BlockSpec((K, two, NB, tile_t), lambda i: (0, 0, 0, i)),
        ],
        out_specs=(
            pl.BlockSpec((N, two, NB, tile_t), lambda i: (0, 0, 0, i)),
            pl.BlockSpec((1, 1), lambda i: (0, 0)),  # resident accumulator
        ),
        compiler_params=pltpu.CompilerParams(
            dimension_semantics=("arbitrary",),  # accumulator carried across the grid
            vmem_limit_bytes=32 * 1024 * 1024,
        ),
    )(wb, Pp)
    return out[:, :, :, :T_out], fm[0, 0]


def final_losses_pallas(disc_r, disc_g):
    """One fused kernel for generator MSE-vs-1 loss and TPRLS loss over all outputs."""
    n_t = len(disc_r)
    diffs, dgs, ns, ms = [], [], [], []
    R = 8
    for dr, dg in zip(disc_r, disc_g):
        dgf = dg.reshape(-1).astype(jnp.float32)
        diff = dr.reshape(-1).astype(jnp.float32) - dgf
        n = dgf.shape[0]
        m = jnp.sort(diff)[(n - 1) // 2]  # lower median == torch.median
        dgs.append(dgf)
        diffs.append(diff)
        ns.append(n)
        ms.append(m)
        R = max(R, _round_up(pl.cdiv(n, 128), 8))

    dg_stack = jnp.stack(
        [jnp.pad(v, (0, R * 128 - v.shape[0])).reshape(R, 128) for v in dgs]
    )
    diff_stack = jnp.stack(
        [jnp.pad(v, (0, R * 128 - v.shape[0])).reshape(R, 128) for v in diffs]
    )
    m_arr = jnp.stack(ms).astype(jnp.float32)
    n_arr = jnp.array(ns, jnp.int32)

    gen_acc, rel_acc = pl.pallas_call(
        _final_losses_kernel,
        out_shape=(
            jax.ShapeDtypeStruct((1, 1), jnp.float32),
            jax.ShapeDtypeStruct((1, 1), jnp.float32),
        ),
        grid=(n_t,),
        in_specs=[
            pl.BlockSpec(memory_space=pltpu.MemorySpace.SMEM),  # medians (f32)
            pl.BlockSpec(memory_space=pltpu.MemorySpace.SMEM),  # valid counts (i32)
            pl.BlockSpec((1, R, 128), lambda t: (t, 0, 0)),
            pl.BlockSpec((1, R, 128), lambda t: (t, 0, 0)),
        ],
        out_specs=(
            pl.BlockSpec((1, 1), lambda t: (0, 0)),
            pl.BlockSpec((1, 1), lambda t: (0, 0)),
        ),
        compiler_params=pltpu.CompilerParams(
            dimension_semantics=("arbitrary",),
            vmem_limit_bytes=32 * 1024 * 1024,
        ),
    )(m_arr, n_arr, dg_stack, diff_stack)
    return gen_acc[0, 0], rel_acc[0, 0]


# ----------------------------------------------------------------------------
# Synthetic MPD / MSD discriminators (patch gather = XLA glue, conv = Pallas VPU kernel)
# ----------------------------------------------------------------------------
def _patches_time_last(h, k, stride, pad):
    """h: (Cin, 2, NB, T) -> patches (k*Cin, 2, NB, T_out) with index kk = dk*Cin + ci."""
    Cin, two, NB, T = h.shape
    hp = jnp.pad(h, ((0, 0), (0, 0), (0, 0), (pad, pad)))
    T_out = (T + 2 * pad - k) // stride + 1
    idx = jnp.arange(T_out)[None, :] * stride + jnp.arange(k)[:, None]  # (k, T_out)
    g = hp[:, :, :, idx]  # (Cin, 2, NB, k, T_out)
    P = jnp.transpose(g, (3, 0, 1, 2, 4)).reshape(k * Cin, two, NB, T_out)
    return P, T_out


def _conv_pair_ref(P, w, b, slope):
    out = jnp.einsum("ksbt,kn->nsbt", P, w, precision=jax.lax.Precision.HIGHEST)
    out = out + b[:, None, None, None]
    if slope is not None:
        out = jnp.where(out >= 0.0, out, slope * out)
    return out


def _init_conv(key, cin, cout, k):
    kw, kb = jax.random.split(key)
    w = jax.random.normal(kw, (k * cin, cout), jnp.float32) / jnp.sqrt(k * cin)
    b = 0.1 * jax.random.normal(kb, (cout,), jnp.float32)
    return w, b


def _init_stack(key):
    k1, k2, k3 = jax.random.split(key, 3)
    return [
        dict(wb=_init_conv(k1, 1, CH, 5), k=5, s=3, p=2, slope=LRELU_SLOPE),
        dict(wb=_init_conv(k2, CH, CH, 5), k=5, s=3, p=2, slope=LRELU_SLOPE),
        dict(wb=_init_conv(k3, CH, 1, 3), k=3, s=1, p=1, slope=None),
    ]


def init_discriminators(key):
    periods = (2, 3)
    scales = (1, 2)
    keys = jax.random.split(key, len(periods) + len(scales))
    mpd = dict(periods=periods, stacks=[_init_stack(keys[i]) for i in range(len(periods))])
    msd = dict(
        scales=scales,
        stacks=[_init_stack(keys[len(periods) + i]) for i in range(len(scales))],
    )
    return mpd, msd


def _mpd_prep(y, y_hat, p):
    """Period fold; returns (Cin=1, 2, B*p, Tp//p) with real/generated stacked on axis 1."""
    B, _, T = y.shape
    Tp = _round_up(T, p)

    def fold(a):
        a = a[:, 0, :]
        a = jnp.pad(a, ((0, 0), (0, Tp - T)))
        return a.reshape(B, Tp // p, p).transpose(0, 2, 1).reshape(B * p, Tp // p)

    return jnp.stack([fold(y), fold(y_hat)])[None]


def _msd_prep(y, y_hat, s):
    """Average-pool by s; returns (1, 2, B, T//s)."""
    B, _, T = y.shape

    def pool(a):
        a = a[:, 0, :]
        if s == 1:
            return a
        Tc = (T // s) * s
        return a[:, :Tc].reshape(B, Tc // s, s).mean(axis=2)

    return jnp.stack([pool(y), pool(y_hat)])[None]


# ----------------------------------------------------------------------------
# Pure-JAX reference losses (verification only)
# ----------------------------------------------------------------------------
def feature_loss_ref(fmap_r, fmap_g):
    total = jnp.float32(0.0)
    for dr, dg in zip(fmap_r, fmap_g):
        for rl, gl in zip(dr, dg):
            total = total + jnp.mean(jnp.abs(rl - gl))
    return total * 2.0


def generator_loss_ref(outs):
    total = jnp.float32(0.0)
    for g in outs:
        total = total + jnp.mean((g - 1.0) ** 2)
    return total


def generator_tprls_loss_ref(drs, dgs, tau=TAU):
    total = jnp.float32(0.0)
    for dr, dg in zip(drs, dgs):
        diff = dr - dg
        flat = diff.reshape(-1)
        n = flat.shape[0]
        m = jnp.sort(flat)[(n - 1) // 2]
        mask = dr < dg + m
        cnt = jnp.sum(mask.astype(jnp.float32))
        num = jnp.sum(jnp.where(mask, (diff - m) ** 2, 0.0))
        l_rel = num / jnp.maximum(cnt, 1.0)
        total = total + jnp.where(cnt > 0, tau - jnp.maximum(tau - l_rel, 0.0), 0.0)
    return total


# ----------------------------------------------------------------------------
# GeneratorLoss.forward
# ----------------------------------------------------------------------------
def generator_loss_forward(mpd, msd, y, y_hat, use_pallas=True):
    B = y.shape[0]
    stacks = []
    for p, layers in zip(mpd["periods"], mpd["stacks"]):
        stacks.append((_mpd_prep(y, y_hat, p), layers))
    for s, layers in zip(msd["scales"], msd["stacks"]):
        stacks.append((_msd_prep(y, y_hat, s), layers))

    fm_total = jnp.float32(0.0)
    fmap_r, fmap_g = [], []
    disc_r, disc_g = [], []
    for h, layers in stacks:
        fr_list, fg_list = [], []
        for layer in layers:
            w, b = layer["wb"]
            P, t_out = _patches_time_last(h, layer["k"], layer["s"], layer["p"])
            if use_pallas:
                h, fm_sum = _conv_pair_pallas(P, w, b, layer["slope"])
                n_el = h.shape[0] * h.shape[2] * t_out  # N * NB * T_out valid elements
                fm_total = fm_total + 2.0 * fm_sum / n_el
            else:
                h = _conv_pair_ref(P, w, b, layer["slope"])
                fr_list.append(h[:, 0])
                fg_list.append(h[:, 1])
        disc_r.append(h[:, 0].reshape(B, -1))
        disc_g.append(h[:, 1].reshape(B, -1))
        fmap_r.append(fr_list)
        fmap_g.append(fg_list)

    if use_pallas:
        loss_gen, loss_rel = final_losses_pallas(disc_r, disc_g)
        return loss_gen + fm_total + loss_rel
    loss_fm = feature_loss_ref(fmap_r, fmap_g)
    loss_gen = generator_loss_ref(disc_g)
    loss_rel = generator_tprls_loss_ref(disc_r, disc_g)
    return loss_gen + loss_fm + loss_rel


if __name__ == "__main__":
    key = jax.random.PRNGKey(0)
    kp, ky, kyh = jax.random.split(key, 3)
    mpd, msd = init_discriminators(kp)

    B, T = 2, 240
    y = jax.random.normal(ky, (B, 1, T), jnp.float32)
    y_hat = jax.random.normal(kyh, (B, 1, T), jnp.float32)

    pallas_fwd = jax.jit(lambda a, b: generator_loss_forward(mpd, msd, a, b, True))
    ref_fwd = jax.jit(lambda a, b: generator_loss_forward(mpd, msd, a, b, False))

    loss = jax.block_until_ready(pallas_fwd(y, y_hat))
    ref = jax.block_until_ready(ref_fwd(y, y_hat))

    assert bool(jnp.isfinite(loss)), "non-finite loss"
    assert abs(float(loss) - float(ref)) < 1e-2 * max(1.0, abs(float(ref))), (
        float(loss),
        float(ref),
    )
    print("KERNEL_OK")
</pallas_src>

<mosaic_0001>
module attributes {stable_mosaic.version = 11 : i64} {
  func.func @_conv_pair_kernel(%arg0: i32, %arg1: memref<24xf32, #tpu.memory_space<smem>>, %arg2: memref<5x2x6x128xf32, #tpu.memory_space<vmem>>, %arg3: memref<4x2x6x128xf32, #tpu.memory_space<vmem>>, %arg4: memref<1x1xf32, #tpu.memory_space<vmem>>) attributes {dimension_semantics = [#tpu.dimension_semantics<arbitrary>], iteration_bounds = array<i64: 1>, scalar_prefetch = 0 : i64, scratch_operands = 0 : i64, tpu.core_type = #tpu.core_type<tc>, window_params = [{transform_indices = @transform_0, window_bounds = array<i64: 24>}, {transform_indices = @transform_1, window_bounds = array<i64: 5, 2, 6, 128>}, {transform_indices = @transform_2, window_bounds = array<i64: 4, 2, 6, 128>}, {pipeline_mode = #tpu.pipeline_mode<synchronous>, transform_indices = @transform_3, window_bounds = array<i64: 1, 1>}]} {
    %c0_i32 = arith.constant 0 : i32
    %0 = arith.cmpi eq, %arg0, %c0_i32 : i32
    %1 = arith.extui %0 : i1 to i32
    %c0_i32_0 = arith.constant 0 : i32
    %2 = arith.cmpi ne, %1, %c0_i32_0 : i32
    scf.if %2 {
      %cst_53 = arith.constant 0.000000e+00 : f32
      %181 = vector.broadcast %cst_53 : f32 to vector<1x1xf32>
      %c0_54 = arith.constant 0 : index
      %c0_55 = arith.constant 0 : index
      %182 = vector.load %arg4[%c0_54, %c0_55] : memref<1x1xf32, #tpu.memory_space<vmem>>, vector<1x1xf32>
      tpu.vector_store %arg4[%c0_54, %c0_55], %181 {strides = array<i32>} : memref<1x1xf32, #tpu.memory_space<vmem>>, vector<1x1xf32>,
    } else {
    }
    %c20 = arith.constant 20 : index
    %3 = memref.load %arg1[%c20] : memref<24xf32, #tpu.memory_space<smem>>
    %4 = vector.broadcast %3 : f32 to vector<2x6x128xf32>
    %c21 = arith.constant 21 : index
    %5 = memref.load %arg1[%c21] : memref<24xf32, #tpu.memory_space<smem>>
    %6 = vector.broadcast %5 : f32 to vector<2x6x128xf32>
    %c22 = arith.constant 22 : index
    %7 = memref.load %arg1[%c22] : memref<24xf32, #tpu.memory_space<smem>>
    %8 = vector.broadcast %7 : f32 to vector<2x6x128xf32>
    %c23 = arith.constant 23 : index
    %9 = memref.load %arg1[%c23] : memref<24xf32, #tpu.memory_space<smem>>
    %10 = vector.broadcast %9 : f32 to vector<2x6x128xf32>
    %c0 = arith.constant 0 : index
    %c0_1 = arith.constant 0 : index
    %c0_2 = arith.constant 0 : index
    %c0_3 = arith.constant 0 : index
    %11 = vector.load %arg2[%c0, %c0_1, %c0_2, %c0_3] : memref<5x2x6x128xf32, #tpu.memory_space<vmem>>, vector<1x2x6x128xf32>
    %12 = vector.shape_cast %11 : vector<1x2x6x128xf32> to vector<2x6x128xf32>
    %c0_4 = arith.constant 0 : index
    %13 = memref.load %arg1[%c0_4] : memref<24xf32, #tpu.memory_space<smem>>
    %14 = vector.broadcast %13 : f32 to vector<2x6x128xf32>
    %15 = arith.mulf %14, %12 : vector<2x6x128xf32>
    %16 = arith.addf %4, %15 : vector<2x6x128xf32>
    %c1 = arith.constant 1 : index
    %17 = memref.load %arg1[%c1] : memref<24xf32, #tpu.memory_space<smem>>
    %18 = vector.broadcast %17 : f32 to vector<2x6x128xf32>
    %19 = arith.mulf %18, %12 : vector<2x6x128xf32>
    %20 = arith.addf %6, %19 : vector<2x6x128xf32>
    %c2 = arith.constant 2 : index
    %21 = memref.load %arg1[%c2] : memref<24xf32, #tpu.memory_space<smem>>
    %22 = vector.broadcast %21 : f32 to vector<2x6x128xf32>
    %23 = arith.mulf %22, %12 : vector<2x6x128xf32>
    %24 = arith.addf %8, %23 : vector<2x6x128xf32>
    %c3 = arith.constant 3 : index
    %25 = memref.load %arg1[%c3] : memref<24xf32, #tpu.memory_space<smem>>
    %26 = vector.broadcast %25 : f32 to vector<2x6x128xf32>
    %27 = arith.mulf %26, %12 : vector<2x6x128xf32>
    %28 = arith.addf %10, %27 : vector<2x6x128xf32>
    %c1_5 = arith.constant 1 : index
    %c0_6 = arith.constant 0 : index
    %c0_7 = arith.constant 0 : index
    %c0_8 = arith.constant 0 : index
    %29 = vector.load %arg2[%c1_5, %c0_6, %c0_7, %c0_8] : memref<5x2x6x128xf32, #tpu.memory_space<vmem>>, vector<1x2x6x128xf32>
    %30 = vector.shape_cast %29 : vector<1x2x6x128xf32> to vector<2x6x128xf32>
    %c4 = arith.constant 4 : index
    %31 = memref.load %arg1[%c4] : memref<24xf32, #tpu.memory_space<smem>>
    %32 = vector.broadcast %31 : f32 to vector<2x6x128xf32>
    %33 = arith.mulf %32, %30 : vector<2x6x128xf32>
    %34 = arith.addf %16, %33 : vector<2x6x128xf32>
    %c5 = arith.constant 5 : index
    %35 = memref.load %arg1[%c5] : memref<24xf32, #tpu.memory_space<smem>>
    %36 = vector.broadcast %35 : f32 to vector<2x6x128xf32>
    %37 = arith.mulf %36, %30 : vector<2x6x128xf32>
    %38 = arith.addf %20, %37 : vector<2x6x128xf32>
    %c6 = arith.constant 6 : index
    %39 = memref.load %arg1[%c6] : memref<24xf32, #tpu.memory_space<smem>>
    %40 = vector.broadcast %39 : f32 to vector<2x6x128xf32>
    %41 = arith.mulf %40, %30 : vector<2x6x128xf32>
    %42 = arith.addf %24, %41 : vector<2x6x128xf32>
    %c7 = arith.constant 7 : index
    %43 = memref.load %arg1[%c7] : memref<24xf32, #tpu.memory_space<smem>>
    %44 = vector.broadcast %43 : f32 to vector<2x6x128xf32>
    %45 = arith.mulf %44, %30 : vector<2x6x128xf32>
    %46 = arith.addf %28, %45 : vector<2x6x128xf32>
    %c2_9 = arith.constant 2 : index
    %c0_10 = arith.constant 0 : index
    %c0_11 = arith.constant 0 : index
    %c0_12 = arith.constant 0 : index
    %47 = vector.load %arg2[%c2_9, %c0_10, %c0_11, %c0_12] : memref<5x2x6x128xf32, #tpu.memory_space<vmem>>, vector<1x2x6x128xf32>
    %48 = vector.shape_cast %47 : vector<1x2x6x128xf32> to vector<2x6x128xf32>
    %c8 = arith.constant 8 : index
    %49 = memref.load %arg1[%c8] : memref<24xf32, #tpu.memory_space<smem>>
    %50 = vector.broadcast %49 : f32 to vector<2x6x128xf32>
    %51 = arith.mulf %50, %48 : vector<2x6x128xf32>
    %52 = arith.addf %34, %51 : vector<2x6x128xf32>
    %c9 = arith.constant 9 : index
    %53 = memref.load %arg1[%c9] : memref<24xf32, #tpu.memory_space<smem>>
    %54 = vector.broadcast %53 : f32 to vector<2x6x128xf32>
    %55 = arith.mulf %54, %48 : vector<2x6x128xf32>
    %56 = arith.addf %38, %55 : vector<2x6x128xf32>
    %c10 = arith.constant 10 : index
    %57 = memref.load %arg1[%c10] : memref<24xf32, #tpu.memory_space<smem>>
    %58 = vector.broadcast %57 : f32 to vector<2x6x128xf32>
    %59 = arith.mulf %58, %48 : vector<2x6x128xf32>
    %60 = arith.addf %42, %59 : vector<2x6x128xf32>
    %c11 = arith.constant 11 : index
    %61 = memref.load %arg1[%c11] : memref<24xf32, #tpu.memory_space<smem>>
    %62 = vector.broadcast %61 : f32 to vector<2x6x128xf32>
    %63 = arith.mulf %62, %48 : vector<2x6x128xf32>
    %64 = arith.addf %46, %63 : vector<2x6x128xf32>
    %c3_13 = arith.constant 3 : index
    %c0_14 = arith.constant 0 : index
    %c0_15 = arith.constant 0 : index
    %c0_16 = arith.constant 0 : index
    %65 = vector.load %arg2[%c3_13, %c0_14, %c0_15, %c0_16] : memref<5x2x6x128xf32, #tpu.memory_space<vmem>>, vector<1x2x6x128xf32>
    %66 = vector.shape_cast %65 : vector<1x2x6x128xf32> to vector<2x6x128xf32>
    %c12 = arith.constant 12 : index
    %67 = memref.load %arg1[%c12] : memref<24xf32, #tpu.memory_space<smem>>
    %68 = vector.broadcast %67 : f32 to vector<2x6x128xf32>
    %69 = arith.mulf %68, %66 : vector<2x6x128xf32>
    %70 = arith.addf %52, %69 : vector<2x6x128xf32>
    %c13 = arith.constant 13 : index
    %71 = memref.load %arg1[%c13] : memref<24xf32, #tpu.memory_space<smem>>
    %72 = vector.broadcast %71 : f32 to vector<2x6x128xf32>
    %73 = arith.mulf %72, %66 : vector<2x6x128xf32>
    %74 = arith.addf %56, %73 : vector<2x6x128xf32>
    %c14 = arith.constant 14 : index
    %75 = memref.load %arg1[%c14] : memref<24xf32, #tpu.memory_space<smem>>
    %76 = vector.broadcast %75 : f32 to vector<2x6x128xf32>
    %77 = arith.mulf %76, %66 : vector<2x6x128xf32>
    %78 = arith.addf %60, %77 : vector<2x6x128xf32>
    %c15 = arith.constant 15 : index
    %79 = memref.load %arg1[%c15] : memref<24xf32, #tpu.memory_space<smem>>
    %80 = vector.broadcast %79 : f32 to vector<2x6x128xf32>
    %81 = arith.mulf %80, %66 : vector<2x6x128xf32>
    %82 = arith.addf %64, %81 : vector<2x6x128xf32>
    %c4_17 = arith.constant 4 : index
    %c0_18 = arith.constant 0 : index
    %c0_19 = arith.constant 0 : index
    %c0_20 = arith.constant 0 : index
    %83 = vector.load %arg2[%c4_17, %c0_18, %c0_19, %c0_20] : memref<5x2x6x128xf32, #tpu.memory_space<vmem>>, vector<1x2x6x128xf32>
    %84 = vector.shape_cast %83 : vector<1x2x6x128xf32> to vector<2x6x128xf32>
    %c16 = arith.constant 16 : index
    %85 = memref.load %arg1[%c16] : memref<24xf32, #tpu.memory_space<smem>>
    %86 = vector.broadcast %85 : f32 to vector<2x6x128xf32>
    %87 = arith.mulf %86, %84 : vector<2x6x128xf32>
    %88 = arith.addf %70, %87 : vector<2x6x128xf32>
    %c17 = arith.constant 17 : index
    %89 = memref.load %arg1[%c17] : memref<24xf32, #tpu.memory_space<smem>>
    %90 = vector.broadcast %89 : f32 to vector<2x6x128xf32>
    %91 = arith.mulf %90, %84 : vector<2x6x128xf32>
    %92 = arith.addf %74, %91 : vector<2x6x128xf32>
    %c18 = arith.constant 18 : index
    %93 = memref.load %arg1[%c18] : memref<24xf32, #tpu.memory_space<smem>>
    %94 = vector.broadcast %93 : f32 to vector<2x6x128xf32>
    %95 = arith.mulf %94, %84 : vector<2x6x128xf32>
    %96 = arith.addf %78, %95 : vector<2x6x128xf32>
    %c19 = arith.constant 19 : index
    %97 = memref.load %arg1[%c19] : memref<24xf32, #tpu.memory_space<smem>>
    %98 = vector.broadcast %97 : f32 to vector<2x6x128xf32>
    %99 = arith.mulf %98, %84 : vector<2x6x128xf32>
    %100 = arith.addf %82, %99 : vector<2x6x128xf32>
    %cst = arith.constant 0.000000e+00 : f32
    %101 = vector.broadcast %cst : f32 to vector<2x6x128xf32>
    %102 = arith.cmpf oge, %88, %101 : vector<2x6x128xf32>
    %cst_21 = arith.constant 1.000000e-01 : f32
    %103 = vector.broadcast %cst_21 : f32 to vector<2x6x128xf32>
    %104 = arith.mulf %103, %88 : vector<2x6x128xf32>
    %105 = arith.select %102, %88, %104 : vector<2x6x128xi1>, vector<2x6x128xf32>
    %c0_22 = arith.constant 0 : index
    %c0_23 = arith.constant 0 : index
    %c0_24 = arith.constant 0 : index
    %c0_25 = arith.constant 0 : index
    %106 = vector.load %arg3[%c0_22, %c0_23, %c0_24, %c0_25] : memref<4x2x6x128xf32, #tpu.memory_space<vmem>>, vector<1x2x6x128xf32>
    %107 = vector.shape_cast %106 : vector<1x2x6x128xf32> to vector<2x6x128xf32>
    %108 = vector.shape_cast %105 : vector<2x6x128xf32> to vector<1x2x6x128xf32>
    tpu.vector_store %arg3[%c0_22, %c0_23, %c0_24, %c0_25], %108 {strides = array<i32>} : memref<4x2x6x128xf32, #tpu.memory_space<vmem>>, vector<1x2x6x128xf32>,
    %109 = vector.extract_strided_slice %105 {offsets = [0, 0, 0], sizes = [1, 6, 128], strides = [1, 1, 1]} : vector<2x6x128xf32> to vector<1x6x128xf32>
    %110 = vector.shape_cast %109 : vector<1x6x128xf32> to vector<6x128xf32>
    %111 = vector.extract_strided_slice %105 {offsets = [1, 0, 0], sizes = [1, 6, 128], strides = [1, 1, 1]} : vector<2x6x128xf32> to vector<1x6x128xf32>
    %112 = vector.shape_cast %111 : vector<1x6x128xf32> to vector<6x128xf32>
    %113 = arith.subf %110, %112 : vector<6x128xf32>
    %114 = math.absf %113 : vector<6x128xf32>
    %115 = vector.shape_cast %114 : vector<6x128xf32> to vector<1x6x128xf32>
    %cst_26 = arith.constant dense<0.000000e+00> : vector<1xf32>
    %116 = vector.multi_reduction <add>, %115, %cst_26 [1, 2] : vector<1x6x128xf32> to vector<1xf32>
    %117 = vector.shape_cast %116 : vector<1xf32> to vector<1x1x1xf32>
    %118 = vector.extract %117[0, 0, 0] : f32 from vector<1x1x1xf32>
    %cst_27 = arith.constant 0.000000e+00 : f32
    %119 = arith.addf %cst_27, %118 : f32
    %cst_28 = arith.constant 0.000000e+00 : f32
    %120 = vector.broadcast %cst_28 : f32 to vector<2x6x128xf32>
    %121 = arith.cmpf oge, %92, %120 : vector<2x6x128xf32>
    %cst_29 = arith.constant 1.000000e-01 : f32
    %122 = vector.broadcast %cst_29 : f32 to vector<2x6x128xf32>
    %123 = arith.mulf %122, %92 : vector<2x6x128xf32>
    %124 = arith.select %121, %92, %123 : vector<2x6x128xi1>, vector<2x6x128xf32>
    %c1_30 = arith.constant 1 : index
    %c0_31 = arith.constant 0 : index
    %c0_32 = arith.constant 0 : index
    %c0_33 = arith.constant 0 : index
    %125 = vector.load %arg3[%c1_30, %c0_31, %c0_32, %c0_33] : memref<4x2x6x128xf32, #tpu.memory_space<vmem>>, vector<1x2x6x128xf32>
    %126 = vector.shape_cast %125 : vector<1x2x6x128xf32> to vector<2x6x128xf32>
    %127 = vector.shape_cast %124 : vector<2x6x128xf32> to vector<1x2x6x128xf32>
    tpu.vector_store %arg3[%c1_30, %c0_31, %c0_32, %c0_33], %127 {strides = array<i32>} : memref<4x2x6x128xf32, #tpu.memory_space<vmem>>, vector<1x2x6x128xf32>,
    %128 = vector.extract_strided_slice %124 {offsets = [0, 0, 0], sizes = [1, 6, 128], strides = [1, 1, 1]} : vector<2x6x128xf32> to vector<1x6x128xf32>
    %129 = vector.shape_cast %128 : vector<1x6x128xf32> to vector<6x128xf32>
    %130 = vector.extract_strided_slice %124 {offsets = [1, 0, 0], sizes = [1, 6, 128], strides = [1, 1, 1]} : vector<2x6x128xf32> to vector<1x6x128xf32>
    %131 = vector.shape_cast %130 : vector<1x6x128xf32> to vector<6x128xf32>
    %132 = arith.subf %129, %131 : vector<6x128xf32>
    %133 = math.absf %132 : vector<6x128xf32>
    %134 = vector.shape_cast %133 : vector<6x128xf32> to vector<1x6x128xf32>
    %cst_34 = arith.constant dense<0.000000e+00> : vector<1xf32>
    %135 = vector.multi_reduction <add>, %134, %cst_34 [1, 2] : vector<1x6x128xf32> to vector<1xf32>
    %136 = vector.shape_cast %135 : vector<1xf32> to vector<1x1x1xf32>
    %137 = vector.extract %136[0, 0, 0] : f32 from vector<1x1x1xf32>
    %138 = arith.addf %119, %137 : f32
    %cst_35 = arith.constant 0.000000e+00 : f32
    %139 = vector.broadcast %cst_35 : f32 to vector<2x6x128xf32>
    %140 = arith.cmpf oge, %96, %139 : vector<2x6x128xf32>
    %cst_36 = arith.constant 1.000000e-01 : f32
    %141 = vector.broadcast %cst_36 : f32 to vector<2x6x128xf32>
    %142 = arith.mulf %141, %96 : vector<2x6x128xf32>
    %143 = arith.select %140, %96, %142 : vector<2x6x128xi1>, vector<2x6x128xf32>
    %c2_37 = arith.constant 2 : index
    %c0_38 = arith.constant 0 : index
    %c0_39 = arith.constant 0 : index
    %c0_40 = arith.constant 0 : index
    %144 = vector.load %arg3[%c2_37, %c0_38, %c0_39, %c0_40] : memref<4x2x6x128xf32, #tpu.memory_space<vmem>>, vector<1x2x6x128xf32>
    %145 = vector.shape_cast %144 : vector<1x2x6x128xf32> to vector<2x6x128xf32>
    %146 = vector.shape_cast %143 : vector<2x6x128xf32> to vector<1x2x6x128xf32>
    tpu.vector_store %arg3[%c2_37, %c0_38, %c0_39, %c0_40], %146 {strides = array<i32>} : memref<4x2x6x128xf32, #tpu.memory_space<vmem>>, vector<1x2x6x128xf32>,
    %147 = vector.extract_strided_slice %143 {offsets = [0, 0, 0], sizes = [1, 6, 128], strides = [1, 1, 1]} : vector<2x6x128xf32> to vector<1x6x128xf32>
    %148 = vector.shape_cast %147 : vector<1x6x128xf32> to vector<6x128xf32>
    %149 = vector.extract_strided_slice %143 {offsets = [1, 0, 0], sizes = [1, 6, 128], strides = [1, 1, 1]} : vector<2x6x128xf32> to vector<1x6x128xf32>
    %150 = vector.shape_cast %149 : vector<1x6x128xf32> to vector<6x128xf32>
    %151 = arith.subf %148, %150 : vector<6x128xf32>
    %152 = math.absf %151 : vector<6x128xf32>
    %153 = vector.shape_cast %152 : vector<6x128xf32> to vector<1x6x128xf32>
    %cst_41 = arith.constant dense<0.000000e+00> : vector<1xf32>
    %154 = vector.multi_reduction <add>, %153, %cst_41 [1, 2] : vector<1x6x128xf32> to vector<1xf32>
    %155 = vector.shape_cast %154 : vector<1xf32> to vector<1x1x1xf32>
    %156 = vector.extract %155[0, 0, 0] : f32 from vector<1x1x1xf32>
    %157 = arith.addf %138, %156 : f32
    %cst_42 = arith.constant 0.000000e+00 : f32
    %158 = vector.broadcast %cst_42 : f32 to vector<2x6x128xf32>
    %159 = arith.cmpf oge, %100, %158 : vector<2x6x128xf32>
    %cst_43 = arith.constant 1.000000e-01 : f32
    %160 = vector.broadcast %cst_43 : f32 to vector<2x6x128xf32>
    %161 = arith.mulf %160, %100 : vector<2x6x128xf32>
    %162 = arith.select %159, %100, %161 : vector<2x6x128xi1>, vector<2x6x128xf32>
    %c3_44 = arith.constant 3 : index
    %c0_45 = arith.constant 0 : index
    %c0_46 = arith.constant 0 : index
    %c0_47 = arith.constant 0 : index
    %163 = vector.load %arg3[%c3_44, %c0_45, %c0_46, %c0_47] : memref<4x2x6x128xf32, #tpu.memory_space<vmem>>, vector<1x2x6x128xf32>
    %164 = vector.shape_cast %163 : vector<1x2x6x128xf32> to vector<2x6x128xf32>
    %165 = vector.shape_cast %162 : vector<2x6x128xf32> to vector<1x2x6x128xf32>
    tpu.vector_store %arg3[%c3_44, %c0_45, %c0_46, %c0_47], %165 {strides = array<i32>} : memref<4x2x6x128xf32, #tpu.memory_space<vmem>>, vector<1x2x6x128xf32>,
    %166 = vector.extract_strided_slice %162 {offsets = [0, 0, 0], sizes = [1, 6, 128], strides = [1, 1, 1]} : vector<2x6x128xf32> to vector<1x6x128xf32>
    %167 = vector.shape_cast %166 : vector<1x6x128xf32> to vector<6x128xf32>
    %168 = vector.extract_strided_slice %162 {offsets = [1, 0, 0], sizes = [1, 6, 128], strides = [1, 1, 1]} : vector<2x6x128xf32> to vector<1x6x128xf32>
    %169 = vector.shape_cast %168 : vector<1x6x128xf32> to vector<6x128xf32>
    %170 = arith.subf %167, %169 : vector<6x128xf32>
    %171 = math.absf %170 : vector<6x128xf32>
    %172 = vector.shape_cast %171 : vector<6x128xf32> to vector<1x6x128xf32>
    %cst_48 = arith.constant dense<0.000000e+00> : vector<1xf32>
    %173 = vector.multi_reduction <add>, %172, %cst_48 [1, 2] : vector<1x6x128xf32> to vector<1xf32>
    %174 = vector.shape_cast %173 : vector<1xf32> to vector<1x1x1xf32>
    %175 = vector.extract %174[0, 0, 0] : f32 from vector<1x1x1xf32>
    %176 = arith.addf %157, %175 : f32
    %c0_49 = arith.constant 0 : index
    %c0_50 = arith.constant 0 : index
    %177 = vector.load %arg4[%c0_49, %c0_50] : memref<1x1xf32, #tpu.memory_space<vmem>>, vector<1x1xf32>
    %178 = vector.broadcast %176 : f32 to vector<1x1xf32>
    %179 = arith.addf %177, %178 : vector<1x1xf32>
    %c0_51 = arith.constant 0 : index
    %c0_52 = arith.constant 0 : index
    %180 = vector.load %arg4[%c0_51, %c0_52] : memref<1x1xf32, #tpu.memory_space<vmem>>, vector<1x1xf32>
    tpu.vector_store %arg4[%c0_51, %c0_52], %179 {strides = array<i32>} : memref<1x1xf32, #tpu.memory_space<vmem>>, vector<1x1xf32>,
    return
  }
  func.func @transform_0(%arg0: i32) -> i32 {
    %c0_i32 = arith.constant 0 : i32
    %c0_i32_0 = arith.constant 0 : i32
    return %c0_i32 : i32
  }
  func.func @transform_1(%arg0: i32) -> (i32, i32, i32, i32) {
    %c0_i32 = arith.constant 0 : i32
    %c0_i32_0 = arith.constant 0 : i32
    %c0_i32_1 = arith.constant 0 : i32
    %c0_i32_2 = arith.constant 0 : i32
    return %c0_i32, %c0_i32_0, %c0_i32_1, %arg0 : i32, i32, i32, i32
  }
  func.func @transform_2(%arg0: i32) -> (i32, i32, i32, i32) {
    %c0_i32 = arith.constant 0 : i32
    %c0_i32_0 = arith.constant 0 : i32
    %c0_i32_1 = arith.constant 0 : i32
    %c0_i32_2 = arith.constant 0 : i32
    return %c0_i32, %c0_i32_0, %c0_i32_1, %arg0 : i32, i32, i32, i32
  }
  func.func @transform_3(%arg0: i32) -> (i32, i32) {
    %c0_i32 = arith.constant 0 : i32
    %c0_i32_0 = arith.constant 0 : i32
    %c0_i32_1 = arith.constant 0 : i32
    return %c0_i32, %c0_i32_0 : i32, i32
  }
}

module attributes {stable_mosaic.version = 11 : i64} {
  func.func @_conv_pair_kernel(%arg0: i32, %arg1: memref<84xf32, #tpu.memory_space<smem>>, %arg2: memref<20x2x6x128xf32, #tpu.memory_space<vmem>>, %arg3: memref<4x2x6x128xf32, #tpu.memory_space<vmem>>, %arg4: memref<1x1xf32, #tpu.memory_space<vmem>>) attributes {dimension_semantics = [#tpu.dimension_semantics<arbitrary>], iteration_bounds = array<i64: 1>, scalar_prefetch = 0 : i64, scratch_operands = 0 : i64, tpu.core_type = #tpu.core_type<tc>, window_params = [{transform_indices = @transform_0, window_bounds = array<i64: 84>}, {transform_indices = @transform_1, window_bounds = array<i64: 20, 2, 6, 128>}, {transform_indices = @transform_2, window_bounds = array<i64: 4, 2, 6, 128>}, {pipeline_mode = #tpu.pipeline_mode<synchronous>, transform_indices = @transform_3, window_bounds = array<i64: 1, 1>}]} {
    %c0_i32 = arith.constant 0 : i32
    %0 = arith.cmpi eq, %arg0, %c0_i32 : i32
    %1 = arith.extui %0 : i1 to i32
    %c0_i32_0 = arith.constant 0 : i32
    %2 = arith.cmpi ne, %1, %c0_i32_0 : i32
    scf.if %2 {
      %cst_113 = arith.constant 0.000000e+00 : f32
      %451 = vector.broadcast %cst_113 : f32 to vector<1x1xf32>
      %c0_114 = arith.constant 0 : index
      %c0_115 = arith.constant 0 : index
      %452 = vector.load %arg4[%c0_114, %c0_115] : memref<1x1xf32, #tpu.memory_space<vmem>>, vector<1x1xf32>
      tpu.vector_store %arg4[%c0_114, %c0_115], %451 {strides = array<i32>} : memref<1x1xf32, #tpu.memory_space<vmem>>, vector<1x1xf32>,
    } else {
    }
    %c80 = arith.constant 80 : index
    %3 = memref.load %arg1[%c80] : memref<84xf32, #tpu.memory_space<smem>>
    %4 = vector.broadcast %3 : f32 to vector<2x6x128xf32>
    %c81 = arith.constant 81 : index
    %5 = memref.load %arg1[%c81] : memref<84xf32, #tpu.memory_space<smem>>
    %6 = vector.broadcast %5 : f32 to vector<2x6x128xf32>
    %c82 = arith.constant 82 : index
    %7 = memref.load %arg1[%c82] : memref<84xf32, #tpu.memory_space<smem>>
    %8 = vector.broadcast %7 : f32 to vector<2x6x128xf32>
    %c83 = arith.constant 83 : index
    %9 = memref.load %arg1[%c83] : memref<84xf32, #tpu.memory_space<smem>>
    %10 = vector.broadcast %9 : f32 to vector<2x6x128xf32>
    %c0 = arith.constant 0 : index
    %c0_1 = arith.constant 0 : index
    %c0_2 = arith.constant 0 : index
    %c0_3 = arith.constant 0 : index
    %11 = vector.load %arg2[%c0, %c0_1, %c0_2, %c0_3] : memref<20x2x6x128xf32, #tpu.memory_space<vmem>>, vector<1x2x6x128xf32>
    %12 = vector.shape_cast %11 : vector<1x2x6x128xf32> to vector<2x6x128xf32>
    %c0_4 = arith.constant 0 : index
    %13 = memref.load %arg1[%c0_4] : memref<84xf32, #tpu.memory_space<smem>>
    %14 = vector.broadcast %13 : f32 to vector<2x6x128xf32>
    %15 = arith.mulf %14, %12 : vector<2x6x128xf32>
    %16 = arith.addf %4, %15 : vector<2x6x128xf32>
    %c1 = arith.constant 1 : index
    %17 = memref.load %arg1[%c1] : memref<84xf32, #tpu.memory_space<smem>>
    %18 = vector.broadcast %17 : f32 to vector<2x6x128xf32>
    %19 = arith.mulf %18, %12 : vector<2x6x128xf32>
    %20 = arith.addf %6, %19 : vector<2x6x128xf32>
    %c2 = arith.constant 2 : index
    %21 = memref.load %arg1[%c2] : memref<84xf32, #tpu.memory_space<smem>>
    %22 = vector.broadcast %21 : f32 to vector<2x6x128xf32>
    %23 = arith.mulf %22, %12 : vector<2x6x128xf32>
    %24 = arith.addf %8, %23 : vector<2x6x128xf32>
    %c3 = arith.constant 3 : index
    %25 = memref.load %arg1[%c3] : memref<84xf32, #tpu.memory_space<smem>>
    %26 = vector.broadcast %25 : f32 to vector<2x6x128xf32>
    %27 = arith.mulf %26, %12 : vector<2x6x128xf32>
    %28 = arith.addf %10, %27 : vector<2x6x128xf32>
    %c1_5 = arith.constant 1 : index
    %c0_6 = arith.constant 0 : index
    %c0_7 = arith.constant 0 : index
    %c0_8 = arith.constant 0 : index
    %29 = vector.load %arg2[%c1_5, %c0_6, %c0_7, %c0_8] : memref<20x2x6x128xf32, #tpu.memory_space<vmem>>, vector<1x2x6x128xf32>
    %30 = vector.shape_cast %29 : vector<1x2x6x128xf32> to vector<2x6x128xf32>
    %c4 = arith.constant 4 : index
    %31 = memref.load %arg1[%c4] : memref<84xf32, #tpu.memory_space<smem>>
    %32 = vector.broadcast %31 : f32 to vector<2x6x128xf32>
    %33 = arith.mulf %32, %30 : vector<2x6x128xf32>
    %34 = arith.addf %16, %33 : vector<2x6x128xf32>
    %c5 = arith.constant 5 : index
    %35 = memref.load %arg1[%c5] : memref<84xf32, #tpu.memory_space<smem>>
    %36 = vector.broadcast %35 : f32 to vector<2x6x128xf32>
    %37 = arith.mulf %36, %30 : vector<2x6x128xf32>
    %38 = arith.addf %20, %37 : vector<2x6x128xf32>
    %c6 = arith.constant 6 : index
    %39 = memref.load %arg1[%c6] : memref<84xf32, #tpu.memory_space<smem>>
    %40 = vector.broadcast %39 : f32 to vector<2x6x128xf32>
    %41 = arith.mulf %40, %30 : vector<2x6x128xf32>
    %42 = arith.addf %24, %41 : vector<2x6x128xf32>
    %c7 = arith.constant 7 : index
    %43 = memref.load %arg1[%c7] : memref<84xf32, #tpu.memory_space<smem>>
    %44 = vector.broadcast %43 : f32 to vector<2x6x128xf32>
    %45 = arith.mulf %44, %30 : vector<2x6x128xf32>
    %46 = arith.addf %28, %45 : vector<2x6x128xf32>
    %c2_9 = arith.constant 2 : index
    %c0_10 = arith.constant 0 : index
    %c0_11 = arith.constant 0 : index
    %c0_12 = arith.constant 0 : index
    %47 = vector.load %arg2[%c2_9, %c0_10, %c0_11, %c0_12] : memref<20x2x6x128xf32, #tpu.memory_space<vmem>>, vector<1x2x6x128xf32>
    %48 = vector.shape_cast %47 : vector<1x2x6x128xf32> to vector<2x6x128xf32>
    %c8 = arith.constant 8 : index
    %49 = memref.load %arg1[%c8] : memref<84xf32, #tpu.memory_space<smem>>
    %50 = vector.broadcast %49 : f32 to vector<2x6x128xf32>
    %51 = arith.mulf %50, %48 : vector<2x6x128xf32>
    %52 = arith.addf %34, %51 : vector<2x6x128xf32>
    %c9 = arith.constant 9 : index
    %53 = memref.load %arg1[%c9] : memref<84xf32, #tpu.memory_space<smem>>
    %54 = vector.broadcast %53 : f32 to vector<2x6x128xf32>
    %55 = arith.mulf %54, %48 : vector<2x6x128xf32>
    %56 = arith.addf %38, %55 : vector<2x6x128xf32>
    %c10 = arith.constant 10 : index
    %57 = memref.load %arg1[%c10] : memref<84xf32, #tpu.memory_space<smem>>
    %58 = vector.broadcast %57 : f32 to vector<2x6x128xf32>
    %59 = arith.mulf %58, %48 : vector<2x6x128xf32>
    %60 = arith.addf %42, %59 : vector<2x6x128xf32>
    %c11 = arith.constant 11 : index
    %61 = memref.load %arg1[%c11] : memref<84xf32, #tpu.memory_space<smem>>
    %62 = vector.broadcast %61 : f32 to vector<2x6x128xf32>
    %63 = arith.mulf %62, %48 : vector<2x6x128xf32>
    %64 = arith.addf %46, %63 : vector<2x6x128xf32>
    %c3_13 = arith.constant 3 : index
    %c0_14 = arith.constant 0 : index
    %c0_15 = arith.constant 0 : index
    %c0_16 = arith.constant 0 : index
    %65 = vector.load %arg2[%c3_13, %c0_14, %c0_15, %c0_16] : memref<20x2x6x128xf32, #tpu.memory_space<vmem>>, vector<1x2x6x128xf32>
    %66 = vector.shape_cast %65 : vector<1x2x6x128xf32> to vector<2x6x128xf32>
    %c12 = arith.constant 12 : index
    %67 = memref.load %arg1[%c12] : memref<84xf32, #tpu.memory_space<smem>>
    %68 = vector.broadcast %67 : f32 to vector<2x6x128xf32>
    %69 = arith.mulf %68, %66 : vector<2x6x128xf32>
    %70 = arith.addf %52, %69 : vector<2x6x128xf32>
    %c13 = arith.constant 13 : index
    %71 = memref.load %arg1[%c13] : memref<84xf32, #tpu.memory_space<smem>>
    %72 = vector.broadcast %71 : f32 to vector<2x6x128xf32>
    %73 = arith.mulf %72, %66 : vector<2x6x128xf32>
    %74 = arith.addf %56, %73 : vector<2x6x128xf32>
    %c14 = arith.constant 14 : index
    %75 = memref.load %arg1[%c14] : memref<84xf32, #tpu.memory_space<smem>>
    %76 = vector.broadcast %75 : f32 to vector<2x6x128xf32>
    %77 = arith.mulf %76, %66 : vector<2x6x128xf32>
    %78 = arith.addf %60, %77 : vector<2x6x128xf32>
    %c15 = arith.constant 15 : index
    %79 = memref.load %arg1[%c15] : memref<84xf32, #tpu.memory_space<smem>>
    %80 = vector.broadcast %79 : f32 to vector<2x6x128xf32>
    %81 = arith.mulf %80, %66 : vector<2x6x128xf32>
    %82 = arith.addf %64, %81 : vector<2x6x128xf32>
    %c4_17 = arith.constant 4 : index
    %c0_18 = arith.constant 0 : index
    %c0_19 = arith.constant 0 : index
    %c0_20 = arith.constant 0 : index
    %83 = vector.load %arg2[%c4_17, %c0_18, %c0_19, %c0_20] : memref<20x2x6x128xf32, #tpu.memory_space<vmem>>, vector<1x2x6x128xf32>
    %84 = vector.shape_cast %83 : vector<1x2x6x128xf32> to vector<2x6x128xf32>
    %c16 = arith.constant 16 : index
    %85 = memref.load %arg1[%c16] : memref<84xf32, #tpu.memory_space<smem>>
    %86 = vector.broadcast %85 : f32 to vector<2x6x128xf32>
    %87 = arith.mulf %86, %84 : vector<2x6x128xf32>
    %88 = arith.addf %70, %87 : vector<2x6x128xf32>
    %c17 = arith.constant 17 : index
    %89 = memref.load %arg1[%c17] : memref<84xf32, #tpu.memory_space<smem>>
    %90 = vector.broadcast %89 : f32 to vector<2x6x128xf32>
    %91 = arith.mulf %90, %84 : vector<2x6x128xf32>
    %92 = arith.addf %74, %91 : vector<2x6x128xf32>
    %c18 = arith.constant 18 : index
    %93 = memref.load %arg1[%c18] : memref<84xf32, #tpu.memory_space<smem>>
    %94 = vector.broadcast %93 : f32 to vector<2x6x128xf32>
    %95 = arith.mulf %94, %84 : vector<2x6x128xf32>
    %96 = arith.addf %78, %95 : vector<2x6x128xf32>
    %c19 = arith.constant 19 : index
    %97 = memref.load %arg1[%c19] : memref<84xf32, #tpu.memory_space<smem>>
    %98 = vector.broadcast %97 : f32 to vector<2x6x128xf32>
    %99 = arith.mulf %98, %84 : vector<2x6x128xf32>
    %100 = arith.addf %82, %99 : vector<2x6x128xf32>
    %c5_21 = arith.constant 5 : index
    %c0_22 = arith.constant 0 : index
    %c0_23 = arith.constant 0 : index
    %c0_24 = arith.constant 0 : index
    %101 = vector.load %arg2[%c5_21, %c0_22, %c0_23, %c0_24] : memref<20x2x6x128xf32, #tpu.memory_space<vmem>>, vector<1x2x6x128xf32>
    %102 = vector.shape_cast %101 : vector<1x2x6x128xf32> to vector<2x6x128xf32>
    %c20 = arith.constant 20 : index
    %103 = memref.load %arg1[%c20] : memref<84xf32, #tpu.memory_space<smem>>
    %104 = vector.broadcast %103 : f32 to vector<2x6x128xf32>
    %105 = arith.mulf %104, %102 : vector<2x6x128xf32>
    %106 = arith.addf %88, %105 : vector<2x6x128xf32>
    %c21 = arith.constant 21 : index
    %107 = memref.load %arg1[%c21] : memref<84xf32, #tpu.memory_space<smem>>
    %108 = vector.broadcast %107 : f32 to vector<2x6x128xf32>
    %109 = arith.mulf %108, %102 : vector<2x6x128xf32>
    %110 = arith.addf %92, %109 : vector<2x6x128xf32>
    %c22 = arith.constant 22 : index
    %111 = memref.load %arg1[%c22] : memref<84xf32, #tpu.memory_space<smem>>
    %112 = vector.broadcast %111 : f32 to vector<2x6x128xf32>
    %113 = arith.mulf %112, %102 : vector<2x6x128xf32>
    %114 = arith.addf %96, %113 : vector<2x6x128xf32>
    %c23 = arith.constant 23 : index
    %115 = memref.load %arg1[%c23] : memref<84xf32, #tpu.memory_space<smem>>
    %116 = vector.broadcast %115 : f32 to vector<2x6x128xf32>
    %117 = arith.mulf %116, %102 : vector<2x6x128xf32>
    %118 = arith.addf %100, %117 : vector<2x6x128xf32>
    %c6_25 = arith.constant 6 : index
    %c0_26 = arith.constant 0 : index
    %c0_27 = arith.constant 0 : index
    %c0_28 = arith.constant 0 : index
    %119 = vector.load %arg2[%c6_25, %c0_26, %c0_27, %c0_28] : memref<20x2x6x128xf32, #tpu.memory_space<vmem>>, vector<1x2x6x128xf32>
    %120 = vector.shape_cast %119 : vector<1x2x6x128xf32> to vector<2x6x128xf32>
    %c24 = arith.constant 24 : index
    %121 = memref.load %arg1[%c24] : memref<84xf32, #tpu.memory_space<smem>>
    %122 = vector.broadcast %121 : f32 to vector<2x6x128xf32>
    %123 = arith.mulf %122, %120 : vector<2x6x128xf32>
    %124 = arith.addf %106, %123 : vector<2x6x128xf32>
    %c25 = arith.constant 25 : index
    %125 = memref.load %arg1[%c25] : memref<84xf32, #tpu.memory_space<smem>>
    %126 = vector.broadcast %125 : f32 to vector<2x6x128xf32>
    %127 = arith.mulf %126, %120 : vector<2x6x128xf32>
    %128 = arith.addf %110, %127 : vector<2x6x128xf32>
    %c26 = arith.constant 26 : index
    %129 = memref.load %arg1[%c26] : memref<84xf32, #tpu.memory_space<smem>>
    %130 = vector.broadcast %129 : f32 to vector<2x6x128xf32>
    %131 = arith.mulf %130, %120 : vector<2x6x128xf32>
    %132 = arith.addf %114, %131 : vector<2x6x128xf32>
    %c27 = arith.constant 27 : index
    %133 = memref.load %arg1[%c27] : memref<84xf32, #tpu.memory_space<smem>>
    %134 = vector.broadcast %133 : f32 to vector<2x6x128xf32>
    %135 = arith.mulf %134, %120 : vector<2x6x128xf32>
    %136 = arith.addf %118, %135 : vector<2x6x128xf32>
    %c7_29 = arith.constant 7 : index
    %c0_30 = arith.constant 0 : index
    %c0_31 = arith.constant 0 : index
    %c0_32 = arith.constant 0 : index
    %137 = vector.load %arg2[%c7_29, %c0_30, %c0_31, %c0_32] : memref<20x2x6x128xf32, #tpu.memory_space<vmem>>, vector<1x2x6x128xf32>
    %138 = vector.shape_cast %137 : vector<1x2x6x128xf32> to vector<2x6x128xf32>
    %c28 = arith.constant 28 : index
    %139 = memref.load %arg1[%c28] : memref<84xf32, #tpu.memory_space<smem>>
    %140 = vector.broadcast %139 : f32 to vector<2x6x128xf32>
    %141 = arith.mulf %140, %138 : vector<2x6x128xf32>
    %142 = arith.addf %124, %141 : vector<2x6x128xf32>
    %c29 = arith.constant 29 : index
    %143 = memref.load %arg1[%c29] : memref<84xf32, #tpu.memory_space<smem>>
    %144 = vector.broadcast %143 : f32 to vector<2x6x128xf32>
    %145 = arith.mulf %144, %138 : vector<2x6x128xf32>
    %146 = arith.addf %128, %145 : vector<2x6x128xf32>
    %c30 = arith.constant 30 : index
    %147 = memref.load %arg1[%c30] : memref<84xf32, #tpu.memory_space<smem>>
    %148 = vector.broadcast %147 : f32 to vector<2x6x128xf32>
    %149 = arith.mulf %148, %138 : vector<2x6x128xf32>
    %150 = arith.addf %132, %149 : vector<2x6x128xf32>
    %c31 = arith.constant 31 : index
    %151 = memref.load %arg1[%c31] : memref<84xf32, #tpu.memory_space<smem>>
    %152 = vector.broadcast %151 : f32 to vector<2x6x128xf32>
    %153 = arith.mulf %152, %138 : vector<2x6x128xf32>
    %154 = arith.addf %136, %153 : vector<2x6x128xf32>
    %c8_33 = arith.constant 8 : index
    %c0_34 = arith.constant 0 : index
    %c0_35 = arith.constant 0 : index
    %c0_36 = arith.constant 0 : index
    %155 = vector.load %arg2[%c8_33, %c0_34, %c0_35, %c0_36] : memref<20x2x6x128xf32, #tpu.memory_space<vmem>>, vector<1x2x6x128xf32>
    %156 = vector.shape_cast %155 : vector<1x2x6x128xf32> to vector<2x6x128xf32>
    %c32 = arith.constant 32 : index
    %157 = memref.load %arg1[%c32] : memref<84xf32, #tpu.memory_space<smem>>
    %158 = vector.broadcast %157 : f32 to vector<2x6x128xf32>
    %159 = arith.mulf %158, %156 : vector<2x6x128xf32>
    %160 = arith.addf %142, %159 : vector<2x6x128xf32>
    %c33 = arith.constant 33 : index
    %161 = memref.load %arg1[%c33] : memref<84xf32, #tpu.memory_space<smem>>
    %162 = vector.broadcast %161 : f32 to vector<2x6x128xf32>
    %163 = arith.mulf %162, %156 : vector<2x6x128xf32>
    %164 = arith.addf %146, %163 : vector<2x6x128xf32>
    %c34 = arith.constant 34 : index
    %165 = memref.load %arg1[%c34] : memref<84xf32, #tpu.memory_space<smem>>
    %166 = vector.broadcast %165 : f32 to vector<2x6x128xf32>
    %167 = arith.mulf %166, %156 : vector<2x6x128xf32>
    %168 = arith.addf %150, %167 : vector<2x6x128xf32>
    %c35 = arith.constant 35 : index
    %169 = memref.load %arg1[%c35] : memref<84xf32, #tpu.memory_space<smem>>
    %170 = vector.broadcast %169 : f32 to vector<2x6x128xf32>
    %171 = arith.mulf %170, %156 : vector<2x6x128xf32>
    %172 = arith.addf %154, %171 : vector<2x6x128xf32>
    %c9_37 = arith.constant 9 : index
    %c0_38 = arith.constant 0 : index
    %c0_39 = arith.constant 0 : index
    %c0_40 = arith.constant 0 : index
    %173 = vector.load %arg2[%c9_37, %c0_38, %c0_39, %c0_40] : memref<20x2x6x128xf32, #tpu.memory_space<vmem>>, vector<1x2x6x128xf32>
    %174 = vector.shape_cast %173 : vector<1x2x6x128xf32> to vector<2x6x128xf32>
    %c36 = arith.constant 36 : index
    %175 = memref.load %arg1[%c36] : memref<84xf32, #tpu.memory_space<smem>>
    %176 = vector.broadcast %175 : f32 to vector<2x6x128xf32>
    %177 = arith.mulf %176, %174 : vector<2x6x128xf32>
    %178 = arith.addf %160, %177 : vector<2x6x128xf32>
    %c37 = arith.constant 37 : index
    %179 = memref.load %arg1[%c37] : memref<84xf32, #tpu.memory_space<smem>>
    %180 = vector.broadcast %179 : f32 to vector<2x6x128xf32>
    %181 = arith.mulf %180, %174 : vector<2x6x128xf32>
    %182 = arith.addf %164, %181 : vector<2x6x128xf32>
    %c38 = arith.constant 38 : index
    %183 = memref.load %arg1[%c38] : memref<84xf32, #tpu.memory_space<smem>>
    %184 = vector.broadcast %183 : f32 to vector<2x6x128xf32>
    %185 = arith.mulf %184, %174 : vector<2x6x128xf32>
    %186 = arith.addf %168, %185 : vector<2x6x128xf32>
    %c39 = arith.constant 39 : index
    %187 = memref.load %arg1[%c39] : memref<84xf32, #tpu.memory_space<smem>>
    %188 = vector.broadcast %187 : f32 to vector<2x6x128xf32>
    %189 = arith.mulf %188, %174 : vector<2x6x128xf32>
    %190 = arith.addf %172, %189 : vector<2x6x128xf32>
    %c10_41 = arith.constant 10 : index
    %c0_42 = arith.constant 0 : index
    %c0_43 = arith.constant 0 : index
    %c0_44 = arith.constant 0 : index
    %191 = vector.load %arg2[%c10_41, %c0_42, %c0_43, %c0_44] : memref<20x2x6x128xf32, #tpu.memory_space<vmem>>, vector<1x2x6x128xf32>
    %192 = vector.shape_cast %191 : vector<1x2x6x128xf32> to vector<2x6x128xf32>
    %c40 = arith.constant 40 : index
    %193 = memref.load %arg1[%c40] : memref<84xf32, #tpu.memory_space<smem>>
    %194 = vector.broadcast %193 : f32 to vector<2x6x128xf32>
    %195 = arith.mulf %194, %192 : vector<2x6x128xf32>
    %196 = arith.addf %178, %195 : vector<2x6x128xf32>
    %c41 = arith.constant 41 : index
    %197 = memref.load %arg1[%c41] : memref<84xf32, #tpu.memory_space<smem>>
    %198 = vector.broadcast %197 : f32 to vector<2x6x128xf32>
    %199 = arith.mulf %198, %192 : vector<2x6x128xf32>
    %200 = arith.addf %182, %199 : vector<2x6x128xf32>
    %c42 = arith.constant 42 : index
    %201 = memref.load %arg1[%c42] : memref<84xf32, #tpu.memory_space<smem>>
    %202 = vector.broadcast %201 : f32 to vector<2x6x128xf32>
    %203 = arith.mulf %202, %192 : vector<2x6x128xf32>
    %204 = arith.addf %186, %203 : vector<2x6x128xf32>
    %c43 = arith.constant 43 : index
    %205 = memref.load %arg1[%c43] : memref<84xf32, #tpu.memory_space<smem>>
    %206 = vector.broadcast %205 : f32 to vector<2x6x128xf32>
    %207 = arith.mulf %206, %192 : vector<2x6x128xf32>
    %208 = arith.addf %190, %207 : vector<2x6x128xf32>
    %c11_45 = arith.constant 11 : index
    %c0_46 = arith.constant 0 : index
    %c0_47 = arith.constant 0 : index
    %c0_48 = arith.constant 0 : index
    %209 = vector.load %arg2[%c11_45, %c0_46, %c0_47, %c0_48] : memref<20x2x6x128xf32, #tpu.memory_space<vmem>>, vector<1x2x6x128xf32>
    %210 = vector.shape_cast %209 : vector<1x2x6x128xf32> to vector<2x6x128xf32>
    %c44 = arith.constant 44 : index
    %211 = memref.load %arg1[%c44] : memref<84xf32, #tpu.memory_space<smem>>
    %212 = vector.broadcast %211 : f32 to vector<2x6x128xf32>
    %213 = arith.mulf %212, %210 : vector<2x6x128xf32>
    %214 = arith.addf %196, %213 : vector<2x6x128xf32>
    %c45 = arith.constant 45 : index
    %215 = memref.load %arg1[%c45] : memref<84xf32, #tpu.memory_space<smem>>
    %216 = vector.broadcast %215 : f32 to vector<2x6x128xf32>
    %217 = arith.mulf %216, %210 : vector<2x6x128xf32>
    %218 = arith.addf %200, %217 : vector<2x6x128xf32>
    %c46 = arith.constant 46 : index
    %219 = memref.load %arg1[%c46] : memref<84xf32, #tpu.memory_space<smem>>
    %220 = vector.broadcast %219 : f32 to vector<2x6x128xf32>
    %221 = arith.mulf %220, %210 : vector<2x6x128xf32>
    %222 = arith.addf %204, %221 : vector<2x6x128xf32>
    %c47 = arith.constant 47 : index
    %223 = memref.load %arg1[%c47] : memref<84xf32, #tpu.memory_space<smem>>
    %224 = vector.broadcast %223 : f32 to vector<2x6x128xf32>
    %225 = arith.mulf %224, %210 : vector<2x6x128xf32>
    %226 = arith.addf %208, %225 : vector<2x6x128xf32>
    %c12_49 = arith.constant 12 : index
    %c0_50 = arith.constant 0 : index
    %c0_51 = arith.constant 0 : index
    %c0_52 = arith.constant 0 : index
    %227 = vector.load %arg2[%c12_49, %c0_50, %c0_51, %c0_52] : memref<20x2x6x128xf32, #tpu.memory_space<vmem>>, vector<1x2x6x128xf32>
    %228 = vector.shape_cast %227 : vector<1x2x6x128xf32> to vector<2x6x128xf32>
    %c48 = arith.constant 48 : index
    %229 = memref.load %arg1[%c48] : memref<84xf32, #tpu.memory_space<smem>>
    %230 = vector.broadcast %229 : f32 to vector<2x6x128xf32>
    %231 = arith.mulf %230, %228 : vector<2x6x128xf32>
    %232 = arith.addf %214, %231 : vector<2x6x128xf32>
    %c49 = arith.constant 49 : index
    %233 = memref.load %arg1[%c49] : memref<84xf32, #tpu.memory_space<smem>>
    %234 = vector.broadcast %233 : f32 to vector<2x6x128xf32>
    %235 = arith.mulf %234, %228 : vector<2x6x128xf32>
    %236 = arith.addf %218, %235 : vector<2x6x128xf32>
    %c50 = arith.constant 50 : index
    %237 = memref.load %arg1[%c50] : memref<84xf32, #tpu.memory_space<smem>>
    %238 = vector.broadcast %237 : f32 to vector<2x6x128xf32>
    %239 = arith.mulf %238, %228 : vector<2x6x128xf32>
    %240 = arith.addf %222, %239 : vector<2x6x128xf32>
    %c51 = arith.constant 51 : index
    %241 = memref.load %arg1[%c51] : memref<84xf32, #tpu.memory_space<smem>>
    %242 = vector.broadcast %241 : f32 to vector<2x6x128xf32>
    %243 = arith.mulf %242, %228 : vector<2x6x128xf32>
    %244 = arith.addf %226, %243 : vector<2x6x128xf32>
    %c13_53 = arith.constant 13 : index
    %c0_54 = arith.constant 0 : index
    %c0_55 = arith.constant 0 : index
    %c0_56 = arith.constant 0 : index
    %245 = vector.load %arg2[%c13_53, %c0_54, %c0_55, %c0_56] : memref<20x2x6x128xf32, #tpu.memory_space<vmem>>, vector<1x2x6x128xf32>
    %246 = vector.shape_cast %245 : vector<1x2x6x128xf32> to vector<2x6x128xf32>
    %c52 = arith.constant 52 : index
    %247 = memref.load %arg1[%c52] : memref<84xf32, #tpu.memory_space<smem>>
    %248 = vector.broadcast %247 : f32 to vector<2x6x128xf32>
    %249 = arith.mulf %248, %246 : vector<2x6x128xf32>
    %250 = arith.addf %232, %249 : vector<2x6x128xf32>
    %c53 = arith.constant 53 : index
    %251 = memref.load %arg1[%c53] : memref<84xf32, #tpu.memory_space<smem>>
    %252 = vector.broadcast %251 : f32 to vector<2x6x128xf32>
    %253 = arith.mulf %252, %246 : vector<2x6x128xf32>
    %254 = arith.addf %236, %253 : vector<2x6x128xf32>
    %c54 = arith.constant 54 : index
    %255 = memref.load %arg1[%c54] : memref<84xf32, #tpu.memory_space<smem>>
    %256 = vector.broadcast %255 : f32 to vector<2x6x128xf32>
    %257 = arith.mulf %256, %246 : vector<2x6x128xf32>
    %258 = arith.addf %240, %257 : vector<2x6x128xf32>
    %c55 = arith.constant 55 : index
    %259 = memref.load %arg1[%c55] : memref<84xf32, #tpu.memory_space<smem>>
    %260 = vector.broadcast %259 : f32 to vector<2x6x128xf32>
    %261 = arith.mulf %260, %246 : vector<2x6x128xf32>
    %262 = arith.addf %244, %261 : vector<2x6x128xf32>
    %c14_57 = arith.constant 14 : index
    %c0_58 = arith.constant 0 : index
    %c0_59 = arith.constant 0 : index
    %c0_60 = arith.constant 0 : index
    %263 = vector.load %arg2[%c14_57, %c0_58, %c0_59, %c0_60] : memref<20x2x6x128xf32, #tpu.memory_space<vmem>>, vector<1x2x6x128xf32>
    %264 = vector.shape_cast %263 : vector<1x2x6x128xf32> to vector<2x6x128xf32>
    %c56 = arith.constant 56 : index
    %265 = memref.load %arg1[%c56] : memref<84xf32, #tpu.memory_space<smem>>
    %266 = vector.broadcast %265 : f32 to vector<2x6x128xf32>
    %267 = arith.mulf %266, %264 : vector<2x6x128xf32>
    %268 = arith.addf %250, %267 : vector<2x6x128xf32>
    %c57 = arith.constant 57 : index
    %269 = memref.load %arg1[%c57] : memref<84xf32, #tpu.memory_space<smem>>
    %270 = vector.broadcast %269 : f32 to vector<2x6x128xf32>
    %271 = arith.mulf %270, %264 : vector<2x6x128xf32>
    %272 = arith.addf %254, %271 : vector<2x6x128xf32>
    %c58 = arith.constant 58 : index
    %273 = memref.load %arg1[%c58] : memref<84xf32, #tpu.memory_space<smem>>
    %274 = vector.broadcast %273 : f32 to vector<2x6x128xf32>
    %275 = arith.mulf %274, %264 : vector<2x6x128xf32>
    %276 = arith.addf %258, %275 : vector<2x6x128xf32>
    %c59 = arith.constant 59 : index
    %277 = memref.load %arg1[%c59] : memref<84xf32, #tpu.memory_space<smem>>
    %278 = vector.broadcast %277 : f32 to vector<2x6x128xf32>
    %279 = arith.mulf %278, %264 : vector<2x6x128xf32>
    %280 = arith.addf %262, %279 : vector<2x6x128xf32>
    %c15_61 = arith.constant 15 : index
    %c0_62 = arith.constant 0 : index
    %c0_63 = arith.constant 0 : index
    %c0_64 = arith.constant 0 : index
    %281 = vector.load %arg2[%c15_61, %c0_62, %c0_63, %c0_64] : memref<20x2x6x128xf32, #tpu.memory_space<vmem>>, vector<1x2x6x128xf32>
    %282 = vector.shape_cast %281 : vector<1x2x6x128xf32> to vector<2x6x128xf32>
    %c60 = arith.constant 60 : index
    %283 = memref.load %arg1[%c60] : memref<84xf32, #tpu.memory_space<smem>>
    %284 = vector.broadcast %283 : f32 to vector<2x6x128xf32>
    %285 = arith.mulf %284, %282 : vector<2x6x128xf32>
    %286 = arith.addf %268, %285 : vector<2x6x128xf32>
    %c61 = arith.constant 61 : index
    %287 = memref.load %arg1[%c61] : memref<84xf32, #tpu.memory_space<smem>>
    %288 = vector.broadcast %287 : f32 to vector<2x6x128xf32>
    %289 = arith.mulf %288, %282 : vector<2x6x128xf32>
    %290 = arith.addf %272, %289 : vector<2x6x128xf32>
    %c62 = arith.constant 62 : index
    %291 = memref.load %arg1[%c62] : memref<84xf32, #tpu.memory_space<smem>>
    %292 = vector.broadcast %291 : f32 to vector<2x6x128xf32>
    %293 = arith.mulf %292, %282 : vector<2x6x128xf32>
    %294 = arith.addf %276, %293 : vector<2x6x128xf32>
    %c63 = arith.constant 63 : index
    %295 = memref.load %arg1[%c63] : memref<84xf32, #tpu.memory_space<smem>>
    %296 = vector.broadcast %295 : f32 to vector<2x6x128xf32>
    %297 = arith.mulf %296, %282 : vector<2x6x128xf32>
    %298 = arith.addf %280, %297 : vector<2x6x128xf32>
    %c16_65 = arith.constant 16 : index
    %c0_66 = arith.constant 0 : index
    %c0_67 = arith.constant 0 : index
    %c0_68 = arith.constant 0 : index
    %299 = vector.load %arg2[%c16_65, %c0_66, %c0_67, %c0_68] : memref<20x2x6x128xf32, #tpu.memory_space<vmem>>, vector<1x2x6x128xf32>
    %300 = vector.shape_cast %299 : vector<1x2x6x128xf32> to vector<2x6x128xf32>
    %c64 = arith.constant 64 : index
    %301 = memref.load %arg1[%c64] : memref<84xf32, #tpu.memory_space<smem>>
    %302 = vector.broadcast %301 : f32 to vector<2x6x128xf32>
    %303 = arith.mulf %302, %300 : vector<2x6x128xf32>
    %304 = arith.addf %286, %303 : vector<2x6x128xf32>
    %c65 = arith.constant 65 : index
    %305 = memref.load %arg1[%c65] : memref<84xf32, #tpu.memory_space<smem>>
    %306 = vector.broadcast %305 : f32 to vector<2x6x128xf32>
    %307 = arith.mulf %306, %300 : vector<2x6x128xf32>
    %308 = arith.addf %290, %307 : vector<2x6x128xf32>
    %c66 = arith.constant 66 : index
    %309 = memref.load %arg1[%c66] : memref<84xf32, #tpu.memory_space<smem>>
    %310 = vector.broadcast %309 : f32 to vector<2x6x128xf32>
    %311 = arith.mulf %310, %300 : vector<2x6x128xf32>
    %312 = arith.addf %294, %311 : vector<2x6x128xf32>
    %c67 = arith.constant 67 : index
    %313 = memref.load %arg1[%c67] : memref<84xf32, #tpu.memory_space<smem>>
    %314 = vector.broadcast %313 : f32 to vector<2x6x128xf32>
    %315 = arith.mulf %314, %300 : vector<2x6x128xf32>
    %316 = arith.addf %298, %315 : vector<2x6x128xf32>
    %c17_69 = arith.constant 17 : index
    %c0_70 = arith.constant 0 : index
    %c0_71 = arith.constant 0 : index
    %c0_72 = arith.constant 0 : index
    %317 = vector.load %arg2[%c17_69, %c0_70, %c0_71, %c0_72] : memref<20x2x6x128xf32, #tpu.memory_space<vmem>>, vector<1x2x6x128xf32>
    %318 = vector.shape_cast %317 : vector<1x2x6x128xf32> to vector<2x6x128xf32>
    %c68 = arith.constant 68 : index
    %319 = memref.load %arg1[%c68] : memref<84xf32, #tpu.memory_space<smem>>
    %320 = vector.broadcast %319 : f32 to vector<2x6x128xf32>
    %321 = arith.mulf %320, %318 : vector<2x6x128xf32>
    %322 = arith.addf %304, %321 : vector<2x6x128xf32>
    %c69 = arith.constant 69 : index
    %323 = memref.load %arg1[%c69] : memref<84xf32, #tpu.memory_space<smem>>
    %324 = vector.broadcast %323 : f32 to vector<2x6x128xf32>
    %325 = arith.mulf %324, %318 : vector<2x6x128xf32>
    %326 = arith.addf %308, %325 : vector<2x6x128xf32>
    %c70 = arith.constant 70 : index
    %327 = memref.load %arg1[%c70] : memref<84xf32, #tpu.memory_space<smem>>
    %328 = vector.broadcast %327 : f32 to vector<2x6x128xf32>
    %329 = arith.mulf %328, %318 : vector<2x6x128xf32>
    %330 = arith.addf %312, %329 : vector<2x6x128xf32>
    %c71 = arith.constant 71 : index
    %331 = memref.load %arg1[%c71] : memref<84xf32, #tpu.memory_space<smem>>
    %332 = vector.broadcast %331 : f32 to vector<2x6x128xf32>
    %333 = arith.mulf %332, %318 : vector<2x6x128xf32>
    %334 = arith.addf %316, %333 : vector<2x6x128xf32>
    %c18_73 = arith.constant 18 : index
    %c0_74 = arith.constant 0 : index
    %c0_75 = arith.constant 0 : index
    %c0_76 = arith.constant 0 : index
    %335 = vector.load %arg2[%c18_73, %c0_74, %c0_75, %c0_76] : memref<20x2x6x128xf32, #tpu.memory_space<vmem>>, vector<1x2x6x128xf32>
    %336 = vector.shape_cast %335 : vector<1x2x6x128xf32> to vector<2x6x128xf32>
    %c72 = arith.constant 72 : index
    %337 = memref.load %arg1[%c72] : memref<84xf32, #tpu.memory_space<smem>>
    %338 = vector.broadcast %337 : f32 to vector<2x6x128xf32>
    %339 = arith.mulf %338, %336 : vector<2x6x128xf32>
    %340 = arith.addf %322, %339 : vector<2x6x128xf32>
    %c73 = arith.constant 73 : index
    %341 = memref.load %arg1[%c73] : memref<84xf32, #tpu.memory_space<smem>>
    %342 = vector.broadcast %341 : f32 to vector<2x6x128xf32>
    %343 = arith.mulf %342, %336 : vector<2x6x128xf32>
    %344 = arith.addf %326, %343 : vector<2x6x128xf32>
    %c74 = arith.constant 74 : index
    %345 = memref.load %arg1[%c74] : memref<84xf32, #tpu.memory_space<smem>>
    %346 = vector.broadcast %345 : f32 to vector<2x6x128xf32>
    %347 = arith.mulf %346, %336 : vector<2x6x128xf32>
    %348 = arith.addf %330, %347 : vector<2x6x128xf32>
    %c75 = arith.constant 75 : index
    %349 = memref.load %arg1[%c75] : memref<84xf32, #tpu.memory_space<smem>>
    %350 = vector.broadcast %349 : f32 to vector<2x6x128xf32>
    %351 = arith.mulf %350, %336 : vector<2x6x128xf32>
    %352 = arith.addf %334, %351 : vector<2x6x128xf32>
    %c19_77 = arith.constant 19 : index
    %c0_78 = arith.constant 0 : index
    %c0_79 = arith.constant 0 : index
    %c0_80 = arith.constant 0 : index
    %353 = vector.load %arg2[%c19_77, %c0_78, %c0_79, %c0_80] : memref<20x2x6x128xf32, #tpu.memory_space<vmem>>, vector<1x2x6x128xf32>
    %354 = vector.shape_cast %353 : vector<1x2x6x128xf32> to vector<2x6x128xf32>
    %c76 = arith.constant 76 : index
    %355 = memref.load %arg1[%c76] : memref<84xf32, #tpu.memory_space<smem>>
    %356 = vector.broadcast %355 : f32 to vector<2x6x128xf32>
    %357 = arith.mulf %356, %354 : vector<2x6x128xf32>
    %358 = arith.addf %340, %357 : vector<2x6x128xf32>
    %c77 = arith.constant 77 : index
    %359 = memref.load %arg1[%c77] : memref<84xf32, #tpu.memory_space<smem>>
    %360 = vector.broadcast %359 : f32 to vector<2x6x128xf32>
    %361 = arith.mulf %360, %354 : vector<2x6x128xf32>
    %362 = arith.addf %344, %361 : vector<2x6x128xf32>
    %c78 = arith.constant 78 : index
    %363 = memref.load %arg1[%c78] : memref<84xf32, #tpu.memory_space<smem>>
    %364 = vector.broadcast %363 : f32 to vector<2x6x128xf32>
    %365 = arith.mulf %364, %354 : vector<2x6x128xf32>
    %366 = arith.addf %348, %365 : vector<2x6x128xf32>
    %c79 = arith.constant 79 : index
    %367 = memref.load %arg1[%c79] : memref<84xf32, #tpu.memory_space<smem>>
    %368 = vector.broadcast %367 : f32 to vector<2x6x128xf32>
    %369 = arith.mulf %368, %354 : vector<2x6x128xf32>
    %370 = arith.addf %352, %369 : vector<2x6x128xf32>
    %cst = arith.constant 0.000000e+00 : f32
    %371 = vector.broadcast %cst : f32 to vector<2x6x128xf32>
    %372 = arith.cmpf oge, %358, %371 : vector<2x6x128xf32>
    %cst_81 = arith.constant 1.000000e-01 : f32
    %373 = vector.broadcast %cst_81 : f32 to vector<2x6x128xf32>
    %374 = arith.mulf %373, %358 : vector<2x6x128xf32>
    %375 = arith.select %372, %358, %374 : vector<2x6x128xi1>, vector<2x6x128xf32>
    %c0_82 = arith.constant 0 : index
    %c0_83 = arith.constant 0 : index
    %c0_84 = arith.constant 0 : index
    %c0_85 = arith.constant 0 : index
    %376 = vector.load %arg3[%c0_82, %c0_83, %c0_84, %c0_85] : memref<4x2x6x128xf32, #tpu.memory_space<vmem>>, vector<1x2x6x128xf32>
    %377 = vector.shape_cast %376 : vector<1x2x6x128xf32> to vector<2x6x128xf32>
    %378 = vector.shape_cast %375 : vector<2x6x128xf32> to vector<1x2x6x128xf32>
    tpu.vector_store %arg3[%c0_82, %c0_83, %c0_84, %c0_85], %378 {strides = array<i32>} : memref<4x2x6x128xf32, #tpu.memory_space<vmem>>, vector<1x2x6x128xf32>,
    %379 = vector.extract_strided_slice %375 {offsets = [0, 0, 0], sizes = [1, 6, 128], strides = [1, 1, 1]} : vector<2x6x128xf32> to vector<1x6x128xf32>
    %380 = vector.shape_cast %379 : vector<1x6x128xf32> to vector<6x128xf32>
    %381 = vector.extract_strided_slice %375 {offsets = [1, 0, 0], sizes = [1, 6, 128], strides = [1, 1, 1]} : vector<2x6x128xf32> to vector<1x6x128xf32>
    %382 = vector.shape_cast %381 : vector<1x6x128xf32> to vector<6x128xf32>
    %383 = arith.subf %380, %382 : vector<6x128xf32>
    %384 = math.absf %383 : vector<6x128xf32>
    %385 = vector.shape_cast %384 : vector<6x128xf32> to vector<1x6x128xf32>
    %cst_86 = arith.constant dense<0.000000e+00> : vector<1xf32>
    %386 = vector.multi_reduction <add>, %385, %cst_86 [1, 2] : vector<1x6x128xf32> to vector<1xf32>
    %387 = vector.shape_cast %386 : vector<1xf32> to vector<1x1x1xf32>
    %388 = vector.extract %387[0, 0, 0] : f32 from vector<1x1x1xf32>
    %cst_87 = arith.constant 0.000000e+00 : f32
    %389 = arith.addf %cst_87, %388 : f32
    %cst_88 = arith.constant 0.000000e+00 : f32
    %390 = vector.broadcast %cst_88 : f32 to vector<2x6x128xf32>
    %391 = arith.cmpf oge, %362, %390 : vector<2x6x128xf32>
    %cst_89 = arith.constant 1.000000e-01 : f32
    %392 = vector.broadcast %cst_89 : f32 to vector<2x6x128xf32>
    %393 = arith.mulf %392, %362 : vector<2x6x128xf32>
    %394 = arith.select %391, %362, %393 : vector<2x6x128xi1>, vector<2x6x128xf32>
    %c1_90 = arith.constant 1 : index
    %c0_91 = arith.constant 0 : index
    %c0_92 = arith.constant 0 : index
    %c0_93 = arith.constant 0 : index
    %395 = vector.load %arg3[%c1_90, %c0_91, %c0_92, %c0_93] : memref<4x2x6x128xf32, #tpu.memory_space<vmem>>, vector<1x2x6x128xf32>
    %396 = vector.shape_cast %395 : vector<1x2x6x128xf32> to vector<2x6x128xf32>
    %397 = vector.shape_cast %394 : vector<2x6x128xf32> to vector<1x2x6x128xf32>
    tpu.vector_store %arg3[%c1_90, %c0_91, %c0_92, %c0_93], %397 {strides = array<i32>} : memref<4x2x6x128xf32, #tpu.memory_space<vmem>>, vector<1x2x6x128xf32>,
    %398 = vector.extract_strided_slice %394 {offsets = [0, 0, 0], sizes = [1, 6, 128], strides = [1, 1, 1]} : vector<2x6x128xf32> to vector<1x6x128xf32>
    %399 = vector.shape_cast %398 : vector<1x6x128xf32> to vector<6x128xf32>
    %400 = vector.extract_strided_slice %394 {offsets = [1, 0, 0], sizes = [1, 6, 128], strides = [1, 1, 1]} : vector<2x6x128xf32> to vector<1x6x128xf32>
    %401 = vector.shape_cast %400 : vector<1x6x128xf32> to vector<6x128xf32>
    %402 = arith.subf %399, %401 : vector<6x128xf32>
    %403 = math.absf %402 : vector<6x128xf32>
    %404 = vector.shape_cast %403 : vector<6x128xf32> to vector<1x6x128xf32>
    %cst_94 = arith.constant dense<0.000000e+00> : vector<1xf32>
    %405 = vector.multi_reduction <add>, %404, %cst_94 [1, 2] : vector<1x6x128xf32> to vector<1xf32>
    %406 = vector.shape_cast %405 : vector<1xf32> to vector<1x1x1xf32>
    %407 = vector.extract %406[0, 0, 0] : f32 from vector<1x1x1xf32>
    %408 = arith.addf %389, %407 : f32
    %cst_95 = arith.constant 0.000000e+00 : f32
    %409 = vector.broadcast %cst_95 : f32 to vector<2x6x128xf32>
    %410 = arith.cmpf oge, %366, %409 : vector<2x6x128xf32>
    %cst_96 = arith.constant 1.000000e-01 : f32
    %411 = vector.broadcast %cst_96 : f32 to vector<2x6x128xf32>
    %412 = arith.mulf %411, %366 : vector<2x6x128xf32>
    %413 = arith.select %410, %366, %412 : vector<2x6x128xi1>, vector<2x6x128xf32>
    %c2_97 = arith.constant 2 : index
    %c0_98 = arith.constant 0 : index
    %c0_99 = arith.constant 0 : index
    %c0_100 = arith.constant 0 : index
    %414 = vector.load %arg3[%c2_97, %c0_98, %c0_99, %c0_100] : memref<4x2x6x128xf32, #tpu.memory_space<vmem>>, vector<1x2x6x128xf32>
    %415 = vector.shape_cast %414 : vector<1x2x6x128xf32> to vector<2x6x128xf32>
    %416 = vector.shape_cast %413 : vector<2x6x128xf32> to vector<1x2x6x128xf32>
    tpu.vector_store %arg3[%c2_97, %c0_98, %c0_99, %c0_100], %416 {strides = array<i32>} : memref<4x2x6x128xf32, #tpu.memory_space<vmem>>, vector<1x2x6x128xf32>,
    %417 = vector.extract_strided_slice %413 {offsets = [0, 0, 0], sizes = [1, 6, 128], strides = [1, 1, 1]} : vector<2x6x128xf32> to vector<1x6x128xf32>
    %418 = vector.shape_cast %417 : vector<1x6x128xf32> to vector<6x128xf32>
    %419 = vector.extract_strided_slice %413 {offsets = [1, 0, 0], sizes = [1, 6, 128], strides = [1, 1, 1]} : vector<2x6x128xf32> to vector<1x6x128xf32>
    %420 = vector.shape_cast %419 : vector<1x6x128xf32> to vector<6x128xf32>
    %421 = arith.subf %418, %420 : vector<6x128xf32>
    %422 = math.absf %421 : vector<6x128xf32>
    %423 = vector.shape_cast %422 : vector<6x128xf32> to vector<1x6x128xf32>
    %cst_101 = arith.constant dense<0.000000e+00> : vector<1xf32>
    %424 = vector.multi_reduction <add>, %423, %cst_101 [1, 2] : vector<1x6x128xf32> to vector<1xf32>
    %425 = vector.shape_cast %424 : vector<1xf32> to vector<1x1x1xf32>
    %426 = vector.extract %425[0, 0, 0] : f32 from vector<1x1x1xf32>
    %427 = arith.addf %408, %426 : f32
    %cst_102 = arith.constant 0.000000e+00 : f32
    %428 = vector.broadcast %cst_102 : f32 to vector<2x6x128xf32>
    %429 = arith.cmpf oge, %370, %428 : vector<2x6x128xf32>
    %cst_103 = arith.constant 1.000000e-01 : f32
    %430 = vector.broadcast %cst_103 : f32 to vector<2x6x128xf32>
    %431 = arith.mulf %430, %370 : vector<2x6x128xf32>
    %432 = arith.select %429, %370, %431 : vector<2x6x128xi1>, vector<2x6x128xf32>
    %c3_104 = arith.constant 3 : index
    %c0_105 = arith.constant 0 : index
    %c0_106 = arith.constant 0 : index
    %c0_107 = arith.constant 0 : index
    %433 = vector.load %arg3[%c3_104, %c0_105, %c0_106, %c0_107] : memref<4x2x6x128xf32, #tpu.memory_space<vmem>>, vector<1x2x6x128xf32>
    %434 = vector.shape_cast %433 : vector<1x2x6x128xf32> to vector<2x6x128xf32>
    %435 = vector.shape_cast %432 : vector<2x6x128xf32> to vector<1x2x6x128xf32>
    tpu.vector_store %arg3[%c3_104, %c0_105, %c0_106, %c0_107], %435 {strides = array<i32>} : memref<4x2x6x128xf32, #tpu.memory_space<vmem>>, vector<1x2x6x128xf32>,
    %436 = vector.extract_strided_slice %432 {offsets = [0, 0, 0], sizes = [1, 6, 128], strides = [1, 1, 1]} : vector<2x6x128xf32> to vector<1x6x128xf32>
    %437 = vector.shape_cast %436 : vector<1x6x128xf32> to vector<6x128xf32>
    %438 = vector.extract_strided_slice %432 {offsets = [1, 0, 0], sizes = [1, 6, 128], strides = [1, 1, 1]} : vector<2x6x128xf32> to vector<1x6x128xf32>
    %439 = vector.shape_cast %438 : vector<1x6x128xf32> to vector<6x128xf32>
    %440 = arith.subf %437, %439 : vector<6x128xf32>
    %441 = math.absf %440 : vector<6x128xf32>
    %442 = vector.shape_cast %441 : vector<6x128xf32> to vector<1x6x128xf32>
    %cst_108 = arith.constant dense<0.000000e+00> : vector<1xf32>
    %443 = vector.multi_reduction <add>, %442, %cst_108 [1, 2] : vector<1x6x128xf32> to vector<1xf32>
    %444 = vector.shape_cast %443 : vector<1xf32> to vector<1x1x1xf32>
    %445 = vector.extract %444[0, 0, 0] : f32 from vector<1x1x1xf32>
    %446 = arith.addf %427, %445 : f32
    %c0_109 = arith.constant 0 : index
    %c0_110 = arith.constant 0 : index
    %447 = vector.load %arg4[%c0_109, %c0_110] : memref<1x1xf32, #tpu.memory_space<vmem>>, vector<1x1xf32>
    %448 = vector.broadcast %446 : f32 to vector<1x1xf32>
    %449 = arith.addf %447, %448 : vector<1x1xf32>
    %c0_111 = arith.constant 0 : index
    %c0_112 = arith.constant 0 : index
    %450 = vector.load %arg4[%c0_111, %c0_112] : memref<1x1xf32, #tpu.memory_space<vmem>>, vector<1x1xf32>
    tpu.vector_store %arg4[%c0_111, %c0_112], %449 {strides = array<i32>} : memref<1x1xf32, #tpu.memory_space<vmem>>, vector<1x1xf32>,
    return
  }
  func.func @transform_0(%arg0: i32) -> i32 {
    %c0_i32 = arith.constant 0 : i32
    %c0_i32_0 = arith.constant 0 : i32
    return %c0_i32 : i32
  }
  func.func @transform_1(%arg0: i32) -> (i32, i32, i32, i32) {
    %c0_i32 = arith.constant 0 : i32
    %c0_i32_0 = arith.constant 0 : i32
    %c0_i32_1 = arith.constant 0 : i32
    %c0_i32_2 = arith.constant 0 : i32
    return %c0_i32, %c0_i32_0, %c0_i32_1, %arg0 : i32, i32, i32, i32
  }
  func.func @transform_2(%arg0: i32) -> (i32, i32, i32, i32) {
    %c0_i32 = arith.constant 0 : i32
    %c0_i32_0 = arith.constant 0 : i32
    %c0_i32_1 = arith.constant 0 : i32
    %c0_i32_2 = arith.constant 0 : i32
    return %c0_i32, %c0_i32_0, %c0_i32_1, %arg0 : i32, i32, i32, i32
  }
  func.func @transform_3(%arg0: i32) -> (i32, i32) {
    %c0_i32 = arith.constant 0 : i32
    %c0_i32_0 = arith.constant 0 : i32
    %c0_i32_1 = arith.constant 0 : i32
    return %c0_i32, %c0_i32_0 : i32, i32
  }
}

module attributes {stable_mosaic.version = 11 : i64} {
  func.func @_conv_pair_kernel(%arg0: i32, %arg1: memref<13xf32, #tpu.memory_space<smem>>, %arg2: memref<12x2x6x128xf32, #tpu.memory_space<vmem>>, %arg3: memref<1x2x6x128xf32, #tpu.memory_space<vmem>>, %arg4: memref<1x1xf32, #tpu.memory_space<vmem>>) attributes {dimension_semantics = [#tpu.dimension_semantics<arbitrary>], iteration_bounds = array<i64: 1>, scalar_prefetch = 0 : i64, scratch_operands = 0 : i64, tpu.core_type = #tpu.core_type<tc>, window_params = [{transform_indices = @transform_0, window_bounds = array<i64: 13>}, {transform_indices = @transform_1, window_bounds = array<i64: 12, 2, 6, 128>}, {transform_indices = @transform_2, window_bounds = array<i64: 1, 2, 6, 128>}, {pipeline_mode = #tpu.pipeline_mode<synchronous>, transform_indices = @transform_3, window_bounds = array<i64: 1, 1>}]} {
    %c0_i32 = arith.constant 0 : i32
    %0 = arith.cmpi eq, %arg0, %c0_i32 : i32
    %1 = arith.extui %0 : i1 to i32
    %c0_i32_0 = arith.constant 0 : i32
    %2 = arith.cmpi ne, %1, %c0_i32_0 : i32
    scf.if %2 {
      %cst_58 = arith.constant 0.000000e+00 : f32
      %95 = vector.broadcast %cst_58 : f32 to vector<1x1xf32>
      %c0_59 = arith.constant 0 : index
      %c0_60 = arith.constant 0 : index
      %96 = vector.load %arg4[%c0_59, %c0_60] : memref<1x1xf32, #tpu.memory_space<vmem>>, vector<1x1xf32>
      tpu.vector_store %arg4[%c0_59, %c0_60], %95 {strides = array<i32>} : memref<1x1xf32, #tpu.memory_space<vmem>>, vector<1x1xf32>,
    } else {
    }
    %c12 = arith.constant 12 : index
    %3 = memref.load %arg1[%c12] : memref<13xf32, #tpu.memory_space<smem>>
    %4 = vector.broadcast %3 : f32 to vector<2x6x128xf32>
    %c0 = arith.constant 0 : index
    %c0_1 = arith.constant 0 : index
    %c0_2 = arith.constant 0 : index
    %c0_3 = arith.constant 0 : index
    %5 = vector.load %arg2[%c0, %c0_1, %c0_2, %c0_3] : memref<12x2x6x128xf32, #tpu.memory_space<vmem>>, vector<1x2x6x128xf32>
    %6 = vector.shape_cast %5 : vector<1x2x6x128xf32> to vector<2x6x128xf32>
    %c0_4 = arith.constant 0 : index
    %7 = memref.load %arg1[%c0_4] : memref<13xf32, #tpu.memory_space<smem>>
    %8 = vector.broadcast %7 : f32 to vector<2x6x128xf32>
    %9 = arith.mulf %8, %6 : vector<2x6x128xf32>
    %10 = arith.addf %4, %9 : vector<2x6x128xf32>
    %c1 = arith.constant 1 : index
    %c0_5 = arith.constant 0 : index
    %c0_6 = arith.constant 0 : index
    %c0_7 = arith.constant 0 : index
    %11 = vector.load %arg2[%c1, %c0_5, %c0_6, %c0_7] : memref<12x2x6x128xf32, #tpu.memory_space<vmem>>, vector<1x2x6x128xf32>
    %12 = vector.shape_cast %11 : vector<1x2x6x128xf32> to vector<2x6x128xf32>
    %c1_8 = arith.constant 1 : index
    %13 = memref.load %arg1[%c1_8] : memref<13xf32, #tpu.memory_space<smem>>
    %14 = vector.broadcast %13 : f32 to vector<2x6x128xf32>
    %15 = arith.mulf %14, %12 : vector<2x6x128xf32>
    %16 = arith.addf %10, %15 : vector<2x6x128xf32>
    %c2 = arith.constant 2 : index
    %c0_9 = arith.constant 0 : index
    %c0_10 = arith.constant 0 : index
    %c0_11 = arith.constant 0 : index
    %17 = vector.load %arg2[%c2, %c0_9, %c0_10, %c0_11] : memref<12x2x6x128xf32, #tpu.memory_space<vmem>>, vector<1x2x6x128xf32>
    %18 = vector.shape_cast %17 : vector<1x2x6x128xf32> to vector<2x6x128xf32>
    %c2_12 = arith.constant 2 : index
    %19 = memref.load %arg1[%c2_12] : memref<13xf32, #tpu.memory_space<smem>>
    %20 = vector.broadcast %19 : f32 to vector<2x6x128xf32>
    %21 = arith.mulf %20, %18 : vector<2x6x128xf32>
    %22 = arith.addf %16, %21 : vector<2x6x128xf32>
    %c3 = arith.constant 3 : index
    %c0_13 = arith.constant 0 : index
    %c0_14 = arith.constant 0 : index
    %c0_15 = arith.constant 0 : index
    %23 = vector.load %arg2[%c3, %c0_13, %c0_14, %c0_15] : memref<12x2x6x128xf32, #tpu.memory_space<vmem>>, vector<1x2x6x128xf32>
    %24 = vector.shape_cast %23 : vector<1x2x6x128xf32> to vector<2x6x128xf32>
    %c3_16 = arith.constant 3 : index
    %25 = memref.load %arg1[%c3_16] : memref<13xf32, #tpu.memory_space<smem>>
    %26 = vector.broadcast %25 : f32 to vector<2x6x128xf32>
    %27 = arith.mulf %26, %24 : vector<2x6x128xf32>
    %28 = arith.addf %22, %27 : vector<2x6x128xf32>
    %c4 = arith.constant 4 : index
    %c0_17 = arith.constant 0 : index
    %c0_18 = arith.constant 0 : index
    %c0_19 = arith.constant 0 : index
    %29 = vector.load %arg2[%c4, %c0_17, %c0_18, %c0_19] : memref<12x2x6x128xf32, #tpu.memory_space<vmem>>, vector<1x2x6x128xf32>
    %30 = vector.shape_cast %29 : vector<1x2x6x128xf32> to vector<2x6x128xf32>
    %c4_20 = arith.constant 4 : index
    %31 = memref.load %arg1[%c4_20] : memref<13xf32, #tpu.memory_space<smem>>
    %32 = vector.broadcast %31 : f32 to vector<2x6x128xf32>
    %33 = arith.mulf %32, %30 : vector<2x6x128xf32>
    %34 = arith.addf %28, %33 : vector<2x6x128xf32>
    %c5 = arith.constant 5 : index
    %c0_21 = arith.constant 0 : index
    %c0_22 = arith.constant 0 : index
    %c0_23 = arith.constant 0 : index
    %35 = vector.load %arg2[%c5, %c0_21, %c0_22, %c0_23] : memref<12x2x6x128xf32, #tpu.memory_space<vmem>>, vector<1x2x6x128xf32>
    %36 = vector.shape_cast %35 : vector<1x2x6x128xf32> to vector<2x6x128xf32>
    %c5_24 = arith.constant 5 : index
    %37 = memref.load %arg1[%c5_24] : memref<13xf32, #tpu.memory_space<smem>>
    %38 = vector.broadcast %37 : f32 to vector<2x6x128xf32>
    %39 = arith.mulf %38, %36 : vector<2x6x128xf32>
    %40 = arith.addf %34, %39 : vector<2x6x128xf32>
    %c6 = arith.constant 6 : index
    %c0_25 = arith.constant 0 : index
    %c0_26 = arith.constant 0 : index
    %c0_27 = arith.constant 0 : index
    %41 = vector.load %arg2[%c6, %c0_25, %c0_26, %c0_27] : memref<12x2x6x128xf32, #tpu.memory_space<vmem>>, vector<1x2x6x128xf32>
    %42 = vector.shape_cast %41 : vector<1x2x6x128xf32> to vector<2x6x128xf32>
    %c6_28 = arith.constant 6 : index
    %43 = memref.load %arg1[%c6_28] : memref<13xf32, #tpu.memory_space<smem>>
    %44 = vector.broadcast %43 : f32 to vector<2x6x128xf32>
    %45 = arith.mulf %44, %42 : vector<2x6x128xf32>
    %46 = arith.addf %40, %45 : vector<2x6x128xf32>
    %c7 = arith.constant 7 : index
    %c0_29 = arith.constant 0 : index
    %c0_30 = arith.constant 0 : index
    %c0_31 = arith.constant 0 : index
    %47 = vector.load %arg2[%c7, %c0_29, %c0_30, %c0_31] : memref<12x2x6x128xf32, #tpu.memory_space<vmem>>, vector<1x2x6x128xf32>
    %48 = vector.shape_cast %47 : vector<1x2x6x128xf32> to vector<2x6x128xf32>
    %c7_32 = arith.constant 7 : index
    %49 = memref.load %arg1[%c7_32] : memref<13xf32, #tpu.memory_space<smem>>
    %50 = vector.broadcast %49 : f32 to vector<2x6x128xf32>
    %51 = arith.mulf %50, %48 : vector<2x6x128xf32>
    %52 = arith.addf %46, %51 : vector<2x6x128xf32>
    %c8 = arith.constant 8 : index
    %c0_33 = arith.constant 0 : index
    %c0_34 = arith.constant 0 : index
    %c0_35 = arith.constant 0 : index
    %53 = vector.load %arg2[%c8, %c0_33, %c0_34, %c0_35] : memref<12x2x6x128xf32, #tpu.memory_space<vmem>>, vector<1x2x6x128xf32>
    %54 = vector.shape_cast %53 : vector<1x2x6x128xf32> to vector<2x6x128xf32>
    %c8_36 = arith.constant 8 : index
    %55 = memref.load %arg1[%c8_36] : memref<13xf32, #tpu.memory_space<smem>>
    %56 = vector.broadcast %55 : f32 to vector<2x6x128xf32>
    %57 = arith.mulf %56, %54 : vector<2x6x128xf32>
    %58 = arith.addf %52, %57 : vector<2x6x128xf32>
    %c9 = arith.constant 9 : index
    %c0_37 = arith.constant 0 : index
    %c0_38 = arith.constant 0 : index
    %c0_39 = arith.constant 0 : index
    %59 = vector.load %arg2[%c9, %c0_37, %c0_38, %c0_39] : memref<12x2x6x128xf32, #tpu.memory_space<vmem>>, vector<1x2x6x128xf32>
    %60 = vector.shape_cast %59 : vector<1x2x6x128xf32> to vector<2x6x128xf32>
    %c9_40 = arith.constant 9 : index
    %61 = memref.load %arg1[%c9_40] : memref<13xf32, #tpu.memory_space<smem>>
    %62 = vector.broadcast %61 : f32 to vector<2x6x128xf32>
    %63 = arith.mulf %62, %60 : vector<2x6x128xf32>
    %64 = arith.addf %58, %63 : vector<2x6x128xf32>
    %c10 = arith.constant 10 : index
    %c0_41 = arith.constant 0 : index
    %c0_42 = arith.constant 0 : index
    %c0_43 = arith.constant 0 : index
    %65 = vector.load %arg2[%c10, %c0_41, %c0_42, %c0_43] : memref<12x2x6x128xf32, #tpu.memory_space<vmem>>, vector<1x2x6x128xf32>
    %66 = vector.shape_cast %65 : vector<1x2x6x128xf32> to vector<2x6x128xf32>
    %c10_44 = arith.constant 10 : index
    %67 = memref.load %arg1[%c10_44] : memref<13xf32, #tpu.memory_space<smem>>
    %68 = vector.broadcast %67 : f32 to vector<2x6x128xf32>
    %69 = arith.mulf %68, %66 : vector<2x6x128xf32>
    %70 = arith.addf %64, %69 : vector<2x6x128xf32>
    %c11 = arith.constant 11 : index
    %c0_45 = arith.constant 0 : index
    %c0_46 = arith.constant 0 : index
    %c0_47 = arith.constant 0 : index
    %71 = vector.load %arg2[%c11, %c0_45, %c0_46, %c0_47] : memref<12x2x6x128xf32, #tpu.memory_space<vmem>>, vector<1x2x6x128xf32>
    %72 = vector.shape_cast %71 : vector<1x2x6x128xf32> to vector<2x6x128xf32>
    %c11_48 = arith.constant 11 : index
    %73 = memref.load %arg1[%c11_48] : memref<13xf32, #tpu.memory_space<smem>>
    %74 = vector.broadcast %73 : f32 to vector<2x6x128xf32>
    %75 = arith.mulf %74, %72 : vector<2x6x128xf32>
    %76 = arith.addf %70, %75 : vector<2x6x128xf32>
    %c0_49 = arith.constant 0 : index
    %c0_50 = arith.constant 0 : index
    %c0_51 = arith.constant 0 : index
    %c0_52 = arith.constant 0 : index
    %77 = vector.load %arg3[%c0_49, %c0_50, %c0_51, %c0_52] : memref<1x2x6x128xf32, #tpu.memory_space<vmem>>, vector<1x2x6x128xf32>
    %78 = vector.shape_cast %77 : vector<1x2x6x128xf32> to vector<2x6x128xf32>
    %79 = vector.shape_cast %76 : vector<2x6x128xf32> to vector<1x2x6x128xf32>
    tpu.vector_store %arg3[%c0_49, %c0_50, %c0_51, %c0_52], %79 {strides = array<i32>} : memref<1x2x6x128xf32, #tpu.memory_space<vmem>>, vector<1x2x6x128xf32>,
    %80 = vector.extract_strided_slice %76 {offsets = [0, 0, 0], sizes = [1, 6, 128], strides = [1, 1, 1]} : vector<2x6x128xf32> to vector<1x6x128xf32>
    %81 = vector.shape_cast %80 : vector<1x6x128xf32> to vector<6x128xf32>
    %82 = vector.extract_strided_slice %76 {offsets = [1, 0, 0], sizes = [1, 6, 128], strides = [1, 1, 1]} : vector<2x6x128xf32> to vector<1x6x128xf32>
    %83 = vector.shape_cast %82 : vector<1x6x128xf32> to vector<6x128xf32>
    %84 = arith.subf %81, %83 : vector<6x128xf32>
    %85 = math.absf %84 : vector<6x128xf32>
    %86 = vector.shape_cast %85 : vector<6x128xf32> to vector<1x6x128xf32>
    %cst = arith.constant dense<0.000000e+00> : vector<1xf32>
    %87 = vector.multi_reduction <add>, %86, %cst [1, 2] : vector<1x6x128xf32> to vector<1xf32>
    %88 = vector.shape_cast %87 : vector<1xf32> to vector<1x1x1xf32>
    %89 = vector.extract %88[0, 0, 0] : f32 from vector<1x1x1xf32>
    %cst_53 = arith.constant 0.000000e+00 : f32
    %90 = arith.addf %cst_53, %89 : f32
    %c0_54 = arith.constant 0 : index
    %c0_55 = arith.constant 0 : index
    %91 = vector.load %arg4[%c0_54, %c0_55] : memref<1x1xf32, #tpu.memory_space<vmem>>, vector<1x1xf32>
    %92 = vector.broadcast %90 : f32 to vector<1x1xf32>
    %93 = arith.addf %91, %92 : vector<1x1xf32>
    %c0_56 = arith.constant 0 : index
    %c0_57 = arith.constant 0 : index
    %94 = vector.load %arg4[%c0_56, %c0_57] : memref<1x1xf32, #tpu.memory_space<vmem>>, vector<1x1xf32>
    tpu.vector_store %arg4[%c0_56, %c0_57], %93 {strides = array<i32>} : memref<1x1xf32, #tpu.memory_space<vmem>>, vector<1x1xf32>,
    return
  }
  func.func @transform_0(%arg0: i32) -> i32 {
    %c0_i32 = arith.constant 0 : i32
    %c0_i32_0 = arith.constant 0 : i32
    return %c0_i32 : i32
  }
  func.func @transform_1(%arg0: i32) -> (i32, i32, i32, i32) {
    %c0_i32 = arith.constant 0 : i32
    %c0_i32_0 = arith.constant 0 : i32
    %c0_i32_1 = arith.constant 0 : i32
    %c0_i32_2 = arith.constant 0 : i32
    return %c0_i32, %c0_i32_0, %c0_i32_1, %arg0 : i32, i32, i32, i32
  }
  func.func @transform_2(%arg0: i32) -> (i32, i32, i32, i32) {
    %c0_i32 = arith.constant 0 : i32
    %c0_i32_0 = arith.constant 0 : i32
    %c0_i32_1 = arith.constant 0 : i32
    %c0_i32_2 = arith.constant 0 : i32
    return %c0_i32, %c0_i32_0, %c0_i32_1, %arg0 : i32, i32, i32, i32
  }
  func.func @transform_3(%arg0: i32) -> (i32, i32) {
    %c0_i32 = arith.constant 0 : i32
    %c0_i32_0 = arith.constant 0 : i32
    %c0_i32_1 = arith.constant 0 : i32
    return %c0_i32, %c0_i32_0 : i32, i32
  }
}

module attributes {stable_mosaic.version = 11 : i64} {
  func.func @_conv_pair_kernel(%arg0: i32, %arg1: memref<24xf32, #tpu.memory_space<smem>>, %arg2: memref<5x2x4x128xf32, #tpu.memory_space<vmem>>, %arg3: memref<4x2x4x128xf32, #tpu.memory_space<vmem>>, %arg4: memref<1x1xf32, #tpu.memory_space<vmem>>) attributes {dimension_semantics = [#tpu.dimension_semantics<arbitrary>], iteration_bounds = array<i64: 1>, scalar_prefetch = 0 : i64, scratch_operands = 0 : i64, tpu.core_type = #tpu.core_type<tc>, window_params = [{transform_indices = @transform_0, window_bounds = array<i64: 24>}, {transform_indices = @transform_1, window_bounds = array<i64: 5, 2, 4, 128>}, {transform_indices = @transform_2, window_bounds = array<i64: 4, 2, 4, 128>}, {pipeline_mode = #tpu.pipeline_mode<synchronous>, transform_indices = @transform_3, window_bounds = array<i64: 1, 1>}]} {
    %c0_i32 = arith.constant 0 : i32
    %0 = arith.cmpi eq, %arg0, %c0_i32 : i32
    %1 = arith.extui %0 : i1 to i32
    %c0_i32_0 = arith.constant 0 : i32
    %2 = arith.cmpi ne, %1, %c0_i32_0 : i32
    scf.if %2 {
      %cst_53 = arith.constant 0.000000e+00 : f32
      %181 = vector.broadcast %cst_53 : f32 to vector<1x1xf32>
      %c0_54 = arith.constant 0 : index
      %c0_55 = arith.constant 0 : index
      %182 = vector.load %arg4[%c0_54, %c0_55] : memref<1x1xf32, #tpu.memory_space<vmem>>, vector<1x1xf32>
      tpu.vector_store %arg4[%c0_54, %c0_55], %181 {strides = array<i32>} : memref<1x1xf32, #tpu.memory_space<vmem>>, vector<1x1xf32>,
    } else {
    }
    %c20 = arith.constant 20 : index
    %3 = memref.load %arg1[%c20] : memref<24xf32, #tpu.memory_space<smem>>
    %4 = vector.broadcast %3 : f32 to vector<2x4x128xf32>
    %c21 = arith.constant 21 : index
    %5 = memref.load %arg1[%c21] : memref<24xf32, #tpu.memory_space<smem>>
    %6 = vector.broadcast %5 : f32 to vector<2x4x128xf32>
    %c22 = arith.constant 22 : index
    %7 = memref.load %arg1[%c22] : memref<24xf32, #tpu.memory_space<smem>>
    %8 = vector.broadcast %7 : f32 to vector<2x4x128xf32>
    %c23 = arith.constant 23 : index
    %9 = memref.load %arg1[%c23] : memref<24xf32, #tpu.memory_space<smem>>
    %10 = vector.broadcast %9 : f32 to vector<2x4x128xf32>
    %c0 = arith.constant 0 : index
    %c0_1 = arith.constant 0 : index
    %c0_2 = arith.constant 0 : index
    %c0_3 = arith.constant 0 : index
    %11 = vector.load %arg2[%c0, %c0_1, %c0_2, %c0_3] : memref<5x2x4x128xf32, #tpu.memory_space<vmem>>, vector<1x2x4x128xf32>
    %12 = vector.shape_cast %11 : vector<1x2x4x128xf32> to vector<2x4x128xf32>
    %c0_4 = arith.constant 0 : index
    %13 = memref.load %arg1[%c0_4] : memref<24xf32, #tpu.memory_space<smem>>
    %14 = vector.broadcast %13 : f32 to vector<2x4x128xf32>
    %15 = arith.mulf %14, %12 : vector<2x4x128xf32>
    %16 = arith.addf %4, %15 : vector<2x4x128xf32>
    %c1 = arith.constant 1 : index
    %17 = memref.load %arg1[%c1] : memref<24xf32, #tpu.memory_space<smem>>
    %18 = vector.broadcast %17 : f32 to vector<2x4x128xf32>
    %19 = arith.mulf %18, %12 : vector<2x4x128xf32>
    %20 = arith.addf %6, %19 : vector<2x4x128xf32>
    %c2 = arith.constant 2 : index
    %21 = memref.load %arg1[%c2] : memref<24xf32, #tpu.memory_space<smem>>
    %22 = vector.broadcast %21 : f32 to vector<2x4x128xf32>
    %23 = arith.mulf %22, %12 : vector<2x4x128xf32>
    %24 = arith.addf %8, %23 : vector<2x4x128xf32>
    %c3 = arith.constant 3 : index
    %25 = memref.load %arg1[%c3] : memref<24xf32, #tpu.memory_space<smem>>
    %26 = vector.broadcast %25 : f32 to vector<2x4x128xf32>
    %27 = arith.mulf %26, %12 : vector<2x4x128xf32>
    %28 = arith.addf %10, %27 : vector<2x4x128xf32>
    %c1_5 = arith.constant 1 : index
    %c0_6 = arith.constant 0 : index
    %c0_7 = arith.constant 0 : index
    %c0_8 = arith.constant 0 : index
    %29 = vector.load %arg2[%c1_5, %c0_6, %c0_7, %c0_8] : memref<5x2x4x128xf32, #tpu.memory_space<vmem>>, vector<1x2x4x128xf32>
    %30 = vector.shape_cast %29 : vector<1x2x4x128xf32> to vector<2x4x128xf32>
    %c4 = arith.constant 4 : index
    %31 = memref.load %arg1[%c4] : memref<24xf32, #tpu.memory_space<smem>>
    %32 = vector.broadcast %31 : f32 to vector<2x4x128xf32>
    %33 = arith.mulf %32, %30 : vector<2x4x128xf32>
    %34 = arith.addf %16, %33 : vector<2x4x128xf32>
    %c5 = arith.constant 5 : index
    %35 = memref.load %arg1[%c5] : memref<24xf32, #tpu.memory_space<smem>>
    %36 = vector.broadcast %35 : f32 to vector<2x4x128xf32>
    %37 = arith.mulf %36, %30 : vector<2x4x128xf32>
    %38 = arith.addf %20, %37 : vector<2x4x128xf32>
    %c6 = arith.constant 6 : index
    %39 = memref.load %arg1[%c6] : memref<24xf32, #tpu.memory_space<smem>>
    %40 = vector.broadcast %39 : f32 to vector<2x4x128xf32>
    %41 = arith.mulf %40, %30 : vector<2x4x128xf32>
    %42 = arith.addf %24, %41 : vector<2x4x128xf32>
    %c7 = arith.constant 7 : index
    %43 = memref.load %arg1[%c7] : memref<24xf32, #tpu.memory_space<smem>>
    %44 = vector.broadcast %43 : f32 to vector<2x4x128xf32>
    %45 = arith.mulf %44, %30 : vector<2x4x128xf32>
    %46 = arith.addf %28, %45 : vector<2x4x128xf32>
    %c2_9 = arith.constant 2 : index
    %c0_10 = arith.constant 0 : index
    %c0_11 = arith.constant 0 : index
    %c0_12 = arith.constant 0 : index
    %47 = vector.load %arg2[%c2_9, %c0_10, %c0_11, %c0_12] : memref<5x2x4x128xf32, #tpu.memory_space<vmem>>, vector<1x2x4x128xf32>
    %48 = vector.shape_cast %47 : vector<1x2x4x128xf32> to vector<2x4x128xf32>
    %c8 = arith.constant 8 : index
    %49 = memref.load %arg1[%c8] : memref<24xf32, #tpu.memory_space<smem>>
    %50 = vector.broadcast %49 : f32 to vector<2x4x128xf32>
    %51 = arith.mulf %50, %48 : vector<2x4x128xf32>
    %52 = arith.addf %34, %51 : vector<2x4x128xf32>
    %c9 = arith.constant 9 : index
    %53 = memref.load %arg1[%c9] : memref<24xf32, #tpu.memory_space<smem>>
    %54 = vector.broadcast %53 : f32 to vector<2x4x128xf32>
    %55 = arith.mulf %54, %48 : vector<2x4x128xf32>
    %56 = arith.addf %38, %55 : vector<2x4x128xf32>
    %c10 = arith.constant 10 : index
    %57 = memref.load %arg1[%c10] : memref<24xf32, #tpu.memory_space<smem>>
    %58 = vector.broadcast %57 : f32 to vector<2x4x128xf32>
    %59 = arith.mulf %58, %48 : vector<2x4x128xf32>
    %60 = arith.addf %42, %59 : vector<2x4x128xf32>
    %c11 = arith.constant 11 : index
    %61 = memref.load %arg1[%c11] : memref<24xf32, #tpu.memory_space<smem>>
    %62 = vector.broadcast %61 : f32 to vector<2x4x128xf32>
    %63 = arith.mulf %62, %48 : vector<2x4x128xf32>
    %64 = arith.addf %46, %63 : vector<2x4x128xf32>
    %c3_13 = arith.constant 3 : index
    %c0_14 = arith.constant 0 : index
    %c0_15 = arith.constant 0 : index
    %c0_16 = arith.constant 0 : index
    %65 = vector.load %arg2[%c3_13, %c0_14, %c0_15, %c0_16] : memref<5x2x4x128xf32, #tpu.memory_space<vmem>>, vector<1x2x4x128xf32>
    %66 = vector.shape_cast %65 : vector<1x2x4x128xf32> to vector<2x4x128xf32>
    %c12 = arith.constant 12 : index
    %67 = memref.load %arg1[%c12] : memref<24xf32, #tpu.memory_space<smem>>
    %68 = vector.broadcast %67 : f32 to vector<2x4x128xf32>
    %69 = arith.mulf %68, %66 : vector<2x4x128xf32>
    %70 = arith.addf %52, %69 : vector<2x4x128xf32>
    %c13 = arith.constant 13 : index
    %71 = memref.load %arg1[%c13] : memref<24xf32, #tpu.memory_space<smem>>
    %72 = vector.broadcast %71 : f32 to vector<2x4x128xf32>
    %73 = arith.mulf %72, %66 : vector<2x4x128xf32>
    %74 = arith.addf %56, %73 : vector<2x4x128xf32>
    %c14 = arith.constant 14 : index
    %75 = memref.load %arg1[%c14] : memref<24xf32, #tpu.memory_space<smem>>
    %76 = vector.broadcast %75 : f32 to vector<2x4x128xf32>
    %77 = arith.mulf %76, %66 : vector<2x4x128xf32>
    %78 = arith.addf %60, %77 : vector<2x4x128xf32>
    %c15 = arith.constant 15 : index
    %79 = memref.load %arg1[%c15] : memref<24xf32, #tpu.memory_space<smem>>
    %80 = vector.broadcast %79 : f32 to vector<2x4x128xf32>
    %81 = arith.mulf %80, %66 : vector<2x4x128xf32>
    %82 = arith.addf %64, %81 : vector<2x4x128xf32>
    %c4_17 = arith.constant 4 : index
    %c0_18 = arith.constant 0 : index
    %c0_19 = arith.constant 0 : index
    %c0_20 = arith.constant 0 : index
    %83 = vector.load %arg2[%c4_17, %c0_18, %c0_19, %c0_20] : memref<5x2x4x128xf32, #tpu.memory_space<vmem>>, vector<1x2x4x128xf32>
    %84 = vector.shape_cast %83 : vector<1x2x4x128xf32> to vector<2x4x128xf32>
    %c16 = arith.constant 16 : index
    %85 = memref.load %arg1[%c16] : memref<24xf32, #tpu.memory_space<smem>>
    %86 = vector.broadcast %85 : f32 to vector<2x4x128xf32>
    %87 = arith.mulf %86, %84 : vector<2x4x128xf32>
    %88 = arith.addf %70, %87 : vector<2x4x128xf32>
    %c17 = arith.constant 17 : index
    %89 = memref.load %arg1[%c17] : memref<24xf32, #tpu.memory_space<smem>>
    %90 = vector.broadcast %89 : f32 to vector<2x4x128xf32>
    %91 = arith.mulf %90, %84 : vector<2x4x128xf32>
    %92 = arith.addf %74, %91 : vector<2x4x128xf32>
    %c18 = arith.constant 18 : index
    %93 = memref.load %arg1[%c18] : memref<24xf32, #tpu.memory_space<smem>>
    %94 = vector.broadcast %93 : f32 to vector<2x4x128xf32>
    %95 = arith.mulf %94, %84 : vector<2x4x128xf32>
    %96 = arith.addf %78, %95 : vector<2x4x128xf32>
    %c19 = arith.constant 19 : index
    %97 = memref.load %arg1[%c19] : memref<24xf32, #tpu.memory_space<smem>>
    %98 = vector.broadcast %97 : f32 to vector<2x4x128xf32>
    %99 = arith.mulf %98, %84 : vector<2x4x128xf32>
    %100 = arith.addf %82, %99 : vector<2x4x128xf32>
    %cst = arith.constant 0.000000e+00 : f32
    %101 = vector.broadcast %cst : f32 to vector<2x4x128xf32>
    %102 = arith.cmpf oge, %88, %101 : vector<2x4x128xf32>
    %cst_21 = arith.constant 1.000000e-01 : f32
    %103 = vector.broadcast %cst_21 : f32 to vector<2x4x128xf32>
    %104 = arith.mulf %103, %88 : vector<2x4x128xf32>
    %105 = arith.select %102, %88, %104 : vector<2x4x128xi1>, vector<2x4x128xf32>
    %c0_22 = arith.constant 0 : index
    %c0_23 = arith.constant 0 : index
    %c0_24 = arith.constant 0 : index
    %c0_25 = arith.constant 0 : index
    %106 = vector.load %arg3[%c0_22, %c0_23, %c0_24, %c0_25] : memref<4x2x4x128xf32, #tpu.memory_space<vmem>>, vector<1x2x4x128xf32>
    %107 = vector.shape_cast %106 : vector<1x2x4x128xf32> to vector<2x4x128xf32>
    %108 = vector.shape_cast %105 : vector<2x4x128xf32> to vector<1x2x4x128xf32>
    tpu.vector_store %arg3[%c0_22, %c0_23, %c0_24, %c0_25], %108 {strides = array<i32>} : memref<4x2x4x128xf32, #tpu.memory_space<vmem>>, vector<1x2x4x128xf32>,
    %109 = vector.extract_strided_slice %105 {offsets = [0, 0, 0], sizes = [1, 4, 128], strides = [1, 1, 1]} : vector<2x4x128xf32> to vector<1x4x128xf32>
    %110 = vector.shape_cast %109 : vector<1x4x128xf32> to vector<4x128xf32>
    %111 = vector.extract_strided_slice %105 {offsets = [1, 0, 0], sizes = [1, 4, 128], strides = [1, 1, 1]} : vector<2x4x128xf32> to vector<1x4x128xf32>
    %112 = vector.shape_cast %111 : vector<1x4x128xf32> to vector<4x128xf32>
    %113 = arith.subf %110, %112 : vector<4x128xf32>
    %114 = math.absf %113 : vector<4x128xf32>
    %115 = vector.shape_cast %114 : vector<4x128xf32> to vector<1x4x128xf32>
    %cst_26 = arith.constant dense<0.000000e+00> : vector<1xf32>
    %116 = vector.multi_reduction <add>, %115, %cst_26 [1, 2] : vector<1x4x128xf32> to vector<1xf32>
    %117 = vector.shape_cast %116 : vector<1xf32> to vector<1x1x1xf32>
    %118 = vector.extract %117[0, 0, 0] : f32 from vector<1x1x1xf32>
    %cst_27 = arith.constant 0.000000e+00 : f32
    %119 = arith.addf %cst_27, %118 : f32
    %cst_28 = arith.constant 0.000000e+00 : f32
    %120 = vector.broadcast %cst_28 : f32 to vector<2x4x128xf32>
    %121 = arith.cmpf oge, %92, %120 : vector<2x4x128xf32>
    %cst_29 = arith.constant 1.000000e-01 : f32
    %122 = vector.broadcast %cst_29 : f32 to vector<2x4x128xf32>
    %123 = arith.mulf %122, %92 : vector<2x4x128xf32>
    %124 = arith.select %121, %92, %123 : vector<2x4x128xi1>, vector<2x4x128xf32>
    %c1_30 = arith.constant 1 : index
    %c0_31 = arith.constant 0 : index
    %c0_32 = arith.constant 0 : index
    %c0_33 = arith.constant 0 : index
    %125 = vector.load %arg3[%c1_30, %c0_31, %c0_32, %c0_33] : memref<4x2x4x128xf32, #tpu.memory_space<vmem>>, vector<1x2x4x128xf32>
    %126 = vector.shape_cast %125 : vector<1x2x4x128xf32> to vector<2x4x128xf32>
    %127 = vector.shape_cast %124 : vector<2x4x128xf32> to vector<1x2x4x128xf32>
    tpu.vector_store %arg3[%c1_30, %c0_31, %c0_32, %c0_33], %127 {strides = array<i32>} : memref<4x2x4x128xf32, #tpu.memory_space<vmem>>, vector<1x2x4x128xf32>,
    %128 = vector.extract_strided_slice %124 {offsets = [0, 0, 0], sizes = [1, 4, 128], strides = [1, 1, 1]} : vector<2x4x128xf32> to vector<1x4x128xf32>
    %129 = vector.shape_cast %128 : vector<1x4x128xf32> to vector<4x128xf32>
    %130 = vector.extract_strided_slice %124 {offsets = [1, 0, 0], sizes = [1, 4, 128], strides = [1, 1, 1]} : vector<2x4x128xf32> to vector<1x4x128xf32>
    %131 = vector.shape_cast %130 : vector<1x4x128xf32> to vector<4x128xf32>
    %132 = arith.subf %129, %131 : vector<4x128xf32>
    %133 = math.absf %132 : vector<4x128xf32>
    %134 = vector.shape_cast %133 : vector<4x128xf32> to vector<1x4x128xf32>
    %cst_34 = arith.constant dense<0.000000e+00> : vector<1xf32>
    %135 = vector.multi_reduction <add>, %134, %cst_34 [1, 2] : vector<1x4x128xf32> to vector<1xf32>
    %136 = vector.shape_cast %135 : vector<1xf32> to vector<1x1x1xf32>
    %137 = vector.extract %136[0, 0, 0] : f32 from vector<1x1x1xf32>
    %138 = arith.addf %119, %137 : f32
    %cst_35 = arith.constant 0.000000e+00 : f32
    %139 = vector.broadcast %cst_35 : f32 to vector<2x4x128xf32>
    %140 = arith.cmpf oge, %96, %139 : vector<2x4x128xf32>
    %cst_36 = arith.constant 1.000000e-01 : f32
    %141 = vector.broadcast %cst_36 : f32 to vector<2x4x128xf32>
    %142 = arith.mulf %141, %96 : vector<2x4x128xf32>
    %143 = arith.select %140, %96, %142 : vector<2x4x128xi1>, vector<2x4x128xf32>
    %c2_37 = arith.constant 2 : index
    %c0_38 = arith.constant 0 : index
    %c0_39 = arith.constant 0 : index
    %c0_40 = arith.constant 0 : index
    %144 = vector.load %arg3[%c2_37, %c0_38, %c0_39, %c0_40] : memref<4x2x4x128xf32, #tpu.memory_space<vmem>>, vector<1x2x4x128xf32>
    %145 = vector.shape_cast %144 : vector<1x2x4x128xf32> to vector<2x4x128xf32>
    %146 = vector.shape_cast %143 : vector<2x4x128xf32> to vector<1x2x4x128xf32>
    tpu.vector_store %arg3[%c2_37, %c0_38, %c0_39, %c0_40], %146 {strides = array<i32>} : memref<4x2x4x128xf32, #tpu.memory_space<vmem>>, vector<1x2x4x128xf32>,
    %147 = vector.extract_strided_slice %143 {offsets = [0, 0, 0], sizes = [1, 4, 128], strides = [1, 1, 1]} : vector<2x4x128xf32> to vector<1x4x128xf32>
    %148 = vector.shape_cast %147 : vector<1x4x128xf32> to vector<4x128xf32>
    %149 = vector.extract_strided_slice %143 {offsets = [1, 0, 0], sizes = [1, 4, 128], strides = [1, 1, 1]} : vector<2x4x128xf32> to vector<1x4x128xf32>
    %150 = vector.shape_cast %149 : vector<1x4x128xf32> to vector<4x128xf32>
    %151 = arith.subf %148, %150 : vector<4x128xf32>
    %152 = math.absf %151 : vector<4x128xf32>
    %153 = vector.shape_cast %152 : vector<4x128xf32> to vector<1x4x128xf32>
    %cst_41 = arith.constant dense<0.000000e+00> : vector<1xf32>
    %154 = vector.multi_reduction <add>, %153, %cst_41 [1, 2] : vector<1x4x128xf32> to vector<1xf32>
    %155 = vector.shape_cast %154 : vector<1xf32> to vector<1x1x1xf32>
    %156 = vector.extract %155[0, 0, 0] : f32 from vector<1x1x1xf32>
    %157 = arith.addf %138, %156 : f32
    %cst_42 = arith.constant 0.000000e+00 : f32
    %158 = vector.broadcast %cst_42 : f32 to vector<2x4x128xf32>
    %159 = arith.cmpf oge, %100, %158 : vector<2x4x128xf32>
    %cst_43 = arith.constant 1.000000e-01 : f32
    %160 = vector.broadcast %cst_43 : f32 to vector<2x4x128xf32>
    %161 = arith.mulf %160, %100 : vector<2x4x128xf32>
    %162 = arith.select %159, %100, %161 : vector<2x4x128xi1>, vector<2x4x128xf32>
    %c3_44 = arith.constant 3 : index
    %c0_45 = arith.constant 0 : index
    %c0_46 = arith.constant 0 : index
    %c0_47 = arith.constant 0 : index
    %163 = vector.load %arg3[%c3_44, %c0_45, %c0_46, %c0_47] : memref<4x2x4x128xf32, #tpu.memory_space<vmem>>, vector<1x2x4x128xf32>
    %164 = vector.shape_cast %163 : vector<1x2x4x128xf32> to vector<2x4x128xf32>
    %165 = vector.shape_cast %162 : vector<2x4x128xf32> to vector<1x2x4x128xf32>
    tpu.vector_store %arg3[%c3_44, %c0_45, %c0_46, %c0_47], %165 {strides = array<i32>} : memref<4x2x4x128xf32, #tpu.memory_space<vmem>>, vector<1x2x4x128xf32>,
    %166 = vector.extract_strided_slice %162 {offsets = [0, 0, 0], sizes = [1, 4, 128], strides = [1, 1, 1]} : vector<2x4x128xf32> to vector<1x4x128xf32>
    %167 = vector.shape_cast %166 : vector<1x4x128xf32> to vector<4x128xf32>
    %168 = vector.extract_strided_slice %162 {offsets = [1, 0, 0], sizes = [1, 4, 128], strides = [1, 1, 1]} : vector<2x4x128xf32> to vector<1x4x128xf32>
    %169 = vector.shape_cast %168 : vector<1x4x128xf32> to vector<4x128xf32>
    %170 = arith.subf %167, %169 : vector<4x128xf32>
    %171 = math.absf %170 : vector<4x128xf32>
    %172 = vector.shape_cast %171 : vector<4x128xf32> to vector<1x4x128xf32>
    %cst_48 = arith.constant dense<0.000000e+00> : vector<1xf32>
    %173 = vector.multi_reduction <add>, %172, %cst_48 [1, 2] : vector<1x4x128xf32> to vector<1xf32>
    %174 = vector.shape_cast %173 : vector<1xf32> to vector<1x1x1xf32>
    %175 = vector.extract %174[0, 0, 0] : f32 from vector<1x1x1xf32>
    %176 = arith.addf %157, %175 : f32
    %c0_49 = arith.constant 0 : index
    %c0_50 = arith.constant 0 : index
    %177 = vector.load %arg4[%c0_49, %c0_50] : memref<1x1xf32, #tpu.memory_space<vmem>>, vector<1x1xf32>
    %178 = vector.broadcast %176 : f32 to vector<1x1xf32>
    %179 = arith.addf %177, %178 : vector<1x1xf32>
    %c0_51 = arith.constant 0 : index
    %c0_52 = arith.constant 0 : index
    %180 = vector.load %arg4[%c0_51, %c0_52] : memref<1x1xf32, #tpu.memory_space<vmem>>, vector<1x1xf32>
    tpu.vector_store %arg4[%c0_51, %c0_52], %179 {strides = array<i32>} : memref<1x1xf32, #tpu.memory_space<vmem>>, vector<1x1xf32>,
    return
  }
  func.func @transform_0(%arg0: i32) -> i32 {
    %c0_i32 = arith.constant 0 : i32
    %c0_i32_0 = arith.constant 0 : i32
    return %c0_i32 : i32
  }
  func.func @transform_1(%arg0: i32) -> (i32, i32, i32, i32) {
    %c0_i32 = arith.constant 0 : i32
    %c0_i32_0 = arith.constant 0 : i32
    %c0_i32_1 = arith.constant 0 : i32
    %c0_i32_2 = arith.constant 0 : i32
    return %c0_i32, %c0_i32_0, %c0_i32_1, %arg0 : i32, i32, i32, i32
  }
  func.func @transform_2(%arg0: i32) -> (i32, i32, i32, i32) {
    %c0_i32 = arith.constant 0 : i32
    %c0_i32_0 = arith.constant 0 : i32
    %c0_i32_1 = arith.constant 0 : i32
    %c0_i32_2 = arith.constant 0 : i32
    return %c0_i32, %c0_i32_0, %c0_i32_1, %arg0 : i32, i32, i32, i32
  }
  func.func @transform_3(%arg0: i32) -> (i32, i32) {
    %c0_i32 = arith.constant 0 : i32
    %c0_i32_0 = arith.constant 0 : i32
    %c0_i32_1 = arith.constant 0 : i32
    return %c0_i32, %c0_i32_0 : i32, i32
  }
}

module attributes {stable_mosaic.version = 11 : i64} {
  func.func @_conv_pair_kernel(%arg0: i32, %arg1: memref<24xf32, #tpu.memory_space<smem>>, %arg2: memref<5x2x2x128xf32, #tpu.memory_space<vmem>>, %arg3: memref<4x2x2x128xf32, #tpu.memory_space<vmem>>, %arg4: memref<1x1xf32, #tpu.memory_space<vmem>>) attributes {dimension_semantics = [#tpu.dimension_semantics<arbitrary>], iteration_bounds = array<i64: 1>, scalar_prefetch = 0 : i64, scratch_operands = 0 : i64, tpu.core_type = #tpu.core_type<tc>, window_params = [{transform_indices = @transform_0, window_bounds = array<i64: 24>}, {transform_indices = @transform_1, window_bounds = array<i64: 5, 2, 2, 128>}, {transform_indices = @transform_2, window_bounds = array<i64: 4, 2, 2, 128>}, {pipeline_mode = #tpu.pipeline_mode<synchronous>, transform_indices = @transform_3, window_bounds = array<i64: 1, 1>}]} {
    %c0_i32 = arith.constant 0 : i32
    %0 = arith.cmpi eq, %arg0, %c0_i32 : i32
    %1 = arith.extui %0 : i1 to i32
    %c0_i32_0 = arith.constant 0 : i32
    %2 = arith.cmpi ne, %1, %c0_i32_0 : i32
    scf.if %2 {
      %cst_53 = arith.constant 0.000000e+00 : f32
      %181 = vector.broadcast %cst_53 : f32 to vector<1x1xf32>
      %c0_54 = arith.constant 0 : index
      %c0_55 = arith.constant 0 : index
      %182 = vector.load %arg4[%c0_54, %c0_55] : memref<1x1xf32, #tpu.memory_space<vmem>>, vector<1x1xf32>
      tpu.vector_store %arg4[%c0_54, %c0_55], %181 {strides = array<i32>} : memref<1x1xf32, #tpu.memory_space<vmem>>, vector<1x1xf32>,
    } else {
    }
    %c20 = arith.constant 20 : index
    %3 = memref.load %arg1[%c20] : memref<24xf32, #tpu.memory_space<smem>>
    %4 = vector.broadcast %3 : f32 to vector<2x2x128xf32>
    %c21 = arith.constant 21 : index
    %5 = memref.load %arg1[%c21] : memref<24xf32, #tpu.memory_space<smem>>
    %6 = vector.broadcast %5 : f32 to vector<2x2x128xf32>
    %c22 = arith.constant 22 : index
    %7 = memref.load %arg1[%c22] : memref<24xf32, #tpu.memory_space<smem>>
    %8 = vector.broadcast %7 : f32 to vector<2x2x128xf32>
    %c23 = arith.constant 23 : index
    %9 = memref.load %arg1[%c23] : memref<24xf32, #tpu.memory_space<smem>>
    %10 = vector.broadcast %9 : f32 to vector<2x2x128xf32>
    %c0 = arith.constant 0 : index
    %c0_1 = arith.constant 0 : index
    %c0_2 = arith.constant 0 : index
    %c0_3 = arith.constant 0 : index
    %11 = vector.load %arg2[%c0, %c0_1, %c0_2, %c0_3] : memref<5x2x2x128xf32, #tpu.memory_space<vmem>>, vector<1x2x2x128xf32>
    %12 = vector.shape_cast %11 : vector<1x2x2x128xf32> to vector<2x2x128xf32>
    %c0_4 = arith.constant 0 : index
    %13 = memref.load %arg1[%c0_4] : memref<24xf32, #tpu.memory_space<smem>>
    %14 = vector.broadcast %13 : f32 to vector<2x2x128xf32>
    %15 = arith.mulf %14, %12 : vector<2x2x128xf32>
    %16 = arith.addf %4, %15 : vector<2x2x128xf32>
    %c1 = arith.constant 1 : index
    %17 = memref.load %arg1[%c1] : memref<24xf32, #tpu.memory_space<smem>>
    %18 = vector.broadcast %17 : f32 to vector<2x2x128xf32>
    %19 = arith.mulf %18, %12 : vector<2x2x128xf32>
    %20 = arith.addf %6, %19 : vector<2x2x128xf32>
    %c2 = arith.constant 2 : index
    %21 = memref.load %arg1[%c2] : memref<24xf32, #tpu.memory_space<smem>>
    %22 = vector.broadcast %21 : f32 to vector<2x2x128xf32>
    %23 = arith.mulf %22, %12 : vector<2x2x128xf32>
    %24 = arith.addf %8, %23 : vector<2x2x128xf32>
    %c3 = arith.constant 3 : index
    %25 = memref.load %arg1[%c3] : memref<24xf32, #tpu.memory_space<smem>>
    %26 = vector.broadcast %25 : f32 to vector<2x2x128xf32>
    %27 = arith.mulf %26, %12 : vector<2x2x128xf32>
    %28 = arith.addf %10, %27 : vector<2x2x128xf32>
    %c1_5 = arith.constant 1 : index
    %c0_6 = arith.constant 0 : index
    %c0_7 = arith.constant 0 : index
    %c0_8 = arith.constant 0 : index
    %29 = vector.load %arg2[%c1_5, %c0_6, %c0_7, %c0_8] : memref<5x2x2x128xf32, #tpu.memory_space<vmem>>, vector<1x2x2x128xf32>
    %30 = vector.shape_cast %29 : vector<1x2x2x128xf32> to vector<2x2x128xf32>
    %c4 = arith.constant 4 : index
    %31 = memref.load %arg1[%c4] : memref<24xf32, #tpu.memory_space<smem>>
    %32 = vector.broadcast %31 : f32 to vector<2x2x128xf32>
    %33 = arith.mulf %32, %30 : vector<2x2x128xf32>
    %34 = arith.addf %16, %33 : vector<2x2x128xf32>
    %c5 = arith.constant 5 : index
    %35 = memref.load %arg1[%c5] : memref<24xf32, #tpu.memory_space<smem>>
    %36 = vector.broadcast %35 : f32 to vector<2x2x128xf32>
    %37 = arith.mulf %36, %30 : vector<2x2x128xf32>
    %38 = arith.addf %20, %37 : vector<2x2x128xf32>
    %c6 = arith.constant 6 : index
    %39 = memref.load %arg1[%c6] : memref<24xf32, #tpu.memory_space<smem>>
    %40 = vector.broadcast %39 : f32 to vector<2x2x128xf32>
    %41 = arith.mulf %40, %30 : vector<2x2x128xf32>
    %42 = arith.addf %24, %41 : vector<2x2x128xf32>
    %c7 = arith.constant 7 : index
    %43 = memref.load %arg1[%c7] : memref<24xf32, #tpu.memory_space<smem>>
    %44 = vector.broadcast %43 : f32 to vector<2x2x128xf32>
    %45 = arith.mulf %44, %30 : vector<2x2x128xf32>
    %46 = arith.addf %28, %45 : vector<2x2x128xf32>
    %c2_9 = arith.constant 2 : index
    %c0_10 = arith.constant 0 : index
    %c0_11 = arith.constant 0 : index
    %c0_12 = arith.constant 0 : index
    %47 = vector.load %arg2[%c2_9, %c0_10, %c0_11, %c0_12] : memref<5x2x2x128xf32, #tpu.memory_space<vmem>>, vector<1x2x2x128xf32>
    %48 = vector.shape_cast %47 : vector<1x2x2x128xf32> to vector<2x2x128xf32>
    %c8 = arith.constant 8 : index
    %49 = memref.load %arg1[%c8] : memref<24xf32, #tpu.memory_space<smem>>
    %50 = vector.broadcast %49 : f32 to vector<2x2x128xf32>
    %51 = arith.mulf %50, %48 : vector<2x2x128xf32>
    %52 = arith.addf %34, %51 : vector<2x2x128xf32>
    %c9 = arith.constant 9 : index
    %53 = memref.load %arg1[%c9] : memref<24xf32, #tpu.memory_space<smem>>
    %54 = vector.broadcast %53 : f32 to vector<2x2x128xf32>
    %55 = arith.mulf %54, %48 : vector<2x2x128xf32>
    %56 = arith.addf %38, %55 : vector<2x2x128xf32>
    %c10 = arith.constant 10 : index
    %57 = memref.load %arg1[%c10] : memref<24xf32, #tpu.memory_space<smem>>
    %58 = vector.broadcast %57 : f32 to vector<2x2x128xf32>
    %59 = arith.mulf %58, %48 : vector<2x2x128xf32>
    %60 = arith.addf %42, %59 : vector<2x2x128xf32>
    %c11 = arith.constant 11 : index
    %61 = memref.load %arg1[%c11] : memref<24xf32, #tpu.memory_space<smem>>
    %62 = vector.broadcast %61 : f32 to vector<2x2x128xf32>
    %63 = arith.mulf %62, %48 : vector<2x2x128xf32>
    %64 = arith.addf %46, %63 : vector<2x2x128xf32>
    %c3_13 = arith.constant 3 : index
    %c0_14 = arith.constant 0 : index
    %c0_15 = arith.constant 0 : index
    %c0_16 = arith.constant 0 : index
    %65 = vector.load %arg2[%c3_13, %c0_14, %c0_15, %c0_16] : memref<5x2x2x128xf32, #tpu.memory_space<vmem>>, vector<1x2x2x128xf32>
    %66 = vector.shape_cast %65 : vector<1x2x2x128xf32> to vector<2x2x128xf32>
    %c12 = arith.constant 12 : index
    %67 = memref.load %arg1[%c12] : memref<24xf32, #tpu.memory_space<smem>>
    %68 = vector.broadcast %67 : f32 to vector<2x2x128xf32>
    %69 = arith.mulf %68, %66 : vector<2x2x128xf32>
    %70 = arith.addf %52, %69 : vector<2x2x128xf32>
    %c13 = arith.constant 13 : index
    %71 = memref.load %arg1[%c13] : memref<24xf32, #tpu.memory_space<smem>>
    %72 = vector.broadcast %71 : f32 to vector<2x2x128xf32>
    %73 = arith.mulf %72, %66 : vector<2x2x128xf32>
    %74 = arith.addf %56, %73 : vector<2x2x128xf32>
    %c14 = arith.constant 14 : index
    %75 = memref.load %arg1[%c14] : memref<24xf32, #tpu.memory_space<smem>>
    %76 = vector.broadcast %75 : f32 to vector<2x2x128xf32>
    %77 = arith.mulf %76, %66 : vector<2x2x128xf32>
    %78 = arith.addf %60, %77 : vector<2x2x128xf32>
    %c15 = arith.constant 15 : index
    %79 = memref.load %arg1[%c15] : memref<24xf32, #tpu.memory_space<smem>>
    %80 = vector.broadcast %79 : f32 to vector<2x2x128xf32>
    %81 = arith.mulf %80, %66 : vector<2x2x128xf32>
    %82 = arith.addf %64, %81 : vector<2x2x128xf32>
    %c4_17 = arith.constant 4 : index
    %c0_18 = arith.constant 0 : index
    %c0_19 = arith.constant 0 : index
    %c0_20 = arith.constant 0 : index
    %83 = vector.load %arg2[%c4_17, %c0_18, %c0_19, %c0_20] : memref<5x2x2x128xf32, #tpu.memory_space<vmem>>, vector<1x2x2x128xf32>
    %84 = vector.shape_cast %83 : vector<1x2x2x128xf32> to vector<2x2x128xf32>
    %c16 = arith.constant 16 : index
    %85 = memref.load %arg1[%c16] : memref<24xf32, #tpu.memory_space<smem>>
    %86 = vector.broadcast %85 : f32 to vector<2x2x128xf32>
    %87 = arith.mulf %86, %84 : vector<2x2x128xf32>
    %88 = arith.addf %70, %87 : vector<2x2x128xf32>
    %c17 = arith.constant 17 : index
    %89 = memref.load %arg1[%c17] : memref<24xf32, #tpu.memory_space<smem>>
    %90 = vector.broadcast %89 : f32 to vector<2x2x128xf32>
    %91 = arith.mulf %90, %84 : vector<2x2x128xf32>
    %92 = arith.addf %74, %91 : vector<2x2x128xf32>
    %c18 = arith.constant 18 : index
    %93 = memref.load %arg1[%c18] : memref<24xf32, #tpu.memory_space<smem>>
    %94 = vector.broadcast %93 : f32 to vector<2x2x128xf32>
    %95 = arith.mulf %94, %84 : vector<2x2x128xf32>
    %96 = arith.addf %78, %95 : vector<2x2x128xf32>
    %c19 = arith.constant 19 : index
    %97 = memref.load %arg1[%c19] : memref<24xf32, #tpu.memory_space<smem>>
    %98 = vector.broadcast %97 : f32 to vector<2x2x128xf32>
    %99 = arith.mulf %98, %84 : vector<2x2x128xf32>
    %100 = arith.addf %82, %99 : vector<2x2x128xf32>
    %cst = arith.constant 0.000000e+00 : f32
    %101 = vector.broadcast %cst : f32 to vector<2x2x128xf32>
    %102 = arith.cmpf oge, %88, %101 : vector<2x2x128xf32>
    %cst_21 = arith.constant 1.000000e-01 : f32
    %103 = vector.broadcast %cst_21 : f32 to vector<2x2x128xf32>
    %104 = arith.mulf %103, %88 : vector<2x2x128xf32>
    %105 = arith.select %102, %88, %104 : vector<2x2x128xi1>, vector<2x2x128xf32>
    %c0_22 = arith.constant 0 : index
    %c0_23 = arith.constant 0 : index
    %c0_24 = arith.constant 0 : index
    %c0_25 = arith.constant 0 : index
    %106 = vector.load %arg3[%c0_22, %c0_23, %c0_24, %c0_25] : memref<4x2x2x128xf32, #tpu.memory_space<vmem>>, vector<1x2x2x128xf32>
    %107 = vector.shape_cast %106 : vector<1x2x2x128xf32> to vector<2x2x128xf32>
    %108 = vector.shape_cast %105 : vector<2x2x128xf32> to vector<1x2x2x128xf32>
    tpu.vector_store %arg3[%c0_22, %c0_23, %c0_24, %c0_25], %108 {strides = array<i32>} : memref<4x2x2x128xf32, #tpu.memory_space<vmem>>, vector<1x2x2x128xf32>,
    %109 = vector.extract_strided_slice %105 {offsets = [0, 0, 0], sizes = [1, 2, 128], strides = [1, 1, 1]} : vector<2x2x128xf32> to vector<1x2x128xf32>
    %110 = vector.shape_cast %109 : vector<1x2x128xf32> to vector<2x128xf32>
    %111 = vector.extract_strided_slice %105 {offsets = [1, 0, 0], sizes = [1, 2, 128], strides = [1, 1, 1]} : vector<2x2x128xf32> to vector<1x2x128xf32>
    %112 = vector.shape_cast %111 : vector<1x2x128xf32> to vector<2x128xf32>
    %113 = arith.subf %110, %112 : vector<2x128xf32>
    %114 = math.absf %113 : vector<2x128xf32>
    %115 = vector.shape_cast %114 : vector<2x128xf32> to vector<1x2x128xf32>
    %cst_26 = arith.constant dense<0.000000e+00> : vector<1xf32>
    %116 = vector.multi_reduction <add>, %115, %cst_26 [1, 2] : vector<1x2x128xf32> to vector<1xf32>
    %117 = vector.shape_cast %116 : vector<1xf32> to vector<1x1x1xf32>
    %118 = vector.extract %117[0, 0, 0] : f32 from vector<1x1x1xf32>
    %cst_27 = arith.constant 0.000000e+00 : f32
    %119 = arith.addf %cst_27, %118 : f32
    %cst_28 = arith.constant 0.000000e+00 : f32
    %120 = vector.broadcast %cst_28 : f32 to vector<2x2x128xf32>
    %121 = arith.cmpf oge, %92, %120 : vector<2x2x128xf32>
    %cst_29 = arith.constant 1.000000e-01 : f32
    %122 = vector.broadcast %cst_29 : f32 to vector<2x2x128xf32>
    %123 = arith.mulf %122, %92 : vector<2x2x128xf32>
    %124 = arith.select %121, %92, %123 : vector<2x2x128xi1>, vector<2x2x128xf32>
    %c1_30 = arith.constant 1 : index
    %c0_31 = arith.constant 0 : index
    %c0_32 = arith.constant 0 : index
    %c0_33 = arith.constant 0 : index
    %125 = vector.load %arg3[%c1_30, %c0_31, %c0_32, %c0_33] : memref<4x2x2x128xf32, #tpu.memory_space<vmem>>, vector<1x2x2x128xf32>
    %126 = vector.shape_cast %125 : vector<1x2x2x128xf32> to vector<2x2x128xf32>
    %127 = vector.shape_cast %124 : vector<2x2x128xf32> to vector<1x2x2x128xf32>
    tpu.vector_store %arg3[%c1_30, %c0_31, %c0_32, %c0_33], %127 {strides = array<i32>} : memref<4x2x2x128xf32, #tpu.memory_space<vmem>>, vector<1x2x2x128xf32>,
    %128 = vector.extract_strided_slice %124 {offsets = [0, 0, 0], sizes = [1, 2, 128], strides = [1, 1, 1]} : vector<2x2x128xf32> to vector<1x2x128xf32>
    %129 = vector.shape_cast %128 : vector<1x2x128xf32> to vector<2x128xf32>
    %130 = vector.extract_strided_slice %124 {offsets = [1, 0, 0], sizes = [1, 2, 128], strides = [1, 1, 1]} : vector<2x2x128xf32> to vector<1x2x128xf32>
    %131 = vector.shape_cast %130 : vector<1x2x128xf32> to vector<2x128xf32>
    %132 = arith.subf %129, %131 : vector<2x128xf32>
    %133 = math.absf %132 : vector<2x128xf32>
    %134 = vector.shape_cast %133 : vector<2x128xf32> to vector<1x2x128xf32>
    %cst_34 = arith.constant dense<0.000000e+00> : vector<1xf32>
    %135 = vector.multi_reduction <add>, %134, %cst_34 [1, 2] : vector<1x2x128xf32> to vector<1xf32>
    %136 = vector.shape_cast %135 : vector<1xf32> to vector<1x1x1xf32>
    %137 = vector.extract %136[0, 0, 0] : f32 from vector<1x1x1xf32>
    %138 = arith.addf %119, %137 : f32
    %cst_35 = arith.constant 0.000000e+00 : f32
    %139 = vector.broadcast %cst_35 : f32 to vector<2x2x128xf32>
    %140 = arith.cmpf oge, %96, %139 : vector<2x2x128xf32>
    %cst_36 = arith.constant 1.000000e-01 : f32
    %141 = vector.broadcast %cst_36 : f32 to vector<2x2x128xf32>
    %142 = arith.mulf %141, %96 : vector<2x2x128xf32>
    %143 = arith.select %140, %96, %142 : vector<2x2x128xi1>, vector<2x2x128xf32>
    %c2_37 = arith.constant 2 : index
    %c0_38 = arith.constant 0 : index
    %c0_39 = arith.constant 0 : index
    %c0_40 = arith.constant 0 : index
    %144 = vector.load %arg3[%c2_37, %c0_38, %c0_39, %c0_40] : memref<4x2x2x128xf32, #tpu.memory_space<vmem>>, vector<1x2x2x128xf32>
    %145 = vector.shape_cast %144 : vector<1x2x2x128xf32> to vector<2x2x128xf32>
    %146 = vector.shape_cast %143 : vector<2x2x128xf32> to vector<1x2x2x128xf32>
    tpu.vector_store %arg3[%c2_37, %c0_38, %c0_39, %c0_40], %146 {strides = array<i32>} : memref<4x2x2x128xf32, #tpu.memory_space<vmem>>, vector<1x2x2x128xf32>,
    %147 = vector.extract_strided_slice %143 {offsets = [0, 0, 0], sizes = [1, 2, 128], strides = [1, 1, 1]} : vector<2x2x128xf32> to vector<1x2x128xf32>
    %148 = vector.shape_cast %147 : vector<1x2x128xf32> to vector<2x128xf32>
    %149 = vector.extract_strided_slice %143 {offsets = [1, 0, 0], sizes = [1, 2, 128], strides = [1, 1, 1]} : vector<2x2x128xf32> to vector<1x2x128xf32>
    %150 = vector.shape_cast %149 : vector<1x2x128xf32> to vector<2x128xf32>
    %151 = arith.subf %148, %150 : vector<2x128xf32>
    %152 = math.absf %151 : vector<2x128xf32>
    %153 = vector.shape_cast %152 : vector<2x128xf32> to vector<1x2x128xf32>
    %cst_41 = arith.constant dense<0.000000e+00> : vector<1xf32>
    %154 = vector.multi_reduction <add>, %153, %cst_41 [1, 2] : vector<1x2x128xf32> to vector<1xf32>
    %155 = vector.shape_cast %154 : vector<1xf32> to vector<1x1x1xf32>
    %156 = vector.extract %155[0, 0, 0] : f32 from vector<1x1x1xf32>
    %157 = arith.addf %138, %156 : f32
    %cst_42 = arith.constant 0.000000e+00 : f32
    %158 = vector.broadcast %cst_42 : f32 to vector<2x2x128xf32>
    %159 = arith.cmpf oge, %100, %158 : vector<2x2x128xf32>
    %cst_43 = arith.constant 1.000000e-01 : f32
    %160 = vector.broadcast %cst_43 : f32 to vector<2x2x128xf32>
    %161 = arith.mulf %160, %100 : vector<2x2x128xf32>
    %162 = arith.select %159, %100, %161 : vector<2x2x128xi1>, vector<2x2x128xf32>
    %c3_44 = arith.constant 3 : index
    %c0_45 = arith.constant 0 : index
    %c0_46 = arith.constant 0 : index
    %c0_47 = arith.constant 0 : index
    %163 = vector.load %arg3[%c3_44, %c0_45, %c0_46, %c0_47] : memref<4x2x2x128xf32, #tpu.memory_space<vmem>>, vector<1x2x2x128xf32>
    %164 = vector.shape_cast %163 : vector<1x2x2x128xf32> to vector<2x2x128xf32>
    %165 = vector.shape_cast %162 : vector<2x2x128xf32> to vector<1x2x2x128xf32>
    tpu.vector_store %arg3[%c3_44, %c0_45, %c0_46, %c0_47], %165 {strides = array<i32>} : memref<4x2x2x128xf32, #tpu.memory_space<vmem>>, vector<1x2x2x128xf32>,
    %166 = vector.extract_strided_slice %162 {offsets = [0, 0, 0], sizes = [1, 2, 128], strides = [1, 1, 1]} : vector<2x2x128xf32> to vector<1x2x128xf32>
    %167 = vector.shape_cast %166 : vector<1x2x128xf32> to vector<2x128xf32>
    %168 = vector.extract_strided_slice %162 {offsets = [1, 0, 0], sizes = [1, 2, 128], strides = [1, 1, 1]} : vector<2x2x128xf32> to vector<1x2x128xf32>
    %169 = vector.shape_cast %168 : vector<1x2x128xf32> to vector<2x128xf32>
    %170 = arith.subf %167, %169 : vector<2x128xf32>
    %171 = math.absf %170 : vector<2x128xf32>
    %172 = vector.shape_cast %171 : vector<2x128xf32> to vector<1x2x128xf32>
    %cst_48 = arith.constant dense<0.000000e+00> : vector<1xf32>
    %173 = vector.multi_reduction <add>, %172, %cst_48 [1, 2] : vector<1x2x128xf32> to vector<1xf32>
    %174 = vector.shape_cast %173 : vector<1xf32> to vector<1x1x1xf32>
    %175 = vector.extract %174[0, 0, 0] : f32 from vector<1x1x1xf32>
    %176 = arith.addf %157, %175 : f32
    %c0_49 = arith.constant 0 : index
    %c0_50 = arith.constant 0 : index
    %177 = vector.load %arg4[%c0_49, %c0_50] : memref<1x1xf32, #tpu.memory_space<vmem>>, vector<1x1xf32>
    %178 = vector.broadcast %176 : f32 to vector<1x1xf32>
    %179 = arith.addf %177, %178 : vector<1x1xf32>
    %c0_51 = arith.constant 0 : index
    %c0_52 = arith.constant 0 : index
    %180 = vector.load %arg4[%c0_51, %c0_52] : memref<1x1xf32, #tpu.memory_space<vmem>>, vector<1x1xf32>
    tpu.vector_store %arg4[%c0_51, %c0_52], %179 {strides = array<i32>} : memref<1x1xf32, #tpu.memory_space<vmem>>, vector<1x1xf32>,
    return
  }
  func.func @transform_0(%arg0: i32) -> i32 {
    %c0_i32 = arith.constant 0 : i32
    %c0_i32_0 = arith.constant 0 : i32
    return %c0_i32 : i32
  }
  func.func @transform_1(%arg0: i32) -> (i32, i32, i32, i32) {
    %c0_i32 = arith.constant 0 : i32
    %c0_i32_0 = arith.constant 0 : i32
    %c0_i32_1 = arith.constant 0 : i32
    %c0_i32_2 = arith.constant 0 : i32
    return %c0_i32, %c0_i32_0, %c0_i32_1, %arg0 : i32, i32, i32, i32
  }
  func.func @transform_2(%arg0: i32) -> (i32, i32, i32, i32) {
    %c0_i32 = arith.constant 0 : i32
    %c0_i32_0 = arith.constant 0 : i32
    %c0_i32_1 = arith.constant 0 : i32
    %c0_i32_2 = arith.constant 0 : i32
    return %c0_i32, %c0_i32_0, %c0_i32_1, %arg0 : i32, i32, i32, i32
  }
  func.func @transform_3(%arg0: i32) -> (i32, i32) {
    %c0_i32 = arith.constant 0 : i32
    %c0_i32_0 = arith.constant 0 : i32
    %c0_i32_1 = arith.constant 0 : i32
    return %c0_i32, %c0_i32_0 : i32, i32
  }
}

module attributes {stable_mosaic.version = 11 : i64} {
  func.func @_conv_pair_kernel(%arg0: i32, %arg1: memref<84xf32, #tpu.memory_space<smem>>, %arg2: memref<20x2x2x128xf32, #tpu.memory_space<vmem>>, %arg3: memref<4x2x2x128xf32, #tpu.memory_space<vmem>>, %arg4: memref<1x1xf32, #tpu.memory_space<vmem>>) attributes {dimension_semantics = [#tpu.dimension_semantics<arbitrary>], iteration_bounds = array<i64: 1>, scalar_prefetch = 0 : i64, scratch_operands = 0 : i64, tpu.core_type = #tpu.core_type<tc>, window_params = [{transform_indices = @transform_0, window_bounds = array<i64: 84>}, {transform_indices = @transform_1, window_bounds = array<i64: 20, 2, 2, 128>}, {transform_indices = @transform_2, window_bounds = array<i64: 4, 2, 2, 128>}, {pipeline_mode = #tpu.pipeline_mode<synchronous>, transform_indices = @transform_3, window_bounds = array<i64: 1, 1>}]} {
    %c0_i32 = arith.constant 0 : i32
    %0 = arith.cmpi eq, %arg0, %c0_i32 : i32
    %1 = arith.extui %0 : i1 to i32
    %c0_i32_0 = arith.constant 0 : i32
    %2 = arith.cmpi ne, %1, %c0_i32_0 : i32
    scf.if %2 {
      %cst_113 = arith.constant 0.000000e+00 : f32
      %451 = vector.broadcast %cst_113 : f32 to vector<1x1xf32>
      %c0_114 = arith.constant 0 : index
      %c0_115 = arith.constant 0 : index
      %452 = vector.load %arg4[%c0_114, %c0_115] : memref<1x1xf32, #tpu.memory_space<vmem>>, vector<1x1xf32>
      tpu.vector_store %arg4[%c0_114, %c0_115], %451 {strides = array<i32>} : memref<1x1xf32, #tpu.memory_space<vmem>>, vector<1x1xf32>,
    } else {
    }
    %c80 = arith.constant 80 : index
    %3 = memref.load %arg1[%c80] : memref<84xf32, #tpu.memory_space<smem>>
    %4 = vector.broadcast %3 : f32 to vector<2x2x128xf32>
    %c81 = arith.constant 81 : index
    %5 = memref.load %arg1[%c81] : memref<84xf32, #tpu.memory_space<smem>>
    %6 = vector.broadcast %5 : f32 to vector<2x2x128xf32>
    %c82 = arith.constant 82 : index
    %7 = memref.load %arg1[%c82] : memref<84xf32, #tpu.memory_space<smem>>
    %8 = vector.broadcast %7 : f32 to vector<2x2x128xf32>
    %c83 = arith.constant 83 : index
    %9 = memref.load %arg1[%c83] : memref<84xf32, #tpu.memory_space<smem>>
    %10 = vector.broadcast %9 : f32 to vector<2x2x128xf32>
    %c0 = arith.constant 0 : index
    %c0_1 = arith.constant 0 : index
    %c0_2 = arith.constant 0 : index
    %c0_3 = arith.constant 0 : index
    %11 = vector.load %arg2[%c0, %c0_1, %c0_2, %c0_3] : memref<20x2x2x128xf32, #tpu.memory_space<vmem>>, vector<1x2x2x128xf32>
    %12 = vector.shape_cast %11 : vector<1x2x2x128xf32> to vector<2x2x128xf32>
    %c0_4 = arith.constant 0 : index
    %13 = memref.load %arg1[%c0_4] : memref<84xf32, #tpu.memory_space<smem>>
    %14 = vector.broadcast %13 : f32 to vector<2x2x128xf32>
    %15 = arith.mulf %14, %12 : vector<2x2x128xf32>
    %16 = arith.addf %4, %15 : vector<2x2x128xf32>
    %c1 = arith.constant 1 : index
    %17 = memref.load %arg1[%c1] : memref<84xf32, #tpu.memory_space<smem>>
    %18 = vector.broadcast %17 : f32 to vector<2x2x128xf32>
    %19 = arith.mulf %18, %12 : vector<2x2x128xf32>
    %20 = arith.addf %6, %19 : vector<2x2x128xf32>
    %c2 = arith.constant 2 : index
    %21 = memref.load %arg1[%c2] : memref<84xf32, #tpu.memory_space<smem>>
    %22 = vector.broadcast %21 : f32 to vector<2x2x128xf32>
    %23 = arith.mulf %22, %12 : vector<2x2x128xf32>
    %24 = arith.addf %8, %23 : vector<2x2x128xf32>
    %c3 = arith.constant 3 : index
    %25 = memref.load %arg1[%c3] : memref<84xf32, #tpu.memory_space<smem>>
    %26 = vector.broadcast %25 : f32 to vector<2x2x128xf32>
    %27 = arith.mulf %26, %12 : vector<2x2x128xf32>
    %28 = arith.addf %10, %27 : vector<2x2x128xf32>
    %c1_5 = arith.constant 1 : index
    %c0_6 = arith.constant 0 : index
    %c0_7 = arith.constant 0 : index
    %c0_8 = arith.constant 0 : index
    %29 = vector.load %arg2[%c1_5, %c0_6, %c0_7, %c0_8] : memref<20x2x2x128xf32, #tpu.memory_space<vmem>>, vector<1x2x2x128xf32>
    %30 = vector.shape_cast %29 : vector<1x2x2x128xf32> to vector<2x2x128xf32>
    %c4 = arith.constant 4 : index
    %31 = memref.load %arg1[%c4] : memref<84xf32, #tpu.memory_space<smem>>
    %32 = vector.broadcast %31 : f32 to vector<2x2x128xf32>
    %33 = arith.mulf %32, %30 : vector<2x2x128xf32>
    %34 = arith.addf %16, %33 : vector<2x2x128xf32>
    %c5 = arith.constant 5 : index
    %35 = memref.load %arg1[%c5] : memref<84xf32, #tpu.memory_space<smem>>
    %36 = vector.broadcast %35 : f32 to vector<2x2x128xf32>
    %37 = arith.mulf %36, %30 : vector<2x2x128xf32>
    %38 = arith.addf %20, %37 : vector<2x2x128xf32>
    %c6 = arith.constant 6 : index
    %39 = memref.load %arg1[%c6] : memref<84xf32, #tpu.memory_space<smem>>
    %40 = vector.broadcast %39 : f32 to vector<2x2x128xf32>
    %41 = arith.mulf %40, %30 : vector<2x2x128xf32>
    %42 = arith.addf %24, %41 : vector<2x2x128xf32>
    %c7 = arith.constant 7 : index
    %43 = memref.load %arg1[%c7] : memref<84xf32, #tpu.memory_space<smem>>
    %44 = vector.broadcast %43 : f32 to vector<2x2x128xf32>
    %45 = arith.mulf %44, %30 : vector<2x2x128xf32>
    %46 = arith.addf %28, %45 : vector<2x2x128xf32>
    %c2_9 = arith.constant 2 : index
    %c0_10 = arith.constant 0 : index
    %c0_11 = arith.constant 0 : index
    %c0_12 = arith.constant 0 : index
    %47 = vector.load %arg2[%c2_9, %c0_10, %c0_11, %c0_12] : memref<20x2x2x128xf32, #tpu.memory_space<vmem>>, vector<1x2x2x128xf32>
    %48 = vector.shape_cast %47 : vector<1x2x2x128xf32> to vector<2x2x128xf32>
    %c8 = arith.constant 8 : index
    %49 = memref.load %arg1[%c8] : memref<84xf32, #tpu.memory_space<smem>>
    %50 = vector.broadcast %49 : f32 to vector<2x2x128xf32>
    %51 = arith.mulf %50, %48 : vector<2x2x128xf32>
    %52 = arith.addf %34, %51 : vector<2x2x128xf32>
    %c9 = arith.constant 9 : index
    %53 = memref.load %arg1[%c9] : memref<84xf32, #tpu.memory_space<smem>>
    %54 = vector.broadcast %53 : f32 to vector<2x2x128xf32>
    %55 = arith.mulf %54, %48 : vector<2x2x128xf32>
    %56 = arith.addf %38, %55 : vector<2x2x128xf32>
    %c10 = arith.constant 10 : index
    %57 = memref.load %arg1[%c10] : memref<84xf32, #tpu.memory_space<smem>>
    %58 = vector.broadcast %57 : f32 to vector<2x2x128xf32>
    %59 = arith.mulf %58, %48 : vector<2x2x128xf32>
    %60 = arith.addf %42, %59 : vector<2x2x128xf32>
    %c11 = arith.constant 11 : index
    %61 = memref.load %arg1[%c11] : memref<84xf32, #tpu.memory_space<smem>>
    %62 = vector.broadcast %61 : f32 to vector<2x2x128xf32>
    %63 = arith.mulf %62, %48 : vector<2x2x128xf32>
    %64 = arith.addf %46, %63 : vector<2x2x128xf32>
    %c3_13 = arith.constant 3 : index
    %c0_14 = arith.constant 0 : index
    %c0_15 = arith.constant 0 : index
    %c0_16 = arith.constant 0 : index
    %65 = vector.load %arg2[%c3_13, %c0_14, %c0_15, %c0_16] : memref<20x2x2x128xf32, #tpu.memory_space<vmem>>, vector<1x2x2x128xf32>
    %66 = vector.shape_cast %65 : vector<1x2x2x128xf32> to vector<2x2x128xf32>
    %c12 = arith.constant 12 : index
    %67 = memref.load %arg1[%c12] : memref<84xf32, #tpu.memory_space<smem>>
    %68 = vector.broadcast %67 : f32 to vector<2x2x128xf32>
    %69 = arith.mulf %68, %66 : vector<2x2x128xf32>
    %70 = arith.addf %52, %69 : vector<2x2x128xf32>
    %c13 = arith.constant 13 : index
    %71 = memref.load %arg1[%c13] : memref<84xf32, #tpu.memory_space<smem>>
    %72 = vector.broadcast %71 : f32 to vector<2x2x128xf32>
    %73 = arith.mulf %72, %66 : vector<2x2x128xf32>
    %74 = arith.addf %56, %73 : vector<2x2x128xf32>
    %c14 = arith.constant 14 : index
    %75 = memref.load %arg1[%c14] : memref<84xf32, #tpu.memory_space<smem>>
    %76 = vector.broadcast %75 : f32 to vector<2x2x128xf32>
    %77 = arith.mulf %76, %66 : vector<2x2x128xf32>
    %78 = arith.addf %60, %77 : vector<2x2x128xf32>
    %c15 = arith.constant 15 : index
    %79 = memref.load %arg1[%c15] : memref<84xf32, #tpu.memory_space<smem>>
    %80 = vector.broadcast %79 : f32 to vector<2x2x128xf32>
    %81 = arith.mulf %80, %66 : vector<2x2x128xf32>
    %82 = arith.addf %64, %81 : vector<2x2x128xf32>
    %c4_17 = arith.constant 4 : index
    %c0_18 = arith.constant 0 : index
    %c0_19 = arith.constant 0 : index
    %c0_20 = arith.constant 0 : index
    %83 = vector.load %arg2[%c4_17, %c0_18, %c0_19, %c0_20] : memref<20x2x2x128xf32, #tpu.memory_space<vmem>>, vector<1x2x2x128xf32>
    %84 = vector.shape_cast %83 : vector<1x2x2x128xf32> to vector<2x2x128xf32>
    %c16 = arith.constant 16 : index
    %85 = memref.load %arg1[%c16] : memref<84xf32, #tpu.memory_space<smem>>
    %86 = vector.broadcast %85 : f32 to vector<2x2x128xf32>
    %87 = arith.mulf %86, %84 : vector<2x2x128xf32>
    %88 = arith.addf %70, %87 : vector<2x2x128xf32>
    %c17 = arith.constant 17 : index
    %89 = memref.load %arg1[%c17] : memref<84xf32, #tpu.memory_space<smem>>
    %90 = vector.broadcast %89 : f32 to vector<2x2x128xf32>
    %91 = arith.mulf %90, %84 : vector<2x2x128xf32>
    %92 = arith.addf %74, %91 : vector<2x2x128xf32>
    %c18 = arith.constant 18 : index
    %93 = memref.load %arg1[%c18] : memref<84xf32, #tpu.memory_space<smem>>
    %94 = vector.broadcast %93 : f32 to vector<2x2x128xf32>
    %95 = arith.mulf %94, %84 : vector<2x2x128xf32>
    %96 = arith.addf %78, %95 : vector<2x2x128xf32>
    %c19 = arith.constant 19 : index
    %97 = memref.load %arg1[%c19] : memref<84xf32, #tpu.memory_space<smem>>
    %98 = vector.broadcast %97 : f32 to vector<2x2x128xf32>
    %99 = arith.mulf %98, %84 : vector<2x2x128xf32>
    %100 = arith.addf %82, %99 : vector<2x2x128xf32>
    %c5_21 = arith.constant 5 : index
    %c0_22 = arith.constant 0 : index
    %c0_23 = arith.constant 0 : index
    %c0_24 = arith.constant 0 : index
    %101 = vector.load %arg2[%c5_21, %c0_22, %c0_23, %c0_24] : memref<20x2x2x128xf32, #tpu.memory_space<vmem>>, vector<1x2x2x128xf32>
    %102 = vector.shape_cast %101 : vector<1x2x2x128xf32> to vector<2x2x128xf32>
    %c20 = arith.constant 20 : index
    %103 = memref.load %arg1[%c20] : memref<84xf32, #tpu.memory_space<smem>>
    %104 = vector.broadcast %103 : f32 to vector<2x2x128xf32>
    %105 = arith.mulf %104, %102 : vector<2x2x128xf32>
    %106 = arith.addf %88, %105 : vector<2x2x128xf32>
    %c21 = arith.constant 21 : index
    %107 = memref.load %arg1[%c21] : memref<84xf32, #tpu.memory_space<smem>>
    %108 = vector.broadcast %107 : f32 to vector<2x2x128xf32>
    %109 = arith.mulf %108, %102 : vector<2x2x128xf32>
    %110 = arith.addf %92, %109 : vector<2x2x128xf32>
    %c22 = arith.constant 22 : index
    %111 = memref.load %arg1[%c22] : memref<84xf32, #tpu.memory_space<smem>>
    %112 = vector.broadcast %111 : f32 to vector<2x2x128xf32>
    %113 = arith.mulf %112, %102 : vector<2x2x128xf32>
    %114 = arith.addf %96, %113 : vector<2x2x128xf32>
    %c23 = arith.constant 23 : index
    %115 = memref.load %arg1[%c23] : memref<84xf32, #tpu.memory_space<smem>>
    %116 = vector.broadcast %115 : f32 to vector<2x2x128xf32>
    %117 = arith.mulf %116, %102 : vector<2x2x128xf32>
    %118 = arith.addf %100, %117 : vector<2x2x128xf32>
    %c6_25 = arith.constant 6 : index
    %c0_26 = arith.constant 0 : index
    %c0_27 = arith.constant 0 : index
    %c0_28 = arith.constant 0 : index
    %119 = vector.load %arg2[%c6_25, %c0_26, %c0_27, %c0_28] : memref<20x2x2x128xf32, #tpu.memory_space<vmem>>, vector<1x2x2x128xf32>
    %120 = vector.shape_cast %119 : vector<1x2x2x128xf32> to vector<2x2x128xf32>
    %c24 = arith.constant 24 : index
    %121 = memref.load %arg1[%c24] : memref<84xf32, #tpu.memory_space<smem>>
    %122 = vector.broadcast %121 : f32 to vector<2x2x128xf32>
    %123 = arith.mulf %122, %120 : vector<2x2x128xf32>
    %124 = arith.addf %106, %123 : vector<2x2x128xf32>
    %c25 = arith.constant 25 : index
    %125 = memref.load %arg1[%c25] : memref<84xf32, #tpu.memory_space<smem>>
    %126 = vector.broadcast %125 : f32 to vector<2x2x128xf32>
    %127 = arith.mulf %126, %120 : vector<2x2x128xf32>
    %128 = arith.addf %110, %127 : vector<2x2x128xf32>
    %c26 = arith.constant 26 : index
    %129 = memref.load %arg1[%c26] : memref<84xf32, #tpu.memory_space<smem>>
    %130 = vector.broadcast %129 : f32 to vector<2x2x128xf32>
    %131 = arith.mulf %130, %120 : vector<2x2x128xf32>
    %132 = arith.addf %114, %131 : vector<2x2x128xf32>
    %c27 = arith.constant 27 : index
    %133 = memref.load %arg1[%c27] : memref<84xf32, #tpu.memory_space<smem>>
    %134 = vector.broadcast %133 : f32 to vector<2x2x128xf32>
    %135 = arith.mulf %134, %120 : vector<2x2x128xf32>
    %136 = arith.addf %118, %135 : vector<2x2x128xf32>
    %c7_29 = arith.constant 7 : index
    %c0_30 = arith.constant 0 : index
    %c0_31 = arith.constant 0 : index
    %c0_32 = arith.constant 0 : index
    %137 = vector.load %arg2[%c7_29, %c0_30, %c0_31, %c0_32] : memref<20x2x2x128xf32, #tpu.memory_space<vmem>>, vector<1x2x2x128xf32>
    %138 = vector.shape_cast %137 : vector<1x2x2x128xf32> to vector<2x2x128xf32>
    %c28 = arith.constant 28 : index
    %139 = memref.load %arg1[%c28] : memref<84xf32, #tpu.memory_space<smem>>
    %140 = vector.broadcast %139 : f32 to vector<2x2x128xf32>
    %141 = arith.mulf %140, %138 : vector<2x2x128xf32>
    %142 = arith.addf %124, %141 : vector<2x2x128xf32>
    %c29 = arith.constant 29 : index
    %143 = memref.load %arg1[%c29] : memref<84xf32, #tpu.memory_space<smem>>
    %144 = vector.broadcast %143 : f32 to vector<2x2x128xf32>
    %145 = arith.mulf %144, %138 : vector<2x2x128xf32>
    %146 = arith.addf %128, %145 : vector<2x2x128xf32>
    %c30 = arith.constant 30 : index
    %147 = memref.load %arg1[%c30] : memref<84xf32, #tpu.memory_space<smem>>
    %148 = vector.broadcast %147 : f32 to vector<2x2x128xf32>
    %149 = arith.mulf %148, %138 : vector<2x2x128xf32>
    %150 = arith.addf %132, %149 : vector<2x2x128xf32>
    %c31 = arith.constant 31 : index
    %151 = memref.load %arg1[%c31] : memref<84xf32, #tpu.memory_space<smem>>
    %152 = vector.broadcast %151 : f32 to vector<2x2x128xf32>
    %153 = arith.mulf %152, %138 : vector<2x2x128xf32>
    %154 = arith.addf %136, %153 : vector<2x2x128xf32>
    %c8_33 = arith.constant 8 : index
    %c0_34 = arith.constant 0 : index
    %c0_35 = arith.constant 0 : index
    %c0_36 = arith.constant 0 : index
    %155 = vector.load %arg2[%c8_33, %c0_34, %c0_35, %c0_36] : memref<20x2x2x128xf32, #tpu.memory_space<vmem>>, vector<1x2x2x128xf32>
    %156 = vector.shape_cast %155 : vector<1x2x2x128xf32> to vector<2x2x128xf32>
    %c32 = arith.constant 32 : index
    %157 = memref.load %arg1[%c32] : memref<84xf32, #tpu.memory_space<smem>>
    %158 = vector.broadcast %157 : f32 to vector<2x2x128xf32>
    %159 = arith.mulf %158, %156 : vector<2x2x128xf32>
    %160 = arith.addf %142, %159 : vector<2x2x128xf32>
    %c33 = arith.constant 33 : index
    %161 = memref.load %arg1[%c33] : memref<84xf32, #tpu.memory_space<smem>>
    %162 = vector.broadcast %161 : f32 to vector<2x2x128xf32>
    %163 = arith.mulf %162, %156 : vector<2x2x128xf32>
    %164 = arith.addf %146, %163 : vector<2x2x128xf32>
    %c34 = arith.constant 34 : index
    %165 = memref.load %arg1[%c34] : memref<84xf32, #tpu.memory_space<smem>>
    %166 = vector.broadcast %165 : f32 to vector<2x2x128xf32>
    %167 = arith.mulf %166, %156 : vector<2x2x128xf32>
    %168 = arith.addf %150, %167 : vector<2x2x128xf32>
    %c35 = arith.constant 35 : index
    %169 = memref.load %arg1[%c35] : memref<84xf32, #tpu.memory_space<smem>>
    %170 = vector.broadcast %169 : f32 to vector<2x2x128xf32>
    %171 = arith.mulf %170, %156 : vector<2x2x128xf32>
    %172 = arith.addf %154, %171 : vector<2x2x128xf32>
    %c9_37 = arith.constant 9 : index
    %c0_38 = arith.constant 0 : index
    %c0_39 = arith.constant 0 : index
    %c0_40 = arith.constant 0 : index
    %173 = vector.load %arg2[%c9_37, %c0_38, %c0_39, %c0_40] : memref<20x2x2x128xf32, #tpu.memory_space<vmem>>, vector<1x2x2x128xf32>
    %174 = vector.shape_cast %173 : vector<1x2x2x128xf32> to vector<2x2x128xf32>
    %c36 = arith.constant 36 : index
    %175 = memref.load %arg1[%c36] : memref<84xf32, #tpu.memory_space<smem>>
    %176 = vector.broadcast %175 : f32 to vector<2x2x128xf32>
    %177 = arith.mulf %176, %174 : vector<2x2x128xf32>
    %178 = arith.addf %160, %177 : vector<2x2x128xf32>
    %c37 = arith.constant 37 : index
    %179 = memref.load %arg1[%c37] : memref<84xf32, #tpu.memory_space<smem>>
    %180 = vector.broadcast %179 : f32 to vector<2x2x128xf32>
    %181 = arith.mulf %180, %174 : vector<2x2x128xf32>
    %182 = arith.addf %164, %181 : vector<2x2x128xf32>
    %c38 = arith.constant 38 : index
    %183 = memref.load %arg1[%c38] : memref<84xf32, #tpu.memory_space<smem>>
    %184 = vector.broadcast %183 : f32 to vector<2x2x128xf32>
    %185 = arith.mulf %184, %174 : vector<2x2x128xf32>
    %186 = arith.addf %168, %185 : vector<2x2x128xf32>
    %c39 = arith.constant 39 : index
    %187 = memref.load %arg1[%c39] : memref<84xf32, #tpu.memory_space<smem>>
    %188 = vector.broadcast %187 : f32 to vector<2x2x128xf32>
    %189 = arith.mulf %188, %174 : vector<2x2x128xf32>
    %190 = arith.addf %172, %189 : vector<2x2x128xf32>
    %c10_41 = arith.constant 10 : index
    %c0_42 = arith.constant 0 : index
    %c0_43 = arith.constant 0 : index
    %c0_44 = arith.constant 0 : index
    %191 = vector.load %arg2[%c10_41, %c0_42, %c0_43, %c0_44] : memref<20x2x2x128xf32, #tpu.memory_space<vmem>>, vector<1x2x2x128xf32>
    %192 = vector.shape_cast %191 : vector<1x2x2x128xf32> to vector<2x2x128xf32>
    %c40 = arith.constant 40 : index
    %193 = memref.load %arg1[%c40] : memref<84xf32, #tpu.memory_space<smem>>
    %194 = vector.broadcast %193 : f32 to vector<2x2x128xf32>
    %195 = arith.mulf %194, %192 : vector<2x2x128xf32>
    %196 = arith.addf %178, %195 : vector<2x2x128xf32>
    %c41 = arith.constant 41 : index
    %197 = memref.load %arg1[%c41] : memref<84xf32, #tpu.memory_space<smem>>
    %198 = vector.broadcast %197 : f32 to vector<2x2x128xf32>
    %199 = arith.mulf %198, %192 : vector<2x2x128xf32>
    %200 = arith.addf %182, %199 : vector<2x2x128xf32>
    %c42 = arith.constant 42 : index
    %201 = memref.load %arg1[%c42] : memref<84xf32, #tpu.memory_space<smem>>
    %202 = vector.broadcast %201 : f32 to vector<2x2x128xf32>
    %203 = arith.mulf %202, %192 : vector<2x2x128xf32>
    %204 = arith.addf %186, %203 : vector<2x2x128xf32>
    %c43 = arith.constant 43 : index
    %205 = memref.load %arg1[%c43] : memref<84xf32, #tpu.memory_space<smem>>
    %206 = vector.broadcast %205 : f32 to vector<2x2x128xf32>
    %207 = arith.mulf %206, %192 : vector<2x2x128xf32>
    %208 = arith.addf %190, %207 : vector<2x2x128xf32>
    %c11_45 = arith.constant 11 : index
    %c0_46 = arith.constant 0 : index
    %c0_47 = arith.constant 0 : index
    %c0_48 = arith.constant 0 : index
    %209 = vector.load %arg2[%c11_45, %c0_46, %c0_47, %c0_48] : memref<20x2x2x128xf32, #tpu.memory_space<vmem>>, vector<1x2x2x128xf32>
    %210 = vector.shape_cast %209 : vector<1x2x2x128xf32> to vector<2x2x128xf32>
    %c44 = arith.constant 44 : index
    %211 = memref.load %arg1[%c44] : memref<84xf32, #tpu.memory_space<smem>>
    %212 = vector.broadcast %211 : f32 to vector<2x2x128xf32>
    %213 = arith.mulf %212, %210 : vector<2x2x128xf32>
    %214 = arith.addf %196, %213 : vector<2x2x128xf32>
    %c45 = arith.constant 45 : index
    %215 = memref.load %arg1[%c45] : memref<84xf32, #tpu.memory_space<smem>>
    %216 = vector.broadcast %215 : f32 to vector<2x2x128xf32>
    %217 = arith.mulf %216, %210 : vector<2x2x128xf32>
    %218 = arith.addf %200, %217 : vector<2x2x128xf32>
    %c46 = arith.constant 46 : index
    %219 = memref.load %arg1[%c46] : memref<84xf32, #tpu.memory_space<smem>>
    %220 = vector.broadcast %219 : f32 to vector<2x2x128xf32>
    %221 = arith.mulf %220, %210 : vector<2x2x128xf32>
    %222 = arith.addf %204, %221 : vector<2x2x128xf32>
    %c47 = arith.constant 47 : index
    %223 = memref.load %arg1[%c47] : memref<84xf32, #tpu.memory_space<smem>>
    %224 = vector.broadcast %223 : f32 to vector<2x2x128xf32>
    %225 = arith.mulf %224, %210 : vector<2x2x128xf32>
    %226 = arith.addf %208, %225 : vector<2x2x128xf32>
    %c12_49 = arith.constant 12 : index
    %c0_50 = arith.constant 0 : index
    %c0_51 = arith.constant 0 : index
    %c0_52 = arith.constant 0 : index
    %227 = vector.load %arg2[%c12_49, %c0_50, %c0_51, %c0_52] : memref<20x2x2x128xf32, #tpu.memory_space<vmem>>, vector<1x2x2x128xf32>
    %228 = vector.shape_cast %227 : vector<1x2x2x128xf32> to vector<2x2x128xf32>
    %c48 = arith.constant 48 : index
    %229 = memref.load %arg1[%c48] : memref<84xf32, #tpu.memory_space<smem>>
    %230 = vector.broadcast %229 : f32 to vector<2x2x128xf32>
    %231 = arith.mulf %230, %228 : vector<2x2x128xf32>
    %232 = arith.addf %214, %231 : vector<2x2x128xf32>
    %c49 = arith.constant 49 : index
    %233 = memref.load %arg1[%c49] : memref<84xf32, #tpu.memory_space<smem>>
    %234 = vector.broadcast %233 : f32 to vector<2x2x128xf32>
    %235 = arith.mulf %234, %228 : vector<2x2x128xf32>
    %236 = arith.addf %218, %235 : vector<2x2x128xf32>
    %c50 = arith.constant 50 : index
    %237 = memref.load %arg1[%c50] : memref<84xf32, #tpu.memory_space<smem>>
    %238 = vector.broadcast %237 : f32 to vector<2x2x128xf32>
    %239 = arith.mulf %238, %228 : vector<2x2x128xf32>
    %240 = arith.addf %222, %239 : vector<2x2x128xf32>
    %c51 = arith.constant 51 : index
    %241 = memref.load %arg1[%c51] : memref<84xf32, #tpu.memory_space<smem>>
    %242 = vector.broadcast %241 : f32 to vector<2x2x128xf32>
    %243 = arith.mulf %242, %228 : vector<2x2x128xf32>
    %244 = arith.addf %226, %243 : vector<2x2x128xf32>
    %c13_53 = arith.constant 13 : index
    %c0_54 = arith.constant 0 : index
    %c0_55 = arith.constant 0 : index
    %c0_56 = arith.constant 0 : index
    %245 = vector.load %arg2[%c13_53, %c0_54, %c0_55, %c0_56] : memref<20x2x2x128xf32, #tpu.memory_space<vmem>>, vector<1x2x2x128xf32>
    %246 = vector.shape_cast %245 : vector<1x2x2x128xf32> to vector<2x2x128xf32>
    %c52 = arith.constant 52 : index
    %247 = memref.load %arg1[%c52] : memref<84xf32, #tpu.memory_space<smem>>
    %248 = vector.broadcast %247 : f32 to vector<2x2x128xf32>
    %249 = arith.mulf %248, %246 : vector<2x2x128xf32>
    %250 = arith.addf %232, %249 : vector<2x2x128xf32>
    %c53 = arith.constant 53 : index
    %251 = memref.load %arg1[%c53] : memref<84xf32, #tpu.memory_space<smem>>
    %252 = vector.broadcast %251 : f32 to vector<2x2x128xf32>
    %253 = arith.mulf %252, %246 : vector<2x2x128xf32>
    %254 = arith.addf %236, %253 : vector<2x2x128xf32>
    %c54 = arith.constant 54 : index
    %255 = memref.load %arg1[%c54] : memref<84xf32, #tpu.memory_space<smem>>
    %256 = vector.broadcast %255 : f32 to vector<2x2x128xf32>
    %257 = arith.mulf %256, %246 : vector<2x2x128xf32>
    %258 = arith.addf %240, %257 : vector<2x2x128xf32>
    %c55 = arith.constant 55 : index
    %259 = memref.load %arg1[%c55] : memref<84xf32, #tpu.memory_space<smem>>
    %260 = vector.broadcast %259 : f32 to vector<2x2x128xf32>
    %261 = arith.mulf %260, %246 : vector<2x2x128xf32>
    %262 = arith.addf %244, %261 : vector<2x2x128xf32>
    %c14_57 = arith.constant 14 : index
    %c0_58 = arith.constant 0 : index
    %c0_59 = arith.constant 0 : index
    %c0_60 = arith.constant 0 : index
    %263 = vector.load %arg2[%c14_57, %c0_58, %c0_59, %c0_60] : memref<20x2x2x128xf32, #tpu.memory_space<vmem>>, vector<1x2x2x128xf32>
    %264 = vector.shape_cast %263 : vector<1x2x2x128xf32> to vector<2x2x128xf32>
    %c56 = arith.constant 56 : index
    %265 = memref.load %arg1[%c56] : memref<84xf32, #tpu.memory_space<smem>>
    %266 = vector.broadcast %265 : f32 to vector<2x2x128xf32>
    %267 = arith.mulf %266, %264 : vector<2x2x128xf32>
    %268 = arith.addf %250, %267 : vector<2x2x128xf32>
    %c57 = arith.constant 57 : index
    %269 = memref.load %arg1[%c57] : memref<84xf32, #tpu.memory_space<smem>>
    %270 = vector.broadcast %269 : f32 to vector<2x2x128xf32>
    %271 = arith.mulf %270, %264 : vector<2x2x128xf32>
    %272 = arith.addf %254, %271 : vector<2x2x128xf32>
    %c58 = arith.constant 58 : index
    %273 = memref.load %arg1[%c58] : memref<84xf32, #tpu.memory_space<smem>>
    %274 = vector.broadcast %273 : f32 to vector<2x2x128xf32>
    %275 = arith.mulf %274, %264 : vector<2x2x128xf32>
    %276 = arith.addf %258, %275 : vector<2x2x128xf32>
    %c59 = arith.constant 59 : index
    %277 = memref.load %arg1[%c59] : memref<84xf32, #tpu.memory_space<smem>>
    %278 = vector.broadcast %277 : f32 to vector<2x2x128xf32>
    %279 = arith.mulf %278, %264 : vector<2x2x128xf32>
    %280 = arith.addf %262, %279 : vector<2x2x128xf32>
    %c15_61 = arith.constant 15 : index
    %c0_62 = arith.constant 0 : index
    %c0_63 = arith.constant 0 : index
    %c0_64 = arith.constant 0 : index
    %281 = vector.load %arg2[%c15_61, %c0_62, %c0_63, %c0_64] : memref<20x2x2x128xf32, #tpu.memory_space<vmem>>, vector<1x2x2x128xf32>
    %282 = vector.shape_cast %281 : vector<1x2x2x128xf32> to vector<2x2x128xf32>
    %c60 = arith.constant 60 : index
    %283 = memref.load %arg1[%c60] : memref<84xf32, #tpu.memory_space<smem>>
    %284 = vector.broadcast %283 : f32 to vector<2x2x128xf32>
    %285 = arith.mulf %284, %282 : vector<2x2x128xf32>
    %286 = arith.addf %268, %285 : vector<2x2x128xf32>
    %c61 = arith.constant 61 : index
    %287 = memref.load %arg1[%c61] : memref<84xf32, #tpu.memory_space<smem>>
    %288 = vector.broadcast %287 : f32 to vector<2x2x128xf32>
    %289 = arith.mulf %288, %282 : vector<2x2x128xf32>
    %290 = arith.addf %272, %289 : vector<2x2x128xf32>
    %c62 = arith.constant 62 : index
    %291 = memref.load %arg1[%c62] : memref<84xf32, #tpu.memory_space<smem>>
    %292 = vector.broadcast %291 : f32 to vector<2x2x128xf32>
    %293 = arith.mulf %292, %282 : vector<2x2x128xf32>
    %294 = arith.addf %276, %293 : vector<2x2x128xf32>
    %c63 = arith.constant 63 : index
    %295 = memref.load %arg1[%c63] : memref<84xf32, #tpu.memory_space<smem>>
    %296 = vector.broadcast %295 : f32 to vector<2x2x128xf32>
    %297 = arith.mulf %296, %282 : vector<2x2x128xf32>
    %298 = arith.addf %280, %297 : vector<2x2x128xf32>
    %c16_65 = arith.constant 16 : index
    %c0_66 = arith.constant 0 : index
    %c0_67 = arith.constant 0 : index
    %c0_68 = arith.constant 0 : index
    %299 = vector.load %arg2[%c16_65, %c0_66, %c0_67, %c0_68] : memref<20x2x2x128xf32, #tpu.memory_space<vmem>>, vector<1x2x2x128xf32>
    %300 = vector.shape_cast %299 : vector<1x2x2x128xf32> to vector<2x2x128xf32>
    %c64 = arith.constant 64 : index
    %301 = memref.load %arg1[%c64] : memref<84xf32, #tpu.memory_space<smem>>
    %302 = vector.broadcast %301 : f32 to vector<2x2x128xf32>
    %303 = arith.mulf %302, %300 : vector<2x2x128xf32>
    %304 = arith.addf %286, %303 : vector<2x2x128xf32>
    %c65 = arith.constant 65 : index
    %305 = memref.load %arg1[%c65] : memref<84xf32, #tpu.memory_space<smem>>
    %306 = vector.broadcast %305 : f32 to vector<2x2x128xf32>
    %307 = arith.mulf %306, %300 : vector<2x2x128xf32>
    %308 = arith.addf %290, %307 : vector<2x2x128xf32>
    %c66 = arith.constant 66 : index
    %309 = memref.load %arg1[%c66] : memref<84xf32, #tpu.memory_space<smem>>
    %310 = vector.broadcast %309 : f32 to vector<2x2x128xf32>
    %311 = arith.mulf %310, %300 : vector<2x2x128xf32>
    %312 = arith.addf %294, %311 : vector<2x2x128xf32>
    %c67 = arith.constant 67 : index
    %313 = memref.load %arg1[%c67] : memref<84xf32, #tpu.memory_space<smem>>
    %314 = vector.broadcast %313 : f32 to vector<2x2x128xf32>
    %315 = arith.mulf %314, %300 : vector<2x2x128xf32>
    %316 = arith.addf %298, %315 : vector<2x2x128xf32>
    %c17_69 = arith.constant 17 : index
    %c0_70 = arith.constant 0 : index
    %c0_71 = arith.constant 0 : index
    %c0_72 = arith.constant 0 : index
    %317 = vector.load %arg2[%c17_69, %c0_70, %c0_71, %c0_72] : memref<20x2x2x128xf32, #tpu.memory_space<vmem>>, vector<1x2x2x128xf32>
    %318 = vector.shape_cast %317 : vector<1x2x2x128xf32> to vector<2x2x128xf32>
    %c68 = arith.constant 68 : index
    %319 = memref.load %arg1[%c68] : memref<84xf32, #tpu.memory_space<smem>>
    %320 = vector.broadcast %319 : f32 to vector<2x2x128xf32>
    %321 = arith.mulf %320, %318 : vector<2x2x128xf32>
    %322 = arith.addf %304, %321 : vector<2x2x128xf32>
    %c69 = arith.constant 69 : index
    %323 = memref.load %arg1[%c69] : memref<84xf32, #tpu.memory_space<smem>>
    %324 = vector.broadcast %323 : f32 to vector<2x2x128xf32>
    %325 = arith.mulf %324, %318 : vector<2x2x128xf32>
    %326 = arith.addf %308, %325 : vector<2x2x128xf32>
    %c70 = arith.constant 70 : index
    %327 = memref.load %arg1[%c70] : memref<84xf32, #tpu.memory_space<smem>>
    %328 = vector.broadcast %327 : f32 to vector<2x2x128xf32>
    %329 = arith.mulf %328, %318 : vector<2x2x128xf32>
    %330 = arith.addf %312, %329 : vector<2x2x128xf32>
    %c71 = arith.constant 71 : index
    %331 = memref.load %arg1[%c71] : memref<84xf32, #tpu.memory_space<smem>>
    %332 = vector.broadcast %331 : f32 to vector<2x2x128xf32>
    %333 = arith.mulf %332, %318 : vector<2x2x128xf32>
    %334 = arith.addf %316, %333 : vector<2x2x128xf32>
    %c18_73 = arith.constant 18 : index
    %c0_74 = arith.constant 0 : index
    %c0_75 = arith.constant 0 : index
    %c0_76 = arith.constant 0 : index
    %335 = vector.load %arg2[%c18_73, %c0_74, %c0_75, %c0_76] : memref<20x2x2x128xf32, #tpu.memory_space<vmem>>, vector<1x2x2x128xf32>
    %336 = vector.shape_cast %335 : vector<1x2x2x128xf32> to vector<2x2x128xf32>
    %c72 = arith.constant 72 : index
    %337 = memref.load %arg1[%c72] : memref<84xf32, #tpu.memory_space<smem>>
    %338 = vector.broadcast %337 : f32 to vector<2x2x128xf32>
    %339 = arith.mulf %338, %336 : vector<2x2x128xf32>
    %340 = arith.addf %322, %339 : vector<2x2x128xf32>
    %c73 = arith.constant 73 : index
    %341 = memref.load %arg1[%c73] : memref<84xf32, #tpu.memory_space<smem>>
    %342 = vector.broadcast %341 : f32 to vector<2x2x128xf32>
    %343 = arith.mulf %342, %336 : vector<2x2x128xf32>
    %344 = arith.addf %326, %343 : vector<2x2x128xf32>
    %c74 = arith.constant 74 : index
    %345 = memref.load %arg1[%c74] : memref<84xf32, #tpu.memory_space<smem>>
    %346 = vector.broadcast %345 : f32 to vector<2x2x128xf32>
    %347 = arith.mulf %346, %336 : vector<2x2x128xf32>
    %348 = arith.addf %330, %347 : vector<2x2x128xf32>
    %c75 = arith.constant 75 : index
    %349 = memref.load %arg1[%c75] : memref<84xf32, #tpu.memory_space<smem>>
    %350 = vector.broadcast %349 : f32 to vector<2x2x128xf32>
    %351 = arith.mulf %350, %336 : vector<2x2x128xf32>
    %352 = arith.addf %334, %351 : vector<2x2x128xf32>
    %c19_77 = arith.constant 19 : index
    %c0_78 = arith.constant 0 : index
    %c0_79 = arith.constant 0 : index
    %c0_80 = arith.constant 0 : index
    %353 = vector.load %arg2[%c19_77, %c0_78, %c0_79, %c0_80] : memref<20x2x2x128xf32, #tpu.memory_space<vmem>>, vector<1x2x2x128xf32>
    %354 = vector.shape_cast %353 : vector<1x2x2x128xf32> to vector<2x2x128xf32>
    %c76 = arith.constant 76 : index
    %355 = memref.load %arg1[%c76] : memref<84xf32, #tpu.memory_space<smem>>
    %356 = vector.broadcast %355 : f32 to vector<2x2x128xf32>
    %357 = arith.mulf %356, %354 : vector<2x2x128xf32>
    %358 = arith.addf %340, %357 : vector<2x2x128xf32>
    %c77 = arith.constant 77 : index
    %359 = memref.load %arg1[%c77] : memref<84xf32, #tpu.memory_space<smem>>
    %360 = vector.broadcast %359 : f32 to vector<2x2x128xf32>
    %361 = arith.mulf %360, %354 : vector<2x2x128xf32>
    %362 = arith.addf %344, %361 : vector<2x2x128xf32>
    %c78 = arith.constant 78 : index
    %363 = memref.load %arg1[%c78] : memref<84xf32, #tpu.memory_space<smem>>
    %364 = vector.broadcast %363 : f32 to vector<2x2x128xf32>
    %365 = arith.mulf %364, %354 : vector<2x2x128xf32>
    %366 = arith.addf %348, %365 : vector<2x2x128xf32>
    %c79 = arith.constant 79 : index
    %367 = memref.load %arg1[%c79] : memref<84xf32, #tpu.memory_space<smem>>
    %368 = vector.broadcast %367 : f32 to vector<2x2x128xf32>
    %369 = arith.mulf %368, %354 : vector<2x2x128xf32>
    %370 = arith.addf %352, %369 : vector<2x2x128xf32>
    %cst = arith.constant 0.000000e+00 : f32
    %371 = vector.broadcast %cst : f32 to vector<2x2x128xf32>
    %372 = arith.cmpf oge, %358, %371 : vector<2x2x128xf32>
    %cst_81 = arith.constant 1.000000e-01 : f32
    %373 = vector.broadcast %cst_81 : f32 to vector<2x2x128xf32>
    %374 = arith.mulf %373, %358 : vector<2x2x128xf32>
    %375 = arith.select %372, %358, %374 : vector<2x2x128xi1>, vector<2x2x128xf32>
    %c0_82 = arith.constant 0 : index
    %c0_83 = arith.constant 0 : index
    %c0_84 = arith.constant 0 : index
    %c0_85 = arith.constant 0 : index
    %376 = vector.load %arg3[%c0_82, %c0_83, %c0_84, %c0_85] : memref<4x2x2x128xf32, #tpu.memory_space<vmem>>, vector<1x2x2x128xf32>
    %377 = vector.shape_cast %376 : vector<1x2x2x128xf32> to vector<2x2x128xf32>
    %378 = vector.shape_cast %375 : vector<2x2x128xf32> to vector<1x2x2x128xf32>
    tpu.vector_store %arg3[%c0_82, %c0_83, %c0_84, %c0_85], %378 {strides = array<i32>} : memref<4x2x2x128xf32, #tpu.memory_space<vmem>>, vector<1x2x2x128xf32>,
    %379 = vector.extract_strided_slice %375 {offsets = [0, 0, 0], sizes = [1, 2, 128], strides = [1, 1, 1]} : vector<2x2x128xf32> to vector<1x2x128xf32>
    %380 = vector.shape_cast %379 : vector<1x2x128xf32> to vector<2x128xf32>
    %381 = vector.extract_strided_slice %375 {offsets = [1, 0, 0], sizes = [1, 2, 128], strides = [1, 1, 1]} : vector<2x2x128xf32> to vector<1x2x128xf32>
    %382 = vector.shape_cast %381 : vector<1x2x128xf32> to vector<2x128xf32>
    %383 = arith.subf %380, %382 : vector<2x128xf32>
    %384 = math.absf %383 : vector<2x128xf32>
    %385 = vector.shape_cast %384 : vector<2x128xf32> to vector<1x2x128xf32>
    %cst_86 = arith.constant dense<0.000000e+00> : vector<1xf32>
    %386 = vector.multi_reduction <add>, %385, %cst_86 [1, 2] : vector<1x2x128xf32> to vector<1xf32>
    %387 = vector.shape_cast %386 : vector<1xf32> to vector<1x1x1xf32>
    %388 = vector.extract %387[0, 0, 0] : f32 from vector<1x1x1xf32>
    %cst_87 = arith.constant 0.000000e+00 : f32
    %389 = arith.addf %cst_87, %388 : f32
    %cst_88 = arith.constant 0.000000e+00 : f32
    %390 = vector.broadcast %cst_88 : f32 to vector<2x2x128xf32>
    %391 = arith.cmpf oge, %362, %390 : vector<2x2x128xf32>
    %cst_89 = arith.constant 1.000000e-01 : f32
    %392 = vector.broadcast %cst_89 : f32 to vector<2x2x128xf32>
    %393 = arith.mulf %392, %362 : vector<2x2x128xf32>
    %394 = arith.select %391, %362, %393 : vector<2x2x128xi1>, vector<2x2x128xf32>
    %c1_90 = arith.constant 1 : index
    %c0_91 = arith.constant 0 : index
    %c0_92 = arith.constant 0 : index
    %c0_93 = arith.constant 0 : index
    %395 = vector.load %arg3[%c1_90, %c0_91, %c0_92, %c0_93] : memref<4x2x2x128xf32, #tpu.memory_space<vmem>>, vector<1x2x2x128xf32>
    %396 = vector.shape_cast %395 : vector<1x2x2x128xf32> to vector<2x2x128xf32>
    %397 = vector.shape_cast %394 : vector<2x2x128xf32> to vector<1x2x2x128xf32>
    tpu.vector_store %arg3[%c1_90, %c0_91, %c0_92, %c0_93], %397 {strides = array<i32>} : memref<4x2x2x128xf32, #tpu.memory_space<vmem>>, vector<1x2x2x128xf32>,
    %398 = vector.extract_strided_slice %394 {offsets = [0, 0, 0], sizes = [1, 2, 128], strides = [1, 1, 1]} : vector<2x2x128xf32> to vector<1x2x128xf32>
    %399 = vector.shape_cast %398 : vector<1x2x128xf32> to vector<2x128xf32>
    %400 = vector.extract_strided_slice %394 {offsets = [1, 0, 0], sizes = [1, 2, 128], strides = [1, 1, 1]} : vector<2x2x128xf32> to vector<1x2x128xf32>
    %401 = vector.shape_cast %400 : vector<1x2x128xf32> to vector<2x128xf32>
    %402 = arith.subf %399, %401 : vector<2x128xf32>
    %403 = math.absf %402 : vector<2x128xf32>
    %404 = vector.shape_cast %403 : vector<2x128xf32> to vector<1x2x128xf32>
    %cst_94 = arith.constant dense<0.000000e+00> : vector<1xf32>
    %405 = vector.multi_reduction <add>, %404, %cst_94 [1, 2] : vector<1x2x128xf32> to vector<1xf32>
    %406 = vector.shape_cast %405 : vector<1xf32> to vector<1x1x1xf32>
    %407 = vector.extract %406[0, 0, 0] : f32 from vector<1x1x1xf32>
    %408 = arith.addf %389, %407 : f32
    %cst_95 = arith.constant 0.000000e+00 : f32
    %409 = vector.broadcast %cst_95 : f32 to vector<2x2x128xf32>
    %410 = arith.cmpf oge, %366, %409 : vector<2x2x128xf32>
    %cst_96 = arith.constant 1.000000e-01 : f32
    %411 = vector.broadcast %cst_96 : f32 to vector<2x2x128xf32>
    %412 = arith.mulf %411, %366 : vector<2x2x128xf32>
    %413 = arith.select %410, %366, %412 : vector<2x2x128xi1>, vector<2x2x128xf32>
    %c2_97 = arith.constant 2 : index
    %c0_98 = arith.constant 0 : index
    %c0_99 = arith.constant 0 : index
    %c0_100 = arith.constant 0 : index
    %414 = vector.load %arg3[%c2_97, %c0_98, %c0_99, %c0_100] : memref<4x2x2x128xf32, #tpu.memory_space<vmem>>, vector<1x2x2x128xf32>
    %415 = vector.shape_cast %414 : vector<1x2x2x128xf32> to vector<2x2x128xf32>
    %416 = vector.shape_cast %413 : vector<2x2x128xf32> to vector<1x2x2x128xf32>
    tpu.vector_store %arg3[%c2_97, %c0_98, %c0_99, %c0_100], %416 {strides = array<i32>} : memref<4x2x2x128xf32, #tpu.memory_space<vmem>>, vector<1x2x2x128xf32>,
    %417 = vector.extract_strided_slice %413 {offsets = [0, 0, 0], sizes = [1, 2, 128], strides = [1, 1, 1]} : vector<2x2x128xf32> to vector<1x2x128xf32>
    %418 = vector.shape_cast %417 : vector<1x2x128xf32> to vector<2x128xf32>
    %419 = vector.extract_strided_slice %413 {offsets = [1, 0, 0], sizes = [1, 2, 128], strides = [1, 1, 1]} : vector<2x2x128xf32> to vector<1x2x128xf32>
    %420 = vector.shape_cast %419 : vector<1x2x128xf32> to vector<2x128xf32>
    %421 = arith.subf %418, %420 : vector<2x128xf32>
    %422 = math.absf %421 : vector<2x128xf32>
    %423 = vector.shape_cast %422 : vector<2x128xf32> to vector<1x2x128xf32>
    %cst_101 = arith.constant dense<0.000000e+00> : vector<1xf32>
    %424 = vector.multi_reduction <add>, %423, %cst_101 [1, 2] : vector<1x2x128xf32> to vector<1xf32>
    %425 = vector.shape_cast %424 : vector<1xf32> to vector<1x1x1xf32>
    %426 = vector.extract %425[0, 0, 0] : f32 from vector<1x1x1xf32>
    %427 = arith.addf %408, %426 : f32
    %cst_102 = arith.constant 0.000000e+00 : f32
    %428 = vector.broadcast %cst_102 : f32 to vector<2x2x128xf32>
    %429 = arith.cmpf oge, %370, %428 : vector<2x2x128xf32>
    %cst_103 = arith.constant 1.000000e-01 : f32
    %430 = vector.broadcast %cst_103 : f32 to vector<2x2x128xf32>
    %431 = arith.mulf %430, %370 : vector<2x2x128xf32>
    %432 = arith.select %429, %370, %431 : vector<2x2x128xi1>, vector<2x2x128xf32>
    %c3_104 = arith.constant 3 : index
    %c0_105 = arith.constant 0 : index
    %c0_106 = arith.constant 0 : index
    %c0_107 = arith.constant 0 : index
    %433 = vector.load %arg3[%c3_104, %c0_105, %c0_106, %c0_107] : memref<4x2x2x128xf32, #tpu.memory_space<vmem>>, vector<1x2x2x128xf32>
    %434 = vector.shape_cast %433 : vector<1x2x2x128xf32> to vector<2x2x128xf32>
    %435 = vector.shape_cast %432 : vector<2x2x128xf32> to vector<1x2x2x128xf32>
    tpu.vector_store %arg3[%c3_104, %c0_105, %c0_106, %c0_107], %435 {strides = array<i32>} : memref<4x2x2x128xf32, #tpu.memory_space<vmem>>, vector<1x2x2x128xf32>,
    %436 = vector.extract_strided_slice %432 {offsets = [0, 0, 0], sizes = [1, 2, 128], strides = [1, 1, 1]} : vector<2x2x128xf32> to vector<1x2x128xf32>
    %437 = vector.shape_cast %436 : vector<1x2x128xf32> to vector<2x128xf32>
    %438 = vector.extract_strided_slice %432 {offsets = [1, 0, 0], sizes = [1, 2, 128], strides = [1, 1, 1]} : vector<2x2x128xf32> to vector<1x2x128xf32>
    %439 = vector.shape_cast %438 : vector<1x2x128xf32> to vector<2x128xf32>
    %440 = arith.subf %437, %439 : vector<2x128xf32>
    %441 = math.absf %440 : vector<2x128xf32>
    %442 = vector.shape_cast %441 : vector<2x128xf32> to vector<1x2x128xf32>
    %cst_108 = arith.constant dense<0.000000e+00> : vector<1xf32>
    %443 = vector.multi_reduction <add>, %442, %cst_108 [1, 2] : vector<1x2x128xf32> to vector<1xf32>
    %444 = vector.shape_cast %443 : vector<1xf32> to vector<1x1x1xf32>
    %445 = vector.extract %444[0, 0, 0] : f32 from vector<1x1x1xf32>
    %446 = arith.addf %427, %445 : f32
    %c0_109 = arith.constant 0 : index
    %c0_110 = arith.constant 0 : index
    %447 = vector.load %arg4[%c0_109, %c0_110] : memref<1x1xf32, #tpu.memory_space<vmem>>, vector<1x1xf32>
    %448 = vector.broadcast %446 : f32 to vector<1x1xf32>
    %449 = arith.addf %447, %448 : vector<1x1xf32>
    %c0_111 = arith.constant 0 : index
    %c0_112 = arith.constant 0 : index
    %450 = vector.load %arg4[%c0_111, %c0_112] : memref<1x1xf32, #tpu.memory_space<vmem>>, vector<1x1xf32>
    tpu.vector_store %arg4[%c0_111, %c0_112], %449 {strides = array<i32>} : memref<1x1xf32, #tpu.memory_space<vmem>>, vector<1x1xf32>,
    return
  }
  func.func @transform_0(%arg0: i32) -> i32 {
    %c0_i32 = arith.constant 0 : i32
    %c0_i32_0 = arith.constant 0 : i32
    return %c0_i32 : i32
  }
  func.func @transform_1(%arg0: i32) -> (i32, i32, i32, i32) {
    %c0_i32 = arith.constant 0 : i32
    %c0_i32_0 = arith.constant 0 : i32
    %c0_i32_1 = arith.constant 0 : i32
    %c0_i32_2 = arith.constant 0 : i32
    return %c0_i32, %c0_i32_0, %c0_i32_1, %arg0 : i32, i32, i32, i32
  }
  func.func @transform_2(%arg0: i32) -> (i32, i32, i32, i32) {
    %c0_i32 = arith.constant 0 : i32
    %c0_i32_0 = arith.constant 0 : i32
    %c0_i32_1 = arith.constant 0 : i32
    %c0_i32_2 = arith.constant 0 : i32
    return %c0_i32, %c0_i32_0, %c0_i32_1, %arg0 : i32, i32, i32, i32
  }
  func.func @transform_3(%arg0: i32) -> (i32, i32) {
    %c0_i32 = arith.constant 0 : i32
    %c0_i32_0 = arith.constant 0 : i32
    %c0_i32_1 = arith.constant 0 : i32
    return %c0_i32, %c0_i32_0 : i32, i32
  }
}

module attributes {stable_mosaic.version = 11 : i64} {
  func.func @_conv_pair_kernel(%arg0: i32, %arg1: memref<13xf32, #tpu.memory_space<smem>>, %arg2: memref<12x2x2x128xf32, #tpu.memory_space<vmem>>, %arg3: memref<1x2x2x128xf32, #tpu.memory_space<vmem>>, %arg4: memref<1x1xf32, #tpu.memory_space<vmem>>) attributes {dimension_semantics = [#tpu.dimension_semantics<arbitrary>], iteration_bounds = array<i64: 1>, scalar_prefetch = 0 : i64, scratch_operands = 0 : i64, tpu.core_type = #tpu.core_type<tc>, window_params = [{transform_indices = @transform_0, window_bounds = array<i64: 13>}, {transform_indices = @transform_1, window_bounds = array<i64: 12, 2, 2, 128>}, {transform_indices = @transform_2, window_bounds = array<i64: 1, 2, 2, 128>}, {pipeline_mode = #tpu.pipeline_mode<synchronous>, transform_indices = @transform_3, window_bounds = array<i64: 1, 1>}]} {
    %c0_i32 = arith.constant 0 : i32
    %0 = arith.cmpi eq, %arg0, %c0_i32 : i32
    %1 = arith.extui %0 : i1 to i32
    %c0_i32_0 = arith.constant 0 : i32
    %2 = arith.cmpi ne, %1, %c0_i32_0 : i32
    scf.if %2 {
      %cst_58 = arith.constant 0.000000e+00 : f32
      %95 = vector.broadcast %cst_58 : f32 to vector<1x1xf32>
      %c0_59 = arith.constant 0 : index
      %c0_60 = arith.constant 0 : index
      %96 = vector.load %arg4[%c0_59, %c0_60] : memref<1x1xf32, #tpu.memory_space<vmem>>, vector<1x1xf32>
      tpu.vector_store %arg4[%c0_59, %c0_60], %95 {strides = array<i32>} : memref<1x1xf32, #tpu.memory_space<vmem>>, vector<1x1xf32>,
    } else {
    }
    %c12 = arith.constant 12 : index
    %3 = memref.load %arg1[%c12] : memref<13xf32, #tpu.memory_space<smem>>
    %4 = vector.broadcast %3 : f32 to vector<2x2x128xf32>
    %c0 = arith.constant 0 : index
    %c0_1 = arith.constant 0 : index
    %c0_2 = arith.constant 0 : index
    %c0_3 = arith.constant 0 : index
    %5 = vector.load %arg2[%c0, %c0_1, %c0_2, %c0_3] : memref<12x2x2x128xf32, #tpu.memory_space<vmem>>, vector<1x2x2x128xf32>
    %6 = vector.shape_cast %5 : vector<1x2x2x128xf32> to vector<2x2x128xf32>
    %c0_4 = arith.constant 0 : index
    %7 = memref.load %arg1[%c0_4] : memref<13xf32, #tpu.memory_space<smem>>
    %8 = vector.broadcast %7 : f32 to vector<2x2x128xf32>
    %9 = arith.mulf %8, %6 : vector<2x2x128xf32>
    %10 = arith.addf %4, %9 : vector<2x2x128xf32>
    %c1 = arith.constant 1 : index
    %c0_5 = arith.constant 0 : index
    %c0_6 = arith.constant 0 : index
    %c0_7 = arith.constant 0 : index
    %11 = vector.load %arg2[%c1, %c0_5, %c0_6, %c0_7] : memref<12x2x2x128xf32, #tpu.memory_space<vmem>>, vector<1x2x2x128xf32>
    %12 = vector.shape_cast %11 : vector<1x2x2x128xf32> to vector<2x2x128xf32>
    %c1_8 = arith.constant 1 : index
    %13 = memref.load %arg1[%c1_8] : memref<13xf32, #tpu.memory_space<smem>>
    %14 = vector.broadcast %13 : f32 to vector<2x2x128xf32>
    %15 = arith.mulf %14, %12 : vector<2x2x128xf32>
    %16 = arith.addf %10, %15 : vector<2x2x128xf32>
    %c2 = arith.constant 2 : index
    %c0_9 = arith.constant 0 : index
    %c0_10 = arith.constant 0 : index
    %c0_11 = arith.constant 0 : index
    %17 = vector.load %arg2[%c2, %c0_9, %c0_10, %c0_11] : memref<12x2x2x128xf32, #tpu.memory_space<vmem>>, vector<1x2x2x128xf32>
    %18 = vector.shape_cast %17 : vector<1x2x2x128xf32> to vector<2x2x128xf32>
    %c2_12 = arith.constant 2 : index
    %19 = memref.load %arg1[%c2_12] : memref<13xf32, #tpu.memory_space<smem>>
    %20 = vector.broadcast %19 : f32 to vector<2x2x128xf32>
    %21 = arith.mulf %20, %18 : vector<2x2x128xf32>
    %22 = arith.addf %16, %21 : vector<2x2x128xf32>
    %c3 = arith.constant 3 : index
    %c0_13 = arith.constant 0 : index
    %c0_14 = arith.constant 0 : index
    %c0_15 = arith.constant 0 : index
    %23 = vector.load %arg2[%c3, %c0_13, %c0_14, %c0_15] : memref<12x2x2x128xf32, #tpu.memory_space<vmem>>, vector<1x2x2x128xf32>
    %24 = vector.shape_cast %23 : vector<1x2x2x128xf32> to vector<2x2x128xf32>
    %c3_16 = arith.constant 3 : index
    %25 = memref.load %arg1[%c3_16] : memref<13xf32, #tpu.memory_space<smem>>
    %26 = vector.broadcast %25 : f32 to vector<2x2x128xf32>
    %27 = arith.mulf %26, %24 : vector<2x2x128xf32>
    %28 = arith.addf %22, %27 : vector<2x2x128xf32>
    %c4 = arith.constant 4 : index
    %c0_17 = arith.constant 0 : index
    %c0_18 = arith.constant 0 : index
    %c0_19 = arith.constant 0 : index
    %29 = vector.load %arg2[%c4, %c0_17, %c0_18, %c0_19] : memref<12x2x2x128xf32, #tpu.memory_space<vmem>>, vector<1x2x2x128xf32>
    %30 = vector.shape_cast %29 : vector<1x2x2x128xf32> to vector<2x2x128xf32>
    %c4_20 = arith.constant 4 : index
    %31 = memref.load %arg1[%c4_20] : memref<13xf32, #tpu.memory_space<smem>>
    %32 = vector.broadcast %31 : f32 to vector<2x2x128xf32>
    %33 = arith.mulf %32, %30 : vector<2x2x128xf32>
    %34 = arith.addf %28, %33 : vector<2x2x128xf32>
    %c5 = arith.constant 5 : index
    %c0_21 = arith.constant 0 : index
    %c0_22 = arith.constant 0 : index
    %c0_23 = arith.constant 0 : index
    %35 = vector.load %arg2[%c5, %c0_21, %c0_22, %c0_23] : memref<12x2x2x128xf32, #tpu.memory_space<vmem>>, vector<1x2x2x128xf32>
    %36 = vector.shape_cast %35 : vector<1x2x2x128xf32> to vector<2x2x128xf32>
    %c5_24 = arith.constant 5 : index
    %37 = memref.load %arg1[%c5_24] : memref<13xf32, #tpu.memory_space<smem>>
    %38 = vector.broadcast %37 : f32 to vector<2x2x128xf32>
    %39 = arith.mulf %38, %36 : vector<2x2x128xf32>
    %40 = arith.addf %34, %39 : vector<2x2x128xf32>
    %c6 = arith.constant 6 : index
    %c0_25 = arith.constant 0 : index
    %c0_26 = arith.constant 0 : index
    %c0_27 = arith.constant 0 : index
    %41 = vector.load %arg2[%c6, %c0_25, %c0_26, %c0_27] : memref<12x2x2x128xf32, #tpu.memory_space<vmem>>, vector<1x2x2x128xf32>
    %42 = vector.shape_cast %41 : vector<1x2x2x128xf32> to vector<2x2x128xf32>
    %c6_28 = arith.constant 6 : index
    %43 = memref.load %arg1[%c6_28] : memref<13xf32, #tpu.memory_space<smem>>
    %44 = vector.broadcast %43 : f32 to vector<2x2x128xf32>
    %45 = arith.mulf %44, %42 : vector<2x2x128xf32>
    %46 = arith.addf %40, %45 : vector<2x2x128xf32>
    %c7 = arith.constant 7 : index
    %c0_29 = arith.constant 0 : index
    %c0_30 = arith.constant 0 : index
    %c0_31 = arith.constant 0 : index
    %47 = vector.load %arg2[%c7, %c0_29, %c0_30, %c0_31] : memref<12x2x2x128xf32, #tpu.memory_space<vmem>>, vector<1x2x2x128xf32>
    %48 = vector.shape_cast %47 : vector<1x2x2x128xf32> to vector<2x2x128xf32>
    %c7_32 = arith.constant 7 : index
    %49 = memref.load %arg1[%c7_32] : memref<13xf32, #tpu.memory_space<smem>>
    %50 = vector.broadcast %49 : f32 to vector<2x2x128xf32>
    %51 = arith.mulf %50, %48 : vector<2x2x128xf32>
    %52 = arith.addf %46, %51 : vector<2x2x128xf32>
    %c8 = arith.constant 8 : index
    %c0_33 = arith.constant 0 : index
    %c0_34 = arith.constant 0 : index
    %c0_35 = arith.constant 0 : index
    %53 = vector.load %arg2[%c8, %c0_33, %c0_34, %c0_35] : memref<12x2x2x128xf32, #tpu.memory_space<vmem>>, vector<1x2x2x128xf32>
    %54 = vector.shape_cast %53 : vector<1x2x2x128xf32> to vector<2x2x128xf32>
    %c8_36 = arith.constant 8 : index
    %55 = memref.load %arg1[%c8_36] : memref<13xf32, #tpu.memory_space<smem>>
    %56 = vector.broadcast %55 : f32 to vector<2x2x128xf32>
    %57 = arith.mulf %56, %54 : vector<2x2x128xf32>
    %58 = arith.addf %52, %57 : vector<2x2x128xf32>
    %c9 = arith.constant 9 : index
    %c0_37 = arith.constant 0 : index
    %c0_38 = arith.constant 0 : index
    %c0_39 = arith.constant 0 : index
    %59 = vector.load %arg2[%c9, %c0_37, %c0_38, %c0_39] : memref<12x2x2x128xf32, #tpu.memory_space<vmem>>, vector<1x2x2x128xf32>
    %60 = vector.shape_cast %59 : vector<1x2x2x128xf32> to vector<2x2x128xf32>
    %c9_40 = arith.constant 9 : index
    %61 = memref.load %arg1[%c9_40] : memref<13xf32, #tpu.memory_space<smem>>
    %62 = vector.broadcast %61 : f32 to vector<2x2x128xf32>
    %63 = arith.mulf %62, %60 : vector<2x2x128xf32>
    %64 = arith.addf %58, %63 : vector<2x2x128xf32>
    %c10 = arith.constant 10 : index
    %c0_41 = arith.constant 0 : index
    %c0_42 = arith.constant 0 : index
    %c0_43 = arith.constant 0 : index
    %65 = vector.load %arg2[%c10, %c0_41, %c0_42, %c0_43] : memref<12x2x2x128xf32, #tpu.memory_space<vmem>>, vector<1x2x2x128xf32>
    %66 = vector.shape_cast %65 : vector<1x2x2x128xf32> to vector<2x2x128xf32>
    %c10_44 = arith.constant 10 : index
    %67 = memref.load %arg1[%c10_44] : memref<13xf32, #tpu.memory_space<smem>>
    %68 = vector.broadcast %67 : f32 to vector<2x2x128xf32>
    %69 = arith.mulf %68, %66 : vector<2x2x128xf32>
    %70 = arith.addf %64, %69 : vector<2x2x128xf32>
    %c11 = arith.constant 11 : index
    %c0_45 = arith.constant 0 : index
    %c0_46 = arith.constant 0 : index
    %c0_47 = arith.constant 0 : index
    %71 = vector.load %arg2[%c11, %c0_45, %c0_46, %c0_47] : memref<12x2x2x128xf32, #tpu.memory_space<vmem>>, vector<1x2x2x128xf32>
    %72 = vector.shape_cast %71 : vector<1x2x2x128xf32> to vector<2x2x128xf32>
    %c11_48 = arith.constant 11 : index
    %73 = memref.load %arg1[%c11_48] : memref<13xf32, #tpu.memory_space<smem>>
    %74 = vector.broadcast %73 : f32 to vector<2x2x128xf32>
    %75 = arith.mulf %74, %72 : vector<2x2x128xf32>
    %76 = arith.addf %70, %75 : vector<2x2x128xf32>
    %c0_49 = arith.constant 0 : index
    %c0_50 = arith.constant 0 : index
    %c0_51 = arith.constant 0 : index
    %c0_52 = arith.constant 0 : index
    %77 = vector.load %arg3[%c0_49, %c0_50, %c0_51, %c0_52] : memref<1x2x2x128xf32, #tpu.memory_space<vmem>>, vector<1x2x2x128xf32>
    %78 = vector.shape_cast %77 : vector<1x2x2x128xf32> to vector<2x2x128xf32>
    %79 = vector.shape_cast %76 : vector<2x2x128xf32> to vector<1x2x2x128xf32>
    tpu.vector_store %arg3[%c0_49, %c0_50, %c0_51, %c0_52], %79 {strides = array<i32>} : memref<1x2x2x128xf32, #tpu.memory_space<vmem>>, vector<1x2x2x128xf32>,
    %80 = vector.extract_strided_slice %76 {offsets = [0, 0, 0], sizes = [1, 2, 128], strides = [1, 1, 1]} : vector<2x2x128xf32> to vector<1x2x128xf32>
    %81 = vector.shape_cast %80 : vector<1x2x128xf32> to vector<2x128xf32>
    %82 = vector.extract_strided_slice %76 {offsets = [1, 0, 0], sizes = [1, 2, 128], strides = [1, 1, 1]} : vector<2x2x128xf32> to vector<1x2x128xf32>
    %83 = vector.shape_cast %82 : vector<1x2x128xf32> to vector<2x128xf32>
    %84 = arith.subf %81, %83 : vector<2x128xf32>
    %85 = math.absf %84 : vector<2x128xf32>
    %86 = vector.shape_cast %85 : vector<2x128xf32> to vector<1x2x128xf32>
    %cst = arith.constant dense<0.000000e+00> : vector<1xf32>
    %87 = vector.multi_reduction <add>, %86, %cst [1, 2] : vector<1x2x128xf32> to vector<1xf32>
    %88 = vector.shape_cast %87 : vector<1xf32> to vector<1x1x1xf32>
    %89 = vector.extract %88[0, 0, 0] : f32 from vector<1x1x1xf32>
    %cst_53 = arith.constant 0.000000e+00 : f32
    %90 = arith.addf %cst_53, %89 : f32
    %c0_54 = arith.constant 0 : index
    %c0_55 = arith.constant 0 : index
    %91 = vector.load %arg4[%c0_54, %c0_55] : memref<1x1xf32, #tpu.memory_space<vmem>>, vector<1x1xf32>
    %92 = vector.broadcast %90 : f32 to vector<1x1xf32>
    %93 = arith.addf %91, %92 : vector<1x1xf32>
    %c0_56 = arith.constant 0 : index
    %c0_57 = arith.constant 0 : index
    %94 = vector.load %arg4[%c0_56, %c0_57] : memref<1x1xf32, #tpu.memory_space<vmem>>, vector<1x1xf32>
    tpu.vector_store %arg4[%c0_56, %c0_57], %93 {strides = array<i32>} : memref<1x1xf32, #tpu.memory_space<vmem>>, vector<1x1xf32>,
    return
  }
  func.func @transform_0(%arg0: i32) -> i32 {
    %c0_i32 = arith.constant 0 : i32
    %c0_i32_0 = arith.constant 0 : i32
    return %c0_i32 : i32
  }
  func.func @transform_1(%arg0: i32) -> (i32, i32, i32, i32) {
    %c0_i32 = arith.constant 0 : i32
    %c0_i32_0 = arith.constant 0 : i32
    %c0_i32_1 = arith.constant 0 : i32
    %c0_i32_2 = arith.constant 0 : i32
    return %c0_i32, %c0_i32_0, %c0_i32_1, %arg0 : i32, i32, i32, i32
  }
  func.func @transform_2(%arg0: i32) -> (i32, i32, i32, i32) {
    %c0_i32 = arith.constant 0 : i32
    %c0_i32_0 = arith.constant 0 : i32
    %c0_i32_1 = arith.constant 0 : i32
    %c0_i32_2 = arith.constant 0 : i32
    return %c0_i32, %c0_i32_0, %c0_i32_1, %arg0 : i32, i32, i32, i32
  }
  func.func @transform_3(%arg0: i32) -> (i32, i32) {
    %c0_i32 = arith.constant 0 : i32
    %c0_i32_0 = arith.constant 0 : i32
    %c0_i32_1 = arith.constant 0 : i32
    return %c0_i32, %c0_i32_0 : i32, i32
  }
}

module attributes {stable_mosaic.version = 11 : i64} {
  func.func @_conv_pair_kernel(%arg0: i32, %arg1: memref<84xf32, #tpu.memory_space<smem>>, %arg2: memref<20x2x4x128xf32, #tpu.memory_space<vmem>>, %arg3: memref<4x2x4x128xf32, #tpu.memory_space<vmem>>, %arg4: memref<1x1xf32, #tpu.memory_space<vmem>>) attributes {dimension_semantics = [#tpu.dimension_semantics<arbitrary>], iteration_bounds = array<i64: 1>, scalar_prefetch = 0 : i64, scratch_operands = 0 : i64, tpu.core_type = #tpu.core_type<tc>, window_params = [{transform_indices = @transform_0, window_bounds = array<i64: 84>}, {transform_indices = @transform_1, window_bounds = array<i64: 20, 2, 4, 128>}, {transform_indices = @transform_2, window_bounds = array<i64: 4, 2, 4, 128>}, {pipeline_mode = #tpu.pipeline_mode<synchronous>, transform_indices = @transform_3, window_bounds = array<i64: 1, 1>}]} {
    %c0_i32 = arith.constant 0 : i32
    %0 = arith.cmpi eq, %arg0, %c0_i32 : i32
    %1 = arith.extui %0 : i1 to i32
    %c0_i32_0 = arith.constant 0 : i32
    %2 = arith.cmpi ne, %1, %c0_i32_0 : i32
    scf.if %2 {
      %cst_113 = arith.constant 0.000000e+00 : f32
      %451 = vector.broadcast %cst_113 : f32 to vector<1x1xf32>
      %c0_114 = arith.constant 0 : index
      %c0_115 = arith.constant 0 : index
      %452 = vector.load %arg4[%c0_114, %c0_115] : memref<1x1xf32, #tpu.memory_space<vmem>>, vector<1x1xf32>
      tpu.vector_store %arg4[%c0_114, %c0_115], %451 {strides = array<i32>} : memref<1x1xf32, #tpu.memory_space<vmem>>, vector<1x1xf32>,
    } else {
    }
    %c80 = arith.constant 80 : index
    %3 = memref.load %arg1[%c80] : memref<84xf32, #tpu.memory_space<smem>>
    %4 = vector.broadcast %3 : f32 to vector<2x4x128xf32>
    %c81 = arith.constant 81 : index
    %5 = memref.load %arg1[%c81] : memref<84xf32, #tpu.memory_space<smem>>
    %6 = vector.broadcast %5 : f32 to vector<2x4x128xf32>
    %c82 = arith.constant 82 : index
    %7 = memref.load %arg1[%c82] : memref<84xf32, #tpu.memory_space<smem>>
    %8 = vector.broadcast %7 : f32 to vector<2x4x128xf32>
    %c83 = arith.constant 83 : index
    %9 = memref.load %arg1[%c83] : memref<84xf32, #tpu.memory_space<smem>>
    %10 = vector.broadcast %9 : f32 to vector<2x4x128xf32>
    %c0 = arith.constant 0 : index
    %c0_1 = arith.constant 0 : index
    %c0_2 = arith.constant 0 : index
    %c0_3 = arith.constant 0 : index
    %11 = vector.load %arg2[%c0, %c0_1, %c0_2, %c0_3] : memref<20x2x4x128xf32, #tpu.memory_space<vmem>>, vector<1x2x4x128xf32>
    %12 = vector.shape_cast %11 : vector<1x2x4x128xf32> to vector<2x4x128xf32>
    %c0_4 = arith.constant 0 : index
    %13 = memref.load %arg1[%c0_4] : memref<84xf32, #tpu.memory_space<smem>>
    %14 = vector.broadcast %13 : f32 to vector<2x4x128xf32>
    %15 = arith.mulf %14, %12 : vector<2x4x128xf32>
    %16 = arith.addf %4, %15 : vector<2x4x128xf32>
    %c1 = arith.constant 1 : index
    %17 = memref.load %arg1[%c1] : memref<84xf32, #tpu.memory_space<smem>>
    %18 = vector.broadcast %17 : f32 to vector<2x4x128xf32>
    %19 = arith.mulf %18, %12 : vector<2x4x128xf32>
    %20 = arith.addf %6, %19 : vector<2x4x128xf32>
    %c2 = arith.constant 2 : index
    %21 = memref.load %arg1[%c2] : memref<84xf32, #tpu.memory_space<smem>>
    %22 = vector.broadcast %21 : f32 to vector<2x4x128xf32>
    %23 = arith.mulf %22, %12 : vector<2x4x128xf32>
    %24 = arith.addf %8, %23 : vector<2x4x128xf32>
    %c3 = arith.constant 3 : index
    %25 = memref.load %arg1[%c3] : memref<84xf32, #tpu.memory_space<smem>>
    %26 = vector.broadcast %25 : f32 to vector<2x4x128xf32>
    %27 = arith.mulf %26, %12 : vector<2x4x128xf32>
    %28 = arith.addf %10, %27 : vector<2x4x128xf32>
    %c1_5 = arith.constant 1 : index
    %c0_6 = arith.constant 0 : index
    %c0_7 = arith.constant 0 : index
    %c0_8 = arith.constant 0 : index
    %29 = vector.load %arg2[%c1_5, %c0_6, %c0_7, %c0_8] : memref<20x2x4x128xf32, #tpu.memory_space<vmem>>, vector<1x2x4x128xf32>
    %30 = vector.shape_cast %29 : vector<1x2x4x128xf32> to vector<2x4x128xf32>
    %c4 = arith.constant 4 : index
    %31 = memref.load %arg1[%c4] : memref<84xf32, #tpu.memory_space<smem>>
    %32 = vector.broadcast %31 : f32 to vector<2x4x128xf32>
    %33 = arith.mulf %32, %30 : vector<2x4x128xf32>
    %34 = arith.addf %16, %33 : vector<2x4x128xf32>
    %c5 = arith.constant 5 : index
    %35 = memref.load %arg1[%c5] : memref<84xf32, #tpu.memory_space<smem>>
    %36 = vector.broadcast %35 : f32 to vector<2x4x128xf32>
    %37 = arith.mulf %36, %30 : vector<2x4x128xf32>
    %38 = arith.addf %20, %37 : vector<2x4x128xf32>
    %c6 = arith.constant 6 : index
    %39 = memref.load %arg1[%c6] : memref<84xf32, #tpu.memory_space<smem>>
    %40 = vector.broadcast %39 : f32 to vector<2x4x128xf32>
    %41 = arith.mulf %40, %30 : vector<2x4x128xf32>
    %42 = arith.addf %24, %41 : vector<2x4x128xf32>
    %c7 = arith.constant 7 : index
    %43 = memref.load %arg1[%c7] : memref<84xf32, #tpu.memory_space<smem>>
    %44 = vector.broadcast %43 : f32 to vector<2x4x128xf32>
    %45 = arith.mulf %44, %30 : vector<2x4x128xf32>
    %46 = arith.addf %28, %45 : vector<2x4x128xf32>
    %c2_9 = arith.constant 2 : index
    %c0_10 = arith.constant 0 : index
    %c0_11 = arith.constant 0 : index
    %c0_12 = arith.constant 0 : index
    %47 = vector.load %arg2[%c2_9, %c0_10, %c0_11, %c0_12] : memref<20x2x4x128xf32, #tpu.memory_space<vmem>>, vector<1x2x4x128xf32>
    %48 = vector.shape_cast %47 : vector<1x2x4x128xf32> to vector<2x4x128xf32>
    %c8 = arith.constant 8 : index
    %49 = memref.load %arg1[%c8] : memref<84xf32, #tpu.memory_space<smem>>
    %50 = vector.broadcast %49 : f32 to vector<2x4x128xf32>
    %51 = arith.mulf %50, %48 : vector<2x4x128xf32>
    %52 = arith.addf %34, %51 : vector<2x4x128xf32>
    %c9 = arith.constant 9 : index
    %53 = memref.load %arg1[%c9] : memref<84xf32, #tpu.memory_space<smem>>
    %54 = vector.broadcast %53 : f32 to vector<2x4x128xf32>
    %55 = arith.mulf %54, %48 : vector<2x4x128xf32>
    %56 = arith.addf %38, %55 : vector<2x4x128xf32>
    %c10 = arith.constant 10 : index
    %57 = memref.load %arg1[%c10] : memref<84xf32, #tpu.memory_space<smem>>
    %58 = vector.broadcast %57 : f32 to vector<2x4x128xf32>
    %59 = arith.mulf %58, %48 : vector<2x4x128xf32>
    %60 = arith.addf %42, %59 : vector<2x4x128xf32>
    %c11 = arith.constant 11 : index
    %61 = memref.load %arg1[%c11] : memref<84xf32, #tpu.memory_space<smem>>
    %62 = vector.broadcast %61 : f32 to vector<2x4x128xf32>
    %63 = arith.mulf %62, %48 : vector<2x4x128xf32>
    %64 = arith.addf %46, %63 : vector<2x4x128xf32>
    %c3_13 = arith.constant 3 : index
    %c0_14 = arith.constant 0 : index
    %c0_15 = arith.constant 0 : index
    %c0_16 = arith.constant 0 : index
    %65 = vector.load %arg2[%c3_13, %c0_14, %c0_15, %c0_16] : memref<20x2x4x128xf32, #tpu.memory_space<vmem>>, vector<1x2x4x128xf32>
    %66 = vector.shape_cast %65 : vector<1x2x4x128xf32> to vector<2x4x128xf32>
    %c12 = arith.constant 12 : index
    %67 = memref.load %arg1[%c12] : memref<84xf32, #tpu.memory_space<smem>>
    %68 = vector.broadcast %67 : f32 to vector<2x4x128xf32>
    %69 = arith.mulf %68, %66 : vector<2x4x128xf32>
    %70 = arith.addf %52, %69 : vector<2x4x128xf32>
    %c13 = arith.constant 13 : index
    %71 = memref.load %arg1[%c13] : memref<84xf32, #tpu.memory_space<smem>>
    %72 = vector.broadcast %71 : f32 to vector<2x4x128xf32>
    %73 = arith.mulf %72, %66 : vector<2x4x128xf32>
    %74 = arith.addf %56, %73 : vector<2x4x128xf32>
    %c14 = arith.constant 14 : index
    %75 = memref.load %arg1[%c14] : memref<84xf32, #tpu.memory_space<smem>>
    %76 = vector.broadcast %75 : f32 to vector<2x4x128xf32>
    %77 = arith.mulf %76, %66 : vector<2x4x128xf32>
    %78 = arith.addf %60, %77 : vector<2x4x128xf32>
    %c15 = arith.constant 15 : index
    %79 = memref.load %arg1[%c15] : memref<84xf32, #tpu.memory_space<smem>>
    %80 = vector.broadcast %79 : f32 to vector<2x4x128xf32>
    %81 = arith.mulf %80, %66 : vector<2x4x128xf32>
    %82 = arith.addf %64, %81 : vector<2x4x128xf32>
    %c4_17 = arith.constant 4 : index
    %c0_18 = arith.constant 0 : index
    %c0_19 = arith.constant 0 : index
    %c0_20 = arith.constant 0 : index
    %83 = vector.load %arg2[%c4_17, %c0_18, %c0_19, %c0_20] : memref<20x2x4x128xf32, #tpu.memory_space<vmem>>, vector<1x2x4x128xf32>
    %84 = vector.shape_cast %83 : vector<1x2x4x128xf32> to vector<2x4x128xf32>
    %c16 = arith.constant 16 : index
    %85 = memref.load %arg1[%c16] : memref<84xf32, #tpu.memory_space<smem>>
    %86 = vector.broadcast %85 : f32 to vector<2x4x128xf32>
    %87 = arith.mulf %86, %84 : vector<2x4x128xf32>
    %88 = arith.addf %70, %87 : vector<2x4x128xf32>
    %c17 = arith.constant 17 : index
    %89 = memref.load %arg1[%c17] : memref<84xf32, #tpu.memory_space<smem>>
    %90 = vector.broadcast %89 : f32 to vector<2x4x128xf32>
    %91 = arith.mulf %90, %84 : vector<2x4x128xf32>
    %92 = arith.addf %74, %91 : vector<2x4x128xf32>
    %c18 = arith.constant 18 : index
    %93 = memref.load %arg1[%c18] : memref<84xf32, #tpu.memory_space<smem>>
    %94 = vector.broadcast %93 : f32 to vector<2x4x128xf32>
    %95 = arith.mulf %94, %84 : vector<2x4x128xf32>
    %96 = arith.addf %78, %95 : vector<2x4x128xf32>
    %c19 = arith.constant 19 : index
    %97 = memref.load %arg1[%c19] : memref<84xf32, #tpu.memory_space<smem>>
    %98 = vector.broadcast %97 : f32 to vector<2x4x128xf32>
    %99 = arith.mulf %98, %84 : vector<2x4x128xf32>
    %100 = arith.addf %82, %99 : vector<2x4x128xf32>
    %c5_21 = arith.constant 5 : index
    %c0_22 = arith.constant 0 : index
    %c0_23 = arith.constant 0 : index
    %c0_24 = arith.constant 0 : index
    %101 = vector.load %arg2[%c5_21, %c0_22, %c0_23, %c0_24] : memref<20x2x4x128xf32, #tpu.memory_space<vmem>>, vector<1x2x4x128xf32>
    %102 = vector.shape_cast %101 : vector<1x2x4x128xf32> to vector<2x4x128xf32>
    %c20 = arith.constant 20 : index
    %103 = memref.load %arg1[%c20] : memref<84xf32, #tpu.memory_space<smem>>
    %104 = vector.broadcast %103 : f32 to vector<2x4x128xf32>
    %105 = arith.mulf %104, %102 : vector<2x4x128xf32>
    %106 = arith.addf %88, %105 : vector<2x4x128xf32>
    %c21 = arith.constant 21 : index
    %107 = memref.load %arg1[%c21] : memref<84xf32, #tpu.memory_space<smem>>
    %108 = vector.broadcast %107 : f32 to vector<2x4x128xf32>
    %109 = arith.mulf %108, %102 : vector<2x4x128xf32>
    %110 = arith.addf %92, %109 : vector<2x4x128xf32>
    %c22 = arith.constant 22 : index
    %111 = memref.load %arg1[%c22] : memref<84xf32, #tpu.memory_space<smem>>
    %112 = vector.broadcast %111 : f32 to vector<2x4x128xf32>
    %113 = arith.mulf %112, %102 : vector<2x4x128xf32>
    %114 = arith.addf %96, %113 : vector<2x4x128xf32>
    %c23 = arith.constant 23 : index
    %115 = memref.load %arg1[%c23] : memref<84xf32, #tpu.memory_space<smem>>
    %116 = vector.broadcast %115 : f32 to vector<2x4x128xf32>
    %117 = arith.mulf %116, %102 : vector<2x4x128xf32>
    %118 = arith.addf %100, %117 : vector<2x4x128xf32>
    %c6_25 = arith.constant 6 : index
    %c0_26 = arith.constant 0 : index
    %c0_27 = arith.constant 0 : index
    %c0_28 = arith.constant 0 : index
    %119 = vector.load %arg2[%c6_25, %c0_26, %c0_27, %c0_28] : memref<20x2x4x128xf32, #tpu.memory_space<vmem>>, vector<1x2x4x128xf32>
    %120 = vector.shape_cast %119 : vector<1x2x4x128xf32> to vector<2x4x128xf32>
    %c24 = arith.constant 24 : index
    %121 = memref.load %arg1[%c24] : memref<84xf32, #tpu.memory_space<smem>>
    %122 = vector.broadcast %121 : f32 to vector<2x4x128xf32>
    %123 = arith.mulf %122, %120 : vector<2x4x128xf32>
    %124 = arith.addf %106, %123 : vector<2x4x128xf32>
    %c25 = arith.constant 25 : index
    %125 = memref.load %arg1[%c25] : memref<84xf32, #tpu.memory_space<smem>>
    %126 = vector.broadcast %125 : f32 to vector<2x4x128xf32>
    %127 = arith.mulf %126, %120 : vector<2x4x128xf32>
    %128 = arith.addf %110, %127 : vector<2x4x128xf32>
    %c26 = arith.constant 26 : index
    %129 = memref.load %arg1[%c26] : memref<84xf32, #tpu.memory_space<smem>>
    %130 = vector.broadcast %129 : f32 to vector<2x4x128xf32>
    %131 = arith.mulf %130, %120 : vector<2x4x128xf32>
    %132 = arith.addf %114, %131 : vector<2x4x128xf32>
    %c27 = arith.constant 27 : index
    %133 = memref.load %arg1[%c27] : memref<84xf32, #tpu.memory_space<smem>>
    %134 = vector.broadcast %133 : f32 to vector<2x4x128xf32>
    %135 = arith.mulf %134, %120 : vector<2x4x128xf32>
    %136 = arith.addf %118, %135 : vector<2x4x128xf32>
    %c7_29 = arith.constant 7 : index
    %c0_30 = arith.constant 0 : index
    %c0_31 = arith.constant 0 : index
    %c0_32 = arith.constant 0 : index
    %137 = vector.load %arg2[%c7_29, %c0_30, %c0_31, %c0_32] : memref<20x2x4x128xf32, #tpu.memory_space<vmem>>, vector<1x2x4x128xf32>
    %138 = vector.shape_cast %137 : vector<1x2x4x128xf32> to vector<2x4x128xf32>
    %c28 = arith.constant 28 : index
    %139 = memref.load %arg1[%c28] : memref<84xf32, #tpu.memory_space<smem>>
    %140 = vector.broadcast %139 : f32 to vector<2x4x128xf32>
    %141 = arith.mulf %140, %138 : vector<2x4x128xf32>
    %142 = arith.addf %124, %141 : vector<2x4x128xf32>
    %c29 = arith.constant 29 : index
    %143 = memref.load %arg1[%c29] : memref<84xf32, #tpu.memory_space<smem>>
    %144 = vector.broadcast %143 : f32 to vector<2x4x128xf32>
    %145 = arith.mulf %144, %138 : vector<2x4x128xf32>
    %146 = arith.addf %128, %145 : vector<2x4x128xf32>
    %c30 = arith.constant 30 : index
    %147 = memref.load %arg1[%c30] : memref<84xf32, #tpu.memory_space<smem>>
    %148 = vector.broadcast %147 : f32 to vector<2x4x128xf32>
    %149 = arith.mulf %148, %138 : vector<2x4x128xf32>
    %150 = arith.addf %132, %149 : vector<2x4x128xf32>
    %c31 = arith.constant 31 : index
    %151 = memref.load %arg1[%c31] : memref<84xf32, #tpu.memory_space<smem>>
    %152 = vector.broadcast %151 : f32 to vector<2x4x128xf32>
    %153 = arith.mulf %152, %138 : vector<2x4x128xf32>
    %154 = arith.addf %136, %153 : vector<2x4x128xf32>
    %c8_33 = arith.constant 8 : index
    %c0_34 = arith.constant 0 : index
    %c0_35 = arith.constant 0 : index
    %c0_36 = arith.constant 0 : index
    %155 = vector.load %arg2[%c8_33, %c0_34, %c0_35, %c0_36] : memref<20x2x4x128xf32, #tpu.memory_space<vmem>>, vector<1x2x4x128xf32>
    %156 = vector.shape_cast %155 : vector<1x2x4x128xf32> to vector<2x4x128xf32>
    %c32 = arith.constant 32 : index
    %157 = memref.load %arg1[%c32] : memref<84xf32, #tpu.memory_space<smem>>
    %158 = vector.broadcast %157 : f32 to vector<2x4x128xf32>
    %159 = arith.mulf %158, %156 : vector<2x4x128xf32>
    %160 = arith.addf %142, %159 : vector<2x4x128xf32>
    %c33 = arith.constant 33 : index
    %161 = memref.load %arg1[%c33] : memref<84xf32, #tpu.memory_space<smem>>
    %162 = vector.broadcast %161 : f32 to vector<2x4x128xf32>
    %163 = arith.mulf %162, %156 : vector<2x4x128xf32>
    %164 = arith.addf %146, %163 : vector<2x4x128xf32>
    %c34 = arith.constant 34 : index
    %165 = memref.load %arg1[%c34] : memref<84xf32, #tpu.memory_space<smem>>
    %166 = vector.broadcast %165 : f32 to vector<2x4x128xf32>
    %167 = arith.mulf %166, %156 : vector<2x4x128xf32>
    %168 = arith.addf %150, %167 : vector<2x4x128xf32>
    %c35 = arith.constant 35 : index
    %169 = memref.load %arg1[%c35] : memref<84xf32, #tpu.memory_space<smem>>
    %170 = vector.broadcast %169 : f32 to vector<2x4x128xf32>
    %171 = arith.mulf %170, %156 : vector<2x4x128xf32>
    %172 = arith.addf %154, %171 : vector<2x4x128xf32>
    %c9_37 = arith.constant 9 : index
    %c0_38 = arith.constant 0 : index
    %c0_39 = arith.constant 0 : index
    %c0_40 = arith.constant 0 : index
    %173 = vector.load %arg2[%c9_37, %c0_38, %c0_39, %c0_40] : memref<20x2x4x128xf32, #tpu.memory_space<vmem>>, vector<1x2x4x128xf32>
    %174 = vector.shape_cast %173 : vector<1x2x4x128xf32> to vector<2x4x128xf32>
    %c36 = arith.constant 36 : index
    %175 = memref.load %arg1[%c36] : memref<84xf32, #tpu.memory_space<smem>>
    %176 = vector.broadcast %175 : f32 to vector<2x4x128xf32>
    %177 = arith.mulf %176, %174 : vector<2x4x128xf32>
    %178 = arith.addf %160, %177 : vector<2x4x128xf32>
    %c37 = arith.constant 37 : index
    %179 = memref.load %arg1[%c37] : memref<84xf32, #tpu.memory_space<smem>>
    %180 = vector.broadcast %179 : f32 to vector<2x4x128xf32>
    %181 = arith.mulf %180, %174 : vector<2x4x128xf32>
    %182 = arith.addf %164, %181 : vector<2x4x128xf32>
    %c38 = arith.constant 38 : index
    %183 = memref.load %arg1[%c38] : memref<84xf32, #tpu.memory_space<smem>>
    %184 = vector.broadcast %183 : f32 to vector<2x4x128xf32>
    %185 = arith.mulf %184, %174 : vector<2x4x128xf32>
    %186 = arith.addf %168, %185 : vector<2x4x128xf32>
    %c39 = arith.constant 39 : index
    %187 = memref.load %arg1[%c39] : memref<84xf32, #tpu.memory_space<smem>>
    %188 = vector.broadcast %187 : f32 to vector<2x4x128xf32>
    %189 = arith.mulf %188, %174 : vector<2x4x128xf32>
    %190 = arith.addf %172, %189 : vector<2x4x128xf32>
    %c10_41 = arith.constant 10 : index
    %c0_42 = arith.constant 0 : index
    %c0_43 = arith.constant 0 : index
    %c0_44 = arith.constant 0 : index
    %191 = vector.load %arg2[%c10_41, %c0_42, %c0_43, %c0_44] : memref<20x2x4x128xf32, #tpu.memory_space<vmem>>, vector<1x2x4x128xf32>
    %192 = vector.shape_cast %191 : vector<1x2x4x128xf32> to vector<2x4x128xf32>
    %c40 = arith.constant 40 : index
    %193 = memref.load %arg1[%c40] : memref<84xf32, #tpu.memory_space<smem>>
    %194 = vector.broadcast %193 : f32 to vector<2x4x128xf32>
    %195 = arith.mulf %194, %192 : vector<2x4x128xf32>
    %196 = arith.addf %178, %195 : vector<2x4x128xf32>
    %c41 = arith.constant 41 : index
    %197 = memref.load %arg1[%c41] : memref<84xf32, #tpu.memory_space<smem>>
    %198 = vector.broadcast %197 : f32 to vector<2x4x128xf32>
    %199 = arith.mulf %198, %192 : vector<2x4x128xf32>
    %200 = arith.addf %182, %199 : vector<2x4x128xf32>
    %c42 = arith.constant 42 : index
    %201 = memref.load %arg1[%c42] : memref<84xf32, #tpu.memory_space<smem>>
    %202 = vector.broadcast %201 : f32 to vector<2x4x128xf32>
    %203 = arith.mulf %202, %192 : vector<2x4x128xf32>
    %204 = arith.addf %186, %203 : vector<2x4x128xf32>
    %c43 = arith.constant 43 : index
    %205 = memref.load %arg1[%c43] : memref<84xf32, #tpu.memory_space<smem>>
    %206 = vector.broadcast %205 : f32 to vector<2x4x128xf32>
    %207 = arith.mulf %206, %192 : vector<2x4x128xf32>
    %208 = arith.addf %190, %207 : vector<2x4x128xf32>
    %c11_45 = arith.constant 11 : index
    %c0_46 = arith.constant 0 : index
    %c0_47 = arith.constant 0 : index
    %c0_48 = arith.constant 0 : index
    %209 = vector.load %arg2[%c11_45, %c0_46, %c0_47, %c0_48] : memref<20x2x4x128xf32, #tpu.memory_space<vmem>>, vector<1x2x4x128xf32>
    %210 = vector.shape_cast %209 : vector<1x2x4x128xf32> to vector<2x4x128xf32>
    %c44 = arith.constant 44 : index
    %211 = memref.load %arg1[%c44] : memref<84xf32, #tpu.memory_space<smem>>
    %212 = vector.broadcast %211 : f32 to vector<2x4x128xf32>
    %213 = arith.mulf %212, %210 : vector<2x4x128xf32>
    %214 = arith.addf %196, %213 : vector<2x4x128xf32>
    %c45 = arith.constant 45 : index
    %215 = memref.load %arg1[%c45] : memref<84xf32, #tpu.memory_space<smem>>
    %216 = vector.broadcast %215 : f32 to vector<2x4x128xf32>
    %217 = arith.mulf %216, %210 : vector<2x4x128xf32>
    %218 = arith.addf %200, %217 : vector<2x4x128xf32>
    %c46 = arith.constant 46 : index
    %219 = memref.load %arg1[%c46] : memref<84xf32, #tpu.memory_space<smem>>
    %220 = vector.broadcast %219 : f32 to vector<2x4x128xf32>
    %221 = arith.mulf %220, %210 : vector<2x4x128xf32>
    %222 = arith.addf %204, %221 : vector<2x4x128xf32>
    %c47 = arith.constant 47 : index
    %223 = memref.load %arg1[%c47] : memref<84xf32, #tpu.memory_space<smem>>
    %224 = vector.broadcast %223 : f32 to vector<2x4x128xf32>
    %225 = arith.mulf %224, %210 : vector<2x4x128xf32>
    %226 = arith.addf %208, %225 : vector<2x4x128xf32>
    %c12_49 = arith.constant 12 : index
    %c0_50 = arith.constant 0 : index
    %c0_51 = arith.constant 0 : index
    %c0_52 = arith.constant 0 : index
    %227 = vector.load %arg2[%c12_49, %c0_50, %c0_51, %c0_52] : memref<20x2x4x128xf32, #tpu.memory_space<vmem>>, vector<1x2x4x128xf32>
    %228 = vector.shape_cast %227 : vector<1x2x4x128xf32> to vector<2x4x128xf32>
    %c48 = arith.constant 48 : index
    %229 = memref.load %arg1[%c48] : memref<84xf32, #tpu.memory_space<smem>>
    %230 = vector.broadcast %229 : f32 to vector<2x4x128xf32>
    %231 = arith.mulf %230, %228 : vector<2x4x128xf32>
    %232 = arith.addf %214, %231 : vector<2x4x128xf32>
    %c49 = arith.constant 49 : index
    %233 = memref.load %arg1[%c49] : memref<84xf32, #tpu.memory_space<smem>>
    %234 = vector.broadcast %233 : f32 to vector<2x4x128xf32>
    %235 = arith.mulf %234, %228 : vector<2x4x128xf32>
    %236 = arith.addf %218, %235 : vector<2x4x128xf32>
    %c50 = arith.constant 50 : index
    %237 = memref.load %arg1[%c50] : memref<84xf32, #tpu.memory_space<smem>>
    %238 = vector.broadcast %237 : f32 to vector<2x4x128xf32>
    %239 = arith.mulf %238, %228 : vector<2x4x128xf32>
    %240 = arith.addf %222, %239 : vector<2x4x128xf32>
    %c51 = arith.constant 51 : index
    %241 = memref.load %arg1[%c51] : memref<84xf32, #tpu.memory_space<smem>>
    %242 = vector.broadcast %241 : f32 to vector<2x4x128xf32>
    %243 = arith.mulf %242, %228 : vector<2x4x128xf32>
    %244 = arith.addf %226, %243 : vector<2x4x128xf32>
    %c13_53 = arith.constant 13 : index
    %c0_54 = arith.constant 0 : index
    %c0_55 = arith.constant 0 : index
    %c0_56 = arith.constant 0 : index
    %245 = vector.load %arg2[%c13_53, %c0_54, %c0_55, %c0_56] : memref<20x2x4x128xf32, #tpu.memory_space<vmem>>, vector<1x2x4x128xf32>
    %246 = vector.shape_cast %245 : vector<1x2x4x128xf32> to vector<2x4x128xf32>
    %c52 = arith.constant 52 : index
    %247 = memref.load %arg1[%c52] : memref<84xf32, #tpu.memory_space<smem>>
    %248 = vector.broadcast %247 : f32 to vector<2x4x128xf32>
    %249 = arith.mulf %248, %246 : vector<2x4x128xf32>
    %250 = arith.addf %232, %249 : vector<2x4x128xf32>
    %c53 = arith.constant 53 : index
    %251 = memref.load %arg1[%c53] : memref<84xf32, #tpu.memory_space<smem>>
    %252 = vector.broadcast %251 : f32 to vector<2x4x128xf32>
    %253 = arith.mulf %252, %246 : vector<2x4x128xf32>
    %254 = arith.addf %236, %253 : vector<2x4x128xf32>
    %c54 = arith.constant 54 : index
    %255 = memref.load %arg1[%c54] : memref<84xf32, #tpu.memory_space<smem>>
    %256 = vector.broadcast %255 : f32 to vector<2x4x128xf32>
    %257 = arith.mulf %256, %246 : vector<2x4x128xf32>
    %258 = arith.addf %240, %257 : vector<2x4x128xf32>
    %c55 = arith.constant 55 : index
    %259 = memref.load %arg1[%c55] : memref<84xf32, #tpu.memory_space<smem>>
    %260 = vector.broadcast %259 : f32 to vector<2x4x128xf32>
    %261 = arith.mulf %260, %246 : vector<2x4x128xf32>
    %262 = arith.addf %244, %261 : vector<2x4x128xf32>
    %c14_57 = arith.constant 14 : index
    %c0_58 = arith.constant 0 : index
    %c0_59 = arith.constant 0 : index
    %c0_60 = arith.constant 0 : index
    %263 = vector.load %arg2[%c14_57, %c0_58, %c0_59, %c0_60] : memref<20x2x4x128xf32, #tpu.memory_space<vmem>>, vector<1x2x4x128xf32>
    %264 = vector.shape_cast %263 : vector<1x2x4x128xf32> to vector<2x4x128xf32>
    %c56 = arith.constant 56 : index
    %265 = memref.load %arg1[%c56] : memref<84xf32, #tpu.memory_space<smem>>
    %266 = vector.broadcast %265 : f32 to vector<2x4x128xf32>
    %267 = arith.mulf %266, %264 : vector<2x4x128xf32>
    %268 = arith.addf %250, %267 : vector<2x4x128xf32>
    %c57 = arith.constant 57 : index
    %269 = memref.load %arg1[%c57] : memref<84xf32, #tpu.memory_space<smem>>
    %270 = vector.broadcast %269 : f32 to vector<2x4x128xf32>
    %271 = arith.mulf %270, %264 : vector<2x4x128xf32>
    %272 = arith.addf %254, %271 : vector<2x4x128xf32>
    %c58 = arith.constant 58 : index
    %273 = memref.load %arg1[%c58] : memref<84xf32, #tpu.memory_space<smem>>
    %274 = vector.broadcast %273 : f32 to vector<2x4x128xf32>
    %275 = arith.mulf %274, %264 : vector<2x4x128xf32>
    %276 = arith.addf %258, %275 : vector<2x4x128xf32>
    %c59 = arith.constant 59 : index
    %277 = memref.load %arg1[%c59] : memref<84xf32, #tpu.memory_space<smem>>
    %278 = vector.broadcast %277 : f32 to vector<2x4x128xf32>
    %279 = arith.mulf %278, %264 : vector<2x4x128xf32>
    %280 = arith.addf %262, %279 : vector<2x4x128xf32>
    %c15_61 = arith.constant 15 : index
    %c0_62 = arith.constant 0 : index
    %c0_63 = arith.constant 0 : index
    %c0_64 = arith.constant 0 : index
    %281 = vector.load %arg2[%c15_61, %c0_62, %c0_63, %c0_64] : memref<20x2x4x128xf32, #tpu.memory_space<vmem>>, vector<1x2x4x128xf32>
    %282 = vector.shape_cast %281 : vector<1x2x4x128xf32> to vector<2x4x128xf32>
    %c60 = arith.constant 60 : index
    %283 = memref.load %arg1[%c60] : memref<84xf32, #tpu.memory_space<smem>>
    %284 = vector.broadcast %283 : f32 to vector<2x4x128xf32>
    %285 = arith.mulf %284, %282 : vector<2x4x128xf32>
    %286 = arith.addf %268, %285 : vector<2x4x128xf32>
    %c61 = arith.constant 61 : index
    %287 = memref.load %arg1[%c61] : memref<84xf32, #tpu.memory_space<smem>>
    %288 = vector.broadcast %287 : f32 to vector<2x4x128xf32>
    %289 = arith.mulf %288, %282 : vector<2x4x128xf32>
    %290 = arith.addf %272, %289 : vector<2x4x128xf32>
    %c62 = arith.constant 62 : index
    %291 = memref.load %arg1[%c62] : memref<84xf32, #tpu.memory_space<smem>>
    %292 = vector.broadcast %291 : f32 to vector<2x4x128xf32>
    %293 = arith.mulf %292, %282 : vector<2x4x128xf32>
    %294 = arith.addf %276, %293 : vector<2x4x128xf32>
    %c63 = arith.constant 63 : index
    %295 = memref.load %arg1[%c63] : memref<84xf32, #tpu.memory_space<smem>>
    %296 = vector.broadcast %295 : f32 to vector<2x4x128xf32>
    %297 = arith.mulf %296, %282 : vector<2x4x128xf32>
    %298 = arith.addf %280, %297 : vector<2x4x128xf32>
    %c16_65 = arith.constant 16 : index
    %c0_66 = arith.constant 0 : index
    %c0_67 = arith.constant 0 : index
    %c0_68 = arith.constant 0 : index
    %299 = vector.load %arg2[%c16_65, %c0_66, %c0_67, %c0_68] : memref<20x2x4x128xf32, #tpu.memory_space<vmem>>, vector<1x2x4x128xf32>
    %300 = vector.shape_cast %299 : vector<1x2x4x128xf32> to vector<2x4x128xf32>
    %c64 = arith.constant 64 : index
    %301 = memref.load %arg1[%c64] : memref<84xf32, #tpu.memory_space<smem>>
    %302 = vector.broadcast %301 : f32 to vector<2x4x128xf32>
    %303 = arith.mulf %302, %300 : vector<2x4x128xf32>
    %304 = arith.addf %286, %303 : vector<2x4x128xf32>
    %c65 = arith.constant 65 : index
    %305 = memref.load %arg1[%c65] : memref<84xf32, #tpu.memory_space<smem>>
    %306 = vector.broadcast %305 : f32 to vector<2x4x128xf32>
    %307 = arith.mulf %306, %300 : vector<2x4x128xf32>
    %308 = arith.addf %290, %307 : vector<2x4x128xf32>
    %c66 = arith.constant 66 : index
    %309 = memref.load %arg1[%c66] : memref<84xf32, #tpu.memory_space<smem>>
    %310 = vector.broadcast %309 : f32 to vector<2x4x128xf32>
    %311 = arith.mulf %310, %300 : vector<2x4x128xf32>
    %312 = arith.addf %294, %311 : vector<2x4x128xf32>
    %c67 = arith.constant 67 : index
    %313 = memref.load %arg1[%c67] : memref<84xf32, #tpu.memory_space<smem>>
    %314 = vector.broadcast %313 : f32 to vector<2x4x128xf32>
    %315 = arith.mulf %314, %300 : vector<2x4x128xf32>
    %316 = arith.addf %298, %315 : vector<2x4x128xf32>
    %c17_69 = arith.constant 17 : index
    %c0_70 = arith.constant 0 : index
    %c0_71 = arith.constant 0 : index
    %c0_72 = arith.constant 0 : index
    %317 = vector.load %arg2[%c17_69, %c0_70, %c0_71, %c0_72] : memref<20x2x4x128xf32, #tpu.memory_space<vmem>>, vector<1x2x4x128xf32>
    %318 = vector.shape_cast %317 : vector<1x2x4x128xf32> to vector<2x4x128xf32>
    %c68 = arith.constant 68 : index
    %319 = memref.load %arg1[%c68] : memref<84xf32, #tpu.memory_space<smem>>
    %320 = vector.broadcast %319 : f32 to vector<2x4x128xf32>
    %321 = arith.mulf %320, %318 : vector<2x4x128xf32>
    %322 = arith.addf %304, %321 : vector<2x4x128xf32>
    %c69 = arith.constant 69 : index
    %323 = memref.load %arg1[%c69] : memref<84xf32, #tpu.memory_space<smem>>
    %324 = vector.broadcast %323 : f32 to vector<2x4x128xf32>
    %325 = arith.mulf %324, %318 : vector<2x4x128xf32>
    %326 = arith.addf %308, %325 : vector<2x4x128xf32>
    %c70 = arith.constant 70 : index
    %327 = memref.load %arg1[%c70] : memref<84xf32, #tpu.memory_space<smem>>
    %328 = vector.broadcast %327 : f32 to vector<2x4x128xf32>
    %329 = arith.mulf %328, %318 : vector<2x4x128xf32>
    %330 = arith.addf %312, %329 : vector<2x4x128xf32>
    %c71 = arith.constant 71 : index
    %331 = memref.load %arg1[%c71] : memref<84xf32, #tpu.memory_space<smem>>
    %332 = vector.broadcast %331 : f32 to vector<2x4x128xf32>
    %333 = arith.mulf %332, %318 : vector<2x4x128xf32>
    %334 = arith.addf %316, %333 : vector<2x4x128xf32>
    %c18_73 = arith.constant 18 : index
    %c0_74 = arith.constant 0 : index
    %c0_75 = arith.constant 0 : index
    %c0_76 = arith.constant 0 : index
    %335 = vector.load %arg2[%c18_73, %c0_74, %c0_75, %c0_76] : memref<20x2x4x128xf32, #tpu.memory_space<vmem>>, vector<1x2x4x128xf32>
    %336 = vector.shape_cast %335 : vector<1x2x4x128xf32> to vector<2x4x128xf32>
    %c72 = arith.constant 72 : index
    %337 = memref.load %arg1[%c72] : memref<84xf32, #tpu.memory_space<smem>>
    %338 = vector.broadcast %337 : f32 to vector<2x4x128xf32>
    %339 = arith.mulf %338, %336 : vector<2x4x128xf32>
    %340 = arith.addf %322, %339 : vector<2x4x128xf32>
    %c73 = arith.constant 73 : index
    %341 = memref.load %arg1[%c73] : memref<84xf32, #tpu.memory_space<smem>>
    %342 = vector.broadcast %341 : f32 to vector<2x4x128xf32>
    %343 = arith.mulf %342, %336 : vector<2x4x128xf32>
    %344 = arith.addf %326, %343 : vector<2x4x128xf32>
    %c74 = arith.constant 74 : index
    %345 = memref.load %arg1[%c74] : memref<84xf32, #tpu.memory_space<smem>>
    %346 = vector.broadcast %345 : f32 to vector<2x4x128xf32>
    %347 = arith.mulf %346, %336 : vector<2x4x128xf32>
    %348 = arith.addf %330, %347 : vector<2x4x128xf32>
    %c75 = arith.constant 75 : index
    %349 = memref.load %arg1[%c75] : memref<84xf32, #tpu.memory_space<smem>>
    %350 = vector.broadcast %349 : f32 to vector<2x4x128xf32>
    %351 = arith.mulf %350, %336 : vector<2x4x128xf32>
    %352 = arith.addf %334, %351 : vector<2x4x128xf32>
    %c19_77 = arith.constant 19 : index
    %c0_78 = arith.constant 0 : index
    %c0_79 = arith.constant 0 : index
    %c0_80 = arith.constant 0 : index
    %353 = vector.load %arg2[%c19_77, %c0_78, %c0_79, %c0_80] : memref<20x2x4x128xf32, #tpu.memory_space<vmem>>, vector<1x2x4x128xf32>
    %354 = vector.shape_cast %353 : vector<1x2x4x128xf32> to vector<2x4x128xf32>
    %c76 = arith.constant 76 : index
    %355 = memref.load %arg1[%c76] : memref<84xf32, #tpu.memory_space<smem>>
    %356 = vector.broadcast %355 : f32 to vector<2x4x128xf32>
    %357 = arith.mulf %356, %354 : vector<2x4x128xf32>
    %358 = arith.addf %340, %357 : vector<2x4x128xf32>
    %c77 = arith.constant 77 : index
    %359 = memref.load %arg1[%c77] : memref<84xf32, #tpu.memory_space<smem>>
    %360 = vector.broadcast %359 : f32 to vector<2x4x128xf32>
    %361 = arith.mulf %360, %354 : vector<2x4x128xf32>
    %362 = arith.addf %344, %361 : vector<2x4x128xf32>
    %c78 = arith.constant 78 : index
    %363 = memref.load %arg1[%c78] : memref<84xf32, #tpu.memory_space<smem>>
    %364 = vector.broadcast %363 : f32 to vector<2x4x128xf32>
    %365 = arith.mulf %364, %354 : vector<2x4x128xf32>
    %366 = arith.addf %348, %365 : vector<2x4x128xf32>
    %c79 = arith.constant 79 : index
    %367 = memref.load %arg1[%c79] : memref<84xf32, #tpu.memory_space<smem>>
    %368 = vector.broadcast %367 : f32 to vector<2x4x128xf32>
    %369 = arith.mulf %368, %354 : vector<2x4x128xf32>
    %370 = arith.addf %352, %369 : vector<2x4x128xf32>
    %cst = arith.constant 0.000000e+00 : f32
    %371 = vector.broadcast %cst : f32 to vector<2x4x128xf32>
    %372 = arith.cmpf oge, %358, %371 : vector<2x4x128xf32>
    %cst_81 = arith.constant 1.000000e-01 : f32
    %373 = vector.broadcast %cst_81 : f32 to vector<2x4x128xf32>
    %374 = arith.mulf %373, %358 : vector<2x4x128xf32>
    %375 = arith.select %372, %358, %374 : vector<2x4x128xi1>, vector<2x4x128xf32>
    %c0_82 = arith.constant 0 : index
    %c0_83 = arith.constant 0 : index
    %c0_84 = arith.constant 0 : index
    %c0_85 = arith.constant 0 : index
    %376 = vector.load %arg3[%c0_82, %c0_83, %c0_84, %c0_85] : memref<4x2x4x128xf32, #tpu.memory_space<vmem>>, vector<1x2x4x128xf32>
    %377 = vector.shape_cast %376 : vector<1x2x4x128xf32> to vector<2x4x128xf32>
    %378 = vector.shape_cast %375 : vector<2x4x128xf32> to vector<1x2x4x128xf32>
    tpu.vector_store %arg3[%c0_82, %c0_83, %c0_84, %c0_85], %378 {strides = array<i32>} : memref<4x2x4x128xf32, #tpu.memory_space<vmem>>, vector<1x2x4x128xf32>,
    %379 = vector.extract_strided_slice %375 {offsets = [0, 0, 0], sizes = [1, 4, 128], strides = [1, 1, 1]} : vector<2x4x128xf32> to vector<1x4x128xf32>
    %380 = vector.shape_cast %379 : vector<1x4x128xf32> to vector<4x128xf32>
    %381 = vector.extract_strided_slice %375 {offsets = [1, 0, 0], sizes = [1, 4, 128], strides = [1, 1, 1]} : vector<2x4x128xf32> to vector<1x4x128xf32>
    %382 = vector.shape_cast %381 : vector<1x4x128xf32> to vector<4x128xf32>
    %383 = arith.subf %380, %382 : vector<4x128xf32>
    %384 = math.absf %383 : vector<4x128xf32>
    %385 = vector.shape_cast %384 : vector<4x128xf32> to vector<1x4x128xf32>
    %cst_86 = arith.constant dense<0.000000e+00> : vector<1xf32>
    %386 = vector.multi_reduction <add>, %385, %cst_86 [1, 2] : vector<1x4x128xf32> to vector<1xf32>
    %387 = vector.shape_cast %386 : vector<1xf32> to vector<1x1x1xf32>
    %388 = vector.extract %387[0, 0, 0] : f32 from vector<1x1x1xf32>
    %cst_87 = arith.constant 0.000000e+00 : f32
    %389 = arith.addf %cst_87, %388 : f32
    %cst_88 = arith.constant 0.000000e+00 : f32
    %390 = vector.broadcast %cst_88 : f32 to vector<2x4x128xf32>
    %391 = arith.cmpf oge, %362, %390 : vector<2x4x128xf32>
    %cst_89 = arith.constant 1.000000e-01 : f32
    %392 = vector.broadcast %cst_89 : f32 to vector<2x4x128xf32>
    %393 = arith.mulf %392, %362 : vector<2x4x128xf32>
    %394 = arith.select %391, %362, %393 : vector<2x4x128xi1>, vector<2x4x128xf32>
    %c1_90 = arith.constant 1 : index
    %c0_91 = arith.constant 0 : index
    %c0_92 = arith.constant 0 : index
    %c0_93 = arith.constant 0 : index
    %395 = vector.load %arg3[%c1_90, %c0_91, %c0_92, %c0_93] : memref<4x2x4x128xf32, #tpu.memory_space<vmem>>, vector<1x2x4x128xf32>
    %396 = vector.shape_cast %395 : vector<1x2x4x128xf32> to vector<2x4x128xf32>
    %397 = vector.shape_cast %394 : vector<2x4x128xf32> to vector<1x2x4x128xf32>
    tpu.vector_store %arg3[%c1_90, %c0_91, %c0_92, %c0_93], %397 {strides = array<i32>} : memref<4x2x4x128xf32, #tpu.memory_space<vmem>>, vector<1x2x4x128xf32>,
    %398 = vector.extract_strided_slice %394 {offsets = [0, 0, 0], sizes = [1, 4, 128], strides = [1, 1, 1]} : vector<2x4x128xf32> to vector<1x4x128xf32>
    %399 = vector.shape_cast %398 : vector<1x4x128xf32> to vector<4x128xf32>
    %400 = vector.extract_strided_slice %394 {offsets = [1, 0, 0], sizes = [1, 4, 128], strides = [1, 1, 1]} : vector<2x4x128xf32> to vector<1x4x128xf32>
    %401 = vector.shape_cast %400 : vector<1x4x128xf32> to vector<4x128xf32>
    %402 = arith.subf %399, %401 : vector<4x128xf32>
    %403 = math.absf %402 : vector<4x128xf32>
    %404 = vector.shape_cast %403 : vector<4x128xf32> to vector<1x4x128xf32>
    %cst_94 = arith.constant dense<0.000000e+00> : vector<1xf32>
    %405 = vector.multi_reduction <add>, %404, %cst_94 [1, 2] : vector<1x4x128xf32> to vector<1xf32>
    %406 = vector.shape_cast %405 : vector<1xf32> to vector<1x1x1xf32>
    %407 = vector.extract %406[0, 0, 0] : f32 from vector<1x1x1xf32>
    %408 = arith.addf %389, %407 : f32
    %cst_95 = arith.constant 0.000000e+00 : f32
    %409 = vector.broadcast %cst_95 : f32 to vector<2x4x128xf32>
    %410 = arith.cmpf oge, %366, %409 : vector<2x4x128xf32>
    %cst_96 = arith.constant 1.000000e-01 : f32
    %411 = vector.broadcast %cst_96 : f32 to vector<2x4x128xf32>
    %412 = arith.mulf %411, %366 : vector<2x4x128xf32>
    %413 = arith.select %410, %366, %412 : vector<2x4x128xi1>, vector<2x4x128xf32>
    %c2_97 = arith.constant 2 : index
    %c0_98 = arith.constant 0 : index
    %c0_99 = arith.constant 0 : index
    %c0_100 = arith.constant 0 : index
    %414 = vector.load %arg3[%c2_97, %c0_98, %c0_99, %c0_100] : memref<4x2x4x128xf32, #tpu.memory_space<vmem>>, vector<1x2x4x128xf32>
    %415 = vector.shape_cast %414 : vector<1x2x4x128xf32> to vector<2x4x128xf32>
    %416 = vector.shape_cast %413 : vector<2x4x128xf32> to vector<1x2x4x128xf32>
    tpu.vector_store %arg3[%c2_97, %c0_98, %c0_99, %c0_100], %416 {strides = array<i32>} : memref<4x2x4x128xf32, #tpu.memory_space<vmem>>, vector<1x2x4x128xf32>,
    %417 = vector.extract_strided_slice %413 {offsets = [0, 0, 0], sizes = [1, 4, 128], strides = [1, 1, 1]} : vector<2x4x128xf32> to vector<1x4x128xf32>
    %418 = vector.shape_cast %417 : vector<1x4x128xf32> to vector<4x128xf32>
    %419 = vector.extract_strided_slice %413 {offsets = [1, 0, 0], sizes = [1, 4, 128], strides = [1, 1, 1]} : vector<2x4x128xf32> to vector<1x4x128xf32>
    %420 = vector.shape_cast %419 : vector<1x4x128xf32> to vector<4x128xf32>
    %421 = arith.subf %418, %420 : vector<4x128xf32>
    %422 = math.absf %421 : vector<4x128xf32>
    %423 = vector.shape_cast %422 : vector<4x128xf32> to vector<1x4x128xf32>
    %cst_101 = arith.constant dense<0.000000e+00> : vector<1xf32>
    %424 = vector.multi_reduction <add>, %423, %cst_101 [1, 2] : vector<1x4x128xf32> to vector<1xf32>
    %425 = vector.shape_cast %424 : vector<1xf32> to vector<1x1x1xf32>
    %426 = vector.extract %425[0, 0, 0] : f32 from vector<1x1x1xf32>
    %427 = arith.addf %408, %426 : f32
    %cst_102 = arith.constant 0.000000e+00 : f32
    %428 = vector.broadcast %cst_102 : f32 to vector<2x4x128xf32>
    %429 = arith.cmpf oge, %370, %428 : vector<2x4x128xf32>
    %cst_103 = arith.constant 1.000000e-01 : f32
    %430 = vector.broadcast %cst_103 : f32 to vector<2x4x128xf32>
    %431 = arith.mulf %430, %370 : vector<2x4x128xf32>
    %432 = arith.select %429, %370, %431 : vector<2x4x128xi1>, vector<2x4x128xf32>
    %c3_104 = arith.constant 3 : index
    %c0_105 = arith.constant 0 : index
    %c0_106 = arith.constant 0 : index
    %c0_107 = arith.constant 0 : index
    %433 = vector.load %arg3[%c3_104, %c0_105, %c0_106, %c0_107] : memref<4x2x4x128xf32, #tpu.memory_space<vmem>>, vector<1x2x4x128xf32>
    %434 = vector.shape_cast %433 : vector<1x2x4x128xf32> to vector<2x4x128xf32>
    %435 = vector.shape_cast %432 : vector<2x4x128xf32> to vector<1x2x4x128xf32>
    tpu.vector_store %arg3[%c3_104, %c0_105, %c0_106, %c0_107], %435 {strides = array<i32>} : memref<4x2x4x128xf32, #tpu.memory_space<vmem>>, vector<1x2x4x128xf32>,
    %436 = vector.extract_strided_slice %432 {offsets = [0, 0, 0], sizes = [1, 4, 128], strides = [1, 1, 1]} : vector<2x4x128xf32> to vector<1x4x128xf32>
    %437 = vector.shape_cast %436 : vector<1x4x128xf32> to vector<4x128xf32>
    %438 = vector.extract_strided_slice %432 {offsets = [1, 0, 0], sizes = [1, 4, 128], strides = [1, 1, 1]} : vector<2x4x128xf32> to vector<1x4x128xf32>
    %439 = vector.shape_cast %438 : vector<1x4x128xf32> to vector<4x128xf32>
    %440 = arith.subf %437, %439 : vector<4x128xf32>
    %441 = math.absf %440 : vector<4x128xf32>
    %442 = vector.shape_cast %441 : vector<4x128xf32> to vector<1x4x128xf32>
    %cst_108 = arith.constant dense<0.000000e+00> : vector<1xf32>
    %443 = vector.multi_reduction <add>, %442, %cst_108 [1, 2] : vector<1x4x128xf32> to vector<1xf32>
    %444 = vector.shape_cast %443 : vector<1xf32> to vector<1x1x1xf32>
    %445 = vector.extract %444[0, 0, 0] : f32 from vector<1x1x1xf32>
    %446 = arith.addf %427, %445 : f32
    %c0_109 = arith.constant 0 : index
    %c0_110 = arith.constant 0 : index
    %447 = vector.load %arg4[%c0_109, %c0_110] : memref<1x1xf32, #tpu.memory_space<vmem>>, vector<1x1xf32>
    %448 = vector.broadcast %446 : f32 to vector<1x1xf32>
    %449 = arith.addf %447, %448 : vector<1x1xf32>
    %c0_111 = arith.constant 0 : index
    %c0_112 = arith.constant 0 : index
    %450 = vector.load %arg4[%c0_111, %c0_112] : memref<1x1xf32, #tpu.memory_space<vmem>>, vector<1x1xf32>
    tpu.vector_store %arg4[%c0_111, %c0_112], %449 {strides = array<i32>} : memref<1x1xf32, #tpu.memory_space<vmem>>, vector<1x1xf32>,
    return
  }
  func.func @transform_0(%arg0: i32) -> i32 {
    %c0_i32 = arith.constant 0 : i32
    %c0_i32_0 = arith.constant 0 : i32
    return %c0_i32 : i32
  }
  func.func @transform_1(%arg0: i32) -> (i32, i32, i32, i32) {
    %c0_i32 = arith.constant 0 : i32
    %c0_i32_0 = arith.constant 0 : i32
    %c0_i32_1 = arith.constant 0 : i32
    %c0_i32_2 = arith.constant 0 : i32
    return %c0_i32, %c0_i32_0, %c0_i32_1, %arg0 : i32, i32, i32, i32
  }
  func.func @transform_2(%arg0: i32) -> (i32, i32, i32, i32) {
    %c0_i32 = arith.constant 0 : i32
    %c0_i32_0 = arith.constant 0 : i32
    %c0_i32_1 = arith.constant 0 : i32
    %c0_i32_2 = arith.constant 0 : i32
    return %c0_i32, %c0_i32_0, %c0_i32_1, %arg0 : i32, i32, i32, i32
  }
  func.func @transform_3(%arg0: i32) -> (i32, i32) {
    %c0_i32 = arith.constant 0 : i32
    %c0_i32_0 = arith.constant 0 : i32
    %c0_i32_1 = arith.constant 0 : i32
    return %c0_i32, %c0_i32_0 : i32, i32
  }
}

module attributes {stable_mosaic.version = 11 : i64} {
  func.func @_conv_pair_kernel(%arg0: i32, %arg1: memref<13xf32, #tpu.memory_space<smem>>, %arg2: memref<12x2x4x128xf32, #tpu.memory_space<vmem>>, %arg3: memref<1x2x4x128xf32, #tpu.memory_space<vmem>>, %arg4: memref<1x1xf32, #tpu.memory_space<vmem>>) attributes {dimension_semantics = [#tpu.dimension_semantics<arbitrary>], iteration_bounds = array<i64: 1>, scalar_prefetch = 0 : i64, scratch_operands = 0 : i64, tpu.core_type = #tpu.core_type<tc>, window_params = [{transform_indices = @transform_0, window_bounds = array<i64: 13>}, {transform_indices = @transform_1, window_bounds = array<i64: 12, 2, 4, 128>}, {transform_indices = @transform_2, window_bounds = array<i64: 1, 2, 4, 128>}, {pipeline_mode = #tpu.pipeline_mode<synchronous>, transform_indices = @transform_3, window_bounds = array<i64: 1, 1>}]} {
    %c0_i32 = arith.constant 0 : i32
    %0 = arith.cmpi eq, %arg0, %c0_i32 : i32
    %1 = arith.extui %0 : i1 to i32
    %c0_i32_0 = arith.constant 0 : i32
    %2 = arith.cmpi ne, %1, %c0_i32_0 : i32
    scf.if %2 {
      %cst_58 = arith.constant 0.000000e+00 : f32
      %95 = vector.broadcast %cst_58 : f32 to vector<1x1xf32>
      %c0_59 = arith.constant 0 : index
      %c0_60 = arith.constant 0 : index
      %96 = vector.load %arg4[%c0_59, %c0_60] : memref<1x1xf32, #tpu.memory_space<vmem>>, vector<1x1xf32>
      tpu.vector_store %arg4[%c0_59, %c0_60], %95 {strides = array<i32>} : memref<1x1xf32, #tpu.memory_space<vmem>>, vector<1x1xf32>,
    } else {
    }
    %c12 = arith.constant 12 : index
    %3 = memref.load %arg1[%c12] : memref<13xf32, #tpu.memory_space<smem>>
    %4 = vector.broadcast %3 : f32 to vector<2x4x128xf32>
    %c0 = arith.constant 0 : index
    %c0_1 = arith.constant 0 : index
    %c0_2 = arith.constant 0 : index
    %c0_3 = arith.constant 0 : index
    %5 = vector.load %arg2[%c0, %c0_1, %c0_2, %c0_3] : memref<12x2x4x128xf32, #tpu.memory_space<vmem>>, vector<1x2x4x128xf32>
    %6 = vector.shape_cast %5 : vector<1x2x4x128xf32> to vector<2x4x128xf32>
    %c0_4 = arith.constant 0 : index
    %7 = memref.load %arg1[%c0_4] : memref<13xf32, #tpu.memory_space<smem>>
    %8 = vector.broadcast %7 : f32 to vector<2x4x128xf32>
    %9 = arith.mulf %8, %6 : vector<2x4x128xf32>
    %10 = arith.addf %4, %9 : vector<2x4x128xf32>
    %c1 = arith.constant 1 : index
    %c0_5 = arith.constant 0 : index
    %c0_6 = arith.constant 0 : index
    %c0_7 = arith.constant 0 : index
    %11 = vector.load %arg2[%c1, %c0_5, %c0_6, %c0_7] : memref<12x2x4x128xf32, #tpu.memory_space<vmem>>, vector<1x2x4x128xf32>
    %12 = vector.shape_cast %11 : vector<1x2x4x128xf32> to vector<2x4x128xf32>
    %c1_8 = arith.constant 1 : index
    %13 = memref.load %arg1[%c1_8] : memref<13xf32, #tpu.memory_space<smem>>
    %14 = vector.broadcast %13 : f32 to vector<2x4x128xf32>
    %15 = arith.mulf %14, %12 : vector<2x4x128xf32>
    %16 = arith.addf %10, %15 : vector<2x4x128xf32>
    %c2 = arith.constant 2 : index
    %c0_9 = arith.constant 0 : index
    %c0_10 = arith.constant 0 : index
    %c0_11 = arith.constant 0 : index
    %17 = vector.load %arg2[%c2, %c0_9, %c0_10, %c0_11] : memref<12x2x4x128xf32, #tpu.memory_space<vmem>>, vector<1x2x4x128xf32>
    %18 = vector.shape_cast %17 : vector<1x2x4x128xf32> to vector<2x4x128xf32>
    %c2_12 = arith.constant 2 : index
    %19 = memref.load %arg1[%c2_12] : memref<13xf32, #tpu.memory_space<smem>>
    %20 = vector.broadcast %19 : f32 to vector<2x4x128xf32>
    %21 = arith.mulf %20, %18 : vector<2x4x128xf32>
    %22 = arith.addf %16, %21 : vector<2x4x128xf32>
    %c3 = arith.constant 3 : index
    %c0_13 = arith.constant 0 : index
    %c0_14 = arith.constant 0 : index
    %c0_15 = arith.constant 0 : index
    %23 = vector.load %arg2[%c3, %c0_13, %c0_14, %c0_15] : memref<12x2x4x128xf32, #tpu.memory_space<vmem>>, vector<1x2x4x128xf32>
    %24 = vector.shape_cast %23 : vector<1x2x4x128xf32> to vector<2x4x128xf32>
    %c3_16 = arith.constant 3 : index
    %25 = memref.load %arg1[%c3_16] : memref<13xf32, #tpu.memory_space<smem>>
    %26 = vector.broadcast %25 : f32 to vector<2x4x128xf32>
    %27 = arith.mulf %26, %24 : vector<2x4x128xf32>
    %28 = arith.addf %22, %27 : vector<2x4x128xf32>
    %c4 = arith.constant 4 : index
    %c0_17 = arith.constant 0 : index
    %c0_18 = arith.constant 0 : index
    %c0_19 = arith.constant 0 : index
    %29 = vector.load %arg2[%c4, %c0_17, %c0_18, %c0_19] : memref<12x2x4x128xf32, #tpu.memory_space<vmem>>, vector<1x2x4x128xf32>
    %30 = vector.shape_cast %29 : vector<1x2x4x128xf32> to vector<2x4x128xf32>
    %c4_20 = arith.constant 4 : index
    %31 = memref.load %arg1[%c4_20] : memref<13xf32, #tpu.memory_space<smem>>
    %32 = vector.broadcast %31 : f32 to vector<2x4x128xf32>
    %33 = arith.mulf %32, %30 : vector<2x4x128xf32>
    %34 = arith.addf %28, %33 : vector<2x4x128xf32>
    %c5 = arith.constant 5 : index
    %c0_21 = arith.constant 0 : index
    %c0_22 = arith.constant 0 : index
    %c0_23 = arith.constant 0 : index
    %35 = vector.load %arg2[%c5, %c0_21, %c0_22, %c0_23] : memref<12x2x4x128xf32, #tpu.memory_space<vmem>>, vector<1x2x4x128xf32>
    %36 = vector.shape_cast %35 : vector<1x2x4x128xf32> to vector<2x4x128xf32>
    %c5_24 = arith.constant 5 : index
    %37 = memref.load %arg1[%c5_24] : memref<13xf32, #tpu.memory_space<smem>>
    %38 = vector.broadcast %37 : f32 to vector<2x4x128xf32>
    %39 = arith.mulf %38, %36 : vector<2x4x128xf32>
    %40 = arith.addf %34, %39 : vector<2x4x128xf32>
    %c6 = arith.constant 6 : index
    %c0_25 = arith.constant 0 : index
    %c0_26 = arith.constant 0 : index
    %c0_27 = arith.constant 0 : index
    %41 = vector.load %arg2[%c6, %c0_25, %c0_26, %c0_27] : memref<12x2x4x128xf32, #tpu.memory_space<vmem>>, vector<1x2x4x128xf32>
    %42 = vector.shape_cast %41 : vector<1x2x4x128xf32> to vector<2x4x128xf32>
    %c6_28 = arith.constant 6 : index
    %43 = memref.load %arg1[%c6_28] : memref<13xf32, #tpu.memory_space<smem>>
    %44 = vector.broadcast %43 : f32 to vector<2x4x128xf32>
    %45 = arith.mulf %44, %42 : vector<2x4x128xf32>
    %46 = arith.addf %40, %45 : vector<2x4x128xf32>
    %c7 = arith.constant 7 : index
    %c0_29 = arith.constant 0 : index
    %c0_30 = arith.constant 0 : index
    %c0_31 = arith.constant 0 : index
    %47 = vector.load %arg2[%c7, %c0_29, %c0_30, %c0_31] : memref<12x2x4x128xf32, #tpu.memory_space<vmem>>, vector<1x2x4x128xf32>
    %48 = vector.shape_cast %47 : vector<1x2x4x128xf32> to vector<2x4x128xf32>
    %c7_32 = arith.constant 7 : index
    %49 = memref.load %arg1[%c7_32] : memref<13xf32, #tpu.memory_space<smem>>
    %50 = vector.broadcast %49 : f32 to vector<2x4x128xf32>
    %51 = arith.mulf %50, %48 : vector<2x4x128xf32>
    %52 = arith.addf %46, %51 : vector<2x4x128xf32>
    %c8 = arith.constant 8 : index
    %c0_33 = arith.constant 0 : index
    %c0_34 = arith.constant 0 : index
    %c0_35 = arith.constant 0 : index
    %53 = vector.load %arg2[%c8, %c0_33, %c0_34, %c0_35] : memref<12x2x4x128xf32, #tpu.memory_space<vmem>>, vector<1x2x4x128xf32>
    %54 = vector.shape_cast %53 : vector<1x2x4x128xf32> to vector<2x4x128xf32>
    %c8_36 = arith.constant 8 : index
    %55 = memref.load %arg1[%c8_36] : memref<13xf32, #tpu.memory_space<smem>>
    %56 = vector.broadcast %55 : f32 to vector<2x4x128xf32>
    %57 = arith.mulf %56, %54 : vector<2x4x128xf32>
    %58 = arith.addf %52, %57 : vector<2x4x128xf32>
    %c9 = arith.constant 9 : index
    %c0_37 = arith.constant 0 : index
    %c0_38 = arith.constant 0 : index
    %c0_39 = arith.constant 0 : index
    %59 = vector.load %arg2[%c9, %c0_37, %c0_38, %c0_39] : memref<12x2x4x128xf32, #tpu.memory_space<vmem>>, vector<1x2x4x128xf32>
    %60 = vector.shape_cast %59 : vector<1x2x4x128xf32> to vector<2x4x128xf32>
    %c9_40 = arith.constant 9 : index
    %61 = memref.load %arg1[%c9_40] : memref<13xf32, #tpu.memory_space<smem>>
    %62 = vector.broadcast %61 : f32 to vector<2x4x128xf32>
    %63 = arith.mulf %62, %60 : vector<2x4x128xf32>
    %64 = arith.addf %58, %63 : vector<2x4x128xf32>
    %c10 = arith.constant 10 : index
    %c0_41 = arith.constant 0 : index
    %c0_42 = arith.constant 0 : index
    %c0_43 = arith.constant 0 : index
    %65 = vector.load %arg2[%c10, %c0_41, %c0_42, %c0_43] : memref<12x2x4x128xf32, #tpu.memory_space<vmem>>, vector<1x2x4x128xf32>
    %66 = vector.shape_cast %65 : vector<1x2x4x128xf32> to vector<2x4x128xf32>
    %c10_44 = arith.constant 10 : index
    %67 = memref.load %arg1[%c10_44] : memref<13xf32, #tpu.memory_space<smem>>
    %68 = vector.broadcast %67 : f32 to vector<2x4x128xf32>
    %69 = arith.mulf %68, %66 : vector<2x4x128xf32>
    %70 = arith.addf %64, %69 : vector<2x4x128xf32>
    %c11 = arith.constant 11 : index
    %c0_45 = arith.constant 0 : index
    %c0_46 = arith.constant 0 : index
    %c0_47 = arith.constant 0 : index
    %71 = vector.load %arg2[%c11, %c0_45, %c0_46, %c0_47] : memref<12x2x4x128xf32, #tpu.memory_space<vmem>>, vector<1x2x4x128xf32>
    %72 = vector.shape_cast %71 : vector<1x2x4x128xf32> to vector<2x4x128xf32>
    %c11_48 = arith.constant 11 : index
    %73 = memref.load %arg1[%c11_48] : memref<13xf32, #tpu.memory_space<smem>>
    %74 = vector.broadcast %73 : f32 to vector<2x4x128xf32>
    %75 = arith.mulf %74, %72 : vector<2x4x128xf32>
    %76 = arith.addf %70, %75 : vector<2x4x128xf32>
    %c0_49 = arith.constant 0 : index
    %c0_50 = arith.constant 0 : index
    %c0_51 = arith.constant 0 : index
    %c0_52 = arith.constant 0 : index
    %77 = vector.load %arg3[%c0_49, %c0_50, %c0_51, %c0_52] : memref<1x2x4x128xf32, #tpu.memory_space<vmem>>, vector<1x2x4x128xf32>
    %78 = vector.shape_cast %77 : vector<1x2x4x128xf32> to vector<2x4x128xf32>
    %79 = vector.shape_cast %76 : vector<2x4x128xf32> to vector<1x2x4x128xf32>
    tpu.vector_store %arg3[%c0_49, %c0_50, %c0_51, %c0_52], %79 {strides = array<i32>} : memref<1x2x4x128xf32, #tpu.memory_space<vmem>>, vector<1x2x4x128xf32>,
    %80 = vector.extract_strided_slice %76 {offsets = [0, 0, 0], sizes = [1, 4, 128], strides = [1, 1, 1]} : vector<2x4x128xf32> to vector<1x4x128xf32>
    %81 = vector.shape_cast %80 : vector<1x4x128xf32> to vector<4x128xf32>
    %82 = vector.extract_strided_slice %76 {offsets = [1, 0, 0], sizes = [1, 4, 128], strides = [1, 1, 1]} : vector<2x4x128xf32> to vector<1x4x128xf32>
    %83 = vector.shape_cast %82 : vector<1x4x128xf32> to vector<4x128xf32>
    %84 = arith.subf %81, %83 : vector<4x128xf32>
    %85 = math.absf %84 : vector<4x128xf32>
    %86 = vector.shape_cast %85 : vector<4x128xf32> to vector<1x4x128xf32>
    %cst = arith.constant dense<0.000000e+00> : vector<1xf32>
    %87 = vector.multi_reduction <add>, %86, %cst [1, 2] : vector<1x4x128xf32> to vector<1xf32>
    %88 = vector.shape_cast %87 : vector<1xf32> to vector<1x1x1xf32>
    %89 = vector.extract %88[0, 0, 0] : f32 from vector<1x1x1xf32>
    %cst_53 = arith.constant 0.000000e+00 : f32
    %90 = arith.addf %cst_53, %89 : f32
    %c0_54 = arith.constant 0 : index
    %c0_55 = arith.constant 0 : index
    %91 = vector.load %arg4[%c0_54, %c0_55] : memref<1x1xf32, #tpu.memory_space<vmem>>, vector<1x1xf32>
    %92 = vector.broadcast %90 : f32 to vector<1x1xf32>
    %93 = arith.addf %91, %92 : vector<1x1xf32>
    %c0_56 = arith.constant 0 : index
    %c0_57 = arith.constant 0 : index
    %94 = vector.load %arg4[%c0_56, %c0_57] : memref<1x1xf32, #tpu.memory_space<vmem>>, vector<1x1xf32>
    tpu.vector_store %arg4[%c0_56, %c0_57], %93 {strides = array<i32>} : memref<1x1xf32, #tpu.memory_space<vmem>>, vector<1x1xf32>,
    return
  }
  func.func @transform_0(%arg0: i32) -> i32 {
    %c0_i32 = arith.constant 0 : i32
    %c0_i32_0 = arith.constant 0 : i32
    return %c0_i32 : i32
  }
  func.func @transform_1(%arg0: i32) -> (i32, i32, i32, i32) {
    %c0_i32 = arith.constant 0 : i32
    %c0_i32_0 = arith.constant 0 : i32
    %c0_i32_1 = arith.constant 0 : i32
    %c0_i32_2 = arith.constant 0 : i32
    return %c0_i32, %c0_i32_0, %c0_i32_1, %arg0 : i32, i32, i32, i32
  }
  func.func @transform_2(%arg0: i32) -> (i32, i32, i32, i32) {
    %c0_i32 = arith.constant 0 : i32
    %c0_i32_0 = arith.constant 0 : i32
    %c0_i32_1 = arith.constant 0 : i32
    %c0_i32_2 = arith.constant 0 : i32
    return %c0_i32, %c0_i32_0, %c0_i32_1, %arg0 : i32, i32, i32, i32
  }
  func.func @transform_3(%arg0: i32) -> (i32, i32) {
    %c0_i32 = arith.constant 0 : i32
    %c0_i32_0 = arith.constant 0 : i32
    %c0_i32_1 = arith.constant 0 : i32
    return %c0_i32, %c0_i32_0 : i32, i32
  }
}

module attributes {stable_mosaic.version = 11 : i64} {
  func.func @_final_losses_kernel(%arg0: i32, %arg1: memref<4xf32, #tpu.memory_space<smem>>, %arg2: memref<4xi32, #tpu.memory_space<smem>>, %arg3: memref<1x8x128xf32, #tpu.memory_space<vmem>>, %arg4: memref<1x8x128xf32, #tpu.memory_space<vmem>>, %arg5: memref<1x1xf32, #tpu.memory_space<vmem>>, %arg6: memref<1x1xf32, #tpu.memory_space<vmem>>) attributes {dimension_semantics = [#tpu.dimension_semantics<arbitrary>], iteration_bounds = array<i64: 4>, scalar_prefetch = 0 : i64, scratch_operands = 0 : i64, tpu.core_type = #tpu.core_type<tc>, window_params = [{transform_indices = @transform_0, window_bounds = array<i64: 4>}, {transform_indices = @transform_1, window_bounds = array<i64: 4>}, {transform_indices = @transform_2, window_bounds = array<i64: 1, 8, 128>}, {transform_indices = @transform_3, window_bounds = array<i64: 1, 8, 128>}, {pipeline_mode = #tpu.pipeline_mode<synchronous>, transform_indices = @transform_4, window_bounds = array<i64: 1, 1>}, {pipeline_mode = #tpu.pipeline_mode<synchronous>, transform_indices = @transform_5, window_bounds = array<i64: 1, 1>}]} {
    %c0_i32 = arith.constant 0 : i32
    %0 = arith.cmpi eq, %arg0, %c0_i32 : i32
    %1 = arith.extui %0 : i1 to i32
    %c0_i32_0 = arith.constant 0 : i32
    %2 = arith.cmpi ne, %1, %c0_i32_0 : i32
    scf.if %2 {
      %cst_27 = arith.constant 0.000000e+00 : f32
      %65 = vector.broadcast %cst_27 : f32 to vector<1x1xf32>
      %c0_28 = arith.constant 0 : index
      %c0_29 = arith.constant 0 : index
      %66 = vector.load %arg5[%c0_28, %c0_29] : memref<1x1xf32, #tpu.memory_space<vmem>>, vector<1x1xf32>
      tpu.vector_store %arg5[%c0_28, %c0_29], %65 {strides = array<i32>} : memref<1x1xf32, #tpu.memory_space<vmem>>, vector<1x1xf32>,
      %cst_30 = arith.constant 0.000000e+00 : f32
      %67 = vector.broadcast %cst_30 : f32 to vector<1x1xf32>
      %c0_31 = arith.constant 0 : index
      %c0_32 = arith.constant 0 : index
      %68 = vector.load %arg6[%c0_31, %c0_32] : memref<1x1xf32, #tpu.memory_space<vmem>>, vector<1x1xf32>
      tpu.vector_store %arg6[%c0_31, %c0_32], %67 {strides = array<i32>} : memref<1x1xf32, #tpu.memory_space<vmem>>, vector<1x1xf32>,
    } else {
    }
    %3 = arith.index_cast %arg0 : i32 to index
    %4 = memref.load %arg2[%3] : memref<4xi32, #tpu.memory_space<smem>>
    %5 = arith.index_cast %arg0 : i32 to index
    %6 = memref.load %arg1[%5] : memref<4xf32, #tpu.memory_space<smem>>
    %c0 = arith.constant 0 : index
    %c0_1 = arith.constant 0 : index
    %c0_2 = arith.constant 0 : index
    %7 = vector.load %arg3[%c0, %c0_1, %c0_2] : memref<1x8x128xf32, #tpu.memory_space<vmem>>, vector<1x8x128xf32>
    %8 = vector.shape_cast %7 : vector<1x8x128xf32> to vector<8x128xf32>
    %c0_3 = arith.constant 0 : index
    %c0_4 = arith.constant 0 : index
    %c0_5 = arith.constant 0 : index
    %9 = vector.load %arg4[%c0_3, %c0_4, %c0_5] : memref<1x8x128xf32, #tpu.memory_space<vmem>>, vector<1x8x128xf32>
    %10 = vector.shape_cast %9 : vector<1x8x128xf32> to vector<8x128xf32>
    %11 = tpu.iota {dimensions = array<i32: 0>} : vector<8x128xi32>
    %12 = tpu.iota {dimensions = array<i32: 1>} : vector<8x128xi32>
    %c128_i32 = arith.constant 128 : i32
    %13 = vector.broadcast %c128_i32 : i32 to vector<8x128xi32>
    %14 = arith.muli %11, %13 : vector<8x128xi32>
    %15 = arith.addi %14, %12 : vector<8x128xi32>
    %16 = vector.broadcast %4 : i32 to vector<8x128xi32>
    %17 = arith.cmpi slt, %15, %16 : vector<8x128xi32>
    %18 = arith.sitofp %4 : i32 to f32
    %cst = arith.constant 1.000000e+00 : f32
    %19 = vector.broadcast %cst : f32 to vector<8x128xf32>
    %20 = arith.subf %8, %19 : vector<8x128xf32>
    %c0_6 = arith.constant 0 : index
    %c0_7 = arith.constant 0 : index
    %21 = vector.load %arg5[%c0_6, %c0_7] : memref<1x1xf32, #tpu.memory_space<vmem>>, vector<1x1xf32>
    %22 = arith.mulf %20, %20 : vector<8x128xf32>
    %cst_8 = arith.constant 0.000000e+00 : f32
    %23 = vector.broadcast %cst_8 : f32 to vector<8x128xf32>
    %24 = arith.select %17, %22, %23 : vector<8x128xi1>, vector<8x128xf32>
    %25 = vector.shape_cast %24 : vector<8x128xf32> to vector<1x8x128xf32>
    %cst_9 = arith.constant dense<0.000000e+00> : vector<1xf32>
    %26 = vector.multi_reduction <add>, %25, %cst_9 [1, 2] : vector<1x8x128xf32> to vector<1xf32>
    %27 = vector.shape_cast %26 : vector<1xf32> to vector<1x1x1xf32>
    %28 = vector.extract %27[0, 0, 0] : f32 from vector<1x1x1xf32>
    %29 = arith.divf %28, %18 : f32
    %30 = vector.broadcast %29 : f32 to vector<1x1xf32>
    %31 = arith.addf %21, %30 : vector<1x1xf32>
    %c0_10 = arith.constant 0 : index
    %c0_11 = arith.constant 0 : index
    %32 = vector.load %arg5[%c0_10, %c0_11] : memref<1x1xf32, #tpu.memory_space<vmem>>, vector<1x1xf32>
    tpu.vector_store %arg5[%c0_10, %c0_11], %31 {strides = array<i32>} : memref<1x1xf32, #tpu.memory_space<vmem>>, vector<1x1xf32>,
    %33 = vector.broadcast %6 : f32 to vector<8x128xf32>
    %34 = arith.cmpf olt, %10, %33 : vector<8x128xf32>
    %35 = arith.andi %17, %34 : vector<8x128xi1>
    %36 = vector.broadcast %6 : f32 to vector<8x128xf32>
    %37 = arith.subf %10, %36 : vector<8x128xf32>
    %38 = vector.broadcast %6 : f32 to vector<8x128xf32>
    %39 = arith.subf %10, %38 : vector<8x128xf32>
    %40 = arith.mulf %37, %39 : vector<8x128xf32>
    %cst_12 = arith.constant 0.000000e+00 : f32
    %41 = vector.broadcast %cst_12 : f32 to vector<8x128xf32>
    %42 = arith.select %35, %40, %41 : vector<8x128xi1>, vector<8x128xf32>
    %43 = vector.shape_cast %42 : vector<8x128xf32> to vector<1x8x128xf32>
    %cst_13 = arith.constant dense<0.000000e+00> : vector<1xf32>
    %44 = vector.multi_reduction <add>, %43, %cst_13 [1, 2] : vector<1x8x128xf32> to vector<1xf32>
    %45 = vector.shape_cast %44 : vector<1xf32> to vector<1x1x1xf32>
    %46 = vector.extract %45[0, 0, 0] : f32 from vector<1x1x1xf32>
    %cst_14 = arith.constant 1.000000e+00 : f32
    %cst_15 = arith.constant 0.000000e+00 : f32
    %47 = vector.broadcast %cst_14 : f32 to vector<8x128xf32>
    %48 = vector.broadcast %cst_15 : f32 to vector<8x128xf32>
    %49 = arith.select %35, %47, %48 : vector<8x128xi1>, vector<8x128xf32>
    %50 = vector.shape_cast %49 : vector<8x128xf32> to vector<1x8x128xf32>
    %cst_16 = arith.constant dense<0.000000e+00> : vector<1xf32>
    %51 = vector.multi_reduction <add>, %50, %cst_16 [1, 2] : vector<1x8x128xf32> to vector<1xf32>
    %52 = vector.shape_cast %51 : vector<1xf32> to vector<1x1x1xf32>
    %53 = vector.extract %52[0, 0, 0] : f32 from vector<1x1x1xf32>
    %cst_17 = arith.constant 1.000000e+00 : f32
    %54 = arith.maximumf %53, %cst_17 : f32
    %55 = arith.divf %46, %54 : f32
    %c0_18 = arith.constant 0 : index
    %c0_19 = arith.constant 0 : index
    %56 = vector.load %arg6[%c0_18, %c0_19] : memref<1x1xf32, #tpu.memory_space<vmem>>, vector<1x1xf32>
    %cst_20 = arith.constant 0.000000e+00 : f32
    %57 = arith.cmpf ogt, %53, %cst_20 : f32
    %cst_21 = arith.constant 4.000000e-02 : f32
    %58 = arith.subf %cst_21, %55 : f32
    %cst_22 = arith.constant 0.000000e+00 : f32
    %59 = arith.maximumf %58, %cst_22 : f32
    %cst_23 = arith.constant 4.000000e-02 : f32
    %60 = arith.subf %cst_23, %59 : f32
    %cst_24 = arith.constant 0.000000e+00 : f32
    %61 = arith.select %57, %60, %cst_24 : f32
    %62 = vector.broadcast %61 : f32 to vector<1x1xf32>
    %63 = arith.addf %56, %62 : vector<1x1xf32>
    %c0_25 = arith.constant 0 : index
    %c0_26 = arith.constant 0 : index
    %64 = vector.load %arg6[%c0_25, %c0_26] : memref<1x1xf32, #tpu.memory_space<vmem>>, vector<1x1xf32>
    tpu.vector_store %arg6[%c0_25, %c0_26], %63 {strides = array<i32>} : memref<1x1xf32, #tpu.memory_space<vmem>>, vector<1x1xf32>,
    return
  }
  func.func @transform_0(%arg0: i32) -> i32 {
    %c0_i32 = arith.constant 0 : i32
    %c0_i32_0 = arith.constant 0 : i32
    return %c0_i32 : i32
  }
  func.func @transform_1(%arg0: i32) -> i32 {
    %c0_i32 = arith.constant 0 : i32
    %c0_i32_0 = arith.constant 0 : i32
    return %c0_i32 : i32
  }
  func.func @transform_2(%arg0: i32) -> (i32, i32, i32) {
    %c0_i32 = arith.constant 0 : i32
    %c0_i32_0 = arith.constant 0 : i32
    %c0_i32_1 = arith.constant 0 : i32
    return %arg0, %c0_i32, %c0_i32_0 : i32, i32, i32
  }
  func.func @transform_3(%arg0: i32) -> (i32, i32, i32) {
    %c0_i32 = arith.constant 0 : i32
    %c0_i32_0 = arith.constant 0 : i32
    %c0_i32_1 = arith.constant 0 : i32
    return %arg0, %c0_i32, %c0_i32_0 : i32, i32, i32
  }
  func.func @transform_4(%arg0: i32) -> (i32, i32) {
    %c0_i32 = arith.constant 0 : i32
    %c0_i32_0 = arith.constant 0 : i32
    %c0_i32_1 = arith.constant 0 : i32
    return %c0_i32, %c0_i32_0 : i32, i32
  }
  func.func @transform_5(%arg0: i32) -> (i32, i32) {
    %c0_i32 = arith.constant 0 : i32
    %c0_i32_0 = arith.constant 0 : i32
    %c0_i32_1 = arith.constant 0 : i32
    return %c0_i32, %c0_i32_0 : i32, i32
  }
}

</mosaic_0001>

<bundles_post_ra>
// kernel: _lambda_.16
= control target key start
LH: loop header
LB: loop body
LE: loop exit
PB: predicated region body
PF: predicated region fallthrough
CT: control target
= control target key end

     0   :  { %9 = vsyncpa [#allocation4], 0  ;;  %s591_s0 = inlined_call_operand.vmem [shape: f32[24], index: 0, kind: input, shape index: {}]   ;;  %s592_s1 = inlined_call_operand.vmem [shape: f32[5,2,6,128], index: 1, kind: input, shape index: {}]   ;;  %s593_s2 = inlined_call_operand.vmem [shape: f32[4,2,6,128], index: 2, kind: output, shape index: {0}]   ;;  %s594_s3 = inlined_call_operand.hbm [shape: f32[1,1], index: 3, kind: output, shape index: {1}]  }
   0x1   :  { %10 = vsyncpa [#allocation3], 0  ;;  %s17_s14 = sshll.u32 %s591_s0, 4  ;;  %s18_s14 = int_to_ptr.vmem [resolvable:$true] %s17_s14 }
   0x2   :  { %s335_s15 = scalar_lea.vmem %s18_s14, 16  ;;  %p340_p1 = scmp.lt.s32.totalorder %s18_s14, %s18_s14 }
   0x3   :  { %p336_p0 = scmp.ne.s32.totalorder %s18_s14, %s335_s15  ;;  %p341_p2 = scmp.lt.s32.totalorder %s335_s15, %s335_s15 }
   0x5   :  { %p342_p3 = por %p341_p2, %p340_p1 }
   0x7   :  { %p343_p4 = pnand %p342_p3, %p336_p0 }
   0x9   :  { %346 = shalt.err (!%p343_p4)
}
   0xa   :  { %s373_s16 = smov [#allocation2]  }
   0xb   :  { %20 = dma.vmem_to_smem %s18_s14, 16, %s373_s16, [#allocation4]  }
   0xc   :  { %369 = dma.done.wait [#allocation4], 16  }
   0xd   :  { %370 = vsyncadd [#allocation4], 4294967280 }
   0xe   :  { %26 = sfence }
   0xf   :  { %s289_s17 = sld [smem:[#allocation2 + $0x16]]  ;;  %s292_s18 = sld [smem:[#allocation2 + $0x2]]  ;;  %v402_v0 = vld [vmem:[%s592_s1] sm:$0x3f]  ;;  %v407_v1 = vld [vmem:[%s592_s1 + $0x8] sm:$0x3f] }
  0x10   :  { %s298_s19 = sld [smem:[#allocation2 + $0x6]]  ;;  %s304_s0 = sld [smem:[#allocation2 + $0xa]]  ;;  %v412_v2 = vld [vmem:[%s592_s1 + $0x10] sm:$0x3f]  ;;  %v419_v3 = vld [vmem:[%s592_s1 + $0x18] sm:$0x3f] }
  0x11   :  { %s414_s26 = sld [smem:[#allocation2 + $0xe]]  ;;  %s421_s29 = sld [smem:[#allocation2 + $0x12]]  ;;  %v428_v4 = vld [vmem:[%s592_s1 + $0x20] sm:$0x3f]  ;;  %v437_v7 = vld [vmem:[%s592_s1 + $0x28] sm:$0x3f] }
  0x12   :  { %s423_s30 = sld [smem:[#allocation2 + $0x14]]  ;;  %s430_s6 = sld [smem:[#allocation2]]  ;;  %v450_v14 = vld [vmem:[%s592_s1 + $0x30] sm:$0x3f]  ;;  %v455_v15 = vld [vmem:[%s592_s1 + $0x38] sm:$0x3f] }
  0x13   :  { %s432_s7 = sld [smem:[#allocation2 + $0x4]]  ;;  %s439_s10 = sld [smem:[#allocation2 + $0x8]]  ;;  %v460_v16 = vld [vmem:[%s592_s1 + $0x40] sm:$0x3f]  ;;  %v467_v21 = vld [vmem:[%s592_s1 + $0x48] sm:$0x3f] }
  0x14   :  { %s441_s11 = sld [smem:[#allocation2 + $0xc]]  ;;  %s469_s20 = sld [smem:[#allocation2 + $0x10]]  ;;  %vm185_vm0 = vcmask 1045504   ;;  %vm31_vm9 = vcmask 0  }
  0x15   :  { %v38_v5 = vstv %s289_s17  ;;  %v56_v6 = vstv %s292_s18  ;;  %s471_s21 = sld [smem:[#allocation2 + $0x17]]  ;;  %s492_s1 = sld [smem:[#allocation2 + $0xb]] }
  0x16   :  { %v57_v8 = vmul.f32 %v56_v6, %v402_v0  ;;  %v58_v9 = vmul.f32 %v56_v6, %v407_v1  ;;  %v83_v10 = vstv %s298_s19  ;;  %v110_v13 = vstv %s304_s0  ;;  %s476_s0 = sld [smem:[#allocation2 + $0x3]]  ;;  %s478_s22 = sld [smem:[#allocation2 + $0x7]] }
  0x17   :  { %v84_v11 = vmul.f32 %v412_v2, %v83_v10  ;;  %v85_v12 = vmul.f32 %v419_v3, %v83_v10  ;;  %v111_v19 = vmul.f32 %v428_v4, %v110_v13  ;;  %v112_v20 = vmul.f32 %v437_v7, %v110_v13  ;;  %s498_s23 = sld [smem:[#allocation2 + $0xf]]  ;;  %s506_s24 = sld [smem:[#allocation2 + $0x13]] }
  0x18   :  { %v59_v17 = vadd.f32 %v57_v8, %v38_v5  ;;  %v60_v18 = vadd.f32 %v58_v9, %v38_v5  ;;  %v137_v22 = vstv %s414_s26  ;;  %v164_v23 = vstv %s421_s29  ;;  %s508_s25 = sld [smem:[#allocation2 + $0x15]]  ;;  %s526_s5 = sld [smem:[#allocation2 + $0x9]] }
  0x19   :  { %v34_v24 = vstv %s423_s30  ;;  %v138_v27 = vmul.f32 %v450_v14, %v137_v22  ;;  %v139_v28 = vmul.f32 %v455_v15, %v137_v22  ;;  %v165_v29 = vmul.f32 %v460_v16, %v164_v23  ;;  %s519_s30 = sld [smem:[#allocation2 + $0x1]]  ;;  %s521_s4 = sld [smem:[#allocation2 + $0x5]] }
  0x1a   :  { %v86_v25 = vadd.f32 %v84_v11, %v59_v17  ;;  %v87_v26 = vadd.f32 %v85_v12, %v60_v18  ;;  %v166_v30 = vmul.f32 %v467_v21, %v164_v23  ;;  %v44_v31 = vstv %s430_s6  ;;  %s535_s6 = sld [smem:[#allocation2 + $0xd]] }
  0x1b   :  { %v71_v32 = vstv %s432_s7  ;;  %v45_v35 = vmul.f32 %v44_v31, %v402_v0  ;;  %v46_v36 = vmul.f32 %v44_v31, %v407_v1  ;;  %v98_v39 = vstv %s439_s10  ;;  %s537_s7 = sld [smem:[#allocation2 + $0x11]] }
  0x1c   :  { %v113_v33 = vadd.f32 %v111_v19, %v86_v25  ;;  %v114_v34 = vadd.f32 %v112_v20, %v87_v26  ;;  %v72_v37 = vmul.f32 %v412_v2, %v71_v32  ;;  %v73_v38 = vmul.f32 %v419_v3, %v71_v32 }
  0x1d   :  { %v125_v40 = vstv %s441_s11  ;;  %v47_v43 = vadd.f32 %v45_v35, %v34_v24  ;;  %v48_v44 = vadd.f32 %v46_v36, %v34_v24  ;;  %v99_v45 = vmul.f32 %v428_v4, %v98_v39 }
  0x1e   :  { %v140_v41 = vadd.f32 %v138_v27, %v113_v33  ;;  %v141_v42 = vadd.f32 %v139_v28, %v114_v34  ;;  %v100_v46 = vmul.f32 %v437_v7, %v98_v39  ;;  %v126_v47 = vmul.f32 %v450_v14, %v125_v40 }
  0x1f   :  { %v127_v48 = vmul.f32 %v455_v15, %v125_v40  ;;  %v74_v51 = vadd.f32 %v72_v37, %v47_v43  ;;  %v75_v52 = vadd.f32 %v73_v38, %v48_v44  ;;  %v152_v53 = vstv %s469_s20 }
  0x20   :  { %v167_v49 = vadd.f32 %v165_v29, %v140_v41  ;;  %v168_v50 = vadd.f32 %v166_v30, %v141_v42  ;;  %v40_v54 = vstv %s471_s21  ;;  %v62_v55 = vstv %s476_s0 }
  0x21   :  { %v89_v56 = vstv %s478_s22  ;;  %v101_v59 = vadd.f32 %v99_v45, %v74_v51  ;;  %v102_v60 = vadd.f32 %v100_v46, %v75_v52  ;;  %v153_v61 = vmul.f32 %v460_v16, %v152_v53 }
  0x22   :  { %vm219_vm1 = vcmp.ge.f32.partialorder %v167_v49, 0.0  ;;  %vm220_vm2 = vcmp.ge.f32.partialorder %v168_v50, 0.0  ;;  %v221_v57 = vmul.f32 0.1, %v167_v49  ;;  %v222_v58 = vmul.f32 0.1, %v168_v50 }
  0x23   :  { %v154_v62 = vmul.f32 %v467_v21, %v152_v53  ;;  %v63_v6 = vmul.f32 %v62_v55, %v402_v0  ;;  %v64_v8 = vmul.f32 %v62_v55, %v407_v1  ;;  %v128_v10 = vadd.f32 %v126_v47, %v101_v59 }
  0x24   :  { %v223_v63 = vsel %vm219_vm1, %v167_v49, %v221_v57  ;;  %v224_v5 = vsel %vm220_vm2, %v168_v50, %v222_v58  ;;  %v129_v11 = vadd.f32 %v127_v48, %v102_v60  ;;  %v90_v12 = vmul.f32 %v412_v2, %v89_v56 }
  0x25   :  { %321 = vst [vmem:[%s593_s2 + $0x28] sm:$0x3f] %v224_v5  ;;  %v228_v9 = vsub.f32 %v223_v63, %v224_v5  ;;  %320 = vst [vmem:[%s593_s2 + $0x20] sm:$0x3f] %v223_v63  ;;  %v65_v13 = vadd.f32 %v63_v6, %v40_v54  ;;  %v66_v17 = vadd.f32 %v64_v8, %v40_v54  ;;  %v116_v19 = vstv %s492_s1 }
  0x26   :  { %v91_v18 = vmul.f32 %v419_v3, %v89_v56  ;;  %v155_v22 = vadd.f32 %v153_v61, %v128_v10  ;;  %v156_v23 = vadd.f32 %v154_v62, %v129_v11  ;;  %v117_v24 = vmul.f32 %v428_v4, %v116_v19 }
  0x27   :  { %v229_v20 = vand.u32 2147483647, %v228_v9  ;;  %v92_v25 = vadd.f32 %v90_v12, %v65_v13  ;;  %v118_v27 = vmul.f32 %v437_v7, %v116_v19  ;;  %v143_v28 = vstv %s498_s23 }
  0x28   :  { %v93_v26 = vadd.f32 %v91_v18, %v66_v17  ;;  %vm175_vm3 = vcmp.ge.f32.partialorder %v155_v22, 0.0  ;;  %vm176_vm4 = vcmp.ge.f32.partialorder %v156_v23, 0.0  ;;  %v177_v30 = vmul.f32 0.1, %v155_v22 }
  0x29   :  { %v230_v29 = vsel %vm185_vm0, %v229_v20, 0.0  ;;  %v178_v31 = vmul.f32 0.1, %v156_v23  ;;  %v119_v32 = vadd.f32 %v117_v24, %v92_v25  ;;  %v144_v34 = vmul.f32 %v450_v14, %v143_v28 }
  0x2a   :  { %231 = vadd.xlane.f32.xlu1 %v230_v29  ;;  %v120_v33 = vadd.f32 %v118_v27, %v93_v26  ;;  %v179_v35 = vsel %vm175_vm3, %v155_v22, %v177_v30  ;;  %v145_v36 = vmul.f32 %v455_v15, %v143_v28  ;;  %v170_v37 = vstv %s506_s24  ;;  %s375_s24 = smov [#allocation5]  }
  0x2b   :  { %v36_v38 = vstv %s508_s25  ;;  %v180_v39 = vsel %vm176_vm4, %v156_v23, %v178_v31  ;;  %181 = vst [vmem:[%s593_s2] sm:$0x3f] %v179_v35  ;;  %v146_v40 = vadd.f32 %v144_v34, %v119_v32  ;;  %v171_v41 = vmul.f32 %v460_v16, %v170_v37  ;;  %s276_s25 = sshll.u32 %s375_s24, 4  ;;  %s277_s25 = int_to_ptr.vmem [resolvable:$true] %s276_s25 }
  0x2c   :  { %v172_v42 = vmul.f32 %v467_v21, %v170_v37  ;;  %182 = vst [vmem:[%s593_s2 + $0x8] sm:$0x3f] %v180_v39  ;;  %v183_v43 = vsub.f32 %v179_v35, %v180_v39  ;;  %v147_v44 = vadd.f32 %v145_v36, %v120_v33  ;;  %v50_v45 = vstv %s519_s30  ;;  %s347_s26 = scalar_lea.vmem %s277_s25, 16  ;;  %s351_s27 = scalar_lea.vmem %s277_s25, 32 }
  0x2d   :  { %v77_v46 = vstv %s521_s4  ;;  %v173_v47 = vadd.f32 %v171_v41, %v146_v40  ;;  %v51_v48 = vmul.f32 %v50_v45, %v402_v0  ;;  %v52_v49 = vmul.f32 %v50_v45, %v407_v1  ;;  %p348_p5 = scmp.ne.s32.totalorder %s277_s25, %s347_s26  ;;  %p352_p6 = scmp.lt.s32.totalorder %s277_s25, %s277_s25 }
  0x2e   :  { %v78_v50 = vmul.f32 %v412_v2, %v77_v46  ;;  %v184_v51 = vand.u32 2147483647, %v183_v43  ;;  %v174_v52 = vadd.f32 %v172_v42, %v147_v44  ;;  %v79_v53 = vmul.f32 %v419_v3, %v77_v46  ;;  %p353_p7 = scmp.lt.s32.totalorder %s351_s27, %s347_s26 }
  0x2f   :  { %v104_v54 = vstv %s526_s5  ;;  %vm241_vm5 = vcmp.ge.f32.partialorder %v173_v47, 0.0  ;;  %v243_v55 = vmul.f32 0.1, %v173_v47  ;;  %v53_v56 = vadd.f32 %v51_v48, %v36_v38 }
  0x30   :  { %v54_v57 = vadd.f32 %v52_v49, %v36_v38  ;;  %v186_v58 = vsel %vm185_vm0, %v184_v51, 0.0  ;;  %vm242_vm6 = vcmp.ge.f32.partialorder %v174_v52, 0.0  ;;  %v244_v59 = vmul.f32 0.1, %v174_v52  ;;  %p354_p8 = por %p353_p7, %p352_p6 }
  0x31   :  { %v105_v0 = vmul.f32 %v428_v4, %v104_v54  ;;  %187 = vadd.xlane.f32.xlu0 %v186_v58  ;;  %v245_v1 = vsel %vm241_vm5, %v173_v47, %v243_v55  ;;  %v80_v2 = vadd.f32 %v78_v50, %v53_v56  ;;  %v106_v61 = vmul.f32 %v437_v7, %v104_v54 }
  0x32   :  { %v81_v60 = vadd.f32 %v79_v53, %v54_v57  ;;  %v246_v3 = vsel %vm242_vm6, %v174_v52, %v244_v59  ;;  %322 = vst [vmem:[%s593_s2 + $0x30] sm:$0x3f] %v245_v1  ;;  %v131_v62 = vstv %s535_s6  ;;  %v158_v63 = vstv %s537_s7  ;;  %p355_p9 = pnand %p354_p8, %p348_p5 }
  0x33   :  { %323 = vst [vmem:[%s593_s2 + $0x38] sm:$0x3f] %v246_v3  ;;  %v250_v5 = vsub.f32 %v245_v1, %v246_v3  ;;  %v107_v6 = vadd.f32 %v105_v0, %v80_v2  ;;  %v132_v8 = vmul.f32 %v450_v14, %v131_v62  ;;  %v133_v9 = vmul.f32 %v455_v15, %v131_v62 }
  0x34   :  { %v108_v4 = vadd.f32 %v106_v61, %v81_v60  ;;  %v159_v7 = vmul.f32 %v460_v16, %v158_v63  ;;  %v160_v10 = vmul.f32 %v467_v21, %v158_v63  ;;  %v374_v24 = vmov 0.0  }
  0x35   :  { %v251_v11 = vand.u32 2147483647, %v250_v5  ;;  %v134_v12 = vadd.f32 %v132_v8, %v107_v6  ;;  %32 = vst.msk [vmem:[#allocation5] sm:$0x1] %vm31_vm9, %v374_v24 }
  0x36   :  { %v135_v13 = vadd.f32 %v133_v9, %v108_v4 }
  0x37   :  { %v252_v17 = vsel %vm185_vm0, %v251_v11, 0.0  ;;  %v161_v18 = vadd.f32 %v159_v7, %v134_v12 }
  0x38   :  { %253 = vadd.xlane.f32.xlu1 %v252_v17  ;;  %v162_v19 = vadd.f32 %v160_v10, %v135_v13 }
  0x39   :  { %vm197_vm7 = vcmp.ge.f32.partialorder %v161_v18, 0.0  ;;  %v199_v20 = vmul.f32 0.1, %v161_v18 }
  0x3a   :  { %vm198_vm8 = vcmp.ge.f32.partialorder %v162_v19, 0.0  ;;  %v200_v22 = vmul.f32 0.1, %v162_v19 }
  0x3b   :  { %v201_v23 = vsel %vm197_vm7, %v161_v18, %v199_v20 }
  0x3c   :  { %v202_v14 = vsel %vm198_vm8, %v162_v19, %v200_v22  ;;  %318 = vst [vmem:[%s593_s2 + $0x10] sm:$0x3f] %v201_v23  ;;  %v263_v53 = vld [vmem:[#allocation5] sm:$0x1] }
  0x3d   :  { %319 = vst [vmem:[%s593_s2 + $0x18] sm:$0x3f] %v202_v14  ;;  %v206_v15 = vsub.f32 %v201_v23, %v202_v14 }
  0x3f   :  { %v207_v16 = vand.u32 2147483647, %v206_v15 }
  0x41   :  { %v208_v21 = vsel %vm185_vm0, %v207_v16, 0.0 }
  0x42   :  { %209 = vadd.xlane.f32.xlu0 %v208_v21 }
  0xb7   :  { %v232_v26 = vpop.xlane.xlu1 %231 }
  0xb8   :  { %v233_v33 = vrot.slane %v232_v26, 4 }
  0xba   :  { %v234_v37 = vadd.f32 %v233_v33, %v232_v26 }
  0xbc   :  { %v235_v39 = vrot.slane %v234_v37, 2 }
  0xbe   :  { %v188_v25 = vpop.xlane.xlu0 %187  ;;  %v236_v44 = vadd.f32 %v235_v39, %v234_v37 }
  0xbf   :  { %v189_v27 = vrot.slane %v188_v25, 4 }
  0xc0   :  { %v237_v48 = vrot.slane %v236_v44, 1 }
  0xc1   :  { %v190_v28 = vadd.f32 %v189_v27, %v188_v25 }
  0xc2   :  { %v238_v52 = vadd.f32 %v237_v48, %v236_v44 }
  0xc3   :  { %v191_v29 = vrot.slane %v190_v28, 2 }
  0xc5   :  { %v254_v30 = vpop.xlane.xlu1 %253  ;;  %v192_v31 = vadd.f32 %v191_v29, %v190_v28 }
  0xc6   :  { %v255_v32 = vrot.slane %v254_v30, 4 }
  0xc7   :  { %v193_v34 = vrot.slane %v192_v31, 1 }
  0xc8   :  { %v256_v36 = vadd.f32 %v255_v32, %v254_v30 }
  0xc9   :  { %v194_v35 = vadd.f32 %v193_v34, %v192_v31 }
  0xca   :  { %v257_v38 = vrot.slane %v256_v36, 2 }
  0xcb   :  { %324 = vpush %v194_v35 }
  0xcc   :  { %v258_v42 = vadd.f32 %v257_v38, %v256_v36 }
  0xce   :  { %v259_v47 = vrot.slane %v258_v42, 1 }
  0xcf   :  { %v210_v40 = vpop.xlane.xlu0 %209 }
  0xd0   :  { %v211_v41 = vrot.slane %v210_v40, 4  ;;  %v260_v51 = vadd.f32 %v259_v47, %v258_v42 }
  0xd2   :  { %v212_v43 = vadd.f32 %v211_v41, %v210_v40 }
  0xd4   :  { %v213_v45 = vrot.slane %v212_v43, 2 }
  0xd6   :  { %v214_v46 = vadd.f32 %v213_v45, %v212_v43 }
  0xd8   :  { %v215_v49 = vrot.slane %v214_v46, 1 }
  0xda   :  { %v216_v50 = vadd.f32 %v215_v49, %v214_v46 }
  0xdc   :  { %326 = vpush %v216_v50 }
  0xdd   :  { %328 = vpush %v238_v52 }
  0xde   :  { %330 = vpush %v260_v51 }
  0xfc   :  { %s325_s2 = spop %324 }
 0x10d   :  { %s327_s20 = spop %326 }
 0x10e   :  { %s218_s21 = sadd.f32 %s327_s20, %s325_s2  ;;  %s329_s0 = spop %328 }
 0x10f   :  { %s331_s1 = spop %330 }
 0x110   :  { %s240_s22 = sadd.f32 %s329_s0, %s218_s21 }
 0x112   :  { %s262_s23 = sadd.f32 %s331_s1, %s240_s22 }
 0x114   :  { %v264_v54 = vstv %s262_s23 }
 0x115   :  { %v265_v55 = vadd.f32 %v264_v54, %v263_v53 }
 0x117   :  { %267 = vst.msk [vmem:[#allocation5] sm:$0x1] %vm31_vm9, %v265_v55 }
 0x118   :  { %358 = shalt.err (!%p355_p9)
}
 0x119   :  { %s359_s30 = scalar_lea.hbm %s594_s3, 16 }
 0x11a   :  { %p360_p10 = scmp.ne.s32.totalorder %s594_s3, %s359_s30  ;;  %p363_p11 = scmp.lt.u32.totalorder %s359_s30, %s594_s3 }
 0x11c   :  { %p365_p12 = pnand %p363_p11, %p360_p10 }
 0x11e   :  { %368 = shalt.err (!%p365_p12)
}
 0x11f   :  { %279 = dma.vmem_to_hbm [thread:$0]  %s277_s25, 16, %s594_s3, [#allocation3]  }
 0x120   :  { %371 = dma.done.wait [#allocation3], 16  }
 0x121   :  { %372 = vsyncadd [#allocation3], 4294967280 }
 0x122   :  { %285 = vsyncpa [#allocation3], 1 }
 0x123   :  { %286 = vsyncpa [#allocation4], 1 }

// kernel: squeeze.52
= control target key start
LH: loop header
LB: loop body
LE: loop exit
PB: predicated region body
PF: predicated region fallthrough
CT: control target
= control target key end

     0   :  { %s51_s10 = smov 45   ;;  %s52_s11 = smov 27   ;;  %vm3_vm0 = vcmask 72704   ;;  %vm9_vm1 = vcmask 441704   ;;  %vm15_vm2 = vcmask 367904   ;;  %vm21_vm3 = vcmask 294104   ;;  %s87_s0 = inlined_call_operand.vmem [shape: f32[1,1,6,9], index: 0, kind: input, shape index: {}]   ;;  %s88_s1 = inlined_call_operand.vmem [shape: f32[54], index: 1, kind: output, shape index: {}]  }
   0x1   :  { %v41_v0 = vld [vmem:[%s87_s0 + $0x5] sm:$0x1]   ;;  %v43_v1 = vld [vmem:[%s87_s0 + $0x3] sm:$0x1]   ;;  %v42_v2 = vld [vmem:[%s87_s0 + $0x4] sm:$0x1]  }
   0x2   :  { %7 = vrot.lane.b32.xlu0 %v41_v0, %s51_s10  ;;  %19 = vrot.lane.b32.xlu1 %v43_v1, %s52_s11  ;;  %v44_v3 = vld [vmem:[%s87_s0 + $0x2] sm:$0x1]   ;;  %v2_v4 = vld [vmem:[%s87_s0] sm:$0x1]   ;;  %s53_s18 = smov 36   ;;  %s54_s19 = smov 18  }
   0x3   :  { %4 = vst.msk [vmem:[#allocation0] sm:$0x1] %vm3_vm0, %v2_v4   ;;  %v45_v5 = vld [vmem:[%s87_s0 + $0x1] sm:$0x1]   ;;  %s55_s0 = smov 9   ;;  %vm27_vm4 = vcmask 220304  }
   0x4   :  { %vm33_vm5 = vcmask 146504  }
   0x6   :  { %13 = vrot.lane.b32.xlu0 %v42_v2, %s53_s18  ;;  %25 = vrot.lane.b32.xlu1 %v44_v3, %s54_s19 }
   0xa   :  { %31 = vrot.lane.b32.xlu0 %v45_v5, %s55_s0 }
  0x74   :  { %v8_v6 = vpop.permute.xlu0 %7   ;;  %v20_v7 = vpop.permute.xlu1 %19  }
  0x75   :  { %10 = vst.msk [vmem:[#allocation0] sm:$0x1] %vm9_vm1, %v8_v6  }
  0x78   :  { %v14_v8 = vpop.permute.xlu0 %13   ;;  %v26_v9 = vpop.permute.xlu1 %25  }
  0x79   :  { %16 = vst.msk [vmem:[#allocation0] sm:$0x1] %vm15_vm2, %v14_v8  }
  0x7a   :  { %22 = vst.msk [vmem:[#allocation0] sm:$0x1] %vm21_vm3, %v20_v7  }
  0x7b   :  { %28 = vst.msk [vmem:[#allocation0] sm:$0x1] %vm27_vm4, %v26_v9  }
  0x7c   :  { %v32_v10 = vpop.permute.xlu0 %31  }
  0x7d   :  { %34 = vst.msk [vmem:[#allocation0] sm:$0x1] %vm33_vm5, %v32_v10  }
  0x84   :  { %v38_v11 = vld [vmem:[#allocation0] sm:$0x1] }
  0x85   :  { %40 = vst [vmem:[%s88_s1] sm:$0x1] %v38_v11 }

// kernel: sub.5
= control target key start
LH: loop header
LB: loop body
LE: loop exit
PB: predicated region body
PF: predicated region fallthrough
CT: control target
= control target key end

     0   :  { %s34_s0 = inlined_call_operand.vmem [shape: f32[54], index: 0, kind: input, shape index: {}]   ;;  %s35_s1 = inlined_call_operand.vmem [shape: f32[54], index: 1, kind: input, shape index: {}]   ;;  %s36_s2 = inlined_call_operand.vmem [shape: f32[54], index: 2, kind: output, shape index: {}]  }
   0x1   :  { %v3_v0 = vld [vmem:[%s34_s0] sm:$0x1] }
   0x2   :  { %v4_v1 = vld [vmem:[%s35_s1] sm:$0x1] }
   0x3   :  { %v7_v2 = vsub.f32 %v3_v0, %v4_v1 }
   0x5   :  { %9 = vst [vmem:[%s36_s2] sm:$0x1] %v7_v2 }

// kernel: _lambda_.17
= control target key start
LH: loop header
LB: loop body
LE: loop exit
PB: predicated region body
PF: predicated region fallthrough
CT: control target
= control target key end

     0   :  { %9 = vsyncpa [#allocation4], 0  ;;  %s1563_s0 = inlined_call_operand.vmem [shape: f32[84], index: 0, kind: input, shape index: {}]   ;;  %s1564_s1 = inlined_call_operand.vmem [shape: f32[20,2,6,128], index: 1, kind: input, shape index: {}]   ;;  %s1565_s2 = inlined_call_operand.vmem [shape: f32[4,2,6,128], index: 2, kind: output, shape index: {0}]   ;;  %s1566_s3 = inlined_call_operand.hbm [shape: f32[1,1], index: 3, kind: output, shape index: {1}]  }
   0x1   :  { %10 = vsyncpa [#allocation3], 0  ;;  %s17_s14 = sshll.u32 %s1563_s0, 4  ;;  %s18_s14 = int_to_ptr.vmem [resolvable:$true] %s17_s14 }
   0x2   :  { %s830_s15 = scalar_lea.vmem %s18_s14, 16  ;;  %p835_p1 = scmp.lt.s32.totalorder %s18_s14, %s18_s14 }
   0x3   :  { %p831_p0 = scmp.ne.s32.totalorder %s18_s14, %s830_s15  ;;  %p836_p2 = scmp.lt.s32.totalorder %s830_s15, %s830_s15 }
   0x5   :  { %p837_p3 = por %p836_p2, %p835_p1 }
   0x7   :  { %p838_p4 = pnand %p837_p3, %p831_p0 }
   0x9   :  { %841 = shalt.err (!%p838_p4)
}
   0xa   :  { %s868_s16 = smov [#allocation2]  }
   0xb   :  { %20 = dma.vmem_to_smem %s18_s14, 16, %s868_s16, [#allocation4]  }
   0xc   :  { %864 = dma.done.wait [#allocation4], 16  }
   0xd   :  { %865 = vsyncadd [#allocation4], 4294967280 }
   0xe   :  { %26 = sfence }
   0xf   :  { %s694_s17 = sld [smem:[#allocation2 + $0x52]]  ;;  %s703_s19 = sld [smem:[#allocation2 + $0x6]]  ;;  %v899_v0 = vld [vmem:[%s1564_s1] sm:$0x3f]  ;;  %v904_v1 = vld [vmem:[%s1564_s1 + $0x8] sm:$0x3f] }
  0x10   :  { %s697_s18 = sld [smem:[#allocation2 + $0x2]]  ;;  %s894_s21 = sld [smem:[#allocation2 + $0xe]]  ;;  %1602 = vst [vmem:[#allocation8_spill] sm:$0xff] %v899_v0  ;;  %1603 = vst [vmem:[#allocation9_spill] sm:$0xff] %v904_v1  ;;  %v911_v2 = vld [vmem:[%s1564_s1 + $0x10] sm:$0x3f] }
  0x11   :  { %s709_s20 = sld [smem:[#allocation2 + $0xa]]  ;;  %1604 = vst [vmem:[#allocation10_spill] sm:$0xff] %v911_v2  ;;  %v916_v3 = vld [vmem:[%s1564_s1 + $0x18] sm:$0x3f]  ;;  %s918_s30 = sld [smem:[#allocation2 + $0x16]]  ;;  %vm590_vm0 = vcmask 1045504  }
  0x12   :  { %s906_s25 = sld [smem:[#allocation2 + $0x12]]  ;;  %1605 = vst [vmem:[#allocation11_spill] sm:$0xff] %v916_v3  ;;  %v923_v6 = vld [vmem:[%s1564_s1 + $0x20] sm:$0x3f]  ;;  %v928_v7 = vld [vmem:[%s1564_s1 + $0x28] sm:$0x3f] }
  0x13   :  { %1606 = vst [vmem:[#allocation12_spill] sm:$0xff] %v923_v6  ;;  %1607 = vst [vmem:[#allocation13_spill] sm:$0xff] %v928_v7  ;;  %s930_s8 = sld [smem:[#allocation2 + $0x1a]]  ;;  %v937_v11 = vld [vmem:[%s1564_s1 + $0x30] sm:$0x3f]  ;;  %s939_s11 = sld [smem:[#allocation2 + $0x1e]] }
  0x14   :  { %v946_v15 = vld [vmem:[%s1564_s1 + $0x38] sm:$0x3f]  ;;  %v951_v16 = vld [vmem:[%s1564_s1 + $0x40] sm:$0x3f]  ;;  %s953_s16 = sld [smem:[#allocation2 + $0x22]]  ;;  %s967_s0 = sld [smem:[#allocation2 + $0x26]] }
  0x15   :  { %v38_v4 = vstv %s694_s17  ;;  %v83_v10 = vstv %s703_s19  ;;  %v960_v21 = vld [vmem:[%s1564_s1 + $0x48] sm:$0x3f]  ;;  %v965_v22 = vld [vmem:[%s1564_s1 + $0x50] sm:$0x3f]  ;;  %s981_s27 = sld [smem:[#allocation2 + $0x2a]]  ;;  %s995_s4 = sld [smem:[#allocation2 + $0x2e]] }
  0x16   :  { %v56_v5 = vstv %s697_s18  ;;  %v84_v12 = vmul.f32 %v911_v2, %v83_v10  ;;  %v85_v13 = vmul.f32 %v916_v3, %v83_v10  ;;  %v137_v23 = vstv %s894_s21  ;;  %v974_v25 = vld [vmem:[%s1564_s1 + $0x58] sm:$0x3f]  ;;  %v979_v26 = vld [vmem:[%s1564_s1 + $0x60] sm:$0x3f]  ;;  %s1009_s10 = sld [smem:[#allocation2 + $0x32]]  ;;  %s1023_s14 = sld [smem:[#allocation2 + $0x36]] }
  0x17   :  { %v57_v8 = vmul.f32 %v56_v5, %v899_v0  ;;  %v58_v9 = vmul.f32 %v56_v5, %v904_v1  ;;  %v110_v14 = vstv %s709_s20  ;;  %v138_v29 = vmul.f32 %v937_v11, %v137_v23  ;;  %v988_v31 = vld [vmem:[%s1564_s1 + $0x68] sm:$0x3f]  ;;  %v993_v32 = vld [vmem:[%s1564_s1 + $0x70] sm:$0x3f]  ;;  %v1002_v35 = vld [vmem:[%s1564_s1 + $0x78] sm:$0x3f] }
  0x18   :  { %v111_v19 = vmul.f32 %v923_v6, %v110_v14  ;;  %v112_v20 = vmul.f32 %v928_v7, %v110_v14  ;;  %v164_v24 = vstv %s906_s25  ;;  %v139_v30 = vmul.f32 %v946_v15, %v137_v23  ;;  %v1007_v36 = vld [vmem:[%s1564_s1 + $0x80] sm:$0x3f]  ;;  %v1016_v41 = vld [vmem:[%s1564_s1 + $0x88] sm:$0x3f]  ;;  %v1021_v42 = vld [vmem:[%s1564_s1 + $0x90] sm:$0x3f] }
  0x19   :  { %v59_v17 = vadd.f32 %v57_v8, %v38_v4  ;;  %v60_v18 = vadd.f32 %v58_v9, %v38_v4  ;;  %v191_v33 = vstv %s918_s30  ;;  %v218_v34 = vstv %s930_s8  ;;  %v1031_v46 = vld [vmem:[%s1564_s1 + $0x98] sm:$0x3f]  ;;  %v1036_v47 = vld [vmem:[%s1564_s1 + $0xa0] sm:$0x3f]  ;;  %s1038_s20 = sld [smem:[#allocation2 + $0x3a]]  ;;  %s1052_s24 = sld [smem:[#allocation2 + $0x3e]] }
  0x1a   :  { %v165_v39 = vmul.f32 %v951_v16, %v164_v24  ;;  %v166_v40 = vmul.f32 %v960_v21, %v164_v24  ;;  %v192_v43 = vmul.f32 %v965_v22, %v191_v33  ;;  %v245_v44 = vstv %s939_s11  ;;  %v1045_v52 = vld [vmem:[%s1564_s1 + $0xa8] sm:$0x3f]  ;;  %v1050_v53 = vld [vmem:[%s1564_s1 + $0xb0] sm:$0x3f]  ;;  %v1061_v58 = vld [vmem:[%s1564_s1 + $0xb8] sm:$0x3f] }
  0x1b   :  { %v86_v27 = vadd.f32 %v84_v12, %v59_v17  ;;  %v87_v28 = vadd.f32 %v85_v13, %v60_v18  ;;  %v272_v45 = vstv %s953_s16  ;;  %v193_v50 = vmul.f32 %v974_v25, %v191_v33  ;;  %v1066_v59 = vld [vmem:[%s1564_s1 + $0xc0] sm:$0x3f]  ;;  %s1068_s29 = sld [smem:[#allocation2 + $0x42]]  ;;  %v1075_v4 = vld [vmem:[%s1564_s1 + $0xc8] sm:$0x3f]  ;;  %s1082_s7 = sld [smem:[#allocation2 + $0x46]] }
  0x1c   :  { %v219_v51 = vmul.f32 %v979_v26, %v218_v34  ;;  %v220_v54 = vmul.f32 %v988_v31, %v218_v34  ;;  %v246_v55 = vmul.f32 %v993_v32, %v245_v44  ;;  %v299_v56 = vstv %s967_s0  ;;  %v1080_v5 = vld [vmem:[%s1564_s1 + $0xd0] sm:$0x3f]  ;;  %v1091_v13 = vld [vmem:[%s1564_s1 + $0xd8] sm:$0x3f]  ;;  %v1096_v14 = vld [vmem:[%s1564_s1 + $0xe0] sm:$0x3f] }
  0x1d   :  { %v113_v37 = vadd.f32 %v111_v19, %v86_v27  ;;  %v114_v38 = vadd.f32 %v112_v20, %v87_v28  ;;  %v326_v57 = vstv %s981_s27  ;;  %v247_v62 = vmul.f32 %v1002_v35, %v245_v44  ;;  %1608 = vst [vmem:[#allocation14_spill] sm:$0xff] %v1096_v14  ;;  %s1098_s13 = sld [smem:[#allocation2 + $0x4a]]  ;;  %v1105_v23 = vld [vmem:[%s1564_s1 + $0xe8] sm:$0x3f]  ;;  %v1110_v24 = vld [vmem:[%s1564_s1 + $0xf0] sm:$0x3f] }
  0x1e   :  { %v273_v63 = vmul.f32 %v1007_v36, %v272_v45  ;;  %v274_v8 = vmul.f32 %v1016_v41, %v272_v45  ;;  %v300_v9 = vmul.f32 %v1021_v42, %v299_v56  ;;  %v353_v10 = vstv %s995_s4  ;;  %1609 = vst [vmem:[#allocation15_spill] sm:$0xff] %v1105_v23  ;;  %1610 = vst [vmem:[#allocation16_spill] sm:$0xff] %v1110_v24  ;;  %s1112_s18 = sld [smem:[#allocation2 + $0x4e]]  ;;  %s1114_s19 = sld [smem:[#allocation2 + $0x50]]  ;;  %v1123_v33 = vld [vmem:[%s1564_s1 + $0xf8] sm:$0x3f] }
  0x1f   :  { %v140_v48 = vadd.f32 %v138_v29, %v113_v37  ;;  %v141_v49 = vadd.f32 %v139_v30, %v114_v38  ;;  %v380_v12 = vstv %s1009_s10  ;;  %v301_v19 = vmul.f32 %v1031_v46, %v299_v56  ;;  %1611 = vst [vmem:[#allocation17_spill] sm:$0xff] %v1123_v33  ;;  %s1125_s22 = sld [smem:[#allocation2]]  ;;  %s1127_s23 = sld [smem:[#allocation2 + $0x4]] }
  0x20   :  { %v327_v20 = vmul.f32 %v1036_v47, %v326_v57  ;;  %v328_v27 = vmul.f32 %v1045_v52, %v326_v57  ;;  %v354_v28 = vmul.f32 %v1050_v53, %v353_v10  ;;  %v407_v29 = vstv %s1023_s14  ;;  %s1141_s25 = sld [smem:[#allocation2 + $0x8]]  ;;  %s1185_s12 = sld [smem:[#allocation2 + $0x14]] }
  0x21   :  { %v167_v60 = vadd.f32 %v165_v39, %v140_v48  ;;  %v168_v61 = vadd.f32 %v166_v40, %v141_v49  ;;  %v434_v30 = vstv %s1038_s20  ;;  %v355_v38 = vmul.f32 %v1061_v58, %v353_v10  ;;  %v1134_v40 = vld [vmem:[%s1564_s1 + $0x100] sm:$0x3f]  ;;  %s1170_s9 = sld [smem:[#allocation2 + $0x10]]  ;;  %s1225_s10 = sld [smem:[#allocation2 + $0x24]] }
  0x22   :  { %v381_v39 = vmul.f32 %v1066_v59, %v380_v12  ;;  %1612 = vst [vmem:[#allocation18_spill] sm:$0xff] %v1134_v40  ;;  %v382_v44 = vmul.f32 %v1075_v4, %v380_v12  ;;  %v1145_v45 = vmul.f32 %v1080_v5, %v407_v29  ;;  %v461_v48 = vstv %s1052_s24  ;;  %v1182_v12 = vld [vmem:[%s1564_s1 + $0x128] sm:$0x3f]  ;;  %s1187_s4 = sld [smem:[#allocation2 + $0x18]]  ;;  %s1251_s16 = sld [smem:[#allocation2 + $0x34]] }
  0x23   :  { %v194_v17 = vadd.f32 %v192_v43, %v167_v60  ;;  %v195_v18 = vadd.f32 %v193_v50, %v168_v61  ;;  %v1139_v43 = vld [vmem:[%s1564_s1 + $0x108] sm:$0x3f]  ;;  %v488_v49 = vstv %s1068_s29  ;;  %v1152_v50 = vld [vmem:[%s1564_s1 + $0x110] sm:$0x3f]  ;;  %v409_v57 = vmul.f32 %v1091_v13, %v407_v29  ;;  %v1166_v61 = vld [vmem:[%s1564_s1 + $0x120] sm:$0x3f] }
  0x24   :  { %1613 = vst [vmem:[#allocation19_spill] sm:$0xff] %v1139_v43  ;;  %1614 = vst [vmem:[#allocation20_spill] sm:$0xff] %v1152_v50  ;;  %v1161_v60 = vmul.f32 %v1096_v14, %v434_v30  ;;  %s1168_s29 = sld [smem:[#allocation2 + $0xc]]  ;;  %v1173_v10 = vmul.f32 %v1105_v23, %v434_v30  ;;  %v1190_v30 = vmul.f32 %v1123_v33, %v461_v48  ;;  %s1231_s15 = sld [smem:[#allocation2 + $0x28]]  ;;  %vm31_vm9 = vcmask 0  }
  0x25   :  { %v221_v34 = vadd.f32 %v219_v51, %v194_v17  ;;  %v222_v37 = vadd.f32 %v220_v54, %v195_v18  ;;  %v1157_v51 = vld [vmem:[%s1564_s1 + $0x118] sm:$0x3f]  ;;  %1616 = vst [vmem:[#allocation22_spill] sm:$0xff] %v1166_v61  ;;  %1617 = vst [vmem:[#allocation23_spill] sm:$0xff] %v1182_v12  ;;  %v542_v17 = vstv %s1098_s13  ;;  %v71_v33 = vstv %s1127_s23  ;;  %s1223_s13 = sld [smem:[#allocation2 + $0x20]]  ;;  %s1290_s14 = sld [smem:[#allocation2 + $0x44]] }
  0x26   :  { %1615 = vst [vmem:[#allocation21_spill] sm:$0xff] %v1157_v51  ;;  %v1205_v14 = vmul.f32 %v1166_v61, %v542_v17  ;;  %s1249_s11 = sld [smem:[#allocation2 + $0x30]]  ;;  %s1300_s28 = sld [smem:[#allocation2 + $0x53]] }
  0x27   :  { %v248_v54 = vadd.f32 %v246_v55, %v221_v34  ;;  %v249_v56 = vadd.f32 %v247_v62, %v222_v37  ;;  %v1176_v55 = vmul.f32 %v1110_v24, %v461_v48  ;;  %v515_v62 = vstv %s1082_s7  ;;  %s1217_s7 = sld [smem:[#allocation2 + $0x1c]]  ;;  %s1264_s26 = sld [smem:[#allocation2 + $0x38]] }
  0x28   :  { %v1193_v34 = vmul.f32 %v1134_v40, %v488_v49  ;;  %v1196_v37 = vmul.f32 %v1139_v43, %v488_v49  ;;  %v1199_v24 = vmul.f32 %v1152_v50, %v515_v62  ;;  %v1202_v23 = vmul.f32 %v1157_v51, %v515_v62  ;;  %s1280_s21 = sld [smem:[#allocation2 + $0x40]]  ;;  %s1302_s0 = sld [smem:[#allocation2 + $0x3]] }
  0x29   :  { %v275_v18 = vadd.f32 %v273_v63, %v248_v54  ;;  %v276_v29 = vadd.f32 %v274_v8, %v249_v56  ;;  %v1208_v48 = vmul.f32 %v1182_v12, %v542_v17  ;;  %v569_v54 = vstv %s1112_s18  ;;  %s1292_s20 = sld [smem:[#allocation2 + $0x48]]  ;;  %s1308_s27 = sld [smem:[#allocation2 + $0x7]] }
  0x2a   :  { %v34_v56 = vstv %s1114_s19  ;;  %v44_v40 = vstv %s1125_s22  ;;  %v98_v49 = vstv %s1141_s25  ;;  %s1243_s19 = sld [smem:[#allocation2 + $0x2c]]  ;;  %s1310_s5 = sld [smem:[#allocation2 + $0xb]] }
  0x2b   :  { %v302_v63 = vadd.f32 %v300_v9, %v275_v18  ;;  %v303_v8 = vadd.f32 %v301_v19, %v276_v29  ;;  %v45_v62 = vmul.f32 %v44_v40, %v899_v0  ;;  %v46_v61 = vmul.f32 %v44_v40, %v904_v1  ;;  %s1298_s25 = sld [smem:[#allocation2 + $0x4c]]  ;;  %s1323_s30 = sld [smem:[#allocation2 + $0xf]] }
  0x2c   :  { %v72_v9 = vmul.f32 %v911_v2, %v71_v33  ;;  %v73_v19 = vmul.f32 %v916_v3, %v71_v33  ;;  %v99_v17 = vmul.f32 %v923_v6, %v98_v49  ;;  %v100_v18 = vmul.f32 %v928_v7, %v98_v49  ;;  %v1236_v49 = vld [vmem:[%s1564_s1 + $0x130] sm:$0x3f]  ;;  %s1329_s8 = sld [smem:[#allocation2 + $0x13]]  ;;  %s1372_s17 = sld [smem:[#allocation2 + $0x2f]] }
  0x2d   :  { %v329_v43 = vadd.f32 %v327_v20, %v302_v63  ;;  %v330_v50 = vadd.f32 %v328_v27, %v303_v8  ;;  %v47_v29 = vadd.f32 %v45_v62, %v34_v56  ;;  %v48_v63 = vadd.f32 %v46_v61, %v34_v56  ;;  %s1374_s18 = sld [smem:[#allocation2 + $0x33]]  ;;  %s1395_s23 = sld [smem:[#allocation2 + $0x47]] }
  0x2e   :  { %v125_v8 = vstv %s1168_s29  ;;  %v152_v40 = vstv %s1170_s9  ;;  %v179_v1 = vstv %s1185_s12  ;;  %v206_v0 = vstv %s1187_s4  ;;  %s1331_s12 = sld [smem:[#allocation2 + $0x17]]  ;;  %s1344_s4 = sld [smem:[#allocation2 + $0x1b]] }
  0x2f   :  { %v356_v20 = vadd.f32 %v354_v28, %v329_v43  ;;  %v357_v27 = vadd.f32 %v355_v38, %v330_v50  ;;  %v74_v7 = vadd.f32 %v72_v9, %v47_v29  ;;  %v75_v6 = vadd.f32 %v73_v19, %v48_v63  ;;  %s1389_s22 = sld [smem:[#allocation2 + $0x43]]  ;;  %s1431_s6 = sld [smem:[#allocation2 + $0xd]] }
  0x30   :  { %v126_v28 = vmul.f32 %v937_v11, %v125_v8  ;;  %v127_v38 = vmul.f32 %v946_v15, %v125_v8  ;;  %v153_v43 = vmul.f32 %v951_v16, %v152_v40  ;;  %v154_v50 = vmul.f32 %v960_v21, %v152_v40  ;;  %s1433_s24 = sld [smem:[#allocation2 + $0x11]]  ;;  %s1439_s29 = sld [smem:[#allocation2 + $0x15]] }
  0x31   :  { %v383_v2 = vadd.f32 %v381_v39, %v356_v20  ;;  %v384_v33 = vadd.f32 %v382_v44, %v357_v27  ;;  %v101_v39 = vadd.f32 %v99_v17, %v74_v7  ;;  %v102_v44 = vadd.f32 %v100_v18, %v75_v6  ;;  %v1258_v6 = vld [vmem:[%s1564_s1 + $0x138] sm:$0x3f]  ;;  %s1278_s1 = sld [smem:[#allocation2 + $0x3c]]  ;;  %s1441_s9 = sld [smem:[#allocation2 + $0x19]] }
  0x32   :  { %v570_v62 = vmul.f32 %v1236_v49, %v569_v54  ;;  %v180_v9 = vmul.f32 %v965_v22, %v179_v1  ;;  %v181_v19 = vmul.f32 %v974_v25, %v179_v1  ;;  %v207_v20 = vmul.f32 %v979_v26, %v206_v0 }
  0x33   :  { %v410_v61 = vadd.f32 %v1145_v45, %v383_v2  ;;  %v411_v56 = vadd.f32 %v409_v57, %v384_v33  ;;  %v128_v45 = vadd.f32 %v126_v28, %v101_v39  ;;  %v129_v57 = vadd.f32 %v127_v38, %v102_v44 }
  0x34   :  { %v208_v1 = vmul.f32 %v988_v31, %v206_v0  ;;  %v233_v17 = vstv %s1217_s7  ;;  %v260_v18 = vstv %s1223_s13  ;;  %v287_v27 = vstv %s1225_s10  ;;  %s1348_s7 = sld [smem:[#allocation2 + $0x1f]]  ;;  %s1354_s13 = sld [smem:[#allocation2 + $0x23]] }
  0x35   :  { %v437_v2 = vadd.f32 %v1161_v60, %v410_v61  ;;  %v438_v7 = vadd.f32 %v1173_v10, %v411_v56  ;;  %v155_v10 = vadd.f32 %v153_v43, %v128_v45  ;;  %v156_v63 = vadd.f32 %v154_v50, %v129_v57  ;;  %s1356_s10 = sld [smem:[#allocation2 + $0x27]] }
  0x36   :  { %v571_v8 = vmul.f32 %v1258_v6, %v569_v54  ;;  %v234_v40 = vmul.f32 %v993_v32, %v233_v17  ;;  %v235_v33 = vmul.f32 %v1002_v35, %v233_v17  ;;  %v314_v28 = vstv %s1231_s15  ;;  %s1362_s15 = sld [smem:[#allocation2 + $0x2b]] }
  0x37   :  { %v464_v29 = vadd.f32 %v1176_v55, %v437_v2  ;;  %v465_v60 = vadd.f32 %v1190_v30, %v438_v7  ;;  %v182_v61 = vadd.f32 %v180_v9, %v155_v10  ;;  %v183_v55 = vadd.f32 %v181_v19, %v156_v63 }
  0x38   :  { %v261_v30 = vmul.f32 %v1007_v36, %v260_v18  ;;  %v262_v43 = vmul.f32 %v1016_v41, %v260_v18  ;;  %v288_v54 = vmul.f32 %v1021_v42, %v287_v27  ;;  %v289_v50 = vmul.f32 %v1031_v46, %v287_v27 }
  0x39   :  { %v491_v0 = vadd.f32 %v1193_v34, %v464_v29  ;;  %v492_v38 = vadd.f32 %v1196_v37, %v465_v60  ;;  %v209_v37 = vadd.f32 %v207_v20, %v182_v61  ;;  %v210_v39 = vadd.f32 %v208_v1, %v183_v55  ;;  %v1618_v55 = vld [vmem:[#allocation14_spill] sm:$0xff] }
  0x3a   :  { %v315_v44 = vmul.f32 %v1036_v47, %v314_v28  ;;  %v341_v9 = vstv %s1243_s19  ;;  %v368_v19 = vstv %s1249_s11  ;;  %v395_v2 = vstv %s1251_s16  ;;  %s1379_s19 = sld [smem:[#allocation2 + $0x37]]  ;;  %s1381_s11 = sld [smem:[#allocation2 + $0x3b]] }
  0x3b   :  { %v518_v34 = vadd.f32 %v1199_v24, %v491_v0  ;;  %v519_v56 = vadd.f32 %v1202_v23, %v492_v38  ;;  %v236_v57 = vadd.f32 %v234_v40, %v209_v37  ;;  %v237_v17 = vadd.f32 %v235_v33, %v210_v39  ;;  %v1620_v37 = vld [vmem:[#allocation16_spill] sm:$0xff]  ;;  %s1387_s16 = sld [smem:[#allocation2 + $0x3f]] }
  0x3c   :  { %v316_v23 = vmul.f32 %v1045_v52, %v314_v28  ;;  %v342_v24 = vmul.f32 %v1050_v53, %v341_v9  ;;  %v343_v20 = vmul.f32 %v1061_v58, %v341_v9  ;;  %v422_v1 = vstv %s1264_s26  ;;  %v1621_v9 = vld [vmem:[#allocation17_spill] sm:$0xff]  ;;  %s1397_s26 = sld [smem:[#allocation2 + $0x4b]] }
  0x3d   :  { %v545_v7 = vadd.f32 %v1205_v14, %v518_v34  ;;  %v546_v45 = vadd.f32 %v1208_v48, %v519_v56  ;;  %v263_v27 = vadd.f32 %v261_v30, %v236_v57  ;;  %v264_v48 = vadd.f32 %v262_v43, %v237_v17  ;;  %v1619_v43 = vld [vmem:[#allocation15_spill] sm:$0xff] }
  0x3e   :  { %v369_v29 = vmul.f32 %v1066_v59, %v368_v19  ;;  %v370_v60 = vmul.f32 %v1075_v4, %v368_v19  ;;  %v396_v10 = vmul.f32 %v1080_v5, %v395_v2  ;;  %v397_v63 = vmul.f32 %v1091_v13, %v395_v2  ;;  %v1622_v2 = vld [vmem:[#allocation18_spill] sm:$0xff] }
  0x3f   :  { %v572_v18 = vadd.f32 %v570_v62, %v545_v7  ;;  %v573_v14 = vadd.f32 %v571_v8, %v546_v45  ;;  %v290_v40 = vadd.f32 %v288_v54, %v263_v27  ;;  %v291_v33 = vadd.f32 %v289_v50, %v264_v48 }
  0x40   :  { %v449_v28 = vstv %s1278_s1  ;;  %v476_v0 = vstv %s1280_s21  ;;  %v423_v30 = vmul.f32 %v1618_v55, %v422_v1  ;;  %v424_v34 = vmul.f32 %v1619_v43, %v422_v1  ;;  %v1623_v1 = vld [vmem:[#allocation19_spill] sm:$0xff]  ;;  %s1403_s1 = sld [smem:[#allocation2 + $0x4f]] }
  0x41   :  { %vm624_vm1 = vcmp.ge.f32.partialorder %v572_v18, 0.0  ;;  %vm625_vm2 = vcmp.ge.f32.partialorder %v573_v14, 0.0  ;;  %v626_v62 = vmul.f32 0.1, %v572_v18  ;;  %v627_v8 = vmul.f32 0.1, %v573_v14 }
  0x42   :  { %v317_v54 = vadd.f32 %v315_v44, %v290_v40  ;;  %v318_v50 = vadd.f32 %v316_v23, %v291_v33  ;;  %v450_v39 = vmul.f32 %v1620_v37, %v449_v28  ;;  %v451_v19 = vmul.f32 %v1621_v9, %v449_v28 }
  0x43   :  { %v628_v38 = vsel %vm624_vm1, %v572_v18, %v626_v62  ;;  %v629_v61 = vsel %vm625_vm2, %v573_v14, %v627_v8  ;;  %v477_v7 = vmul.f32 %v1622_v2, %v476_v0  ;;  %v503_v45 = vstv %s1290_s14  ;;  %v1624_v14 = vld [vmem:[#allocation20_spill] sm:$0xff]  ;;  %v1625_v62 = vld [vmem:[#allocation22_spill] sm:$0xff] }
  0x44   :  { %816 = vst [vmem:[%s1565_s2 + $0x28] sm:$0x3f] %v629_v61  ;;  %v633_v56 = vsub.f32 %v628_v38, %v629_v61  ;;  %815 = vst [vmem:[%s1565_s2 + $0x20] sm:$0x3f] %v628_v38  ;;  %v530_v57 = vstv %s1292_s20  ;;  %v344_v17 = vadd.f32 %v342_v24, %v317_v54  ;;  %v345_v23 = vadd.f32 %v343_v20, %v318_v50  ;;  %v1626_v50 = vld [vmem:[#allocation8_spill] sm:$0xff] }
  0x45   :  { %v478_v18 = vmul.f32 %v1623_v1, %v476_v0  ;;  %v504_v27 = vmul.f32 %v1624_v14, %v503_v45  ;;  %v505_v48 = vmul.f32 %v1157_v51, %v503_v45  ;;  %v531_v8 = vmul.f32 %v1625_v62, %v530_v57  ;;  %v1627_v62 = vld [vmem:[#allocation9_spill] sm:$0xff] }
  0x46   :  { %v634_v44 = vand.u32 2147483647, %v633_v56  ;;  %v557_v40 = vstv %s1298_s25  ;;  %v371_v28 = vadd.f32 %v369_v29, %v344_v17  ;;  %v372_v38 = vadd.f32 %v370_v60, %v345_v23  ;;  %v1628_v29 = vld [vmem:[#allocation10_spill] sm:$0xff]  ;;  %v1629_v17 = vld [vmem:[#allocation12_spill] sm:$0xff] }
  0x47   :  { %v532_v61 = vmul.f32 %v1182_v12, %v530_v57  ;;  %v40_v56 = vstv %s1300_s28  ;;  %v62_v2 = vstv %s1302_s0  ;;  %v89_v24 = vstv %s1308_s27  ;;  %s1412_s28 = sld [smem:[#allocation2 + $0x51]]  ;;  %s1420_s27 = sld [smem:[#allocation2 + $0x5]] }
  0x48   :  { %v635_v33 = vsel %vm590_vm0, %v634_v44, 0.0  ;;  %v116_v20 = vstv %s1310_s5  ;;  %v398_v0 = vadd.f32 %v396_v10, %v371_v28  ;;  %v399_v54 = vadd.f32 %v397_v63, %v372_v38  ;;  %s1414_s0 = sld [smem:[#allocation2 + $0x1]] }
  0x49   :  { %636 = vadd.xlane.f32.xlu1 %v635_v33  ;;  %v63_v45 = vmul.f32 %v62_v2, %v1626_v50  ;;  %v64_v44 = vmul.f32 %v62_v2, %v1627_v62  ;;  %v90_v60 = vmul.f32 %v1628_v29, %v89_v24  ;;  %v91_v57 = vmul.f32 %v916_v3, %v89_v24  ;;  %v1630_v33 = vld [vmem:[#allocation13_spill] sm:$0xff]  ;;  %s1422_s5 = sld [smem:[#allocation2 + $0x9]] }
  0x4a   :  { %v117_v23 = vmul.f32 %v1629_v17, %v116_v20  ;;  %v118_v12 = vmul.f32 %v1630_v33, %v116_v20  ;;  %v425_v10 = vadd.f32 %v423_v30, %v398_v0  ;;  %v426_v63 = vadd.f32 %v424_v34, %v399_v54 }
  0x4b   :  { %v65_v28 = vadd.f32 %v63_v45, %v40_v56  ;;  %v66_v38 = vadd.f32 %v64_v44, %v40_v56  ;;  %v558_v2 = vmul.f32 %v1236_v49, %v557_v40  ;;  %v143_v62 = vstv %s1323_s30  ;;  %s1461_s30 = sld [smem:[#allocation2 + $0x1d]] }
  0x4c   :  { %v170_v50 = vstv %s1329_s8  ;;  %v197_v51 = vstv %s1331_s12  ;;  %v452_v24 = vadd.f32 %v450_v39, %v425_v10  ;;  %v453_v17 = vadd.f32 %v451_v19, %v426_v63  ;;  %s1467_s8 = sld [smem:[#allocation2 + $0x21]]  ;;  %s1469_s12 = sld [smem:[#allocation2 + $0x25]] }
  0x4d   :  { %v92_v3 = vadd.f32 %v90_v60, %v65_v28  ;;  %v93_v20 = vadd.f32 %v91_v57, %v66_v38  ;;  %v144_v33 = vmul.f32 %v937_v11, %v143_v62  ;;  %v145_v29 = vmul.f32 %v946_v15, %v143_v62 }
  0x4e   :  { %v171_v30 = vmul.f32 %v951_v16, %v170_v50  ;;  %v172_v34 = vmul.f32 %v960_v21, %v170_v50  ;;  %v479_v56 = vadd.f32 %v477_v7, %v452_v24  ;;  %v480_v0 = vadd.f32 %v478_v18, %v453_v17 }
  0x4f   :  { %v119_v54 = vadd.f32 %v117_v23, %v92_v3  ;;  %v120_v45 = vadd.f32 %v118_v12, %v93_v20  ;;  %v559_v39 = vmul.f32 %v1258_v6, %v557_v40  ;;  %v198_v19 = vmul.f32 %v965_v22, %v197_v51 }
  0x50   :  { %v199_v44 = vmul.f32 %v974_v25, %v197_v51  ;;  %v224_v60 = vstv %s1344_s4  ;;  %v506_v62 = vadd.f32 %v504_v27, %v479_v56  ;;  %v507_v57 = vadd.f32 %v505_v48, %v480_v0  ;;  %s1479_s4 = sld [smem:[#allocation2 + $0x29]] }
  0x51   :  { %v146_v10 = vadd.f32 %v144_v33, %v119_v54  ;;  %v147_v50 = vadd.f32 %v145_v29, %v120_v45  ;;  %v251_v7 = vstv %s1348_s7  ;;  %v278_v18 = vstv %s1354_s13  ;;  %s1485_s7 = sld [smem:[#allocation2 + $0x2d]]  ;;  %s1489_s13 = sld [smem:[#allocation2 + $0x31]] }
  0x52   :  { %v305_v3 = vstv %s1356_s10  ;;  %v533_v12 = vadd.f32 %v531_v8, %v506_v62  ;;  %v534_v17 = vadd.f32 %v532_v61, %v507_v57  ;;  %v225_v51 = vmul.f32 %v979_v26, %v224_v60  ;;  %s1493_s10 = sld [smem:[#allocation2 + $0x35]] }
  0x53   :  { %v173_v40 = vadd.f32 %v171_v30, %v146_v10  ;;  %v174_v23 = vadd.f32 %v172_v34, %v147_v50  ;;  %v226_v27 = vmul.f32 %v988_v31, %v224_v60  ;;  %v252_v48 = vmul.f32 %v993_v32, %v251_v7 }
  0x54   :  { %v332_v29 = vstv %s1362_s15  ;;  %v560_v33 = vadd.f32 %v558_v2, %v533_v12  ;;  %v561_v63 = vadd.f32 %v559_v39, %v534_v17  ;;  %v253_v8 = vmul.f32 %v1002_v35, %v251_v7  ;;  %s1499_s15 = sld [smem:[#allocation2 + $0x39]] }
  0x55   :  { %v200_v28 = vadd.f32 %v198_v19, %v173_v40  ;;  %v201_v38 = vadd.f32 %v199_v44, %v174_v23  ;;  %v279_v61 = vmul.f32 %v1007_v36, %v278_v18  ;;  %v280_v24 = vmul.f32 %v1016_v41, %v278_v18 }
  0x56   :  { %v306_v20 = vmul.f32 %v1021_v42, %v305_v3  ;;  %vm580_vm3 = vcmp.ge.f32.partialorder %v560_v33, 0.0  ;;  %vm581_vm4 = vcmp.ge.f32.partialorder %v561_v63, 0.0  ;;  %v582_v2 = vmul.f32 0.1, %v560_v33 }
  0x57   :  { %v583_v30 = vmul.f32 0.1, %v561_v63  ;;  %v227_v34 = vadd.f32 %v225_v51, %v200_v28  ;;  %v228_v56 = vadd.f32 %v226_v27, %v201_v38  ;;  %v307_v0 = vmul.f32 %v1031_v46, %v305_v3 }
  0x58   :  { %v359_v54 = vstv %s1372_s17  ;;  %v584_v45 = vsel %vm580_vm3, %v560_v33, %v582_v2  ;;  %v333_v19 = vmul.f32 %v1036_v47, %v332_v29  ;;  %v386_v44 = vstv %s1374_s18  ;;  %s1505_s17 = sld [smem:[#allocation2 + $0x3d]] }
  0x59   :  { %v585_v39 = vsel %vm581_vm4, %v561_v63, %v583_v30  ;;  %586 = vst [vmem:[%s1565_s2] sm:$0x3f] %v584_v45  ;;  %v254_v62 = vadd.f32 %v252_v48, %v227_v34  ;;  %v255_v57 = vadd.f32 %v253_v8, %v228_v56  ;;  %v334_v10 = vmul.f32 %v1045_v52, %v332_v29 }
  0x5a   :  { %587 = vst [vmem:[%s1565_s2 + $0x8] sm:$0x3f] %v585_v39  ;;  %v588_v60 = vsub.f32 %v584_v45, %v585_v39  ;;  %v360_v50 = vmul.f32 %v1050_v53, %v359_v54  ;;  %v361_v7 = vmul.f32 %v1061_v58, %v359_v54  ;;  %v413_v18 = vstv %s1379_s19 }
  0x5b   :  { %v440_v3 = vstv %s1381_s11  ;;  %v281_v17 = vadd.f32 %v279_v61, %v254_v62  ;;  %v282_v40 = vadd.f32 %v280_v24, %v255_v57  ;;  %v387_v23 = vmul.f32 %v1066_v59, %v386_v44  ;;  %v1632_v57 = vld [vmem:[#allocation21_spill] sm:$0xff] }
  0x5c   :  { %v589_v12 = vand.u32 2147483647, %v588_v60  ;;  %v388_v51 = vmul.f32 %v1075_v4, %v386_v44  ;;  %v414_v27 = vmul.f32 %v1080_v5, %v413_v18  ;;  %v415_v48 = vmul.f32 %v1091_v13, %v413_v18 }
  0x5d   :  { %v467_v29 = vstv %s1387_s16  ;;  %v308_v63 = vadd.f32 %v306_v20, %v281_v17  ;;  %v309_v28 = vadd.f32 %v307_v0, %v282_v40  ;;  %v441_v38 = vmul.f32 %v1618_v55, %v440_v3  ;;  %v1631_v0 = vld [vmem:[#allocation18_spill] sm:$0xff] }
  0x5e   :  { %v591_v33 = vsel %vm590_vm0, %v589_v12, 0.0  ;;  %v442_v8 = vmul.f32 %v1619_v43, %v440_v3  ;;  %v494_v61 = vstv %s1389_s22  ;;  %v521_v24 = vstv %s1395_s23  ;;  %v1633_v3 = vld [vmem:[#allocation22_spill] sm:$0xff]  ;;  %s1515_s22 = sld [smem:[#allocation2 + $0x41]]  ;;  %s1520_s23 = sld [smem:[#allocation2 + $0x45]] }
  0x5f   :  { %592 = vadd.xlane.f32.xlu0 %v591_v33  ;;  %v548_v2 = vstv %s1397_s26  ;;  %v335_v20 = vadd.f32 %v333_v19, %v308_v63  ;;  %v336_v30 = vadd.f32 %v334_v10, %v309_v28  ;;  %v468_v34 = vmul.f32 %v1620_v37, %v467_v29  ;;  %v1634_v63 = vld [vmem:[#allocation8_spill] sm:$0xff]  ;;  %s804_s26 = sld [smem:[#allocation2 + $0x49]] }
  0x60   :  { %v469_v56 = vmul.f32 %v1621_v9, %v467_v29  ;;  %v495_v54 = vmul.f32 %v1631_v0, %v494_v61  ;;  %v496_v45 = vmul.f32 %v1623_v1, %v494_v61  ;;  %v522_v39 = vmul.f32 %v1624_v14, %v521_v24  ;;  %v1635_v61 = vld [vmem:[#allocation9_spill] sm:$0xff] }
  0x61   :  { %v575_v44 = vstv %s1403_s1  ;;  %v362_v60 = vadd.f32 %v360_v50, %v335_v20  ;;  %v363_v62 = vadd.f32 %v361_v7, %v336_v30  ;;  %v523_v18 = vmul.f32 %v1632_v57, %v521_v24  ;;  %v1636_v50 = vld [vmem:[#allocation10_spill] sm:$0xff]  ;;  %v1637_v20 = vld [vmem:[#allocation11_spill] sm:$0xff]  ;;  %v1638_v30 = vld [vmem:[#allocation12_spill] sm:$0xff]  ;;  %s810_s1 = sld [smem:[#allocation2 + $0x4d]] }
  0x62   :  { %v549_v12 = vmul.f32 %v1633_v3, %v548_v2  ;;  %v36_v17 = vstv %s1412_s28  ;;  %v50_v19 = vstv %s1414_s0  ;;  %v77_v10 = vstv %s1420_s27  ;;  %v1639_v57 = vld [vmem:[#allocation13_spill] sm:$0xff] }
  0x63   :  { %v104_v40 = vstv %s1422_s5  ;;  %v389_v29 = vadd.f32 %v387_v23, %v362_v60  ;;  %v390_v33 = vadd.f32 %v388_v51, %v363_v62  ;;  %v51_v28 = vmul.f32 %v50_v19, %v1634_v63 }
  0x64   :  { %v52_v14 = vmul.f32 %v50_v19, %v1635_v61  ;;  %v78_v7 = vmul.f32 %v1636_v50, %v77_v10  ;;  %v79_v24 = vmul.f32 %v1637_v20, %v77_v10  ;;  %v105_v3 = vmul.f32 %v1638_v30, %v104_v40 }
  0x65   :  { %v106_v1 = vmul.f32 %v1639_v57, %v104_v40  ;;  %v416_v0 = vadd.f32 %v414_v27, %v389_v29  ;;  %v417_v9 = vadd.f32 %v415_v48, %v390_v33  ;;  %v53_v37 = vadd.f32 %v51_v28, %v36_v17  ;;  %v1640_v28 = vld [vmem:[#allocation23_spill] sm:$0xff] }
  0x66   :  { %v54_v23 = vadd.f32 %v52_v14, %v36_v17  ;;  %v131_v60 = vstv %s1431_s6  ;;  %v158_v51 = vstv %s1433_s24  ;;  %v185_v62 = vstv %s1439_s29  ;;  %s870_s29 = smov [#allocation5]  }
  0x67   :  { %v212_v63 = vstv %s1441_s9  ;;  %v443_v19 = vadd.f32 %v441_v38, %v416_v0  ;;  %v444_v10 = vadd.f32 %v442_v8, %v417_v9  ;;  %v80_v61 = vadd.f32 %v78_v7, %v53_v37  ;;  %s681_s9 = sshll.u32 %s870_s29, 4  ;;  %s682_s9 = int_to_ptr.vmem [resolvable:$true] %s681_s9 }
  0x68   :  { %v81_v50 = vadd.f32 %v79_v24, %v54_v23  ;;  %v132_v57 = vmul.f32 %v937_v11, %v131_v60  ;;  %v133_v40 = vmul.f32 %v946_v15, %v131_v60  ;;  %v159_v27 = vmul.f32 %v951_v16, %v158_v51  ;;  %p847_p6 = scmp.lt.s32.totalorder %s682_s9, %s682_s9 }
  0x69   :  { %v160_v14 = vmul.f32 %v960_v21, %v158_v51  ;;  %v470_v48 = vadd.f32 %v468_v34, %v443_v19  ;;  %v471_v17 = vadd.f32 %v469_v56, %v444_v10  ;;  %v107_v29 = vadd.f32 %v105_v3, %v80_v61 }
  0x6a   :  { %v108_v33 = vadd.f32 %v106_v1, %v81_v50  ;;  %v550_v20 = vmul.f32 %v1640_v28, %v548_v2  ;;  %v576_v38 = vmul.f32 %v1236_v49, %v575_v44  ;;  %v186_v37 = vmul.f32 %v965_v22, %v185_v62 }
  0x6b   :  { %v187_v11 = vmul.f32 %v974_v25, %v185_v62  ;;  %v497_v15 = vadd.f32 %v495_v54, %v470_v48  ;;  %v498_v16 = vadd.f32 %v496_v45, %v471_v17  ;;  %v134_v21 = vadd.f32 %v132_v57, %v107_v29 }
  0x6c   :  { %v135_v9 = vadd.f32 %v133_v40, %v108_v33  ;;  %v577_v8 = vmul.f32 %v1258_v6, %v575_v44  ;;  %v213_v1 = vmul.f32 %v979_v26, %v212_v63  ;;  %v214_v2 = vmul.f32 %v988_v31, %v212_v63 }
  0x6d   :  { %v239_v34 = vstv %s1461_s30  ;;  %v524_v22 = vadd.f32 %v522_v39, %v497_v15  ;;  %v525_v56 = vadd.f32 %v523_v18, %v498_v16  ;;  %v161_v0 = vadd.f32 %v159_v27, %v134_v21  ;;  %s842_s30 = scalar_lea.vmem %s682_s9, 16 }
  0x6e   :  { %v162_v25 = vadd.f32 %v160_v14, %v135_v9  ;;  %v266_v3 = vstv %s1467_s8  ;;  %v293_v7 = vstv %s1469_s12  ;;  %v240_v26 = vmul.f32 %v993_v32, %v239_v34  ;;  %p843_p5 = scmp.ne.s32.totalorder %s682_s9, %s842_s30  ;;  %s846_s8 = scalar_lea.vmem %s682_s9, 32 }
  0x6f   :  { %v551_v54 = vadd.f32 %v549_v12, %v524_v22  ;;  %v552_v45 = vadd.f32 %v550_v20, %v525_v56  ;;  %v188_v24 = vadd.f32 %v186_v37, %v161_v0  ;;  %v241_v31 = vmul.f32 %v1002_v35, %v239_v34  ;;  %v1641_v56 = vld [vmem:[#allocation16_spill] sm:$0xff]  ;;  %p848_p7 = scmp.lt.s32.totalorder %s846_s8, %s842_s30 }
  0x70   :  { %v189_v44 = vadd.f32 %v187_v11, %v162_v25  ;;  %v267_v60 = vmul.f32 %v1007_v36, %v266_v3  ;;  %v268_v51 = vmul.f32 %v1016_v41, %v266_v3  ;;  %v294_v12 = vmul.f32 %v1021_v42, %v293_v7  ;;  %v1642_v25 = vld [vmem:[#allocation17_spill] sm:$0xff] }
  0x71   :  { %v578_v30 = vadd.f32 %v576_v38, %v551_v54  ;;  %v579_v23 = vadd.f32 %v577_v8, %v552_v45  ;;  %v215_v39 = vadd.f32 %v213_v1, %v188_v24  ;;  %v320_v62 = vstv %s1479_s4  ;;  %v1643_v45 = vld [vmem:[#allocation18_spill] sm:$0xff]  ;;  %v1644_v24 = vld [vmem:[#allocation19_spill] sm:$0xff]  ;;  %p849_p8 = por %p848_p7, %p847_p6 }
  0x72   :  { %v216_v18 = vadd.f32 %v214_v2, %v189_v44  ;;  %v295_v10 = vmul.f32 %v1031_v46, %v293_v7  ;;  %v347_v61 = vstv %s1485_s7  ;;  %v321_v36 = vmul.f32 %v1036_v47, %v320_v62 }
  0x73   :  { %vm646_vm5 = vcmp.ge.f32.partialorder %v578_v30, 0.0  ;;  %vm647_vm6 = vcmp.ge.f32.partialorder %v579_v23, 0.0  ;;  %v648_v32 = vmul.f32 0.1, %v578_v30  ;;  %v649_v35 = vmul.f32 0.1, %v579_v23  ;;  %p850_p9 = pnand %p849_p8, %p843_p5 }
  0x74   :  { %v242_v63 = vadd.f32 %v240_v26, %v215_v39  ;;  %v243_v19 = vadd.f32 %v241_v31, %v216_v18  ;;  %v322_v41 = vmul.f32 %v1045_v52, %v320_v62  ;;  %v374_v27 = vstv %s1489_s13 }
  0x75   :  { %v650_v50 = vsel %vm646_vm5, %v578_v30, %v648_v32  ;;  %v651_v57 = vsel %vm647_vm6, %v579_v23, %v649_v35  ;;  %v348_v47 = vmul.f32 %v1050_v53, %v347_v61  ;;  %v349_v17 = vmul.f32 %v1061_v58, %v347_v61 }
  0x76   :  { %817 = vst [vmem:[%s1565_s2 + $0x30] sm:$0x3f] %v650_v50  ;;  %818 = vst [vmem:[%s1565_s2 + $0x38] sm:$0x3f] %v651_v57  ;;  %v655_v42 = vsub.f32 %v650_v50, %v651_v57  ;;  %v269_v46 = vadd.f32 %v267_v60, %v242_v63  ;;  %v270_v40 = vadd.f32 %v268_v51, %v243_v19  ;;  %v401_v33 = vstv %s1493_s10 }
  0x77   :  { %v375_v29 = vmul.f32 %v1066_v59, %v374_v27  ;;  %v376_v53 = vmul.f32 %v1075_v4, %v374_v27  ;;  %v428_v11 = vstv %s1499_s15  ;;  %v402_v58 = vmul.f32 %v1080_v5, %v401_v33 }
  0x78   :  { %v656_v52 = vand.u32 2147483647, %v655_v42  ;;  %v296_v14 = vadd.f32 %v294_v12, %v269_v46  ;;  %v297_v48 = vadd.f32 %v295_v10, %v270_v40  ;;  %v403_v59 = vmul.f32 %v1091_v13, %v401_v33  ;;  %v1647_v12 = vld [vmem:[#allocation22_spill] sm:$0xff] }
  0x79   :  { %v455_v21 = vstv %s1505_s17  ;;  %v429_v1 = vmul.f32 %v1618_v55, %v428_v11  ;;  %v430_v2 = vmul.f32 %v1619_v43, %v428_v11  ;;  %v482_v34 = vstv %s1515_s22  ;;  %v1645_v55 = vld [vmem:[#allocation20_spill] sm:$0xff]  ;;  %v1646_v43 = vld [vmem:[#allocation21_spill] sm:$0xff] }
  0x7a   :  { %v657_v20 = vsel %vm590_vm0, %v656_v52, 0.0  ;;  %v323_v38 = vadd.f32 %v321_v36, %v296_v14  ;;  %v324_v37 = vadd.f32 %v322_v41, %v297_v48  ;;  %v456_v0 = vmul.f32 %v1641_v56, %v455_v21 }
  0x7b   :  { %658 = vadd.xlane.f32.xlu1 %v657_v20  ;;  %v457_v3 = vmul.f32 %v1642_v25, %v455_v21  ;;  %v509_v7 = vstv %s1520_s23  ;;  %v483_v13 = vmul.f32 %v1643_v45, %v482_v34  ;;  %v484_v44 = vmul.f32 %v1644_v24, %v482_v34 }
  0x7c   :  { %v350_v15 = vadd.f32 %v348_v47, %v323_v38  ;;  %v351_v16 = vadd.f32 %v349_v17, %v324_v37  ;;  %v536_v26 = vstv %s804_s26  ;;  %v510_v23 = vmul.f32 %v1645_v55, %v509_v7 }
  0x7d   :  { %v511_v39 = vmul.f32 %v1646_v43, %v509_v7  ;;  %v563_v18 = vstv %s810_s1  ;;  %v537_v62 = vmul.f32 %v1647_v12, %v536_v26  ;;  %v538_v32 = vmul.f32 %v1640_v28, %v536_v26 }
  0x7e   :  { %v377_v9 = vadd.f32 %v375_v29, %v350_v15  ;;  %v378_v8 = vadd.f32 %v376_v53, %v351_v16  ;;  %v564_v19 = vmul.f32 %v1236_v49, %v563_v18  ;;  %v565_v10 = vmul.f32 %v1258_v6, %v563_v18 }
  0x7f   :  { %v869_v27 = vmov 0.0  }
  0x80   :  { %v404_v4 = vadd.f32 %v402_v58, %v377_v9  ;;  %v405_v22 = vadd.f32 %v403_v59, %v378_v8  ;;  %32 = vst.msk [vmem:[#allocation5] sm:$0x1] %vm31_vm9, %v869_v27 }
  0x82   :  { %v431_v54 = vadd.f32 %v429_v1, %v404_v4  ;;  %v432_v5 = vadd.f32 %v430_v2, %v405_v22 }
  0x84   :  { %v458_v31 = vadd.f32 %v456_v0, %v431_v54  ;;  %v459_v30 = vadd.f32 %v457_v3, %v432_v5 }
  0x86   :  { %v485_v60 = vadd.f32 %v483_v13, %v458_v31  ;;  %v486_v51 = vadd.f32 %v484_v44, %v459_v30 }
  0x87   :  { %v668_v7 = vld [vmem:[#allocation5] sm:$0x1] }
  0x88   :  { %v512_v35 = vadd.f32 %v510_v23, %v485_v60  ;;  %v513_v63 = vadd.f32 %v511_v39, %v486_v51 }
  0x8a   :  { %v539_v61 = vadd.f32 %v537_v62, %v512_v35  ;;  %v540_v50 = vadd.f32 %v538_v32, %v513_v63 }
  0x8c   :  { %v566_v57 = vadd.f32 %v564_v19, %v539_v61  ;;  %v567_v36 = vadd.f32 %v565_v10, %v540_v50 }
  0x8e   :  { %vm602_vm7 = vcmp.ge.f32.partialorder %v566_v57, 0.0  ;;  %vm603_vm8 = vcmp.ge.f32.partialorder %v567_v36, 0.0  ;;  %v604_v41 = vmul.f32 0.1, %v566_v57  ;;  %v605_v42 = vmul.f32 0.1, %v567_v36 }
  0x90   :  { %v606_v46 = vsel %vm602_vm7, %v566_v57, %v604_v41  ;;  %v607_v40 = vsel %vm603_vm8, %v567_v36, %v605_v42 }
  0x91   :  { %813 = vst [vmem:[%s1565_s2 + $0x10] sm:$0x3f] %v606_v46  ;;  %814 = vst [vmem:[%s1565_s2 + $0x18] sm:$0x3f] %v607_v40  ;;  %v611_v49 = vsub.f32 %v606_v46, %v607_v40 }
  0x93   :  { %v612_v6 = vand.u32 2147483647, %v611_v49 }
  0x95   :  { %v613_v28 = vsel %vm590_vm0, %v612_v6, 0.0 }
  0x96   :  { %614 = vadd.xlane.f32.xlu0 %v613_v28 }
  0xd6   :  { %v637_v20 = vpop.xlane.xlu1 %636 }
  0xd7   :  { %v638_v53 = vrot.slane %v637_v20, 4 }
  0xd9   :  { %v639_v15 = vadd.f32 %v638_v53, %v637_v20 }
  0xdb   :  { %v640_v58 = vrot.slane %v639_v15, 2 }
  0xdd   :  { %v641_v1 = vadd.f32 %v640_v58, %v639_v15 }
  0xdf   :  { %v642_v22 = vrot.slane %v641_v1, 1 }
  0xe1   :  { %v643_v3 = vadd.f32 %v642_v22, %v641_v1 }
  0xec   :  { %v593_v47 = vpop.xlane.xlu0 %592 }
  0xed   :  { %v594_v52 = vrot.slane %v593_v47, 4 }
  0xef   :  { %v595_v14 = vadd.f32 %v594_v52, %v593_v47 }
  0xf1   :  { %v596_v48 = vrot.slane %v595_v14, 2 }
  0xf3   :  { %v597_v17 = vadd.f32 %v596_v48, %v595_v14 }
  0xf5   :  { %v598_v29 = vrot.slane %v597_v17, 1 }
  0xf7   :  { %v599_v33 = vadd.f32 %v598_v29, %v597_v17 }
  0xf9   :  { %819 = vpush %v599_v33 }
 0x108   :  { %v659_v38 = vpop.xlane.xlu1 %658 }
 0x109   :  { %v660_v37 = vrot.slane %v659_v38, 4 }
 0x10b   :  { %v661_v11 = vadd.f32 %v660_v37, %v659_v38 }
 0x10d   :  { %v662_v16 = vrot.slane %v661_v11, 2 }
 0x10f   :  { %v663_v9 = vadd.f32 %v662_v16, %v661_v11 }
 0x111   :  { %v664_v4 = vrot.slane %v663_v9, 1 }
 0x113   :  { %v665_v25 = vadd.f32 %v664_v4, %v663_v9 }
 0x123   :  { %v615_v59 = vpop.xlane.xlu0 %614 }
 0x124   :  { %v616_v21 = vrot.slane %v615_v59, 4 }
 0x126   :  { %v617_v8 = vadd.f32 %v616_v21, %v615_v59 }
 0x128   :  { %v618_v2 = vrot.slane %v617_v8, 2 }
 0x12a   :  { %v619_v34 = vadd.f32 %v618_v2, %v617_v8  ;;  %s820_s2 = spop %819 }
 0x12c   :  { %v620_v56 = vrot.slane %v619_v34, 1 }
 0x12e   :  { %v621_v0 = vadd.f32 %v620_v56, %v619_v34 }
 0x130   :  { %821 = vpush %v621_v0 }
 0x131   :  { %823 = vpush %v643_v3 }
 0x132   :  { %825 = vpush %v665_v25 }
 0x161   :  { %s822_s28 = spop %821 }
 0x162   :  { %s623_s0 = sadd.f32 %s822_s28, %s820_s2  ;;  %s824_s27 = spop %823 }
 0x163   :  { %s826_s6 = spop %825 }
 0x164   :  { %s645_s5 = sadd.f32 %s824_s27, %s623_s0 }
 0x166   :  { %s667_s24 = sadd.f32 %s826_s6, %s645_s5 }
 0x168   :  { %v669_v54 = vstv %s667_s24 }
 0x169   :  { %v670_v5 = vadd.f32 %v669_v54, %v668_v7 }
 0x16b   :  { %672 = vst.msk [vmem:[#allocation5] sm:$0x1] %vm31_vm9, %v670_v5 }
 0x16c   :  { %853 = shalt.err (!%p850_p9)
}
 0x16d   :  { %s854_s7 = scalar_lea.hbm %s1566_s3, 16 }
 0x16e   :  { %p855_p10 = scmp.ne.s32.totalorder %s1566_s3, %s854_s7  ;;  %p858_p11 = scmp.lt.u32.totalorder %s854_s7, %s1566_s3 }
 0x170   :  { %p860_p12 = pnand %p858_p11, %p855_p10 }
 0x172   :  { %863 = shalt.err (!%p860_p12)
}
 0x173   :  { %684 = dma.vmem_to_hbm [thread:$0]  %s682_s9, 16, %s1566_s3, [#allocation3]  }
 0x174   :  { %866 = dma.done.wait [#allocation3], 16  }
 0x175   :  { %867 = vsyncadd [#allocation3], 4294967280 }
 0x176   :  { %690 = vsyncpa [#allocation3], 1 }
 0x177   :  { %691 = vsyncpa [#allocation4], 1 }

// kernel: _lambda_.18
= control target key start
LH: loop header
LB: loop body
LE: loop exit
PB: predicated region body
PF: predicated region fallthrough
CT: control target
= control target key end

     0   :  { %9 = vsyncpa [#allocation4], 0  ;;  %s404_s0 = inlined_call_operand.vmem [shape: f32[13], index: 0, kind: input, shape index: {}]   ;;  %s405_s1 = inlined_call_operand.vmem [shape: f32[12,2,6,128], index: 1, kind: input, shape index: {}]   ;;  %s406_s2 = inlined_call_operand.vmem [shape: f32[1,2,6,128], index: 2, kind: output, shape index: {0}]   ;;  %s407_s3 = inlined_call_operand.hbm [shape: f32[1,1], index: 3, kind: output, shape index: {1}]  }
   0x1   :  { %10 = vsyncpa [#allocation3], 0  ;;  %s17_s14 = sshll.u32 %s404_s0, 4  ;;  %s18_s14 = int_to_ptr.vmem [resolvable:$true] %s17_s14 }
   0x2   :  { %s221_s15 = scalar_lea.vmem %s18_s14, 16  ;;  %p226_p1 = scmp.lt.s32.totalorder %s18_s14, %s18_s14 }
   0x3   :  { %p222_p0 = scmp.ne.s32.totalorder %s18_s14, %s221_s15  ;;  %p227_p2 = scmp.lt.s32.totalorder %s221_s15, %s221_s15 }
   0x5   :  { %p228_p3 = por %p227_p2, %p226_p1 }
   0x7   :  { %p229_p4 = pnand %p228_p3, %p222_p0 }
   0x9   :  { %232 = shalt.err (!%p229_p4)
}
   0xa   :  { %s259_s16 = smov [#allocation2]  }
   0xb   :  { %20 = dma.vmem_to_smem %s18_s14, 16, %s259_s16, [#allocation4]  }
   0xc   :  { %255 = dma.done.wait [#allocation4], 16  }
   0xd   :  { %256 = vsyncadd [#allocation4], 4294967280 }
   0xe   :  { %26 = sfence }
   0xf   :  { %s182_s17 = sld [smem:[#allocation2 + $0xc]]  ;;  %s37_s18 = sld [smem:[#allocation2]]  ;;  %v35_v0 = vld [vmem:[%s405_s1] sm:$0x3f]  ;;  %v36_v1 = vld [vmem:[%s405_s1 + $0x8] sm:$0x3f] }
  0x10   :  { %s185_s19 = sld [smem:[#allocation2 + $0x1]]  ;;  %s188_s20 = sld [smem:[#allocation2 + $0x2]]  ;;  %v183_v2 = vld [vmem:[%s405_s1 + $0x10] sm:$0x3f]  ;;  %v184_v3 = vld [vmem:[%s405_s1 + $0x18] sm:$0x3f] }
  0x11   :  { %s285_s21 = sld [smem:[#allocation2 + $0x3]]  ;;  %s293_s25 = sld [smem:[#allocation2 + $0x4]]  ;;  %v186_v6 = vld [vmem:[%s405_s1 + $0x20] sm:$0x3f]  ;;  %v187_v7 = vld [vmem:[%s405_s1 + $0x28] sm:$0x3f] }
  0x12   :  { %s301_s30 = sld [smem:[#allocation2 + $0x5]]  ;;  %s309_s8 = sld [smem:[#allocation2 + $0x6]]  ;;  %v189_v14 = vld [vmem:[%s405_s1 + $0x30] sm:$0x3f]  ;;  %v190_v15 = vld [vmem:[%s405_s1 + $0x38] sm:$0x3f] }
  0x13   :  { %s317_s13 = sld [smem:[#allocation2 + $0x7]]  ;;  %v192_v21 = vld [vmem:[%s405_s1 + $0x40] sm:$0x3f]  ;;  %v193_v22 = vld [vmem:[%s405_s1 + $0x48] sm:$0x3f]  ;;  %s336_s22 = sld [smem:[#allocation2 + $0x9]] }
  0x14   :  { %v195_v28 = vld [vmem:[%s405_s1 + $0x50] sm:$0x3f]  ;;  %v196_v29 = vld [vmem:[%s405_s1 + $0x58] sm:$0x3f]  ;;  %v198_v35 = vld [vmem:[%s405_s1 + $0x60] sm:$0x3f] }
  0x15   :  { %v34_v4 = vstv %s182_s17  ;;  %v38_v5 = vstv %s37_s18  ;;  %s327_s18 = sld [smem:[#allocation2 + $0x8]]  ;;  %v199_v36 = vld [vmem:[%s405_s1 + $0x68] sm:$0x3f]  ;;  %s345_s27 = sld [smem:[#allocation2 + $0xa]]  ;;  %v201_v42 = vld [vmem:[%s405_s1 + $0x70] sm:$0x3f] }
  0x16   :  { %v39_v8 = vmul.f32 %v38_v5, %v35_v0  ;;  %v40_v9 = vmul.f32 %v38_v5, %v36_v1  ;;  %v47_v10 = vstv %s185_s19  ;;  %v56_v13 = vstv %s188_s20  ;;  %v202_v43 = vld [vmem:[%s405_s1 + $0x78] sm:$0x3f]  ;;  %s354_s5 = sld [smem:[#allocation2 + $0xb]]  ;;  %v204_v49 = vld [vmem:[%s405_s1 + $0x80] sm:$0x3f] }
  0x17   :  { %v48_v11 = vmul.f32 %v183_v2, %v47_v10  ;;  %v49_v12 = vmul.f32 %v184_v3, %v47_v10  ;;  %v57_v18 = vmul.f32 %v186_v6, %v56_v13  ;;  %v58_v19 = vmul.f32 %v187_v7, %v56_v13  ;;  %v205_v50 = vld [vmem:[%s405_s1 + $0x88] sm:$0x3f]  ;;  %v207_v56 = vld [vmem:[%s405_s1 + $0x90] sm:$0x3f]  ;;  %v208_v57 = vld [vmem:[%s405_s1 + $0x98] sm:$0x3f] }
  0x18   :  { %v41_v16 = vadd.f32 %v39_v8, %v34_v4  ;;  %v42_v17 = vadd.f32 %v40_v9, %v34_v4  ;;  %v65_v20 = vstv %s285_s21  ;;  %v74_v23 = vstv %s293_s25  ;;  %v210_v63 = vld [vmem:[%s405_s1 + $0xa0] sm:$0x3f]  ;;  %v211_v0 = vld [vmem:[%s405_s1 + $0xa8] sm:$0x3f] }
  0x19   :  { %v66_v26 = vmul.f32 %v189_v14, %v65_v20  ;;  %v67_v27 = vmul.f32 %v190_v15, %v65_v20  ;;  %v83_v30 = vstv %s301_s30  ;;  %v75_v33 = vmul.f32 %v192_v21, %v74_v23  ;;  %v213_v6 = vld [vmem:[%s405_s1 + $0xb0] sm:$0x3f]  ;;  %v214_v7 = vld [vmem:[%s405_s1 + $0xb8] sm:$0x3f]  ;;  %s261_s1 = smov [#allocation5]  }
  0x1a   :  { %v50_v24 = vadd.f32 %v48_v11, %v41_v16  ;;  %v51_v25 = vadd.f32 %v49_v12, %v42_v17  ;;  %v76_v34 = vmul.f32 %v193_v22, %v74_v23  ;;  %v92_v37 = vstv %s309_s8 }
  0x1b   :  { %v84_v40 = vmul.f32 %v195_v28, %v83_v30  ;;  %v85_v41 = vmul.f32 %v196_v29, %v83_v30  ;;  %v101_v44 = vstv %s317_s13  ;;  %v93_v47 = vmul.f32 %v198_v35, %v92_v37 }
  0x1c   :  { %v59_v31 = vadd.f32 %v57_v18, %v50_v24  ;;  %v60_v32 = vadd.f32 %v58_v19, %v51_v25  ;;  %v94_v48 = vmul.f32 %v199_v36, %v92_v37  ;;  %v110_v51 = vstv %s327_s18 }
  0x1d   :  { %v102_v54 = vmul.f32 %v201_v42, %v101_v44  ;;  %v103_v55 = vmul.f32 %v202_v43, %v101_v44  ;;  %v119_v58 = vstv %s336_s22  ;;  %v111_v61 = vmul.f32 %v204_v49, %v110_v51 }
  0x1e   :  { %v68_v38 = vadd.f32 %v66_v26, %v59_v31  ;;  %v69_v39 = vadd.f32 %v67_v27, %v60_v32  ;;  %v112_v62 = vmul.f32 %v205_v50, %v110_v51  ;;  %v128_v1 = vstv %s345_s27 }
  0x1f   :  { %v120_v4 = vmul.f32 %v207_v56, %v119_v58  ;;  %v121_v5 = vmul.f32 %v208_v57, %v119_v58  ;;  %v137_v8 = vstv %s354_s5  ;;  %v129_v11 = vmul.f32 %v210_v63, %v128_v1 }
  0x20   :  { %v77_v45 = vadd.f32 %v75_v33, %v68_v38  ;;  %v78_v46 = vadd.f32 %v76_v34, %v69_v39  ;;  %v130_v12 = vmul.f32 %v211_v0, %v128_v1  ;;  %v138_v15 = vmul.f32 %v213_v6, %v137_v8 }
  0x21   :  { %v139_v16 = vmul.f32 %v214_v7, %v137_v8  ;;  %vm146_vm0 = vcmask 1045504   ;;  %vm31_vm1 = vcmask 0   ;;  %v260_v24 = vmov 0.0  }
  0x22   :  { %v86_v52 = vadd.f32 %v84_v40, %v77_v45  ;;  %v87_v53 = vadd.f32 %v85_v41, %v78_v46  ;;  %32 = vst.msk [vmem:[#allocation5] sm:$0x1] %vm31_vm1, %v260_v24 }
  0x24   :  { %v95_v59 = vadd.f32 %v93_v47, %v86_v52  ;;  %v96_v60 = vadd.f32 %v94_v48, %v87_v53 }
  0x26   :  { %v104_v2 = vadd.f32 %v102_v54, %v95_v59  ;;  %v105_v3 = vadd.f32 %v103_v55, %v96_v60 }
  0x28   :  { %v113_v9 = vadd.f32 %v111_v61, %v104_v2  ;;  %v114_v10 = vadd.f32 %v112_v62, %v105_v3 }
  0x29   :  { %v158_v32 = vld [vmem:[#allocation5] sm:$0x1] }
  0x2a   :  { %v122_v13 = vadd.f32 %v120_v4, %v113_v9  ;;  %v123_v14 = vadd.f32 %v121_v5, %v114_v10 }
  0x2c   :  { %v131_v17 = vadd.f32 %v129_v11, %v122_v13  ;;  %v132_v18 = vadd.f32 %v130_v12, %v123_v14 }
  0x2e   :  { %v140_v19 = vadd.f32 %v138_v15, %v131_v17  ;;  %v141_v20 = vadd.f32 %v139_v16, %v132_v18 }
  0x30   :  { %142 = vst [vmem:[%s406_s2] sm:$0x3f] %v140_v19  ;;  %143 = vst [vmem:[%s406_s2 + $0x8] sm:$0x3f] %v141_v20  ;;  %v144_v21 = vsub.f32 %v140_v19, %v141_v20  ;;  %s171_s2 = sshll.u32 %s261_s1, 4  ;;  %s172_s2 = int_to_ptr.vmem [resolvable:$true] %s171_s2 }
  0x31   :  { %s233_s26 = scalar_lea.vmem %s172_s2, 16  ;;  %s237_s27 = scalar_lea.vmem %s172_s2, 32 }
  0x32   :  { %v145_v22 = vand.u32 2147483647, %v144_v21  ;;  %p234_p5 = scmp.ne.s32.totalorder %s172_s2, %s233_s26  ;;  %p238_p6 = scmp.lt.s32.totalorder %s172_s2, %s172_s2 }
  0x33   :  { %p239_p7 = scmp.lt.s32.totalorder %s237_s27, %s233_s26 }
  0x34   :  { %v147_v23 = vsel %vm146_vm0, %v145_v22, 0.0 }
  0x35   :  { %148 = vadd.xlane.f32.xlu0 %v147_v23  ;;  %p240_p8 = por %p239_p7, %p238_p6 }
  0x37   :  { %p241_p9 = pnand %p240_p8, %p234_p5 }
  0xc2   :  { %v149_v25 = vpop.xlane.xlu0 %148 }
  0xc3   :  { %v150_v26 = vrot.slane %v149_v25, 4 }
  0xc5   :  { %v151_v27 = vadd.f32 %v150_v26, %v149_v25 }
  0xc7   :  { %v152_v28 = vrot.slane %v151_v27, 2 }
  0xc9   :  { %v153_v29 = vadd.f32 %v152_v28, %v151_v27 }
  0xcb   :  { %v154_v30 = vrot.slane %v153_v29, 1 }
  0xcd   :  { %v155_v31 = vadd.f32 %v154_v30, %v153_v29 }
  0xcf   :  { %216 = vpush %v155_v31 }
 0x100   :  { %s217_s25 = spop %216 }
 0x101   :  { %v159_v33 = vstv %s217_s25 }
 0x102   :  { %v160_v34 = vadd.f32 %v159_v33, %v158_v32 }
 0x104   :  { %162 = vst.msk [vmem:[#allocation5] sm:$0x1] %vm31_vm1, %v160_v34 }
 0x105   :  { %244 = shalt.err (!%p241_p9)
}
 0x106   :  { %s245_s30 = scalar_lea.hbm %s407_s3, 16 }
 0x107   :  { %p246_p10 = scmp.ne.s32.totalorder %s407_s3, %s245_s30  ;;  %p249_p11 = scmp.lt.u32.totalorder %s245_s30, %s407_s3 }
 0x109   :  { %p251_p12 = pnand %p249_p11, %p246_p10 }
 0x10b   :  { %254 = shalt.err (!%p251_p12)
}
 0x10c   :  { %174 = dma.vmem_to_hbm [thread:$0]  %s172_s2, 16, %s407_s3, [#allocation3]  }
 0x10d   :  { %257 = dma.done.wait [#allocation3], 16  }
 0x10e   :  { %258 = vsyncadd [#allocation3], 4294967280 }
 0x10f   :  { %180 = vsyncpa [#allocation3], 1 }
 0x110   :  { %181 = vsyncpa [#allocation4], 1 }

// kernel: _lambda_.13
= control target key start
LH: loop header
LB: loop body
LE: loop exit
PB: predicated region body
PF: predicated region fallthrough
CT: control target
= control target key end

     0   :  { %9 = vsyncpa [#allocation4], 0  ;;  %s591_s0 = inlined_call_operand.vmem [shape: f32[24], index: 0, kind: input, shape index: {}]   ;;  %s592_s1 = inlined_call_operand.vmem [shape: f32[5,2,4,128], index: 1, kind: input, shape index: {}]   ;;  %s593_s2 = inlined_call_operand.vmem [shape: f32[4,2,4,128], index: 2, kind: output, shape index: {0}]   ;;  %s594_s3 = inlined_call_operand.hbm [shape: f32[1,1], index: 3, kind: output, shape index: {1}]  }
   0x1   :  { %10 = vsyncpa [#allocation3], 0  ;;  %s17_s14 = sshll.u32 %s591_s0, 4  ;;  %s18_s14 = int_to_ptr.vmem [resolvable:$true] %s17_s14 }
   0x2   :  { %s335_s15 = scalar_lea.vmem %s18_s14, 16  ;;  %p340_p1 = scmp.lt.s32.totalorder %s18_s14, %s18_s14 }
   0x3   :  { %p336_p0 = scmp.ne.s32.totalorder %s18_s14, %s335_s15  ;;  %p341_p2 = scmp.lt.s32.totalorder %s335_s15, %s335_s15 }
   0x5   :  { %p342_p3 = por %p341_p2, %p340_p1 }
   0x7   :  { %p343_p4 = pnand %p342_p3, %p336_p0 }
   0x9   :  { %346 = shalt.err (!%p343_p4)
}
   0xa   :  { %s373_s16 = smov [#allocation2]  }
   0xb   :  { %20 = dma.vmem_to_smem %s18_s14, 16, %s373_s16, [#allocation4]  }
   0xc   :  { %369 = dma.done.wait [#allocation4], 16  }
   0xd   :  { %370 = vsyncadd [#allocation4], 4294967280 }
   0xe   :  { %26 = sfence }
   0xf   :  { %s289_s17 = sld [smem:[#allocation2 + $0x16]]  ;;  %s292_s18 = sld [smem:[#allocation2 + $0x2]]  ;;  %v402_v0 = vld [vmem:[%s592_s1] sm:$0xf]  ;;  %v407_v1 = vld [vmem:[%s592_s1 + $0x4] sm:$0xf] }
  0x10   :  { %s298_s19 = sld [smem:[#allocation2 + $0x6]]  ;;  %s304_s0 = sld [smem:[#allocation2 + $0xa]]  ;;  %v412_v2 = vld [vmem:[%s592_s1 + $0x8] sm:$0xf]  ;;  %v419_v3 = vld [vmem:[%s592_s1 + $0xc] sm:$0xf] }
  0x11   :  { %s414_s26 = sld [smem:[#allocation2 + $0xe]]  ;;  %s421_s29 = sld [smem:[#allocation2 + $0x12]]  ;;  %v428_v4 = vld [vmem:[%s592_s1 + $0x10] sm:$0xf]  ;;  %v437_v7 = vld [vmem:[%s592_s1 + $0x14] sm:$0xf] }
  0x12   :  { %s423_s30 = sld [smem:[#allocation2 + $0x14]]  ;;  %s430_s6 = sld [smem:[#allocation2]]  ;;  %v450_v14 = vld [vmem:[%s592_s1 + $0x18] sm:$0xf]  ;;  %v455_v15 = vld [vmem:[%s592_s1 + $0x1c] sm:$0xf] }
  0x13   :  { %s432_s7 = sld [smem:[#allocation2 + $0x4]]  ;;  %s439_s10 = sld [smem:[#allocation2 + $0x8]]  ;;  %v460_v16 = vld [vmem:[%s592_s1 + $0x20] sm:$0xf]  ;;  %v467_v21 = vld [vmem:[%s592_s1 + $0x24] sm:$0xf] }
  0x14   :  { %s441_s11 = sld [smem:[#allocation2 + $0xc]]  ;;  %s469_s20 = sld [smem:[#allocation2 + $0x10]]  ;;  %vm185_vm0 = vcmask 1043456   ;;  %vm31_vm9 = vcmask 0  }
  0x15   :  { %v38_v5 = vstv %s289_s17  ;;  %v56_v6 = vstv %s292_s18  ;;  %s471_s21 = sld [smem:[#allocation2 + $0x17]]  ;;  %s492_s1 = sld [smem:[#allocation2 + $0xb]] }
  0x16   :  { %v57_v8 = vmul.f32 %v56_v6, %v402_v0  ;;  %v58_v9 = vmul.f32 %v56_v6, %v407_v1  ;;  %v83_v10 = vstv %s298_s19  ;;  %v110_v13 = vstv %s304_s0  ;;  %s476_s0 = sld [smem:[#allocation2 + $0x3]]  ;;  %s478_s22 = sld [smem:[#allocation2 + $0x7]] }
  0x17   :  { %v84_v11 = vmul.f32 %v412_v2, %v83_v10  ;;  %v85_v12 = vmul.f32 %v419_v3, %v83_v10  ;;  %v111_v19 = vmul.f32 %v428_v4, %v110_v13  ;;  %v112_v20 = vmul.f32 %v437_v7, %v110_v13  ;;  %s498_s23 = sld [smem:[#allocation2 + $0xf]]  ;;  %s506_s24 = sld [smem:[#allocation2 + $0x13]] }
  0x18   :  { %v59_v17 = vadd.f32 %v57_v8, %v38_v5  ;;  %v60_v18 = vadd.f32 %v58_v9, %v38_v5  ;;  %v137_v22 = vstv %s414_s26  ;;  %v164_v23 = vstv %s421_s29  ;;  %s508_s25 = sld [smem:[#allocation2 + $0x15]]  ;;  %s526_s5 = sld [smem:[#allocation2 + $0x9]] }
  0x19   :  { %v34_v24 = vstv %s423_s30  ;;  %v138_v27 = vmul.f32 %v450_v14, %v137_v22  ;;  %v139_v28 = vmul.f32 %v455_v15, %v137_v22  ;;  %v165_v29 = vmul.f32 %v460_v16, %v164_v23  ;;  %s519_s30 = sld [smem:[#allocation2 + $0x1]]  ;;  %s521_s4 = sld [smem:[#allocation2 + $0x5]] }
  0x1a   :  { %v86_v25 = vadd.f32 %v84_v11, %v59_v17  ;;  %v87_v26 = vadd.f32 %v85_v12, %v60_v18  ;;  %v166_v30 = vmul.f32 %v467_v21, %v164_v23  ;;  %v44_v31 = vstv %s430_s6  ;;  %s535_s6 = sld [smem:[#allocation2 + $0xd]] }
  0x1b   :  { %v71_v32 = vstv %s432_s7  ;;  %v45_v35 = vmul.f32 %v44_v31, %v402_v0  ;;  %v46_v36 = vmul.f32 %v44_v31, %v407_v1  ;;  %v98_v39 = vstv %s439_s10  ;;  %s537_s7 = sld [smem:[#allocation2 + $0x11]] }
  0x1c   :  { %v113_v33 = vadd.f32 %v111_v19, %v86_v25  ;;  %v114_v34 = vadd.f32 %v112_v20, %v87_v26  ;;  %v72_v37 = vmul.f32 %v412_v2, %v71_v32  ;;  %v73_v38 = vmul.f32 %v419_v3, %v71_v32 }
  0x1d   :  { %v125_v40 = vstv %s441_s11  ;;  %v47_v43 = vadd.f32 %v45_v35, %v34_v24  ;;  %v48_v44 = vadd.f32 %v46_v36, %v34_v24  ;;  %v99_v45 = vmul.f32 %v428_v4, %v98_v39 }
  0x1e   :  { %v140_v41 = vadd.f32 %v138_v27, %v113_v33  ;;  %v141_v42 = vadd.f32 %v139_v28, %v114_v34  ;;  %v100_v46 = vmul.f32 %v437_v7, %v98_v39  ;;  %v126_v47 = vmul.f32 %v450_v14, %v125_v40 }
  0x1f   :  { %v127_v48 = vmul.f32 %v455_v15, %v125_v40  ;;  %v74_v51 = vadd.f32 %v72_v37, %v47_v43  ;;  %v75_v52 = vadd.f32 %v73_v38, %v48_v44  ;;  %v152_v53 = vstv %s469_s20 }
  0x20   :  { %v167_v49 = vadd.f32 %v165_v29, %v140_v41  ;;  %v168_v50 = vadd.f32 %v166_v30, %v141_v42  ;;  %v40_v54 = vstv %s471_s21  ;;  %v62_v55 = vstv %s476_s0 }
  0x21   :  { %v89_v56 = vstv %s478_s22  ;;  %v101_v59 = vadd.f32 %v99_v45, %v74_v51  ;;  %v102_v60 = vadd.f32 %v100_v46, %v75_v52  ;;  %v153_v61 = vmul.f32 %v460_v16, %v152_v53 }
  0x22   :  { %vm219_vm1 = vcmp.ge.f32.partialorder %v167_v49, 0.0  ;;  %vm220_vm2 = vcmp.ge.f32.partialorder %v168_v50, 0.0  ;;  %v221_v57 = vmul.f32 0.1, %v167_v49  ;;  %v222_v58 = vmul.f32 0.1, %v168_v50 }
  0x23   :  { %v154_v62 = vmul.f32 %v467_v21, %v152_v53  ;;  %v63_v6 = vmul.f32 %v62_v55, %v402_v0  ;;  %v64_v8 = vmul.f32 %v62_v55, %v407_v1  ;;  %v128_v10 = vadd.f32 %v126_v47, %v101_v59 }
  0x24   :  { %v223_v63 = vsel %vm219_vm1, %v167_v49, %v221_v57  ;;  %v224_v5 = vsel %vm220_vm2, %v168_v50, %v222_v58  ;;  %v129_v11 = vadd.f32 %v127_v48, %v102_v60  ;;  %v90_v12 = vmul.f32 %v412_v2, %v89_v56 }
  0x25   :  { %321 = vst [vmem:[%s593_s2 + $0x14] sm:$0xf] %v224_v5  ;;  %v228_v9 = vsub.f32 %v223_v63, %v224_v5  ;;  %320 = vst [vmem:[%s593_s2 + $0x10] sm:$0xf] %v223_v63  ;;  %v65_v13 = vadd.f32 %v63_v6, %v40_v54  ;;  %v66_v17 = vadd.f32 %v64_v8, %v40_v54  ;;  %v116_v19 = vstv %s492_s1 }
  0x26   :  { %v91_v18 = vmul.f32 %v419_v3, %v89_v56  ;;  %v155_v22 = vadd.f32 %v153_v61, %v128_v10  ;;  %v156_v23 = vadd.f32 %v154_v62, %v129_v11  ;;  %v117_v24 = vmul.f32 %v428_v4, %v116_v19 }
  0x27   :  { %v229_v20 = vand.u32 2147483647, %v228_v9  ;;  %v92_v25 = vadd.f32 %v90_v12, %v65_v13  ;;  %v118_v27 = vmul.f32 %v437_v7, %v116_v19  ;;  %v143_v28 = vstv %s498_s23 }
  0x28   :  { %v93_v26 = vadd.f32 %v91_v18, %v66_v17  ;;  %vm175_vm3 = vcmp.ge.f32.partialorder %v155_v22, 0.0  ;;  %vm176_vm4 = vcmp.ge.f32.partialorder %v156_v23, 0.0  ;;  %v177_v30 = vmul.f32 0.1, %v155_v22 }
  0x29   :  { %v230_v29 = vsel %vm185_vm0, %v229_v20, 0.0  ;;  %v178_v31 = vmul.f32 0.1, %v156_v23  ;;  %v119_v32 = vadd.f32 %v117_v24, %v92_v25  ;;  %v144_v34 = vmul.f32 %v450_v14, %v143_v28 }
  0x2a   :  { %231 = vadd.xlane.f32.xlu1 %v230_v29  ;;  %v120_v33 = vadd.f32 %v118_v27, %v93_v26  ;;  %v179_v35 = vsel %vm175_vm3, %v155_v22, %v177_v30  ;;  %v145_v36 = vmul.f32 %v455_v15, %v143_v28  ;;  %v170_v37 = vstv %s506_s24  ;;  %s375_s24 = smov [#allocation5]  }
  0x2b   :  { %v36_v38 = vstv %s508_s25  ;;  %v180_v39 = vsel %vm176_vm4, %v156_v23, %v178_v31  ;;  %181 = vst [vmem:[%s593_s2] sm:$0xf] %v179_v35  ;;  %v146_v40 = vadd.f32 %v144_v34, %v119_v32  ;;  %v171_v41 = vmul.f32 %v460_v16, %v170_v37  ;;  %s276_s25 = sshll.u32 %s375_s24, 4  ;;  %s277_s25 = int_to_ptr.vmem [resolvable:$true] %s276_s25 }
  0x2c   :  { %v172_v42 = vmul.f32 %v467_v21, %v170_v37  ;;  %182 = vst [vmem:[%s593_s2 + $0x4] sm:$0xf] %v180_v39  ;;  %v183_v43 = vsub.f32 %v179_v35, %v180_v39  ;;  %v147_v44 = vadd.f32 %v145_v36, %v120_v33  ;;  %v50_v45 = vstv %s519_s30  ;;  %s347_s26 = scalar_lea.vmem %s277_s25, 16  ;;  %s351_s27 = scalar_lea.vmem %s277_s25, 32 }
  0x2d   :  { %v77_v46 = vstv %s521_s4  ;;  %v173_v47 = vadd.f32 %v171_v41, %v146_v40  ;;  %v51_v48 = vmul.f32 %v50_v45, %v402_v0  ;;  %v52_v49 = vmul.f32 %v50_v45, %v407_v1  ;;  %p348_p5 = scmp.ne.s32.totalorder %s277_s25, %s347_s26  ;;  %p352_p6 = scmp.lt.s32.totalorder %s277_s25, %s277_s25 }
  0x2e   :  { %v78_v50 = vmul.f32 %v412_v2, %v77_v46  ;;  %v184_v51 = vand.u32 2147483647, %v183_v43  ;;  %v174_v52 = vadd.f32 %v172_v42, %v147_v44  ;;  %v79_v53 = vmul.f32 %v419_v3, %v77_v46  ;;  %p353_p7 = scmp.lt.s32.totalorder %s351_s27, %s347_s26 }
  0x2f   :  { %v104_v54 = vstv %s526_s5  ;;  %vm241_vm5 = vcmp.ge.f32.partialorder %v173_v47, 0.0  ;;  %v243_v55 = vmul.f32 0.1, %v173_v47  ;;  %v53_v56 = vadd.f32 %v51_v48, %v36_v38 }
  0x30   :  { %v54_v57 = vadd.f32 %v52_v49, %v36_v38  ;;  %v186_v58 = vsel %vm185_vm0, %v184_v51, 0.0  ;;  %vm242_vm6 = vcmp.ge.f32.partialorder %v174_v52, 0.0  ;;  %v244_v59 = vmul.f32 0.1, %v174_v52  ;;  %p354_p8 = por %p353_p7, %p352_p6 }
  0x31   :  { %v105_v0 = vmul.f32 %v428_v4, %v104_v54  ;;  %187 = vadd.xlane.f32.xlu0 %v186_v58  ;;  %v245_v1 = vsel %vm241_vm5, %v173_v47, %v243_v55  ;;  %v80_v2 = vadd.f32 %v78_v50, %v53_v56  ;;  %v106_v61 = vmul.f32 %v437_v7, %v104_v54 }
  0x32   :  { %v81_v60 = vadd.f32 %v79_v53, %v54_v57  ;;  %v246_v3 = vsel %vm242_vm6, %v174_v52, %v244_v59  ;;  %322 = vst [vmem:[%s593_s2 + $0x18] sm:$0xf] %v245_v1  ;;  %v131_v62 = vstv %s535_s6  ;;  %v158_v63 = vstv %s537_s7  ;;  %p355_p9 = pnand %p354_p8, %p348_p5 }
  0x33   :  { %323 = vst [vmem:[%s593_s2 + $0x1c] sm:$0xf] %v246_v3  ;;  %v250_v5 = vsub.f32 %v245_v1, %v246_v3  ;;  %v107_v6 = vadd.f32 %v105_v0, %v80_v2  ;;  %v132_v8 = vmul.f32 %v450_v14, %v131_v62  ;;  %v133_v9 = vmul.f32 %v455_v15, %v131_v62 }
  0x34   :  { %v108_v4 = vadd.f32 %v106_v61, %v81_v60  ;;  %v159_v7 = vmul.f32 %v460_v16, %v158_v63  ;;  %v160_v10 = vmul.f32 %v467_v21, %v158_v63  ;;  %v374_v24 = vmov 0.0  }
  0x35   :  { %v251_v11 = vand.u32 2147483647, %v250_v5  ;;  %v134_v12 = vadd.f32 %v132_v8, %v107_v6  ;;  %32 = vst.msk [vmem:[#allocation5] sm:$0x1] %vm31_vm9, %v374_v24 }
  0x36   :  { %v135_v13 = vadd.f32 %v133_v9, %v108_v4 }
  0x37   :  { %v252_v17 = vsel %vm185_vm0, %v251_v11, 0.0  ;;  %v161_v18 = vadd.f32 %v159_v7, %v134_v12 }
  0x38   :  { %253 = vadd.xlane.f32.xlu1 %v252_v17  ;;  %v162_v19 = vadd.f32 %v160_v10, %v135_v13 }
  0x39   :  { %vm197_vm7 = vcmp.ge.f32.partialorder %v161_v18, 0.0  ;;  %v199_v20 = vmul.f32 0.1, %v161_v18 }
  0x3a   :  { %vm198_vm8 = vcmp.ge.f32.partialorder %v162_v19, 0.0  ;;  %v200_v22 = vmul.f32 0.1, %v162_v19 }
  0x3b   :  { %v201_v23 = vsel %vm197_vm7, %v161_v18, %v199_v20 }
  0x3c   :  { %v202_v14 = vsel %vm198_vm8, %v162_v19, %v200_v22  ;;  %318 = vst [vmem:[%s593_s2 + $0x8] sm:$0xf] %v201_v23  ;;  %v263_v53 = vld [vmem:[#allocation5] sm:$0x1] }
  0x3d   :  { %319 = vst [vmem:[%s593_s2 + $0xc] sm:$0xf] %v202_v14  ;;  %v206_v15 = vsub.f32 %v201_v23, %v202_v14 }
  0x3f   :  { %v207_v16 = vand.u32 2147483647, %v206_v15 }
  0x41   :  { %v208_v21 = vsel %vm185_vm0, %v207_v16, 0.0 }
  0x42   :  { %209 = vadd.xlane.f32.xlu0 %v208_v21 }
  0xb7   :  { %v232_v26 = vpop.xlane.xlu1 %231 }
  0xb8   :  { %v233_v33 = vrot.slane %v232_v26, 4 }
  0xba   :  { %v234_v37 = vadd.f32 %v233_v33, %v232_v26 }
  0xbc   :  { %v235_v39 = vrot.slane %v234_v37, 2 }
  0xbe   :  { %v188_v25 = vpop.xlane.xlu0 %187  ;;  %v236_v44 = vadd.f32 %v235_v39, %v234_v37 }
  0xbf   :  { %v189_v27 = vrot.slane %v188_v25, 4 }
  0xc0   :  { %v237_v48 = vrot.slane %v236_v44, 1 }
  0xc1   :  { %v190_v28 = vadd.f32 %v189_v27, %v188_v25 }
  0xc2   :  { %v238_v52 = vadd.f32 %v237_v48, %v236_v44 }
  0xc3   :  { %v191_v29 = vrot.slane %v190_v28, 2 }
  0xc5   :  { %v254_v30 = vpop.xlane.xlu1 %253  ;;  %v192_v31 = vadd.f32 %v191_v29, %v190_v28 }
  0xc6   :  { %v255_v32 = vrot.slane %v254_v30, 4 }
  0xc7   :  { %v193_v34 = vrot.slane %v192_v31, 1 }
  0xc8   :  { %v256_v36 = vadd.f32 %v255_v32, %v254_v30 }
  0xc9   :  { %v194_v35 = vadd.f32 %v193_v34, %v192_v31 }
  0xca   :  { %v257_v38 = vrot.slane %v256_v36, 2 }
  0xcb   :  { %324 = vpush %v194_v35 }
  0xcc   :  { %v258_v42 = vadd.f32 %v257_v38, %v256_v36 }
  0xce   :  { %v259_v47 = vrot.slane %v258_v42, 1 }
  0xcf   :  { %v210_v40 = vpop.xlane.xlu0 %209 }
  0xd0   :  { %v211_v41 = vrot.slane %v210_v40, 4  ;;  %v260_v51 = vadd.f32 %v259_v47, %v258_v42 }
  0xd2   :  { %v212_v43 = vadd.f32 %v211_v41, %v210_v40 }
  0xd4   :  { %v213_v45 = vrot.slane %v212_v43, 2 }
  0xd6   :  { %v214_v46 = vadd.f32 %v213_v45, %v212_v43 }
  0xd8   :  { %v215_v49 = vrot.slane %v214_v46, 1 }
  0xda   :  { %v216_v50 = vadd.f32 %v215_v49, %v214_v46 }
  0xdc   :  { %326 = vpush %v216_v50 }
  0xdd   :  { %328 = vpush %v238_v52 }
  0xde   :  { %330 = vpush %v260_v51 }
  0xfc   :  { %s325_s2 = spop %324 }
 0x10d   :  { %s327_s20 = spop %326 }
 0x10e   :  { %s218_s21 = sadd.f32 %s327_s20, %s325_s2  ;;  %s329_s0 = spop %328 }
 0x10f   :  { %s331_s1 = spop %330 }
 0x110   :  { %s240_s22 = sadd.f32 %s329_s0, %s218_s21 }
 0x112   :  { %s262_s23 = sadd.f32 %s331_s1, %s240_s22 }
 0x114   :  { %v264_v54 = vstv %s262_s23 }
 0x115   :  { %v265_v55 = vadd.f32 %v264_v54, %v263_v53 }
 0x117   :  { %267 = vst.msk [vmem:[#allocation5] sm:$0x1] %vm31_vm9, %v265_v55 }
 0x118   :  { %358 = shalt.err (!%p355_p9)
}
 0x119   :  { %s359_s30 = scalar_lea.hbm %s594_s3, 16 }
 0x11a   :  { %p360_p10 = scmp.ne.s32.totalorder %s594_s3, %s359_s30  ;;  %p363_p11 = scmp.lt.u32.totalorder %s359_s30, %s594_s3 }
 0x11c   :  { %p365_p12 = pnand %p363_p11, %p360_p10 }
 0x11e   :  { %368 = shalt.err (!%p365_p12)
}
 0x11f   :  { %279 = dma.vmem_to_hbm [thread:$0]  %s277_s25, 16, %s594_s3, [#allocation3]  }
 0x120   :  { %371 = dma.done.wait [#allocation3], 16  }
 0x121   :  { %372 = vsyncadd [#allocation3], 4294967280 }
 0x122   :  { %285 = vsyncpa [#allocation3], 1 }
 0x123   :  { %286 = vsyncpa [#allocation4], 1 }

// kernel: _lambda_.22
= control target key start
LH: loop header
LB: loop body
LE: loop exit
PB: predicated region body
PF: predicated region fallthrough
CT: control target
= control target key end

     0   :  { %9 = vsyncpa [#allocation4], 0  ;;  %s591_s0 = inlined_call_operand.vmem [shape: f32[24], index: 0, kind: input, shape index: {}]   ;;  %s592_s1 = inlined_call_operand.vmem [shape: f32[5,2,2,128], index: 1, kind: input, shape index: {}]   ;;  %s593_s2 = inlined_call_operand.vmem [shape: f32[4,2,2,128], index: 2, kind: output, shape index: {0}]   ;;  %s594_s3 = inlined_call_operand.hbm [shape: f32[1,1], index: 3, kind: output, shape index: {1}]  }
   0x1   :  { %10 = vsyncpa [#allocation3], 0  ;;  %s17_s14 = sshll.u32 %s591_s0, 4  ;;  %s18_s14 = int_to_ptr.vmem [resolvable:$true] %s17_s14 }
   0x2   :  { %s335_s15 = scalar_lea.vmem %s18_s14, 16  ;;  %p340_p1 = scmp.lt.s32.totalorder %s18_s14, %s18_s14 }
   0x3   :  { %p336_p0 = scmp.ne.s32.totalorder %s18_s14, %s335_s15  ;;  %p341_p2 = scmp.lt.s32.totalorder %s335_s15, %s335_s15 }
   0x5   :  { %p342_p3 = por %p341_p2, %p340_p1 }
   0x7   :  { %p343_p4 = pnand %p342_p3, %p336_p0 }
   0x9   :  { %346 = shalt.err (!%p343_p4)
}
   0xa   :  { %s373_s16 = smov [#allocation2]  }
   0xb   :  { %20 = dma.vmem_to_smem %s18_s14, 16, %s373_s16, [#allocation4]  }
   0xc   :  { %369 = dma.done.wait [#allocation4], 16  }
   0xd   :  { %370 = vsyncadd [#allocation4], 4294967280 }
   0xe   :  { %26 = sfence }
   0xf   :  { %s289_s17 = sld [smem:[#allocation2 + $0x16]]  ;;  %s292_s18 = sld [smem:[#allocation2 + $0x2]]  ;;  %v402_v0 = vld [vmem:[%s592_s1] sm:$0x3]  ;;  %v407_v1 = vld [vmem:[%s592_s1 + $0x2] sm:$0x3] }
  0x10   :  { %s298_s19 = sld [smem:[#allocation2 + $0x6]]  ;;  %s304_s0 = sld [smem:[#allocation2 + $0xa]]  ;;  %v412_v2 = vld [vmem:[%s592_s1 + $0x4] sm:$0x3]  ;;  %v419_v3 = vld [vmem:[%s592_s1 + $0x6] sm:$0x3] }
  0x11   :  { %s414_s26 = sld [smem:[#allocation2 + $0xe]]  ;;  %s421_s29 = sld [smem:[#allocation2 + $0x12]]  ;;  %v428_v4 = vld [vmem:[%s592_s1 + $0x8] sm:$0x3]  ;;  %v437_v7 = vld [vmem:[%s592_s1 + $0xa] sm:$0x3] }
  0x12   :  { %s423_s30 = sld [smem:[#allocation2 + $0x14]]  ;;  %s430_s6 = sld [smem:[#allocation2]]  ;;  %v450_v14 = vld [vmem:[%s592_s1 + $0xc] sm:$0x3]  ;;  %v455_v15 = vld [vmem:[%s592_s1 + $0xe] sm:$0x3] }
  0x13   :  { %s432_s7 = sld [smem:[#allocation2 + $0x4]]  ;;  %s439_s10 = sld [smem:[#allocation2 + $0x8]]  ;;  %v460_v16 = vld [vmem:[%s592_s1 + $0x10] sm:$0x3]  ;;  %v467_v21 = vld [vmem:[%s592_s1 + $0x12] sm:$0x3] }
  0x14   :  { %s441_s11 = sld [smem:[#allocation2 + $0xc]]  ;;  %s469_s20 = sld [smem:[#allocation2 + $0x10]]  ;;  %vm185_vm0 = vcmask 1041408   ;;  %vm31_vm9 = vcmask 0  }
  0x15   :  { %v38_v5 = vstv %s289_s17  ;;  %v56_v6 = vstv %s292_s18  ;;  %s471_s21 = sld [smem:[#allocation2 + $0x17]]  ;;  %s492_s1 = sld [smem:[#allocation2 + $0xb]] }
  0x16   :  { %v57_v8 = vmul.f32 %v56_v6, %v402_v0  ;;  %v58_v9 = vmul.f32 %v56_v6, %v407_v1  ;;  %v83_v10 = vstv %s298_s19  ;;  %v110_v13 = vstv %s304_s0  ;;  %s476_s0 = sld [smem:[#allocation2 + $0x3]]  ;;  %s478_s22 = sld [smem:[#allocation2 + $0x7]] }
  0x17   :  { %v84_v11 = vmul.f32 %v412_v2, %v83_v10  ;;  %v85_v12 = vmul.f32 %v419_v3, %v83_v10  ;;  %v111_v19 = vmul.f32 %v428_v4, %v110_v13  ;;  %v112_v20 = vmul.f32 %v437_v7, %v110_v13  ;;  %s498_s23 = sld [smem:[#allocation2 + $0xf]]  ;;  %s506_s24 = sld [smem:[#allocation2 + $0x13]] }
  0x18   :  { %v59_v17 = vadd.f32 %v57_v8, %v38_v5  ;;  %v60_v18 = vadd.f32 %v58_v9, %v38_v5  ;;  %v137_v22 = vstv %s414_s26  ;;  %v164_v23 = vstv %s421_s29  ;;  %s508_s25 = sld [smem:[#allocation2 + $0x15]]  ;;  %s526_s5 = sld [smem:[#allocation2 + $0x9]] }
  0x19   :  { %v34_v24 = vstv %s423_s30  ;;  %v138_v27 = vmul.f32 %v450_v14, %v137_v22  ;;  %v139_v28 = vmul.f32 %v455_v15, %v137_v22  ;;  %v165_v29 = vmul.f32 %v460_v16, %v164_v23  ;;  %s519_s30 = sld [smem:[#allocation2 + $0x1]]  ;;  %s521_s4 = sld [smem:[#allocation2 + $0x5]] }
  0x1a   :  { %v86_v25 = vadd.f32 %v84_v11, %v59_v17  ;;  %v87_v26 = vadd.f32 %v85_v12, %v60_v18  ;;  %v166_v30 = vmul.f32 %v467_v21, %v164_v23  ;;  %v44_v31 = vstv %s430_s6  ;;  %s535_s6 = sld [smem:[#allocation2 + $0xd]] }
  0x1b   :  { %v71_v32 = vstv %s432_s7  ;;  %v45_v35 = vmul.f32 %v44_v31, %v402_v0  ;;  %v46_v36 = vmul.f32 %v44_v31, %v407_v1  ;;  %v98_v39 = vstv %s439_s10  ;;  %s537_s7 = sld [smem:[#allocation2 + $0x11]] }
  0x1c   :  { %v113_v33 = vadd.f32 %v111_v19, %v86_v25  ;;  %v114_v34 = vadd.f32 %v112_v20, %v87_v26  ;;  %v72_v37 = vmul.f32 %v412_v2, %v71_v32  ;;  %v73_v38 = vmul.f32 %v419_v3, %v71_v32 }
  0x1d   :  { %v125_v40 = vstv %s441_s11  ;;  %v47_v43 = vadd.f32 %v45_v35, %v34_v24  ;;  %v48_v44 = vadd.f32 %v46_v36, %v34_v24  ;;  %v99_v45 = vmul.f32 %v428_v4, %v98_v39 }
  0x1e   :  { %v140_v41 = vadd.f32 %v138_v27, %v113_v33  ;;  %v141_v42 = vadd.f32 %v139_v28, %v114_v34  ;;  %v100_v46 = vmul.f32 %v437_v7, %v98_v39  ;;  %v126_v47 = vmul.f32 %v450_v14, %v125_v40 }
  0x1f   :  { %v127_v48 = vmul.f32 %v455_v15, %v125_v40  ;;  %v74_v51 = vadd.f32 %v72_v37, %v47_v43  ;;  %v75_v52 = vadd.f32 %v73_v38, %v48_v44  ;;  %v152_v53 = vstv %s469_s20 }
  0x20   :  { %v167_v49 = vadd.f32 %v165_v29, %v140_v41  ;;  %v168_v50 = vadd.f32 %v166_v30, %v141_v42  ;;  %v40_v54 = vstv %s471_s21  ;;  %v62_v55 = vstv %s476_s0 }
  0x21   :  { %v89_v56 = vstv %s478_s22  ;;  %v101_v59 = vadd.f32 %v99_v45, %v74_v51  ;;  %v102_v60 = vadd.f32 %v100_v46, %v75_v52  ;;  %v153_v61 = vmul.f32 %v460_v16, %v152_v53 }
  0x22   :  { %vm219_vm1 = vcmp.ge.f32.partialorder %v167_v49, 0.0  ;;  %vm220_vm2 = vcmp.ge.f32.partialorder %v168_v50, 0.0  ;;  %v221_v57 = vmul.f32 0.1, %v167_v49  ;;  %v222_v58 = vmul.f32 0.1, %v168_v50 }
  0x23   :  { %v154_v62 = vmul.f32 %v467_v21, %v152_v53  ;;  %v63_v6 = vmul.f32 %v62_v55, %v402_v0  ;;  %v64_v8 = vmul.f32 %v62_v55, %v407_v1  ;;  %v128_v10 = vadd.f32 %v126_v47, %v101_v59 }
  0x24   :  { %v223_v63 = vsel %vm219_vm1, %v167_v49, %v221_v57  ;;  %v224_v5 = vsel %vm220_vm2, %v168_v50, %v222_v58  ;;  %v129_v11 = vadd.f32 %v127_v48, %v102_v60  ;;  %v90_v12 = vmul.f32 %v412_v2, %v89_v56 }
  0x25   :  { %321 = vst [vmem:[%s593_s2 + $0xa] sm:$0x3] %v224_v5  ;;  %v228_v9 = vsub.f32 %v223_v63, %v224_v5  ;;  %320 = vst [vmem:[%s593_s2 + $0x8] sm:$0x3] %v223_v63  ;;  %v65_v13 = vadd.f32 %v63_v6, %v40_v54  ;;  %v66_v17 = vadd.f32 %v64_v8, %v40_v54  ;;  %v116_v19 = vstv %s492_s1 }
  0x26   :  { %v91_v18 = vmul.f32 %v419_v3, %v89_v56  ;;  %v155_v22 = vadd.f32 %v153_v61, %v128_v10  ;;  %v156_v23 = vadd.f32 %v154_v62, %v129_v11  ;;  %v117_v24 = vmul.f32 %v428_v4, %v116_v19 }
  0x27   :  { %v229_v20 = vand.u32 2147483647, %v228_v9  ;;  %v92_v25 = vadd.f32 %v90_v12, %v65_v13  ;;  %v118_v27 = vmul.f32 %v437_v7, %v116_v19  ;;  %v143_v28 = vstv %s498_s23 }
  0x28   :  { %v93_v26 = vadd.f32 %v91_v18, %v66_v17  ;;  %vm175_vm3 = vcmp.ge.f32.partialorder %v155_v22, 0.0  ;;  %vm176_vm4 = vcmp.ge.f32.partialorder %v156_v23, 0.0  ;;  %v177_v30 = vmul.f32 0.1, %v155_v22 }
  0x29   :  { %v230_v29 = vsel %vm185_vm0, %v229_v20, 0.0  ;;  %v178_v31 = vmul.f32 0.1, %v156_v23  ;;  %v119_v32 = vadd.f32 %v117_v24, %v92_v25  ;;  %v144_v34 = vmul.f32 %v450_v14, %v143_v28 }
  0x2a   :  { %231 = vadd.xlane.f32.xlu1 %v230_v29  ;;  %v120_v33 = vadd.f32 %v118_v27, %v93_v26  ;;  %v179_v35 = vsel %vm175_vm3, %v155_v22, %v177_v30  ;;  %v145_v36 = vmul.f32 %v455_v15, %v143_v28  ;;  %v170_v37 = vstv %s506_s24  ;;  %s375_s24 = smov [#allocation5]  }
  0x2b   :  { %v36_v38 = vstv %s508_s25  ;;  %v180_v39 = vsel %vm176_vm4, %v156_v23, %v178_v31  ;;  %181 = vst [vmem:[%s593_s2] sm:$0x3] %v179_v35  ;;  %v146_v40 = vadd.f32 %v144_v34, %v119_v32  ;;  %v171_v41 = vmul.f32 %v460_v16, %v170_v37  ;;  %s276_s25 = sshll.u32 %s375_s24, 4  ;;  %s277_s25 = int_to_ptr.vmem [resolvable:$true] %s276_s25 }
  0x2c   :  { %v172_v42 = vmul.f32 %v467_v21, %v170_v37  ;;  %182 = vst [vmem:[%s593_s2 + $0x2] sm:$0x3] %v180_v39  ;;  %v183_v43 = vsub.f32 %v179_v35, %v180_v39  ;;  %v147_v44 = vadd.f32 %v145_v36, %v120_v33  ;;  %v50_v45 = vstv %s519_s30  ;;  %s347_s26 = scalar_lea.vmem %s277_s25, 16  ;;  %s351_s27 = scalar_lea.vmem %s277_s25, 32 }
  0x2d   :  { %v77_v46 = vstv %s521_s4  ;;  %v173_v47 = vadd.f32 %v171_v41, %v146_v40  ;;  %v51_v48 = vmul.f32 %v50_v45, %v402_v0  ;;  %v52_v49 = vmul.f32 %v50_v45, %v407_v1  ;;  %p348_p5 = scmp.ne.s32.totalorder %s277_s25, %s347_s26  ;;  %p352_p6 = scmp.lt.s32.totalorder %s277_s25, %s277_s25 }
  0x2e   :  { %v78_v50 = vmul.f32 %v412_v2, %v77_v46  ;;  %v184_v51 = vand.u32 2147483647, %v183_v43  ;;  %v174_v52 = vadd.f32 %v172_v42, %v147_v44  ;;  %v79_v53 = vmul.f32 %v419_v3, %v77_v46  ;;  %p353_p7 = scmp.lt.s32.totalorder %s351_s27, %s347_s26 }
  0x2f   :  { %v104_v54 = vstv %s526_s5  ;;  %vm241_vm5 = vcmp.ge.f32.partialorder %v173_v47, 0.0  ;;  %v243_v55 = vmul.f32 0.1, %v173_v47  ;;  %v53_v56 = vadd.f32 %v51_v48, %v36_v38 }
  0x30   :  { %v54_v57 = vadd.f32 %v52_v49, %v36_v38  ;;  %v186_v58 = vsel %vm185_vm0, %v184_v51, 0.0  ;;  %vm242_vm6 = vcmp.ge.f32.partialorder %v174_v52, 0.0  ;;  %v244_v59 = vmul.f32 0.1, %v174_v52  ;;  %p354_p8 = por %p353_p7, %p352_p6 }
  0x31   :  { %v105_v0 = vmul.f32 %v428_v4, %v104_v54  ;;  %187 = vadd.xlane.f32.xlu0 %v186_v58  ;;  %v245_v1 = vsel %vm241_vm5, %v173_v47, %v243_v55  ;;  %v80_v2 = vadd.f32 %v78_v50, %v53_v56  ;;  %v106_v61 = vmul.f32 %v437_v7, %v104_v54 }
  0x32   :  { %v81_v60 = vadd.f32 %v79_v53, %v54_v57  ;;  %v246_v3 = vsel %vm242_vm6, %v174_v52, %v244_v59  ;;  %322 = vst [vmem:[%s593_s2 + $0xc] sm:$0x3] %v245_v1  ;;  %v131_v62 = vstv %s535_s6  ;;  %v158_v63 = vstv %s537_s7  ;;  %p355_p9 = pnand %p354_p8, %p348_p5 }
  0x33   :  { %323 = vst [vmem:[%s593_s2 + $0xe] sm:$0x3] %v246_v3  ;;  %v250_v5 = vsub.f32 %v245_v1, %v246_v3  ;;  %v107_v6 = vadd.f32 %v105_v0, %v80_v2  ;;  %v132_v8 = vmul.f32 %v450_v14, %v131_v62  ;;  %v133_v9 = vmul.f32 %v455_v15, %v131_v62 }
  0x34   :  { %v108_v4 = vadd.f32 %v106_v61, %v81_v60  ;;  %v159_v7 = vmul.f32 %v460_v16, %v158_v63  ;;  %v160_v10 = vmul.f32 %v467_v21, %v158_v63  ;;  %v374_v24 = vmov 0.0  }
  0x35   :  { %v251_v11 = vand.u32 2147483647, %v250_v5  ;;  %v134_v12 = vadd.f32 %v132_v8, %v107_v6  ;;  %32 = vst.msk [vmem:[#allocation5] sm:$0x1] %vm31_vm9, %v374_v24 }
  0x36   :  { %v135_v13 = vadd.f32 %v133_v9, %v108_v4 }
  0x37   :  { %v252_v17 = vsel %vm185_vm0, %v251_v11, 0.0  ;;  %v161_v18 = vadd.f32 %v159_v7, %v134_v12 }
  0x38   :  { %253 = vadd.xlane.f32.xlu1 %v252_v17  ;;  %v162_v19 = vadd.f32 %v160_v10, %v135_v13 }
  0x39   :  { %vm197_vm7 = vcmp.ge.f32.partialorder %v161_v18, 0.0  ;;  %v199_v20 = vmul.f32 0.1, %v161_v18 }
  0x3a   :  { %vm198_vm8 = vcmp.ge.f32.partialorder %v162_v19, 0.0  ;;  %v200_v22 = vmul.f32 0.1, %v162_v19 }
  0x3b   :  { %v201_v23 = vsel %vm197_vm7, %v161_v18, %v199_v20 }
  0x3c   :  { %v202_v14 = vsel %vm198_vm8, %v162_v19, %v200_v22  ;;  %318 = vst [vmem:[%s593_s2 + $0x4] sm:$0x3] %v201_v23  ;;  %v263_v53 = vld [vmem:[#allocation5] sm:$0x1] }
  0x3d   :  { %319 = vst [vmem:[%s593_s2 + $0x6] sm:$0x3] %v202_v14  ;;  %v206_v15 = vsub.f32 %v201_v23, %v202_v14 }
  0x3f   :  { %v207_v16 = vand.u32 2147483647, %v206_v15 }
  0x41   :  { %v208_v21 = vsel %vm185_vm0, %v207_v16, 0.0 }
  0x42   :  { %209 = vadd.xlane.f32.xlu0 %v208_v21 }
  0xb7   :  { %v232_v26 = vpop.xlane.xlu1 %231 }
  0xb8   :  { %v233_v33 = vrot.slane %v232_v26, 4 }
  0xba   :  { %v234_v37 = vadd.f32 %v233_v33, %v232_v26 }
  0xbc   :  { %v235_v39 = vrot.slane %v234_v37, 2 }
  0xbe   :  { %v188_v25 = vpop.xlane.xlu0 %187  ;;  %v236_v44 = vadd.f32 %v235_v39, %v234_v37 }
  0xbf   :  { %v189_v27 = vrot.slane %v188_v25, 4 }
  0xc0   :  { %v237_v48 = vrot.slane %v236_v44, 1 }
  0xc1   :  { %v190_v28 = vadd.f32 %v189_v27, %v188_v25 }
  0xc2   :  { %v238_v52 = vadd.f32 %v237_v48, %v236_v44 }
  0xc3   :  { %v191_v29 = vrot.slane %v190_v28, 2 }
  0xc5   :  { %v254_v30 = vpop.xlane.xlu1 %253  ;;  %v192_v31 = vadd.f32 %v191_v29, %v190_v28 }
  0xc6   :  { %v255_v32 = vrot.slane %v254_v30, 4 }
  0xc7   :  { %v193_v34 = vrot.slane %v192_v31, 1 }
  0xc8   :  { %v256_v36 = vadd.f32 %v255_v32, %v254_v30 }
  0xc9   :  { %v194_v35 = vadd.f32 %v193_v34, %v192_v31 }
  0xca   :  { %v257_v38 = vrot.slane %v256_v36, 2 }
  0xcb   :  { %324 = vpush %v194_v35 }
  0xcc   :  { %v258_v42 = vadd.f32 %v257_v38, %v256_v36 }
  0xce   :  { %v259_v47 = vrot.slane %v258_v42, 1 }
  0xcf   :  { %v210_v40 = vpop.xlane.xlu0 %209 }
  0xd0   :  { %v211_v41 = vrot.slane %v210_v40, 4  ;;  %v260_v51 = vadd.f32 %v259_v47, %v258_v42 }
  0xd2   :  { %v212_v43 = vadd.f32 %v211_v41, %v210_v40 }
  0xd4   :  { %v213_v45 = vrot.slane %v212_v43, 2 }
  0xd6   :  { %v214_v46 = vadd.f32 %v213_v45, %v212_v43 }
  0xd8   :  { %v215_v49 = vrot.slane %v214_v46, 1 }
  0xda   :  { %v216_v50 = vadd.f32 %v215_v49, %v214_v46 }
  0xdc   :  { %326 = vpush %v216_v50 }
  0xdd   :  { %328 = vpush %v238_v52 }
  0xde   :  { %330 = vpush %v260_v51 }
  0xfc   :  { %s325_s2 = spop %324 }
 0x10d   :  { %s327_s20 = spop %326 }
 0x10e   :  { %s218_s21 = sadd.f32 %s327_s20, %s325_s2  ;;  %s329_s0 = spop %328 }
 0x10f   :  { %s331_s1 = spop %330 }
 0x110   :  { %s240_s22 = sadd.f32 %s329_s0, %s218_s21 }
 0x112   :  { %s262_s23 = sadd.f32 %s331_s1, %s240_s22 }
 0x114   :  { %v264_v54 = vstv %s262_s23 }
 0x115   :  { %v265_v55 = vadd.f32 %v264_v54, %v263_v53 }
 0x117   :  { %267 = vst.msk [vmem:[#allocation5] sm:$0x1] %vm31_vm9, %v265_v55 }
 0x118   :  { %358 = shalt.err (!%p355_p9)
}
 0x119   :  { %s359_s30 = scalar_lea.hbm %s594_s3, 16 }
 0x11a   :  { %p360_p10 = scmp.ne.s32.totalorder %s594_s3, %s359_s30  ;;  %p363_p11 = scmp.lt.u32.totalorder %s359_s30, %s594_s3 }
 0x11c   :  { %p365_p12 = pnand %p363_p11, %p360_p10 }
 0x11e   :  { %368 = shalt.err (!%p365_p12)
}
 0x11f   :  { %279 = dma.vmem_to_hbm [thread:$0]  %s277_s25, 16, %s594_s3, [#allocation3]  }
 0x120   :  { %371 = dma.done.wait [#allocation3], 16  }
 0x121   :  { %372 = vsyncadd [#allocation3], 4294967280 }
 0x122   :  { %285 = vsyncpa [#allocation3], 1 }
 0x123   :  { %286 = vsyncpa [#allocation4], 1 }

// kernel: squeeze.56
= control target key start
LH: loop header
LB: loop body
LE: loop exit
PB: predicated region body
PF: predicated region fallthrough
CT: control target
= control target key end

     0   :  { %vm7_vm0 = vcmask 113664   ;;  %vm13_vm1 = vcmask 228464   ;;  %s39_s0 = inlined_call_operand.vmem [shape: f32[1,1,2,14], index: 0, kind: input, shape index: {}]   ;;  %s40_s1 = inlined_call_operand.vmem [shape: f32[28], index: 1, kind: output, shape index: {}]  }
   0x1   :  { %v4_v0 = vld [vmem:[%s39_s0] sm:$0x3]  ;;  %s22_s0 = smov 14  }
   0x2   :  { %5 = vst [vmem:[#allocation1] sm:$0x3] %v4_v0 }
   0x9   :  { %v10_v1 = vld [vmem:[#allocation1 + $0x1] sm:$0x1]   ;;  %v6_v2 = vld [vmem:[#allocation1] sm:$0x1]  }
   0xa   :  { %11 = vrot.lane.b32.xlu0 %v10_v1, %s22_s0  ;;  %8 = vst.msk [vmem:[#allocation0] sm:$0x1] %vm7_vm0, %v6_v2  }
  0x7c   :  { %v12_v3 = vpop.permute.xlu0 %11  }
  0x7d   :  { %14 = vst.msk [vmem:[#allocation0] sm:$0x1] %vm13_vm1, %v12_v3  }
  0x84   :  { %v18_v4 = vld [vmem:[#allocation0] sm:$0x1] }
  0x85   :  { %20 = vst [vmem:[%s40_s1] sm:$0x1] %v18_v4 }

// kernel: sub.7
= control target key start
LH: loop header
LB: loop body
LE: loop exit
PB: predicated region body
PF: predicated region fallthrough
CT: control target
= control target key end

     0   :  { %s34_s0 = inlined_call_operand.vmem [shape: f32[28], index: 0, kind: input, shape index: {}]   ;;  %s35_s1 = inlined_call_operand.vmem [shape: f32[28], index: 1, kind: input, shape index: {}]   ;;  %s36_s2 = inlined_call_operand.vmem [shape: f32[28], index: 2, kind: output, shape index: {}]  }
   0x1   :  { %v3_v0 = vld [vmem:[%s34_s0] sm:$0x1] }
   0x2   :  { %v4_v1 = vld [vmem:[%s35_s1] sm:$0x1] }
   0x3   :  { %v7_v2 = vsub.f32 %v3_v0, %v4_v1 }
   0x5   :  { %9 = vst [vmem:[%s36_s2] sm:$0x1] %v7_v2 }

// kernel: _lambda_.23
= control target key start
LH: loop header
LB: loop body
LE: loop exit
PB: predicated region body
PF: predicated region fallthrough
CT: control target
= control target key end

     0   :  { %9 = vsyncpa [#allocation4], 0  ;;  %s1563_s0 = inlined_call_operand.vmem [shape: f32[84], index: 0, kind: input, shape index: {}]   ;;  %s1564_s1 = inlined_call_operand.vmem [shape: f32[20,2,2,128], index: 1, kind: input, shape index: {}]   ;;  %s1565_s2 = inlined_call_operand.vmem [shape: f32[4,2,2,128], index: 2, kind: output, shape index: {0}]   ;;  %s1566_s3 = inlined_call_operand.hbm [shape: f32[1,1], index: 3, kind: output, shape index: {1}]  }
   0x1   :  { %10 = vsyncpa [#allocation3], 0  ;;  %s17_s14 = sshll.u32 %s1563_s0, 4  ;;  %s18_s14 = int_to_ptr.vmem [resolvable:$true] %s17_s14 }
   0x2   :  { %s830_s15 = scalar_lea.vmem %s18_s14, 16  ;;  %p835_p1 = scmp.lt.s32.totalorder %s18_s14, %s18_s14 }
   0x3   :  { %p831_p0 = scmp.ne.s32.totalorder %s18_s14, %s830_s15  ;;  %p836_p2 = scmp.lt.s32.totalorder %s830_s15, %s830_s15 }
   0x5   :  { %p837_p3 = por %p836_p2, %p835_p1 }
   0x7   :  { %p838_p4 = pnand %p837_p3, %p831_p0 }
   0x9   :  { %841 = shalt.err (!%p838_p4)
}
   0xa   :  { %s868_s16 = smov [#allocation2]  }
   0xb   :  { %20 = dma.vmem_to_smem %s18_s14, 16, %s868_s16, [#allocation4]  }
   0xc   :  { %864 = dma.done.wait [#allocation4], 16  }
   0xd   :  { %865 = vsyncadd [#allocation4], 4294967280 }
   0xe   :  { %26 = sfence }
   0xf   :  { %s694_s17 = sld [smem:[#allocation2 + $0x52]]  ;;  %s703_s19 = sld [smem:[#allocation2 + $0x6]]  ;;  %v899_v0 = vld [vmem:[%s1564_s1] sm:$0x3]  ;;  %v904_v1 = vld [vmem:[%s1564_s1 + $0x2] sm:$0x3] }
  0x10   :  { %s697_s18 = sld [smem:[#allocation2 + $0x2]]  ;;  %s894_s21 = sld [smem:[#allocation2 + $0xe]]  ;;  %1602 = vst [vmem:[#allocation8_spill] sm:$0xff] %v899_v0  ;;  %1603 = vst [vmem:[#allocation9_spill] sm:$0xff] %v904_v1  ;;  %v911_v2 = vld [vmem:[%s1564_s1 + $0x4] sm:$0x3] }
  0x11   :  { %s709_s20 = sld [smem:[#allocation2 + $0xa]]  ;;  %1604 = vst [vmem:[#allocation10_spill] sm:$0xff] %v911_v2  ;;  %v916_v3 = vld [vmem:[%s1564_s1 + $0x6] sm:$0x3]  ;;  %s918_s30 = sld [smem:[#allocation2 + $0x16]]  ;;  %vm590_vm0 = vcmask 1041408  }
  0x12   :  { %s906_s25 = sld [smem:[#allocation2 + $0x12]]  ;;  %1605 = vst [vmem:[#allocation11_spill] sm:$0xff] %v916_v3  ;;  %v923_v6 = vld [vmem:[%s1564_s1 + $0x8] sm:$0x3]  ;;  %v928_v7 = vld [vmem:[%s1564_s1 + $0xa] sm:$0x3] }
  0x13   :  { %1606 = vst [vmem:[#allocation12_spill] sm:$0xff] %v923_v6  ;;  %1607 = vst [vmem:[#allocation13_spill] sm:$0xff] %v928_v7  ;;  %s930_s8 = sld [smem:[#allocation2 + $0x1a]]  ;;  %v937_v11 = vld [vmem:[%s1564_s1 + $0xc] sm:$0x3]  ;;  %s939_s11 = sld [smem:[#allocation2 + $0x1e]] }
  0x14   :  { %v946_v15 = vld [vmem:[%s1564_s1 + $0xe] sm:$0x3]  ;;  %v951_v16 = vld [vmem:[%s1564_s1 + $0x10] sm:$0x3]  ;;  %s953_s16 = sld [smem:[#allocation2 + $0x22]]  ;;  %s967_s0 = sld [smem:[#allocation2 + $0x26]] }
  0x15   :  { %v38_v4 = vstv %s694_s17  ;;  %v83_v10 = vstv %s703_s19  ;;  %v960_v21 = vld [vmem:[%s1564_s1 + $0x12] sm:$0x3]  ;;  %v965_v22 = vld [vmem:[%s1564_s1 + $0x14] sm:$0x3]  ;;  %s981_s27 = sld [smem:[#allocation2 + $0x2a]]  ;;  %s995_s4 = sld [smem:[#allocation2 + $0x2e]] }
  0x16   :  { %v56_v5 = vstv %s697_s18  ;;  %v84_v12 = vmul.f32 %v911_v2, %v83_v10  ;;  %v85_v13 = vmul.f32 %v916_v3, %v83_v10  ;;  %v137_v23 = vstv %s894_s21  ;;  %v974_v25 = vld [vmem:[%s1564_s1 + $0x16] sm:$0x3]  ;;  %v979_v26 = vld [vmem:[%s1564_s1 + $0x18] sm:$0x3]  ;;  %s1009_s10 = sld [smem:[#allocation2 + $0x32]]  ;;  %s1023_s14 = sld [smem:[#allocation2 + $0x36]] }
  0x17   :  { %v57_v8 = vmul.f32 %v56_v5, %v899_v0  ;;  %v58_v9 = vmul.f32 %v56_v5, %v904_v1  ;;  %v110_v14 = vstv %s709_s20  ;;  %v138_v29 = vmul.f32 %v937_v11, %v137_v23  ;;  %v988_v31 = vld [vmem:[%s1564_s1 + $0x1a] sm:$0x3]  ;;  %v993_v32 = vld [vmem:[%s1564_s1 + $0x1c] sm:$0x3]  ;;  %v1002_v35 = vld [vmem:[%s1564_s1 + $0x1e] sm:$0x3] }
  0x18   :  { %v111_v19 = vmul.f32 %v923_v6, %v110_v14  ;;  %v112_v20 = vmul.f32 %v928_v7, %v110_v14  ;;  %v164_v24 = vstv %s906_s25  ;;  %v139_v30 = vmul.f32 %v946_v15, %v137_v23  ;;  %v1007_v36 = vld [vmem:[%s1564_s1 + $0x20] sm:$0x3]  ;;  %v1016_v41 = vld [vmem:[%s1564_s1 + $0x22] sm:$0x3]  ;;  %v1021_v42 = vld [vmem:[%s1564_s1 + $0x24] sm:$0x3] }
  0x19   :  { %v59_v17 = vadd.f32 %v57_v8, %v38_v4  ;;  %v60_v18 = vadd.f32 %v58_v9, %v38_v4  ;;  %v191_v33 = vstv %s918_s30  ;;  %v218_v34 = vstv %s930_s8  ;;  %v1031_v46 = vld [vmem:[%s1564_s1 + $0x26] sm:$0x3]  ;;  %v1036_v47 = vld [vmem:[%s1564_s1 + $0x28] sm:$0x3]  ;;  %s1038_s20 = sld [smem:[#allocation2 + $0x3a]]  ;;  %s1052_s24 = sld [smem:[#allocation2 + $0x3e]] }
  0x1a   :  { %v165_v39 = vmul.f32 %v951_v16, %v164_v24  ;;  %v166_v40 = vmul.f32 %v960_v21, %v164_v24  ;;  %v192_v43 = vmul.f32 %v965_v22, %v191_v33  ;;  %v245_v44 = vstv %s939_s11  ;;  %v1045_v52 = vld [vmem:[%s1564_s1 + $0x2a] sm:$0x3]  ;;  %v1050_v53 = vld [vmem:[%s1564_s1 + $0x2c] sm:$0x3]  ;;  %v1061_v58 = vld [vmem:[%s1564_s1 + $0x2e] sm:$0x3] }
  0x1b   :  { %v86_v27 = vadd.f32 %v84_v12, %v59_v17  ;;  %v87_v28 = vadd.f32 %v85_v13, %v60_v18  ;;  %v272_v45 = vstv %s953_s16  ;;  %v193_v50 = vmul.f32 %v974_v25, %v191_v33  ;;  %v1066_v59 = vld [vmem:[%s1564_s1 + $0x30] sm:$0x3]  ;;  %s1068_s29 = sld [smem:[#allocation2 + $0x42]]  ;;  %v1075_v4 = vld [vmem:[%s1564_s1 + $0x32] sm:$0x3]  ;;  %s1082_s7 = sld [smem:[#allocation2 + $0x46]] }
  0x1c   :  { %v219_v51 = vmul.f32 %v979_v26, %v218_v34  ;;  %v220_v54 = vmul.f32 %v988_v31, %v218_v34  ;;  %v246_v55 = vmul.f32 %v993_v32, %v245_v44  ;;  %v299_v56 = vstv %s967_s0  ;;  %v1080_v5 = vld [vmem:[%s1564_s1 + $0x34] sm:$0x3]  ;;  %v1091_v13 = vld [vmem:[%s1564_s1 + $0x36] sm:$0x3]  ;;  %v1096_v14 = vld [vmem:[%s1564_s1 + $0x38] sm:$0x3] }
  0x1d   :  { %v113_v37 = vadd.f32 %v111_v19, %v86_v27  ;;  %v114_v38 = vadd.f32 %v112_v20, %v87_v28  ;;  %v326_v57 = vstv %s981_s27  ;;  %v247_v62 = vmul.f32 %v1002_v35, %v245_v44  ;;  %1608 = vst [vmem:[#allocation14_spill] sm:$0xff] %v1096_v14  ;;  %s1098_s13 = sld [smem:[#allocation2 + $0x4a]]  ;;  %v1105_v23 = vld [vmem:[%s1564_s1 + $0x3a] sm:$0x3]  ;;  %v1110_v24 = vld [vmem:[%s1564_s1 + $0x3c] sm:$0x3] }
  0x1e   :  { %v273_v63 = vmul.f32 %v1007_v36, %v272_v45  ;;  %v274_v8 = vmul.f32 %v1016_v41, %v272_v45  ;;  %v300_v9 = vmul.f32 %v1021_v42, %v299_v56  ;;  %v353_v10 = vstv %s995_s4  ;;  %1609 = vst [vmem:[#allocation15_spill] sm:$0xff] %v1105_v23  ;;  %1610 = vst [vmem:[#allocation16_spill] sm:$0xff] %v1110_v24  ;;  %s1112_s18 = sld [smem:[#allocation2 + $0x4e]]  ;;  %s1114_s19 = sld [smem:[#allocation2 + $0x50]]  ;;  %v1123_v33 = vld [vmem:[%s1564_s1 + $0x3e] sm:$0x3] }
  0x1f   :  { %v140_v48 = vadd.f32 %v138_v29, %v113_v37  ;;  %v141_v49 = vadd.f32 %v139_v30, %v114_v38  ;;  %v380_v12 = vstv %s1009_s10  ;;  %v301_v19 = vmul.f32 %v1031_v46, %v299_v56  ;;  %1611 = vst [vmem:[#allocation17_spill] sm:$0xff] %v1123_v33  ;;  %s1125_s22 = sld [smem:[#allocation2]]  ;;  %s1127_s23 = sld [smem:[#allocation2 + $0x4]] }
  0x20   :  { %v327_v20 = vmul.f32 %v1036_v47, %v326_v57  ;;  %v328_v27 = vmul.f32 %v1045_v52, %v326_v57  ;;  %v354_v28 = vmul.f32 %v1050_v53, %v353_v10  ;;  %v407_v29 = vstv %s1023_s14  ;;  %s1141_s25 = sld [smem:[#allocation2 + $0x8]]  ;;  %s1185_s12 = sld [smem:[#allocation2 + $0x14]] }
  0x21   :  { %v167_v60 = vadd.f32 %v165_v39, %v140_v48  ;;  %v168_v61 = vadd.f32 %v166_v40, %v141_v49  ;;  %v434_v30 = vstv %s1038_s20  ;;  %v355_v38 = vmul.f32 %v1061_v58, %v353_v10  ;;  %v1134_v40 = vld [vmem:[%s1564_s1 + $0x40] sm:$0x3]  ;;  %s1170_s9 = sld [smem:[#allocation2 + $0x10]]  ;;  %s1225_s10 = sld [smem:[#allocation2 + $0x24]] }
  0x22   :  { %v381_v39 = vmul.f32 %v1066_v59, %v380_v12  ;;  %1612 = vst [vmem:[#allocation18_spill] sm:$0xff] %v1134_v40  ;;  %v382_v44 = vmul.f32 %v1075_v4, %v380_v12  ;;  %v1145_v45 = vmul.f32 %v1080_v5, %v407_v29  ;;  %v461_v48 = vstv %s1052_s24  ;;  %v1182_v12 = vld [vmem:[%s1564_s1 + $0x4a] sm:$0x3]  ;;  %s1187_s4 = sld [smem:[#allocation2 + $0x18]]  ;;  %s1251_s16 = sld [smem:[#allocation2 + $0x34]] }
  0x23   :  { %v194_v17 = vadd.f32 %v192_v43, %v167_v60  ;;  %v195_v18 = vadd.f32 %v193_v50, %v168_v61  ;;  %v1139_v43 = vld [vmem:[%s1564_s1 + $0x42] sm:$0x3]  ;;  %v488_v49 = vstv %s1068_s29  ;;  %v1152_v50 = vld [vmem:[%s1564_s1 + $0x44] sm:$0x3]  ;;  %v409_v57 = vmul.f32 %v1091_v13, %v407_v29  ;;  %v1166_v61 = vld [vmem:[%s1564_s1 + $0x48] sm:$0x3] }
  0x24   :  { %1613 = vst [vmem:[#allocation19_spill] sm:$0xff] %v1139_v43  ;;  %1614 = vst [vmem:[#allocation20_spill] sm:$0xff] %v1152_v50  ;;  %v1161_v60 = vmul.f32 %v1096_v14, %v434_v30  ;;  %s1168_s29 = sld [smem:[#allocation2 + $0xc]]  ;;  %v1173_v10 = vmul.f32 %v1105_v23, %v434_v30  ;;  %v1190_v30 = vmul.f32 %v1123_v33, %v461_v48  ;;  %s1231_s15 = sld [smem:[#allocation2 + $0x28]]  ;;  %vm31_vm9 = vcmask 0  }
  0x25   :  { %v221_v34 = vadd.f32 %v219_v51, %v194_v17  ;;  %v222_v37 = vadd.f32 %v220_v54, %v195_v18  ;;  %v1157_v51 = vld [vmem:[%s1564_s1 + $0x46] sm:$0x3]  ;;  %1616 = vst [vmem:[#allocation22_spill] sm:$0xff] %v1166_v61  ;;  %1617 = vst [vmem:[#allocation23_spill] sm:$0xff] %v1182_v12  ;;  %v542_v17 = vstv %s1098_s13  ;;  %v71_v33 = vstv %s1127_s23  ;;  %s1223_s13 = sld [smem:[#allocation2 + $0x20]]  ;;  %s1290_s14 = sld [smem:[#allocation2 + $0x44]] }
  0x26   :  { %1615 = vst [vmem:[#allocation21_spill] sm:$0xff] %v1157_v51  ;;  %v1205_v14 = vmul.f32 %v1166_v61, %v542_v17  ;;  %s1249_s11 = sld [smem:[#allocation2 + $0x30]]  ;;  %s1300_s28 = sld [smem:[#allocation2 + $0x53]] }
  0x27   :  { %v248_v54 = vadd.f32 %v246_v55, %v221_v34  ;;  %v249_v56 = vadd.f32 %v247_v62, %v222_v37  ;;  %v1176_v55 = vmul.f32 %v1110_v24, %v461_v48  ;;  %v515_v62 = vstv %s1082_s7  ;;  %s1217_s7 = sld [smem:[#allocation2 + $0x1c]]  ;;  %s1264_s26 = sld [smem:[#allocation2 + $0x38]] }
  0x28   :  { %v1193_v34 = vmul.f32 %v1134_v40, %v488_v49  ;;  %v1196_v37 = vmul.f32 %v1139_v43, %v488_v49  ;;  %v1199_v24 = vmul.f32 %v1152_v50, %v515_v62  ;;  %v1202_v23 = vmul.f32 %v1157_v51, %v515_v62  ;;  %s1280_s21 = sld [smem:[#allocation2 + $0x40]]  ;;  %s1302_s0 = sld [smem:[#allocation2 + $0x3]] }
  0x29   :  { %v275_v18 = vadd.f32 %v273_v63, %v248_v54  ;;  %v276_v29 = vadd.f32 %v274_v8, %v249_v56  ;;  %v1208_v48 = vmul.f32 %v1182_v12, %v542_v17  ;;  %v569_v54 = vstv %s1112_s18  ;;  %s1292_s20 = sld [smem:[#allocation2 + $0x48]]  ;;  %s1308_s27 = sld [smem:[#allocation2 + $0x7]] }
  0x2a   :  { %v34_v56 = vstv %s1114_s19  ;;  %v44_v40 = vstv %s1125_s22  ;;  %v98_v49 = vstv %s1141_s25  ;;  %s1243_s19 = sld [smem:[#allocation2 + $0x2c]]  ;;  %s1310_s5 = sld [smem:[#allocation2 + $0xb]] }
  0x2b   :  { %v302_v63 = vadd.f32 %v300_v9, %v275_v18  ;;  %v303_v8 = vadd.f32 %v301_v19, %v276_v29  ;;  %v45_v62 = vmul.f32 %v44_v40, %v899_v0  ;;  %v46_v61 = vmul.f32 %v44_v40, %v904_v1  ;;  %s1298_s25 = sld [smem:[#allocation2 + $0x4c]]  ;;  %s1323_s30 = sld [smem:[#allocation2 + $0xf]] }
  0x2c   :  { %v72_v9 = vmul.f32 %v911_v2, %v71_v33  ;;  %v73_v19 = vmul.f32 %v916_v3, %v71_v33  ;;  %v99_v17 = vmul.f32 %v923_v6, %v98_v49  ;;  %v100_v18 = vmul.f32 %v928_v7, %v98_v49  ;;  %v1236_v49 = vld [vmem:[%s1564_s1 + $0x4c] sm:$0x3]  ;;  %s1329_s8 = sld [smem:[#allocation2 + $0x13]]  ;;  %s1372_s17 = sld [smem:[#allocation2 + $0x2f]] }
  0x2d   :  { %v329_v43 = vadd.f32 %v327_v20, %v302_v63  ;;  %v330_v50 = vadd.f32 %v328_v27, %v303_v8  ;;  %v47_v29 = vadd.f32 %v45_v62, %v34_v56  ;;  %v48_v63 = vadd.f32 %v46_v61, %v34_v56  ;;  %s1374_s18 = sld [smem:[#allocation2 + $0x33]]  ;;  %s1395_s23 = sld [smem:[#allocation2 + $0x47]] }
  0x2e   :  { %v125_v8 = vstv %s1168_s29  ;;  %v152_v40 = vstv %s1170_s9  ;;  %v179_v1 = vstv %s1185_s12  ;;  %v206_v0 = vstv %s1187_s4  ;;  %s1331_s12 = sld [smem:[#allocation2 + $0x17]]  ;;  %s1344_s4 = sld [smem:[#allocation2 + $0x1b]] }
  0x2f   :  { %v356_v20 = vadd.f32 %v354_v28, %v329_v43  ;;  %v357_v27 = vadd.f32 %v355_v38, %v330_v50  ;;  %v74_v7 = vadd.f32 %v72_v9, %v47_v29  ;;  %v75_v6 = vadd.f32 %v73_v19, %v48_v63  ;;  %s1389_s22 = sld [smem:[#allocation2 + $0x43]]  ;;  %s1431_s6 = sld [smem:[#allocation2 + $0xd]] }
  0x30   :  { %v126_v28 = vmul.f32 %v937_v11, %v125_v8  ;;  %v127_v38 = vmul.f32 %v946_v15, %v125_v8  ;;  %v153_v43 = vmul.f32 %v951_v16, %v152_v40  ;;  %v154_v50 = vmul.f32 %v960_v21, %v152_v40  ;;  %s1433_s24 = sld [smem:[#allocation2 + $0x11]]  ;;  %s1439_s29 = sld [smem:[#allocation2 + $0x15]] }
  0x31   :  { %v383_v2 = vadd.f32 %v381_v39, %v356_v20  ;;  %v384_v33 = vadd.f32 %v382_v44, %v357_v27  ;;  %v101_v39 = vadd.f32 %v99_v17, %v74_v7  ;;  %v102_v44 = vadd.f32 %v100_v18, %v75_v6  ;;  %v1258_v6 = vld [vmem:[%s1564_s1 + $0x4e] sm:$0x3]  ;;  %s1278_s1 = sld [smem:[#allocation2 + $0x3c]]  ;;  %s1441_s9 = sld [smem:[#allocation2 + $0x19]] }
  0x32   :  { %v570_v62 = vmul.f32 %v1236_v49, %v569_v54  ;;  %v180_v9 = vmul.f32 %v965_v22, %v179_v1  ;;  %v181_v19 = vmul.f32 %v974_v25, %v179_v1  ;;  %v207_v20 = vmul.f32 %v979_v26, %v206_v0 }
  0x33   :  { %v410_v61 = vadd.f32 %v1145_v45, %v383_v2  ;;  %v411_v56 = vadd.f32 %v409_v57, %v384_v33  ;;  %v128_v45 = vadd.f32 %v126_v28, %v101_v39  ;;  %v129_v57 = vadd.f32 %v127_v38, %v102_v44 }
  0x34   :  { %v208_v1 = vmul.f32 %v988_v31, %v206_v0  ;;  %v233_v17 = vstv %s1217_s7  ;;  %v260_v18 = vstv %s1223_s13  ;;  %v287_v27 = vstv %s1225_s10  ;;  %s1348_s7 = sld [smem:[#allocation2 + $0x1f]]  ;;  %s1354_s13 = sld [smem:[#allocation2 + $0x23]] }
  0x35   :  { %v437_v2 = vadd.f32 %v1161_v60, %v410_v61  ;;  %v438_v7 = vadd.f32 %v1173_v10, %v411_v56  ;;  %v155_v10 = vadd.f32 %v153_v43, %v128_v45  ;;  %v156_v63 = vadd.f32 %v154_v50, %v129_v57  ;;  %s1356_s10 = sld [smem:[#allocation2 + $0x27]] }
  0x36   :  { %v571_v8 = vmul.f32 %v1258_v6, %v569_v54  ;;  %v234_v40 = vmul.f32 %v993_v32, %v233_v17  ;;  %v235_v33 = vmul.f32 %v1002_v35, %v233_v17  ;;  %v314_v28 = vstv %s1231_s15  ;;  %s1362_s15 = sld [smem:[#allocation2 + $0x2b]] }
  0x37   :  { %v464_v29 = vadd.f32 %v1176_v55, %v437_v2  ;;  %v465_v60 = vadd.f32 %v1190_v30, %v438_v7  ;;  %v182_v61 = vadd.f32 %v180_v9, %v155_v10  ;;  %v183_v55 = vadd.f32 %v181_v19, %v156_v63 }
  0x38   :  { %v261_v30 = vmul.f32 %v1007_v36, %v260_v18  ;;  %v262_v43 = vmul.f32 %v1016_v41, %v260_v18  ;;  %v288_v54 = vmul.f32 %v1021_v42, %v287_v27  ;;  %v289_v50 = vmul.f32 %v1031_v46, %v287_v27 }
  0x39   :  { %v491_v0 = vadd.f32 %v1193_v34, %v464_v29  ;;  %v492_v38 = vadd.f32 %v1196_v37, %v465_v60  ;;  %v209_v37 = vadd.f32 %v207_v20, %v182_v61  ;;  %v210_v39 = vadd.f32 %v208_v1, %v183_v55  ;;  %v1618_v55 = vld [vmem:[#allocation14_spill] sm:$0xff] }
  0x3a   :  { %v315_v44 = vmul.f32 %v1036_v47, %v314_v28  ;;  %v341_v9 = vstv %s1243_s19  ;;  %v368_v19 = vstv %s1249_s11  ;;  %v395_v2 = vstv %s1251_s16  ;;  %s1379_s19 = sld [smem:[#allocation2 + $0x37]]  ;;  %s1381_s11 = sld [smem:[#allocation2 + $0x3b]] }
  0x3b   :  { %v518_v34 = vadd.f32 %v1199_v24, %v491_v0  ;;  %v519_v56 = vadd.f32 %v1202_v23, %v492_v38  ;;  %v236_v57 = vadd.f32 %v234_v40, %v209_v37  ;;  %v237_v17 = vadd.f32 %v235_v33, %v210_v39  ;;  %v1620_v37 = vld [vmem:[#allocation16_spill] sm:$0xff]  ;;  %s1387_s16 = sld [smem:[#allocation2 + $0x3f]] }
  0x3c   :  { %v316_v23 = vmul.f32 %v1045_v52, %v314_v28  ;;  %v342_v24 = vmul.f32 %v1050_v53, %v341_v9  ;;  %v343_v20 = vmul.f32 %v1061_v58, %v341_v9  ;;  %v422_v1 = vstv %s1264_s26  ;;  %v1621_v9 = vld [vmem:[#allocation17_spill] sm:$0xff]  ;;  %s1397_s26 = sld [smem:[#allocation2 + $0x4b]] }
  0x3d   :  { %v545_v7 = vadd.f32 %v1205_v14, %v518_v34  ;;  %v546_v45 = vadd.f32 %v1208_v48, %v519_v56  ;;  %v263_v27 = vadd.f32 %v261_v30, %v236_v57  ;;  %v264_v48 = vadd.f32 %v262_v43, %v237_v17  ;;  %v1619_v43 = vld [vmem:[#allocation15_spill] sm:$0xff] }
  0x3e   :  { %v369_v29 = vmul.f32 %v1066_v59, %v368_v19  ;;  %v370_v60 = vmul.f32 %v1075_v4, %v368_v19  ;;  %v396_v10 = vmul.f32 %v1080_v5, %v395_v2  ;;  %v397_v63 = vmul.f32 %v1091_v13, %v395_v2  ;;  %v1622_v2 = vld [vmem:[#allocation18_spill] sm:$0xff] }
  0x3f   :  { %v572_v18 = vadd.f32 %v570_v62, %v545_v7  ;;  %v573_v14 = vadd.f32 %v571_v8, %v546_v45  ;;  %v290_v40 = vadd.f32 %v288_v54, %v263_v27  ;;  %v291_v33 = vadd.f32 %v289_v50, %v264_v48 }
  0x40   :  { %v449_v28 = vstv %s1278_s1  ;;  %v476_v0 = vstv %s1280_s21  ;;  %v423_v30 = vmul.f32 %v1618_v55, %v422_v1  ;;  %v424_v34 = vmul.f32 %v1619_v43, %v422_v1  ;;  %v1623_v1 = vld [vmem:[#allocation19_spill] sm:$0xff]  ;;  %s1403_s1 = sld [smem:[#allocation2 + $0x4f]] }
  0x41   :  { %vm624_vm1 = vcmp.ge.f32.partialorder %v572_v18, 0.0  ;;  %vm625_vm2 = vcmp.ge.f32.partialorder %v573_v14, 0.0  ;;  %v626_v62 = vmul.f32 0.1, %v572_v18  ;;  %v627_v8 = vmul.f32 0.1, %v573_v14 }
  0x42   :  { %v317_v54 = vadd.f32 %v315_v44, %v290_v40  ;;  %v318_v50 = vadd.f32 %v316_v23, %v291_v33  ;;  %v450_v39 = vmul.f32 %v1620_v37, %v449_v28  ;;  %v451_v19 = vmul.f32 %v1621_v9, %v449_v28 }
  0x43   :  { %v628_v38 = vsel %vm624_vm1, %v572_v18, %v626_v62  ;;  %v629_v61 = vsel %vm625_vm2, %v573_v14, %v627_v8  ;;  %v477_v7 = vmul.f32 %v1622_v2, %v476_v0  ;;  %v503_v45 = vstv %s1290_s14  ;;  %v1624_v14 = vld [vmem:[#allocation20_spill] sm:$0xff]  ;;  %v1625_v62 = vld [vmem:[#allocation22_spill] sm:$0xff] }
  0x44   :  { %816 = vst [vmem:[%s1565_s2 + $0xa] sm:$0x3] %v629_v61  ;;  %v633_v56 = vsub.f32 %v628_v38, %v629_v61  ;;  %815 = vst [vmem:[%s1565_s2 + $0x8] sm:$0x3] %v628_v38  ;;  %v530_v57 = vstv %s1292_s20  ;;  %v344_v17 = vadd.f32 %v342_v24, %v317_v54  ;;  %v345_v23 = vadd.f32 %v343_v20, %v318_v50  ;;  %v1626_v50 = vld [vmem:[#allocation8_spill] sm:$0xff] }
  0x45   :  { %v478_v18 = vmul.f32 %v1623_v1, %v476_v0  ;;  %v504_v27 = vmul.f32 %v1624_v14, %v503_v45  ;;  %v505_v48 = vmul.f32 %v1157_v51, %v503_v45  ;;  %v531_v8 = vmul.f32 %v1625_v62, %v530_v57  ;;  %v1627_v62 = vld [vmem:[#allocation9_spill] sm:$0xff] }
  0x46   :  { %v634_v44 = vand.u32 2147483647, %v633_v56  ;;  %v557_v40 = vstv %s1298_s25  ;;  %v371_v28 = vadd.f32 %v369_v29, %v344_v17  ;;  %v372_v38 = vadd.f32 %v370_v60, %v345_v23  ;;  %v1628_v29 = vld [vmem:[#allocation10_spill] sm:$0xff]  ;;  %v1629_v17 = vld [vmem:[#allocation12_spill] sm:$0xff] }
  0x47   :  { %v532_v61 = vmul.f32 %v1182_v12, %v530_v57  ;;  %v40_v56 = vstv %s1300_s28  ;;  %v62_v2 = vstv %s1302_s0  ;;  %v89_v24 = vstv %s1308_s27  ;;  %s1412_s28 = sld [smem:[#allocation2 + $0x51]]  ;;  %s1420_s27 = sld [smem:[#allocation2 + $0x5]] }
  0x48   :  { %v635_v33 = vsel %vm590_vm0, %v634_v44, 0.0  ;;  %v116_v20 = vstv %s1310_s5  ;;  %v398_v0 = vadd.f32 %v396_v10, %v371_v28  ;;  %v399_v54 = vadd.f32 %v397_v63, %v372_v38  ;;  %s1414_s0 = sld [smem:[#allocation2 + $0x1]] }
  0x49   :  { %636 = vadd.xlane.f32.xlu1 %v635_v33  ;;  %v63_v45 = vmul.f32 %v62_v2, %v1626_v50  ;;  %v64_v44 = vmul.f32 %v62_v2, %v1627_v62  ;;  %v90_v60 = vmul.f32 %v1628_v29, %v89_v24  ;;  %v91_v57 = vmul.f32 %v916_v3, %v89_v24  ;;  %v1630_v33 = vld [vmem:[#allocation13_spill] sm:$0xff]  ;;  %s1422_s5 = sld [smem:[#allocation2 + $0x9]] }
  0x4a   :  { %v117_v23 = vmul.f32 %v1629_v17, %v116_v20  ;;  %v118_v12 = vmul.f32 %v1630_v33, %v116_v20  ;;  %v425_v10 = vadd.f32 %v423_v30, %v398_v0  ;;  %v426_v63 = vadd.f32 %v424_v34, %v399_v54 }
  0x4b   :  { %v65_v28 = vadd.f32 %v63_v45, %v40_v56  ;;  %v66_v38 = vadd.f32 %v64_v44, %v40_v56  ;;  %v558_v2 = vmul.f32 %v1236_v49, %v557_v40  ;;  %v143_v62 = vstv %s1323_s30  ;;  %s1461_s30 = sld [smem:[#allocation2 + $0x1d]] }
  0x4c   :  { %v170_v50 = vstv %s1329_s8  ;;  %v197_v51 = vstv %s1331_s12  ;;  %v452_v24 = vadd.f32 %v450_v39, %v425_v10  ;;  %v453_v17 = vadd.f32 %v451_v19, %v426_v63  ;;  %s1467_s8 = sld [smem:[#allocation2 + $0x21]]  ;;  %s1469_s12 = sld [smem:[#allocation2 + $0x25]] }
  0x4d   :  { %v92_v3 = vadd.f32 %v90_v60, %v65_v28  ;;  %v93_v20 = vadd.f32 %v91_v57, %v66_v38  ;;  %v144_v33 = vmul.f32 %v937_v11, %v143_v62  ;;  %v145_v29 = vmul.f32 %v946_v15, %v143_v62 }
  0x4e   :  { %v171_v30 = vmul.f32 %v951_v16, %v170_v50  ;;  %v172_v34 = vmul.f32 %v960_v21, %v170_v50  ;;  %v479_v56 = vadd.f32 %v477_v7, %v452_v24  ;;  %v480_v0 = vadd.f32 %v478_v18, %v453_v17 }
  0x4f   :  { %v119_v54 = vadd.f32 %v117_v23, %v92_v3  ;;  %v120_v45 = vadd.f32 %v118_v12, %v93_v20  ;;  %v559_v39 = vmul.f32 %v1258_v6, %v557_v40  ;;  %v198_v19 = vmul.f32 %v965_v22, %v197_v51 }
  0x50   :  { %v199_v44 = vmul.f32 %v974_v25, %v197_v51  ;;  %v224_v60 = vstv %s1344_s4  ;;  %v506_v62 = vadd.f32 %v504_v27, %v479_v56  ;;  %v507_v57 = vadd.f32 %v505_v48, %v480_v0  ;;  %s1479_s4 = sld [smem:[#allocation2 + $0x29]] }
  0x51   :  { %v146_v10 = vadd.f32 %v144_v33, %v119_v54  ;;  %v147_v50 = vadd.f32 %v145_v29, %v120_v45  ;;  %v251_v7 = vstv %s1348_s7  ;;  %v278_v18 = vstv %s1354_s13  ;;  %s1485_s7 = sld [smem:[#allocation2 + $0x2d]]  ;;  %s1489_s13 = sld [smem:[#allocation2 + $0x31]] }
  0x52   :  { %v305_v3 = vstv %s1356_s10  ;;  %v533_v12 = vadd.f32 %v531_v8, %v506_v62  ;;  %v534_v17 = vadd.f32 %v532_v61, %v507_v57  ;;  %v225_v51 = vmul.f32 %v979_v26, %v224_v60  ;;  %s1493_s10 = sld [smem:[#allocation2 + $0x35]] }
  0x53   :  { %v173_v40 = vadd.f32 %v171_v30, %v146_v10  ;;  %v174_v23 = vadd.f32 %v172_v34, %v147_v50  ;;  %v226_v27 = vmul.f32 %v988_v31, %v224_v60  ;;  %v252_v48 = vmul.f32 %v993_v32, %v251_v7 }
  0x54   :  { %v332_v29 = vstv %s1362_s15  ;;  %v560_v33 = vadd.f32 %v558_v2, %v533_v12  ;;  %v561_v63 = vadd.f32 %v559_v39, %v534_v17  ;;  %v253_v8 = vmul.f32 %v1002_v35, %v251_v7  ;;  %s1499_s15 = sld [smem:[#allocation2 + $0x39]] }
  0x55   :  { %v200_v28 = vadd.f32 %v198_v19, %v173_v40  ;;  %v201_v38 = vadd.f32 %v199_v44, %v174_v23  ;;  %v279_v61 = vmul.f32 %v1007_v36, %v278_v18  ;;  %v280_v24 = vmul.f32 %v1016_v41, %v278_v18 }
  0x56   :  { %v306_v20 = vmul.f32 %v1021_v42, %v305_v3  ;;  %vm580_vm3 = vcmp.ge.f32.partialorder %v560_v33, 0.0  ;;  %vm581_vm4 = vcmp.ge.f32.partialorder %v561_v63, 0.0  ;;  %v582_v2 = vmul.f32 0.1, %v560_v33 }
  0x57   :  { %v583_v30 = vmul.f32 0.1, %v561_v63  ;;  %v227_v34 = vadd.f32 %v225_v51, %v200_v28  ;;  %v228_v56 = vadd.f32 %v226_v27, %v201_v38  ;;  %v307_v0 = vmul.f32 %v1031_v46, %v305_v3 }
  0x58   :  { %v359_v54 = vstv %s1372_s17  ;;  %v584_v45 = vsel %vm580_vm3, %v560_v33, %v582_v2  ;;  %v333_v19 = vmul.f32 %v1036_v47, %v332_v29  ;;  %v386_v44 = vstv %s1374_s18  ;;  %s1505_s17 = sld [smem:[#allocation2 + $0x3d]] }
  0x59   :  { %v585_v39 = vsel %vm581_vm4, %v561_v63, %v583_v30  ;;  %586 = vst [vmem:[%s1565_s2] sm:$0x3] %v584_v45  ;;  %v254_v62 = vadd.f32 %v252_v48, %v227_v34  ;;  %v255_v57 = vadd.f32 %v253_v8, %v228_v56  ;;  %v334_v10 = vmul.f32 %v1045_v52, %v332_v29 }
  0x5a   :  { %587 = vst [vmem:[%s1565_s2 + $0x2] sm:$0x3] %v585_v39  ;;  %v588_v60 = vsub.f32 %v584_v45, %v585_v39  ;;  %v360_v50 = vmul.f32 %v1050_v53, %v359_v54  ;;  %v361_v7 = vmul.f32 %v1061_v58, %v359_v54  ;;  %v413_v18 = vstv %s1379_s19 }
  0x5b   :  { %v440_v3 = vstv %s1381_s11  ;;  %v281_v17 = vadd.f32 %v279_v61, %v254_v62  ;;  %v282_v40 = vadd.f32 %v280_v24, %v255_v57  ;;  %v387_v23 = vmul.f32 %v1066_v59, %v386_v44  ;;  %v1632_v57 = vld [vmem:[#allocation21_spill] sm:$0xff] }
  0x5c   :  { %v589_v12 = vand.u32 2147483647, %v588_v60  ;;  %v388_v51 = vmul.f32 %v1075_v4, %v386_v44  ;;  %v414_v27 = vmul.f32 %v1080_v5, %v413_v18  ;;  %v415_v48 = vmul.f32 %v1091_v13, %v413_v18 }
  0x5d   :  { %v467_v29 = vstv %s1387_s16  ;;  %v308_v63 = vadd.f32 %v306_v20, %v281_v17  ;;  %v309_v28 = vadd.f32 %v307_v0, %v282_v40  ;;  %v441_v38 = vmul.f32 %v1618_v55, %v440_v3  ;;  %v1631_v0 = vld [vmem:[#allocation18_spill] sm:$0xff] }
  0x5e   :  { %v591_v33 = vsel %vm590_vm0, %v589_v12, 0.0  ;;  %v442_v8 = vmul.f32 %v1619_v43, %v440_v3  ;;  %v494_v61 = vstv %s1389_s22  ;;  %v521_v24 = vstv %s1395_s23  ;;  %v1633_v3 = vld [vmem:[#allocation22_spill] sm:$0xff]  ;;  %s1515_s22 = sld [smem:[#allocation2 + $0x41]]  ;;  %s1520_s23 = sld [smem:[#allocation2 + $0x45]] }
  0x5f   :  { %592 = vadd.xlane.f32.xlu0 %v591_v33  ;;  %v548_v2 = vstv %s1397_s26  ;;  %v335_v20 = vadd.f32 %v333_v19, %v308_v63  ;;  %v336_v30 = vadd.f32 %v334_v10, %v309_v28  ;;  %v468_v34 = vmul.f32 %v1620_v37, %v467_v29  ;;  %v1634_v63 = vld [vmem:[#allocation8_spill] sm:$0xff]  ;;  %s804_s26 = sld [smem:[#allocation2 + $0x49]] }
  0x60   :  { %v469_v56 = vmul.f32 %v1621_v9, %v467_v29  ;;  %v495_v54 = vmul.f32 %v1631_v0, %v494_v61  ;;  %v496_v45 = vmul.f32 %v1623_v1, %v494_v61  ;;  %v522_v39 = vmul.f32 %v1624_v14, %v521_v24  ;;  %v1635_v61 = vld [vmem:[#allocation9_spill] sm:$0xff] }
  0x61   :  { %v575_v44 = vstv %s1403_s1  ;;  %v362_v60 = vadd.f32 %v360_v50, %v335_v20  ;;  %v363_v62 = vadd.f32 %v361_v7, %v336_v30  ;;  %v523_v18 = vmul.f32 %v1632_v57, %v521_v24  ;;  %v1636_v50 = vld [vmem:[#allocation10_spill] sm:$0xff]  ;;  %v1637_v20 = vld [vmem:[#allocation11_spill] sm:$0xff]  ;;  %v1638_v30 = vld [vmem:[#allocation12_spill] sm:$0xff]  ;;  %s810_s1 = sld [smem:[#allocation2 + $0x4d]] }
  0x62   :  { %v549_v12 = vmul.f32 %v1633_v3, %v548_v2  ;;  %v36_v17 = vstv %s1412_s28  ;;  %v50_v19 = vstv %s1414_s0  ;;  %v77_v10 = vstv %s1420_s27  ;;  %v1639_v57 = vld [vmem:[#allocation13_spill] sm:$0xff] }
  0x63   :  { %v104_v40 = vstv %s1422_s5  ;;  %v389_v29 = vadd.f32 %v387_v23, %v362_v60  ;;  %v390_v33 = vadd.f32 %v388_v51, %v363_v62  ;;  %v51_v28 = vmul.f32 %v50_v19, %v1634_v63 }
  0x64   :  { %v52_v14 = vmul.f32 %v50_v19, %v1635_v61  ;;  %v78_v7 = vmul.f32 %v1636_v50, %v77_v10  ;;  %v79_v24 = vmul.f32 %v1637_v20, %v77_v10  ;;  %v105_v3 = vmul.f32 %v1638_v30, %v104_v40 }
  0x65   :  { %v106_v1 = vmul.f32 %v1639_v57, %v104_v40  ;;  %v416_v0 = vadd.f32 %v414_v27, %v389_v29  ;;  %v417_v9 = vadd.f32 %v415_v48, %v390_v33  ;;  %v53_v37 = vadd.f32 %v51_v28, %v36_v17  ;;  %v1640_v28 = vld [vmem:[#allocation23_spill] sm:$0xff] }
  0x66   :  { %v54_v23 = vadd.f32 %v52_v14, %v36_v17  ;;  %v131_v60 = vstv %s1431_s6  ;;  %v158_v51 = vstv %s1433_s24  ;;  %v185_v62 = vstv %s1439_s29  ;;  %s870_s29 = smov [#allocation5]  }
  0x67   :  { %v212_v63 = vstv %s1441_s9  ;;  %v443_v19 = vadd.f32 %v441_v38, %v416_v0  ;;  %v444_v10 = vadd.f32 %v442_v8, %v417_v9  ;;  %v80_v61 = vadd.f32 %v78_v7, %v53_v37  ;;  %s681_s9 = sshll.u32 %s870_s29, 4  ;;  %s682_s9 = int_to_ptr.vmem [resolvable:$true] %s681_s9 }
  0x68   :  { %v81_v50 = vadd.f32 %v79_v24, %v54_v23  ;;  %v132_v57 = vmul.f32 %v937_v11, %v131_v60  ;;  %v133_v40 = vmul.f32 %v946_v15, %v131_v60  ;;  %v159_v27 = vmul.f32 %v951_v16, %v158_v51  ;;  %p847_p6 = scmp.lt.s32.totalorder %s682_s9, %s682_s9 }
  0x69   :  { %v160_v14 = vmul.f32 %v960_v21, %v158_v51  ;;  %v470_v48 = vadd.f32 %v468_v34, %v443_v19  ;;  %v471_v17 = vadd.f32 %v469_v56, %v444_v10  ;;  %v107_v29 = vadd.f32 %v105_v3, %v80_v61 }
  0x6a   :  { %v108_v33 = vadd.f32 %v106_v1, %v81_v50  ;;  %v550_v20 = vmul.f32 %v1640_v28, %v548_v2  ;;  %v576_v38 = vmul.f32 %v1236_v49, %v575_v44  ;;  %v186_v37 = vmul.f32 %v965_v22, %v185_v62 }
  0x6b   :  { %v187_v11 = vmul.f32 %v974_v25, %v185_v62  ;;  %v497_v15 = vadd.f32 %v495_v54, %v470_v48  ;;  %v498_v16 = vadd.f32 %v496_v45, %v471_v17  ;;  %v134_v21 = vadd.f32 %v132_v57, %v107_v29 }
  0x6c   :  { %v135_v9 = vadd.f32 %v133_v40, %v108_v33  ;;  %v577_v8 = vmul.f32 %v1258_v6, %v575_v44  ;;  %v213_v1 = vmul.f32 %v979_v26, %v212_v63  ;;  %v214_v2 = vmul.f32 %v988_v31, %v212_v63 }
  0x6d   :  { %v239_v34 = vstv %s1461_s30  ;;  %v524_v22 = vadd.f32 %v522_v39, %v497_v15  ;;  %v525_v56 = vadd.f32 %v523_v18, %v498_v16  ;;  %v161_v0 = vadd.f32 %v159_v27, %v134_v21  ;;  %s842_s30 = scalar_lea.vmem %s682_s9, 16 }
  0x6e   :  { %v162_v25 = vadd.f32 %v160_v14, %v135_v9  ;;  %v266_v3 = vstv %s1467_s8  ;;  %v293_v7 = vstv %s1469_s12  ;;  %v240_v26 = vmul.f32 %v993_v32, %v239_v34  ;;  %p843_p5 = scmp.ne.s32.totalorder %s682_s9, %s842_s30  ;;  %s846_s8 = scalar_lea.vmem %s682_s9, 32 }
  0x6f   :  { %v551_v54 = vadd.f32 %v549_v12, %v524_v22  ;;  %v552_v45 = vadd.f32 %v550_v20, %v525_v56  ;;  %v188_v24 = vadd.f32 %v186_v37, %v161_v0  ;;  %v241_v31 = vmul.f32 %v1002_v35, %v239_v34  ;;  %v1641_v56 = vld [vmem:[#allocation16_spill] sm:$0xff]  ;;  %p848_p7 = scmp.lt.s32.totalorder %s846_s8, %s842_s30 }
  0x70   :  { %v189_v44 = vadd.f32 %v187_v11, %v162_v25  ;;  %v267_v60 = vmul.f32 %v1007_v36, %v266_v3  ;;  %v268_v51 = vmul.f32 %v1016_v41, %v266_v3  ;;  %v294_v12 = vmul.f32 %v1021_v42, %v293_v7  ;;  %v1642_v25 = vld [vmem:[#allocation17_spill] sm:$0xff] }
  0x71   :  { %v578_v30 = vadd.f32 %v576_v38, %v551_v54  ;;  %v579_v23 = vadd.f32 %v577_v8, %v552_v45  ;;  %v215_v39 = vadd.f32 %v213_v1, %v188_v24  ;;  %v320_v62 = vstv %s1479_s4  ;;  %v1643_v45 = vld [vmem:[#allocation18_spill] sm:$0xff]  ;;  %v1644_v24 = vld [vmem:[#allocation19_spill] sm:$0xff]  ;;  %p849_p8 = por %p848_p7, %p847_p6 }
  0x72   :  { %v216_v18 = vadd.f32 %v214_v2, %v189_v44  ;;  %v295_v10 = vmul.f32 %v1031_v46, %v293_v7  ;;  %v347_v61 = vstv %s1485_s7  ;;  %v321_v36 = vmul.f32 %v1036_v47, %v320_v62 }
  0x73   :  { %vm646_vm5 = vcmp.ge.f32.partialorder %v578_v30, 0.0  ;;  %vm647_vm6 = vcmp.ge.f32.partialorder %v579_v23, 0.0  ;;  %v648_v32 = vmul.f32 0.1, %v578_v30  ;;  %v649_v35 = vmul.f32 0.1, %v579_v23  ;;  %p850_p9 = pnand %p849_p8, %p843_p5 }
  0x74   :  { %v242_v63 = vadd.f32 %v240_v26, %v215_v39  ;;  %v243_v19 = vadd.f32 %v241_v31, %v216_v18  ;;  %v322_v41 = vmul.f32 %v1045_v52, %v320_v62  ;;  %v374_v27 = vstv %s1489_s13 }
  0x75   :  { %v650_v50 = vsel %vm646_vm5, %v578_v30, %v648_v32  ;;  %v651_v57 = vsel %vm647_vm6, %v579_v23, %v649_v35  ;;  %v348_v47 = vmul.f32 %v1050_v53, %v347_v61  ;;  %v349_v17 = vmul.f32 %v1061_v58, %v347_v61 }
  0x76   :  { %817 = vst [vmem:[%s1565_s2 + $0xc] sm:$0x3] %v650_v50  ;;  %818 = vst [vmem:[%s1565_s2 + $0xe] sm:$0x3] %v651_v57  ;;  %v655_v42 = vsub.f32 %v650_v50, %v651_v57  ;;  %v269_v46 = vadd.f32 %v267_v60, %v242_v63  ;;  %v270_v40 = vadd.f32 %v268_v51, %v243_v19  ;;  %v401_v33 = vstv %s1493_s10 }
  0x77   :  { %v375_v29 = vmul.f32 %v1066_v59, %v374_v27  ;;  %v376_v53 = vmul.f32 %v1075_v4, %v374_v27  ;;  %v428_v11 = vstv %s1499_s15  ;;  %v402_v58 = vmul.f32 %v1080_v5, %v401_v33 }
  0x78   :  { %v656_v52 = vand.u32 2147483647, %v655_v42  ;;  %v296_v14 = vadd.f32 %v294_v12, %v269_v46  ;;  %v297_v48 = vadd.f32 %v295_v10, %v270_v40  ;;  %v403_v59 = vmul.f32 %v1091_v13, %v401_v33  ;;  %v1647_v12 = vld [vmem:[#allocation22_spill] sm:$0xff] }
  0x79   :  { %v455_v21 = vstv %s1505_s17  ;;  %v429_v1 = vmul.f32 %v1618_v55, %v428_v11  ;;  %v430_v2 = vmul.f32 %v1619_v43, %v428_v11  ;;  %v482_v34 = vstv %s1515_s22  ;;  %v1645_v55 = vld [vmem:[#allocation20_spill] sm:$0xff]  ;;  %v1646_v43 = vld [vmem:[#allocation21_spill] sm:$0xff] }
  0x7a   :  { %v657_v20 = vsel %vm590_vm0, %v656_v52, 0.0  ;;  %v323_v38 = vadd.f32 %v321_v36, %v296_v14  ;;  %v324_v37 = vadd.f32 %v322_v41, %v297_v48  ;;  %v456_v0 = vmul.f32 %v1641_v56, %v455_v21 }
  0x7b   :  { %658 = vadd.xlane.f32.xlu1 %v657_v20  ;;  %v457_v3 = vmul.f32 %v1642_v25, %v455_v21  ;;  %v509_v7 = vstv %s1520_s23  ;;  %v483_v13 = vmul.f32 %v1643_v45, %v482_v34  ;;  %v484_v44 = vmul.f32 %v1644_v24, %v482_v34 }
  0x7c   :  { %v350_v15 = vadd.f32 %v348_v47, %v323_v38  ;;  %v351_v16 = vadd.f32 %v349_v17, %v324_v37  ;;  %v536_v26 = vstv %s804_s26  ;;  %v510_v23 = vmul.f32 %v1645_v55, %v509_v7 }
  0x7d   :  { %v511_v39 = vmul.f32 %v1646_v43, %v509_v7  ;;  %v563_v18 = vstv %s810_s1  ;;  %v537_v62 = vmul.f32 %v1647_v12, %v536_v26  ;;  %v538_v32 = vmul.f32 %v1640_v28, %v536_v26 }
  0x7e   :  { %v377_v9 = vadd.f32 %v375_v29, %v350_v15  ;;  %v378_v8 = vadd.f32 %v376_v53, %v351_v16  ;;  %v564_v19 = vmul.f32 %v1236_v49, %v563_v18  ;;  %v565_v10 = vmul.f32 %v1258_v6, %v563_v18 }
  0x7f   :  { %v869_v27 = vmov 0.0  }
  0x80   :  { %v404_v4 = vadd.f32 %v402_v58, %v377_v9  ;;  %v405_v22 = vadd.f32 %v403_v59, %v378_v8  ;;  %32 = vst.msk [vmem:[#allocation5] sm:$0x1] %vm31_vm9, %v869_v27 }
  0x82   :  { %v431_v54 = vadd.f32 %v429_v1, %v404_v4  ;;  %v432_v5 = vadd.f32 %v430_v2, %v405_v22 }
  0x84   :  { %v458_v31 = vadd.f32 %v456_v0, %v431_v54  ;;  %v459_v30 = vadd.f32 %v457_v3, %v432_v5 }
  0x86   :  { %v485_v60 = vadd.f32 %v483_v13, %v458_v31  ;;  %v486_v51 = vadd.f32 %v484_v44, %v459_v30 }
  0x87   :  { %v668_v7 = vld [vmem:[#allocation5] sm:$0x1] }
  0x88   :  { %v512_v35 = vadd.f32 %v510_v23, %v485_v60  ;;  %v513_v63 = vadd.f32 %v511_v39, %v486_v51 }
  0x8a   :  { %v539_v61 = vadd.f32 %v537_v62, %v512_v35  ;;  %v540_v50 = vadd.f32 %v538_v32, %v513_v63 }
  0x8c   :  { %v566_v57 = vadd.f32 %v564_v19, %v539_v61  ;;  %v567_v36 = vadd.f32 %v565_v10, %v540_v50 }
  0x8e   :  { %vm602_vm7 = vcmp.ge.f32.partialorder %v566_v57, 0.0  ;;  %vm603_vm8 = vcmp.ge.f32.partialorder %v567_v36, 0.0  ;;  %v604_v41 = vmul.f32 0.1, %v566_v57  ;;  %v605_v42 = vmul.f32 0.1, %v567_v36 }
  0x90   :  { %v606_v46 = vsel %vm602_vm7, %v566_v57, %v604_v41  ;;  %v607_v40 = vsel %vm603_vm8, %v567_v36, %v605_v42 }
  0x91   :  { %813 = vst [vmem:[%s1565_s2 + $0x4] sm:$0x3] %v606_v46  ;;  %814 = vst [vmem:[%s1565_s2 + $0x6] sm:$0x3] %v607_v40  ;;  %v611_v49 = vsub.f32 %v606_v46, %v607_v40 }
  0x93   :  { %v612_v6 = vand.u32 2147483647, %v611_v49 }
  0x95   :  { %v613_v28 = vsel %vm590_vm0, %v612_v6, 0.0 }
  0x96   :  { %614 = vadd.xlane.f32.xlu0 %v613_v28 }
  0xd6   :  { %v637_v20 = vpop.xlane.xlu1 %636 }
  0xd7   :  { %v638_v53 = vrot.slane %v637_v20, 4 }
  0xd9   :  { %v639_v15 = vadd.f32 %v638_v53, %v637_v20 }
  0xdb   :  { %v640_v58 = vrot.slane %v639_v15, 2 }
  0xdd   :  { %v641_v1 = vadd.f32 %v640_v58, %v639_v15 }
  0xdf   :  { %v642_v22 = vrot.slane %v641_v1, 1 }
  0xe1   :  { %v643_v3 = vadd.f32 %v642_v22, %v641_v1 }
  0xec   :  { %v593_v47 = vpop.xlane.xlu0 %592 }
  0xed   :  { %v594_v52 = vrot.slane %v593_v47, 4 }
  0xef   :  { %v595_v14 = vadd.f32 %v594_v52, %v593_v47 }
  0xf1   :  { %v596_v48 = vrot.slane %v595_v14, 2 }
  0xf3   :  { %v597_v17 = vadd.f32 %v596_v48, %v595_v14 }
  0xf5   :  { %v598_v29 = vrot.slane %v597_v17, 1 }
  0xf7   :  { %v599_v33 = vadd.f32 %v598_v29, %v597_v17 }
  0xf9   :  { %819 = vpush %v599_v33 }
 0x108   :  { %v659_v38 = vpop.xlane.xlu1 %658 }
 0x109   :  { %v660_v37 = vrot.slane %v659_v38, 4 }
 0x10b   :  { %v661_v11 = vadd.f32 %v660_v37, %v659_v38 }
 0x10d   :  { %v662_v16 = vrot.slane %v661_v11, 2 }
 0x10f   :  { %v663_v9 = vadd.f32 %v662_v16, %v661_v11 }
 0x111   :  { %v664_v4 = vrot.slane %v663_v9, 1 }
 0x113   :  { %v665_v25 = vadd.f32 %v664_v4, %v663_v9 }
 0x123   :  { %v615_v59 = vpop.xlane.xlu0 %614 }
 0x124   :  { %v616_v21 = vrot.slane %v615_v59, 4 }
 0x126   :  { %v617_v8 = vadd.f32 %v616_v21, %v615_v59 }
 0x128   :  { %v618_v2 = vrot.slane %v617_v8, 2 }
 0x12a   :  { %v619_v34 = vadd.f32 %v618_v2, %v617_v8  ;;  %s820_s2 = spop %819 }
 0x12c   :  { %v620_v56 = vrot.slane %v619_v34, 1 }
 0x12e   :  { %v621_v0 = vadd.f32 %v620_v56, %v619_v34 }
 0x130   :  { %821 = vpush %v621_v0 }
 0x131   :  { %823 = vpush %v643_v3 }
 0x132   :  { %825 = vpush %v665_v25 }
 0x161   :  { %s822_s28 = spop %821 }
 0x162   :  { %s623_s0 = sadd.f32 %s822_s28, %s820_s2  ;;  %s824_s27 = spop %823 }
 0x163   :  { %s826_s6 = spop %825 }
 0x164   :  { %s645_s5 = sadd.f32 %s824_s27, %s623_s0 }
 0x166   :  { %s667_s24 = sadd.f32 %s826_s6, %s645_s5 }
 0x168   :  { %v669_v54 = vstv %s667_s24 }
 0x169   :  { %v670_v5 = vadd.f32 %v669_v54, %v668_v7 }
 0x16b   :  { %672 = vst.msk [vmem:[#allocation5] sm:$0x1] %vm31_vm9, %v670_v5 }
 0x16c   :  { %853 = shalt.err (!%p850_p9)
}
 0x16d   :  { %s854_s7 = scalar_lea.hbm %s1566_s3, 16 }
 0x16e   :  { %p855_p10 = scmp.ne.s32.totalorder %s1566_s3, %s854_s7  ;;  %p858_p11 = scmp.lt.u32.totalorder %s854_s7, %s1566_s3 }
 0x170   :  { %p860_p12 = pnand %p858_p11, %p855_p10 }
 0x172   :  { %863 = shalt.err (!%p860_p12)
}
 0x173   :  { %684 = dma.vmem_to_hbm [thread:$0]  %s682_s9, 16, %s1566_s3, [#allocation3]  }
 0x174   :  { %866 = dma.done.wait [#allocation3], 16  }
 0x175   :  { %867 = vsyncadd [#allocation3], 4294967280 }
 0x176   :  { %690 = vsyncpa [#allocation3], 1 }
 0x177   :  { %691 = vsyncpa [#allocation4], 1 }

// kernel: _lambda_.24
= control target key start
LH: loop header
LB: loop body
LE: loop exit
PB: predicated region body
PF: predicated region fallthrough
CT: control target
= control target key end

     0   :  { %9 = vsyncpa [#allocation4], 0  ;;  %s404_s0 = inlined_call_operand.vmem [shape: f32[13], index: 0, kind: input, shape index: {}]   ;;  %s405_s1 = inlined_call_operand.vmem [shape: f32[12,2,2,128], index: 1, kind: input, shape index: {}]   ;;  %s406_s2 = inlined_call_operand.vmem [shape: f32[1,2,2,128], index: 2, kind: output, shape index: {0}]   ;;  %s407_s3 = inlined_call_operand.hbm [shape: f32[1,1], index: 3, kind: output, shape index: {1}]  }
   0x1   :  { %10 = vsyncpa [#allocation3], 0  ;;  %s17_s14 = sshll.u32 %s404_s0, 4  ;;  %s18_s14 = int_to_ptr.vmem [resolvable:$true] %s17_s14 }
   0x2   :  { %s221_s15 = scalar_lea.vmem %s18_s14, 16  ;;  %p226_p1 = scmp.lt.s32.totalorder %s18_s14, %s18_s14 }
   0x3   :  { %p222_p0 = scmp.ne.s32.totalorder %s18_s14, %s221_s15  ;;  %p227_p2 = scmp.lt.s32.totalorder %s221_s15, %s221_s15 }
   0x5   :  { %p228_p3 = por %p227_p2, %p226_p1 }
   0x7   :  { %p229_p4 = pnand %p228_p3, %p222_p0 }
   0x9   :  { %232 = shalt.err (!%p229_p4)
}
   0xa   :  { %s259_s16 = smov [#allocation2]  }
   0xb   :  { %20 = dma.vmem_to_smem %s18_s14, 16, %s259_s16, [#allocation4]  }
   0xc   :  { %255 = dma.done.wait [#allocation4], 16  }
   0xd   :  { %256 = vsyncadd [#allocation4], 4294967280 }
   0xe   :  { %26 = sfence }
   0xf   :  { %s182_s17 = sld [smem:[#allocation2 + $0xc]]  ;;  %s37_s18 = sld [smem:[#allocation2]]  ;;  %v35_v0 = vld [vmem:[%s405_s1] sm:$0x3]  ;;  %v36_v1 = vld [vmem:[%s405_s1 + $0x2] sm:$0x3] }
  0x10   :  { %s185_s19 = sld [smem:[#allocation2 + $0x1]]  ;;  %s188_s20 = sld [smem:[#allocation2 + $0x2]]  ;;  %v183_v2 = vld [vmem:[%s405_s1 + $0x4] sm:$0x3]  ;;  %v184_v3 = vld [vmem:[%s405_s1 + $0x6] sm:$0x3] }
  0x11   :  { %s285_s21 = sld [smem:[#allocation2 + $0x3]]  ;;  %s293_s25 = sld [smem:[#allocation2 + $0x4]]  ;;  %v186_v6 = vld [vmem:[%s405_s1 + $0x8] sm:$0x3]  ;;  %v187_v7 = vld [vmem:[%s405_s1 + $0xa] sm:$0x3] }
  0x12   :  { %s301_s30 = sld [smem:[#allocation2 + $0x5]]  ;;  %s309_s8 = sld [smem:[#allocation2 + $0x6]]  ;;  %v189_v14 = vld [vmem:[%s405_s1 + $0xc] sm:$0x3]  ;;  %v190_v15 = vld [vmem:[%s405_s1 + $0xe] sm:$0x3] }
  0x13   :  { %s317_s13 = sld [smem:[#allocation2 + $0x7]]  ;;  %v192_v21 = vld [vmem:[%s405_s1 + $0x10] sm:$0x3]  ;;  %v193_v22 = vld [vmem:[%s405_s1 + $0x12] sm:$0x3]  ;;  %s336_s22 = sld [smem:[#allocation2 + $0x9]] }
  0x14   :  { %v195_v28 = vld [vmem:[%s405_s1 + $0x14] sm:$0x3]  ;;  %v196_v29 = vld [vmem:[%s405_s1 + $0x16] sm:$0x3]  ;;  %v198_v35 = vld [vmem:[%s405_s1 + $0x18] sm:$0x3] }
  0x15   :  { %v34_v4 = vstv %s182_s17  ;;  %v38_v5 = vstv %s37_s18  ;;  %s327_s18 = sld [smem:[#allocation2 + $0x8]]  ;;  %v199_v36 = vld [vmem:[%s405_s1 + $0x1a] sm:$0x3]  ;;  %s345_s27 = sld [smem:[#allocation2 + $0xa]]  ;;  %v201_v42 = vld [vmem:[%s405_s1 + $0x1c] sm:$0x3] }
  0x16   :  { %v39_v8 = vmul.f32 %v38_v5, %v35_v0  ;;  %v40_v9 = vmul.f32 %v38_v5, %v36_v1  ;;  %v47_v10 = vstv %s185_s19  ;;  %v56_v13 = vstv %s188_s20  ;;  %v202_v43 = vld [vmem:[%s405_s1 + $0x1e] sm:$0x3]  ;;  %s354_s5 = sld [smem:[#allocation2 + $0xb]]  ;;  %v204_v49 = vld [vmem:[%s405_s1 + $0x20] sm:$0x3] }
  0x17   :  { %v48_v11 = vmul.f32 %v183_v2, %v47_v10  ;;  %v49_v12 = vmul.f32 %v184_v3, %v47_v10  ;;  %v57_v18 = vmul.f32 %v186_v6, %v56_v13  ;;  %v58_v19 = vmul.f32 %v187_v7, %v56_v13  ;;  %v205_v50 = vld [vmem:[%s405_s1 + $0x22] sm:$0x3]  ;;  %v207_v56 = vld [vmem:[%s405_s1 + $0x24] sm:$0x3]  ;;  %v208_v57 = vld [vmem:[%s405_s1 + $0x26] sm:$0x3] }
  0x18   :  { %v41_v16 = vadd.f32 %v39_v8, %v34_v4  ;;  %v42_v17 = vadd.f32 %v40_v9, %v34_v4  ;;  %v65_v20 = vstv %s285_s21  ;;  %v74_v23 = vstv %s293_s25  ;;  %v210_v63 = vld [vmem:[%s405_s1 + $0x28] sm:$0x3]  ;;  %v211_v0 = vld [vmem:[%s405_s1 + $0x2a] sm:$0x3] }
  0x19   :  { %v66_v26 = vmul.f32 %v189_v14, %v65_v20  ;;  %v67_v27 = vmul.f32 %v190_v15, %v65_v20  ;;  %v83_v30 = vstv %s301_s30  ;;  %v75_v33 = vmul.f32 %v192_v21, %v74_v23  ;;  %v213_v6 = vld [vmem:[%s405_s1 + $0x2c] sm:$0x3]  ;;  %v214_v7 = vld [vmem:[%s405_s1 + $0x2e] sm:$0x3]  ;;  %s261_s1 = smov [#allocation5]  }
  0x1a   :  { %v50_v24 = vadd.f32 %v48_v11, %v41_v16  ;;  %v51_v25 = vadd.f32 %v49_v12, %v42_v17  ;;  %v76_v34 = vmul.f32 %v193_v22, %v74_v23  ;;  %v92_v37 = vstv %s309_s8 }
  0x1b   :  { %v84_v40 = vmul.f32 %v195_v28, %v83_v30  ;;  %v85_v41 = vmul.f32 %v196_v29, %v83_v30  ;;  %v101_v44 = vstv %s317_s13  ;;  %v93_v47 = vmul.f32 %v198_v35, %v92_v37 }
  0x1c   :  { %v59_v31 = vadd.f32 %v57_v18, %v50_v24  ;;  %v60_v32 = vadd.f32 %v58_v19, %v51_v25  ;;  %v94_v48 = vmul.f32 %v199_v36, %v92_v37  ;;  %v110_v51 = vstv %s327_s18 }
  0x1d   :  { %v102_v54 = vmul.f32 %v201_v42, %v101_v44  ;;  %v103_v55 = vmul.f32 %v202_v43, %v101_v44  ;;  %v119_v58 = vstv %s336_s22  ;;  %v111_v61 = vmul.f32 %v204_v49, %v110_v51 }
  0x1e   :  { %v68_v38 = vadd.f32 %v66_v26, %v59_v31  ;;  %v69_v39 = vadd.f32 %v67_v27, %v60_v32  ;;  %v112_v62 = vmul.f32 %v205_v50, %v110_v51  ;;  %v128_v1 = vstv %s345_s27 }
  0x1f   :  { %v120_v4 = vmul.f32 %v207_v56, %v119_v58  ;;  %v121_v5 = vmul.f32 %v208_v57, %v119_v58  ;;  %v137_v8 = vstv %s354_s5  ;;  %v129_v11 = vmul.f32 %v210_v63, %v128_v1 }
  0x20   :  { %v77_v45 = vadd.f32 %v75_v33, %v68_v38  ;;  %v78_v46 = vadd.f32 %v76_v34, %v69_v39  ;;  %v130_v12 = vmul.f32 %v211_v0, %v128_v1  ;;  %v138_v15 = vmul.f32 %v213_v6, %v137_v8 }
  0x21   :  { %v139_v16 = vmul.f32 %v214_v7, %v137_v8  ;;  %vm146_vm0 = vcmask 1041408   ;;  %vm31_vm1 = vcmask 0   ;;  %v260_v24 = vmov 0.0  }
  0x22   :  { %v86_v52 = vadd.f32 %v84_v40, %v77_v45  ;;  %v87_v53 = vadd.f32 %v85_v41, %v78_v46  ;;  %32 = vst.msk [vmem:[#allocation5] sm:$0x1] %vm31_vm1, %v260_v24 }
  0x24   :  { %v95_v59 = vadd.f32 %v93_v47, %v86_v52  ;;  %v96_v60 = vadd.f32 %v94_v48, %v87_v53 }
  0x26   :  { %v104_v2 = vadd.f32 %v102_v54, %v95_v59  ;;  %v105_v3 = vadd.f32 %v103_v55, %v96_v60 }
  0x28   :  { %v113_v9 = vadd.f32 %v111_v61, %v104_v2  ;;  %v114_v10 = vadd.f32 %v112_v62, %v105_v3 }
  0x29   :  { %v158_v32 = vld [vmem:[#allocation5] sm:$0x1] }
  0x2a   :  { %v122_v13 = vadd.f32 %v120_v4, %v113_v9  ;;  %v123_v14 = vadd.f32 %v121_v5, %v114_v10 }
  0x2c   :  { %v131_v17 = vadd.f32 %v129_v11, %v122_v13  ;;  %v132_v18 = vadd.f32 %v130_v12, %v123_v14 }
  0x2e   :  { %v140_v19 = vadd.f32 %v138_v15, %v131_v17  ;;  %v141_v20 = vadd.f32 %v139_v16, %v132_v18 }
  0x30   :  { %142 = vst [vmem:[%s406_s2] sm:$0x3] %v140_v19  ;;  %143 = vst [vmem:[%s406_s2 + $0x2] sm:$0x3] %v141_v20  ;;  %v144_v21 = vsub.f32 %v140_v19, %v141_v20  ;;  %s171_s2 = sshll.u32 %s261_s1, 4  ;;  %s172_s2 = int_to_ptr.vmem [resolvable:$true] %s171_s2 }
  0x31   :  { %s233_s26 = scalar_lea.vmem %s172_s2, 16  ;;  %s237_s27 = scalar_lea.vmem %s172_s2, 32 }
  0x32   :  { %v145_v22 = vand.u32 2147483647, %v144_v21  ;;  %p234_p5 = scmp.ne.s32.totalorder %s172_s2, %s233_s26  ;;  %p238_p6 = scmp.lt.s32.totalorder %s172_s2, %s172_s2 }
  0x33   :  { %p239_p7 = scmp.lt.s32.totalorder %s237_s27, %s233_s26 }
  0x34   :  { %v147_v23 = vsel %vm146_vm0, %v145_v22, 0.0 }
  0x35   :  { %148 = vadd.xlane.f32.xlu0 %v147_v23  ;;  %p240_p8 = por %p239_p7, %p238_p6 }
  0x37   :  { %p241_p9 = pnand %p240_p8, %p234_p5 }
  0xc2   :  { %v149_v25 = vpop.xlane.xlu0 %148 }
  0xc3   :  { %v150_v26 = vrot.slane %v149_v25, 4 }
  0xc5   :  { %v151_v27 = vadd.f32 %v150_v26, %v149_v25 }
  0xc7   :  { %v152_v28 = vrot.slane %v151_v27, 2 }
  0xc9   :  { %v153_v29 = vadd.f32 %v152_v28, %v151_v27 }
  0xcb   :  { %v154_v30 = vrot.slane %v153_v29, 1 }
  0xcd   :  { %v155_v31 = vadd.f32 %v154_v30, %v153_v29 }
  0xcf   :  { %216 = vpush %v155_v31 }
 0x100   :  { %s217_s25 = spop %216 }
 0x101   :  { %v159_v33 = vstv %s217_s25 }
 0x102   :  { %v160_v34 = vadd.f32 %v159_v33, %v158_v32 }
 0x104   :  { %162 = vst.msk [vmem:[#allocation5] sm:$0x1] %vm31_vm1, %v160_v34 }
 0x105   :  { %244 = shalt.err (!%p241_p9)
}
 0x106   :  { %s245_s30 = scalar_lea.hbm %s407_s3, 16 }
 0x107   :  { %p246_p10 = scmp.ne.s32.totalorder %s407_s3, %s245_s30  ;;  %p249_p11 = scmp.lt.u32.totalorder %s245_s30, %s407_s3 }
 0x109   :  { %p251_p12 = pnand %p249_p11, %p246_p10 }
 0x10b   :  { %254 = shalt.err (!%p251_p12)
}
 0x10c   :  { %174 = dma.vmem_to_hbm [thread:$0]  %s172_s2, 16, %s407_s3, [#allocation3]  }
 0x10d   :  { %257 = dma.done.wait [#allocation3], 16  }
 0x10e   :  { %258 = vsyncadd [#allocation3], 4294967280 }
 0x10f   :  { %180 = vsyncpa [#allocation3], 1 }
 0x110   :  { %181 = vsyncpa [#allocation4], 1 }

// kernel: _lambda_.14
= control target key start
LH: loop header
LB: loop body
LE: loop exit
PB: predicated region body
PF: predicated region fallthrough
CT: control target
= control target key end

     0   :  { %9 = vsyncpa [#allocation4], 0  ;;  %s1563_s0 = inlined_call_operand.vmem [shape: f32[84], index: 0, kind: input, shape index: {}]   ;;  %s1564_s1 = inlined_call_operand.vmem [shape: f32[20,2,4,128], index: 1, kind: input, shape index: {}]   ;;  %s1565_s2 = inlined_call_operand.vmem [shape: f32[4,2,4,128], index: 2, kind: output, shape index: {0}]   ;;  %s1566_s3 = inlined_call_operand.hbm [shape: f32[1,1], index: 3, kind: output, shape index: {1}]  }
   0x1   :  { %10 = vsyncpa [#allocation3], 0  ;;  %s17_s14 = sshll.u32 %s1563_s0, 4  ;;  %s18_s14 = int_to_ptr.vmem [resolvable:$true] %s17_s14 }
   0x2   :  { %s830_s15 = scalar_lea.vmem %s18_s14, 16  ;;  %p835_p1 = scmp.lt.s32.totalorder %s18_s14, %s18_s14 }
   0x3   :  { %p831_p0 = scmp.ne.s32.totalorder %s18_s14, %s830_s15  ;;  %p836_p2 = scmp.lt.s32.totalorder %s830_s15, %s830_s15 }
   0x5   :  { %p837_p3 = por %p836_p2, %p835_p1 }
   0x7   :  { %p838_p4 = pnand %p837_p3, %p831_p0 }
   0x9   :  { %841 = shalt.err (!%p838_p4)
}
   0xa   :  { %s868_s16 = smov [#allocation2]  }
   0xb   :  { %20 = dma.vmem_to_smem %s18_s14, 16, %s868_s16, [#allocation4]  }
   0xc   :  { %864 = dma.done.wait [#allocation4], 16  }
   0xd   :  { %865 = vsyncadd [#allocation4], 4294967280 }
   0xe   :  { %26 = sfence }
   0xf   :  { %s694_s17 = sld [smem:[#allocation2 + $0x52]]  ;;  %s703_s19 = sld [smem:[#allocation2 + $0x6]]  ;;  %v899_v0 = vld [vmem:[%s1564_s1] sm:$0xf]  ;;  %v904_v1 = vld [vmem:[%s1564_s1 + $0x4] sm:$0xf] }
  0x10   :  { %s697_s18 = sld [smem:[#allocation2 + $0x2]]  ;;  %s894_s21 = sld [smem:[#allocation2 + $0xe]]  ;;  %1602 = vst [vmem:[#allocation8_spill] sm:$0xff] %v899_v0  ;;  %1603 = vst [vmem:[#allocation9_spill] sm:$0xff] %v904_v1  ;;  %v911_v2 = vld [vmem:[%s1564_s1 + $0x8] sm:$0xf] }
  0x11   :  { %s709_s20 = sld [smem:[#allocation2 + $0xa]]  ;;  %1604 = vst [vmem:[#allocation10_spill] sm:$0xff] %v911_v2  ;;  %v916_v3 = vld [vmem:[%s1564_s1 + $0xc] sm:$0xf]  ;;  %s918_s30 = sld [smem:[#allocation2 + $0x16]]  ;;  %vm590_vm0 = vcmask 1043456  }
  0x12   :  { %s906_s25 = sld [smem:[#allocation2 + $0x12]]  ;;  %1605 = vst [vmem:[#allocation11_spill] sm:$0xff] %v916_v3  ;;  %v923_v6 = vld [vmem:[%s1564_s1 + $0x10] sm:$0xf]  ;;  %v928_v7 = vld [vmem:[%s1564_s1 + $0x14] sm:$0xf] }
  0x13   :  { %1606 = vst [vmem:[#allocation12_spill] sm:$0xff] %v923_v6  ;;  %1607 = vst [vmem:[#allocation13_spill] sm:$0xff] %v928_v7  ;;  %s930_s8 = sld [smem:[#allocation2 + $0x1a]]  ;;  %v937_v11 = vld [vmem:[%s1564_s1 + $0x18] sm:$0xf]  ;;  %s939_s11 = sld [smem:[#allocation2 + $0x1e]] }
  0x14   :  { %v946_v15 = vld [vmem:[%s1564_s1 + $0x1c] sm:$0xf]  ;;  %v951_v16 = vld [vmem:[%s1564_s1 + $0x20] sm:$0xf]  ;;  %s953_s16 = sld [smem:[#allocation2 + $0x22]]  ;;  %s967_s0 = sld [smem:[#allocation2 + $0x26]] }
  0x15   :  { %v38_v4 = vstv %s694_s17  ;;  %v83_v10 = vstv %s703_s19  ;;  %v960_v21 = vld [vmem:[%s1564_s1 + $0x24] sm:$0xf]  ;;  %v965_v22 = vld [vmem:[%s1564_s1 + $0x28] sm:$0xf]  ;;  %s981_s27 = sld [smem:[#allocation2 + $0x2a]]  ;;  %s995_s4 = sld [smem:[#allocation2 + $0x2e]] }
  0x16   :  { %v56_v5 = vstv %s697_s18  ;;  %v84_v12 = vmul.f32 %v911_v2, %v83_v10  ;;  %v85_v13 = vmul.f32 %v916_v3, %v83_v10  ;;  %v137_v23 = vstv %s894_s21  ;;  %v974_v25 = vld [vmem:[%s1564_s1 + $0x2c] sm:$0xf]  ;;  %v979_v26 = vld [vmem:[%s1564_s1 + $0x30] sm:$0xf]  ;;  %s1009_s10 = sld [smem:[#allocation2 + $0x32]]  ;;  %s1023_s14 = sld [smem:[#allocation2 + $0x36]] }
  0x17   :  { %v57_v8 = vmul.f32 %v56_v5, %v899_v0  ;;  %v58_v9 = vmul.f32 %v56_v5, %v904_v1  ;;  %v110_v14 = vstv %s709_s20  ;;  %v138_v29 = vmul.f32 %v937_v11, %v137_v23  ;;  %v988_v31 = vld [vmem:[%s1564_s1 + $0x34] sm:$0xf]  ;;  %v993_v32 = vld [vmem:[%s1564_s1 + $0x38] sm:$0xf]  ;;  %v1002_v35 = vld [vmem:[%s1564_s1 + $0x3c] sm:$0xf] }
  0x18   :  { %v111_v19 = vmul.f32 %v923_v6, %v110_v14  ;;  %v112_v20 = vmul.f32 %v928_v7, %v110_v14  ;;  %v164_v24 = vstv %s906_s25  ;;  %v139_v30 = vmul.f32 %v946_v15, %v137_v23  ;;  %v1007_v36 = vld [vmem:[%s1564_s1 + $0x40] sm:$0xf]  ;;  %v1016_v41 = vld [vmem:[%s1564_s1 + $0x44] sm:$0xf]  ;;  %v1021_v42 = vld [vmem:[%s1564_s1 + $0x48] sm:$0xf] }
  0x19   :  { %v59_v17 = vadd.f32 %v57_v8, %v38_v4  ;;  %v60_v18 = vadd.f32 %v58_v9, %v38_v4  ;;  %v191_v33 = vstv %s918_s30  ;;  %v218_v34 = vstv %s930_s8  ;;  %v1031_v46 = vld [vmem:[%s1564_s1 + $0x4c] sm:$0xf]  ;;  %v1036_v47 = vld [vmem:[%s1564_s1 + $0x50] sm:$0xf]  ;;  %s1038_s20 = sld [smem:[#allocation2 + $0x3a]]  ;;  %s1052_s24 = sld [smem:[#allocation2 + $0x3e]] }
  0x1a   :  { %v165_v39 = vmul.f32 %v951_v16, %v164_v24  ;;  %v166_v40 = vmul.f32 %v960_v21, %v164_v24  ;;  %v192_v43 = vmul.f32 %v965_v22, %v191_v33  ;;  %v245_v44 = vstv %s939_s11  ;;  %v1045_v52 = vld [vmem:[%s1564_s1 + $0x54] sm:$0xf]  ;;  %v1050_v53 = vld [vmem:[%s1564_s1 + $0x58] sm:$0xf]  ;;  %v1061_v58 = vld [vmem:[%s1564_s1 + $0x5c] sm:$0xf] }
  0x1b   :  { %v86_v27 = vadd.f32 %v84_v12, %v59_v17  ;;  %v87_v28 = vadd.f32 %v85_v13, %v60_v18  ;;  %v272_v45 = vstv %s953_s16  ;;  %v193_v50 = vmul.f32 %v974_v25, %v191_v33  ;;  %v1066_v59 = vld [vmem:[%s1564_s1 + $0x60] sm:$0xf]  ;;  %s1068_s29 = sld [smem:[#allocation2 + $0x42]]  ;;  %v1075_v4 = vld [vmem:[%s1564_s1 + $0x64] sm:$0xf]  ;;  %s1082_s7 = sld [smem:[#allocation2 + $0x46]] }
  0x1c   :  { %v219_v51 = vmul.f32 %v979_v26, %v218_v34  ;;  %v220_v54 = vmul.f32 %v988_v31, %v218_v34  ;;  %v246_v55 = vmul.f32 %v993_v32, %v245_v44  ;;  %v299_v56 = vstv %s967_s0  ;;  %v1080_v5 = vld [vmem:[%s1564_s1 + $0x68] sm:$0xf]  ;;  %v1091_v13 = vld [vmem:[%s1564_s1 + $0x6c] sm:$0xf]  ;;  %v1096_v14 = vld [vmem:[%s1564_s1 + $0x70] sm:$0xf] }
  0x1d   :  { %v113_v37 = vadd.f32 %v111_v19, %v86_v27  ;;  %v114_v38 = vadd.f32 %v112_v20, %v87_v28  ;;  %v326_v57 = vstv %s981_s27  ;;  %v247_v62 = vmul.f32 %v1002_v35, %v245_v44  ;;  %1608 = vst [vmem:[#allocation14_spill] sm:$0xff] %v1096_v14  ;;  %s1098_s13 = sld [smem:[#allocation2 + $0x4a]]  ;;  %v1105_v23 = vld [vmem:[%s1564_s1 + $0x74] sm:$0xf]  ;;  %v1110_v24 = vld [vmem:[%s1564_s1 + $0x78] sm:$0xf] }
  0x1e   :  { %v273_v63 = vmul.f32 %v1007_v36, %v272_v45  ;;  %v274_v8 = vmul.f32 %v1016_v41, %v272_v45  ;;  %v300_v9 = vmul.f32 %v1021_v42, %v299_v56  ;;  %v353_v10 = vstv %s995_s4  ;;  %1609 = vst [vmem:[#allocation15_spill] sm:$0xff] %v1105_v23  ;;  %1610 = vst [vmem:[#allocation16_spill] sm:$0xff] %v1110_v24  ;;  %s1112_s18 = sld [smem:[#allocation2 + $0x4e]]  ;;  %s1114_s19 = sld [smem:[#allocation2 + $0x50]]  ;;  %v1123_v33 = vld [vmem:[%s1564_s1 + $0x7c] sm:$0xf] }
  0x1f   :  { %v140_v48 = vadd.f32 %v138_v29, %v113_v37  ;;  %v141_v49 = vadd.f32 %v139_v30, %v114_v38  ;;  %v380_v12 = vstv %s1009_s10  ;;  %v301_v19 = vmul.f32 %v1031_v46, %v299_v56  ;;  %1611 = vst [vmem:[#allocation17_spill] sm:$0xff] %v1123_v33  ;;  %s1125_s22 = sld [smem:[#allocation2]]  ;;  %s1127_s23 = sld [smem:[#allocation2 + $0x4]] }
  0x20   :  { %v327_v20 = vmul.f32 %v1036_v47, %v326_v57  ;;  %v328_v27 = vmul.f32 %v1045_v52, %v326_v57  ;;  %v354_v28 = vmul.f32 %v1050_v53, %v353_v10  ;;  %v407_v29 = vstv %s1023_s14  ;;  %s1141_s25 = sld [smem:[#allocation2 + $0x8]]  ;;  %s1185_s12 = sld [smem:[#allocation2 + $0x14]] }
  0x21   :  { %v167_v60 = vadd.f32 %v165_v39, %v140_v48  ;;  %v168_v61 = vadd.f32 %v166_v40, %v141_v49  ;;  %v434_v30 = vstv %s1038_s20  ;;  %v355_v38 = vmul.f32 %v1061_v58, %v353_v10  ;;  %v1134_v40 = vld [vmem:[%s1564_s1 + $0x80] sm:$0xf]  ;;  %s1170_s9 = sld [smem:[#allocation2 + $0x10]]  ;;  %s1225_s10 = sld [smem:[#allocation2 + $0x24]] }
  0x22   :  { %v381_v39 = vmul.f32 %v1066_v59, %v380_v12  ;;  %1612 = vst [vmem:[#allocation18_spill] sm:$0xff] %v1134_v40  ;;  %v382_v44 = vmul.f32 %v1075_v4, %v380_v12  ;;  %v1145_v45 = vmul.f32 %v1080_v5, %v407_v29  ;;  %v461_v48 = vstv %s1052_s24  ;;  %v1182_v12 = vld [vmem:[%s1564_s1 + $0x94] sm:$0xf]  ;;  %s1187_s4 = sld [smem:[#allocation2 + $0x18]]  ;;  %s1251_s16 = sld [smem:[#allocation2 + $0x34]] }
  0x23   :  { %v194_v17 = vadd.f32 %v192_v43, %v167_v60  ;;  %v195_v18 = vadd.f32 %v193_v50, %v168_v61  ;;  %v1139_v43 = vld [vmem:[%s1564_s1 + $0x84] sm:$0xf]  ;;  %v488_v49 = vstv %s1068_s29  ;;  %v1152_v50 = vld [vmem:[%s1564_s1 + $0x88] sm:$0xf]  ;;  %v409_v57 = vmul.f32 %v1091_v13, %v407_v29  ;;  %v1166_v61 = vld [vmem:[%s1564_s1 + $0x90] sm:$0xf] }
  0x24   :  { %1613 = vst [vmem:[#allocation19_spill] sm:$0xff] %v1139_v43  ;;  %1614 = vst [vmem:[#allocation20_spill] sm:$0xff] %v1152_v50  ;;  %v1161_v60 = vmul.f32 %v1096_v14, %v434_v30  ;;  %s1168_s29 = sld [smem:[#allocation2 + $0xc]]  ;;  %v1173_v10 = vmul.f32 %v1105_v23, %v434_v30  ;;  %v1190_v30 = vmul.f32 %v1123_v33, %v461_v48  ;;  %s1231_s15 = sld [smem:[#allocation2 + $0x28]]  ;;  %vm31_vm9 = vcmask 0  }
  0x25   :  { %v221_v34 = vadd.f32 %v219_v51, %v194_v17  ;;  %v222_v37 = vadd.f32 %v220_v54, %v195_v18  ;;  %v1157_v51 = vld [vmem:[%s1564_s1 + $0x8c] sm:$0xf]  ;;  %1616 = vst [vmem:[#allocation22_spill] sm:$0xff] %v1166_v61  ;;  %1617 = vst [vmem:[#allocation23_spill] sm:$0xff] %v1182_v12  ;;  %v542_v17 = vstv %s1098_s13  ;;  %v71_v33 = vstv %s1127_s23  ;;  %s1223_s13 = sld [smem:[#allocation2 + $0x20]]  ;;  %s1290_s14 = sld [smem:[#allocation2 + $0x44]] }
  0x26   :  { %1615 = vst [vmem:[#allocation21_spill] sm:$0xff] %v1157_v51  ;;  %v1205_v14 = vmul.f32 %v1166_v61, %v542_v17  ;;  %s1249_s11 = sld [smem:[#allocation2 + $0x30]]  ;;  %s1300_s28 = sld [smem:[#allocation2 + $0x53]] }
  0x27   :  { %v248_v54 = vadd.f32 %v246_v55, %v221_v34  ;;  %v249_v56 = vadd.f32 %v247_v62, %v222_v37  ;;  %v1176_v55 = vmul.f32 %v1110_v24, %v461_v48  ;;  %v515_v62 = vstv %s1082_s7  ;;  %s1217_s7 = sld [smem:[#allocation2 + $0x1c]]  ;;  %s1264_s26 = sld [smem:[#allocation2 + $0x38]] }
  0x28   :  { %v1193_v34 = vmul.f32 %v1134_v40, %v488_v49  ;;  %v1196_v37 = vmul.f32 %v1139_v43, %v488_v49  ;;  %v1199_v24 = vmul.f32 %v1152_v50, %v515_v62  ;;  %v1202_v23 = vmul.f32 %v1157_v51, %v515_v62  ;;  %s1280_s21 = sld [smem:[#allocation2 + $0x40]]  ;;  %s1302_s0 = sld [smem:[#allocation2 + $0x3]] }
  0x29   :  { %v275_v18 = vadd.f32 %v273_v63, %v248_v54  ;;  %v276_v29 = vadd.f32 %v274_v8, %v249_v56  ;;  %v1208_v48 = vmul.f32 %v1182_v12, %v542_v17  ;;  %v569_v54 = vstv %s1112_s18  ;;  %s1292_s20 = sld [smem:[#allocation2 + $0x48]]  ;;  %s1308_s27 = sld [smem:[#allocation2 + $0x7]] }
  0x2a   :  { %v34_v56 = vstv %s1114_s19  ;;  %v44_v40 = vstv %s1125_s22  ;;  %v98_v49 = vstv %s1141_s25  ;;  %s1243_s19 = sld [smem:[#allocation2 + $0x2c]]  ;;  %s1310_s5 = sld [smem:[#allocation2 + $0xb]] }
  0x2b   :  { %v302_v63 = vadd.f32 %v300_v9, %v275_v18  ;;  %v303_v8 = vadd.f32 %v301_v19, %v276_v29  ;;  %v45_v62 = vmul.f32 %v44_v40, %v899_v0  ;;  %v46_v61 = vmul.f32 %v44_v40, %v904_v1  ;;  %s1298_s25 = sld [smem:[#allocation2 + $0x4c]]  ;;  %s1323_s30 = sld [smem:[#allocation2 + $0xf]] }
  0x2c   :  { %v72_v9 = vmul.f32 %v911_v2, %v71_v33  ;;  %v73_v19 = vmul.f32 %v916_v3, %v71_v33  ;;  %v99_v17 = vmul.f32 %v923_v6, %v98_v49  ;;  %v100_v18 = vmul.f32 %v928_v7, %v98_v49  ;;  %v1236_v49 = vld [vmem:[%s1564_s1 + $0x98] sm:$0xf]  ;;  %s1329_s8 = sld [smem:[#allocation2 + $0x13]]  ;;  %s1372_s17 = sld [smem:[#allocation2 + $0x2f]] }
  0x2d   :  { %v329_v43 = vadd.f32 %v327_v20, %v302_v63  ;;  %v330_v50 = vadd.f32 %v328_v27, %v303_v8  ;;  %v47_v29 = vadd.f32 %v45_v62, %v34_v56  ;;  %v48_v63 = vadd.f32 %v46_v61, %v34_v56  ;;  %s1374_s18 = sld [smem:[#allocation2 + $0x33]]  ;;  %s1395_s23 = sld [smem:[#allocation2 + $0x47]] }
  0x2e   :  { %v125_v8 = vstv %s1168_s29  ;;  %v152_v40 = vstv %s1170_s9  ;;  %v179_v1 = vstv %s1185_s12  ;;  %v206_v0 = vstv %s1187_s4  ;;  %s1331_s12 = sld [smem:[#allocation2 + $0x17]]  ;;  %s1344_s4 = sld [smem:[#allocation2 + $0x1b]] }
  0x2f   :  { %v356_v20 = vadd.f32 %v354_v28, %v329_v43  ;;  %v357_v27 = vadd.f32 %v355_v38, %v330_v50  ;;  %v74_v7 = vadd.f32 %v72_v9, %v47_v29  ;;  %v75_v6 = vadd.f32 %v73_v19, %v48_v63  ;;  %s1389_s22 = sld [smem:[#allocation2 + $0x43]]  ;;  %s1431_s6 = sld [smem:[#allocation2 + $0xd]] }
  0x30   :  { %v126_v28 = vmul.f32 %v937_v11, %v125_v8  ;;  %v127_v38 = vmul.f32 %v946_v15, %v125_v8  ;;  %v153_v43 = vmul.f32 %v951_v16, %v152_v40  ;;  %v154_v50 = vmul.f32 %v960_v21, %v152_v40  ;;  %s1433_s24 = sld [smem:[#allocation2 + $0x11]]  ;;  %s1439_s29 = sld [smem:[#allocation2 + $0x15]] }
  0x31   :  { %v383_v2 = vadd.f32 %v381_v39, %v356_v20  ;;  %v384_v33 = vadd.f32 %v382_v44, %v357_v27  ;;  %v101_v39 = vadd.f32 %v99_v17, %v74_v7  ;;  %v102_v44 = vadd.f32 %v100_v18, %v75_v6  ;;  %v1258_v6 = vld [vmem:[%s1564_s1 + $0x9c] sm:$0xf]  ;;  %s1278_s1 = sld [smem:[#allocation2 + $0x3c]]  ;;  %s1441_s9 = sld [smem:[#allocation2 + $0x19]] }
  0x32   :  { %v570_v62 = vmul.f32 %v1236_v49, %v569_v54  ;;  %v180_v9 = vmul.f32 %v965_v22, %v179_v1  ;;  %v181_v19 = vmul.f32 %v974_v25, %v179_v1  ;;  %v207_v20 = vmul.f32 %v979_v26, %v206_v0 }
  0x33   :  { %v410_v61 = vadd.f32 %v1145_v45, %v383_v2  ;;  %v411_v56 = vadd.f32 %v409_v57, %v384_v33  ;;  %v128_v45 = vadd.f32 %v126_v28, %v101_v39  ;;  %v129_v57 = vadd.f32 %v127_v38, %v102_v44 }
  0x34   :  { %v208_v1 = vmul.f32 %v988_v31, %v206_v0  ;;  %v233_v17 = vstv %s1217_s7  ;;  %v260_v18 = vstv %s1223_s13  ;;  %v287_v27 = vstv %s1225_s10  ;;  %s1348_s7 = sld [smem:[#allocation2 + $0x1f]]  ;;  %s1354_s13 = sld [smem:[#allocation2 + $0x23]] }
  0x35   :  { %v437_v2 = vadd.f32 %v1161_v60, %v410_v61  ;;  %v438_v7 = vadd.f32 %v1173_v10, %v411_v56  ;;  %v155_v10 = vadd.f32 %v153_v43, %v128_v45  ;;  %v156_v63 = vadd.f32 %v154_v50, %v129_v57  ;;  %s1356_s10 = sld [smem:[#allocation2 + $0x27]] }
  0x36   :  { %v571_v8 = vmul.f32 %v1258_v6, %v569_v54  ;;  %v234_v40 = vmul.f32 %v993_v32, %v233_v17  ;;  %v235_v33 = vmul.f32 %v1002_v35, %v233_v17  ;;  %v314_v28 = vstv %s1231_s15  ;;  %s1362_s15 = sld [smem:[#allocation2 + $0x2b]] }
  0x37   :  { %v464_v29 = vadd.f32 %v1176_v55, %v437_v2  ;;  %v465_v60 = vadd.f32 %v1190_v30, %v438_v7  ;;  %v182_v61 = vadd.f32 %v180_v9, %v155_v10  ;;  %v183_v55 = vadd.f32 %v181_v19, %v156_v63 }
  0x38   :  { %v261_v30 = vmul.f32 %v1007_v36, %v260_v18  ;;  %v262_v43 = vmul.f32 %v1016_v41, %v260_v18  ;;  %v288_v54 = vmul.f32 %v1021_v42, %v287_v27  ;;  %v289_v50 = vmul.f32 %v1031_v46, %v287_v27 }
  0x39   :  { %v491_v0 = vadd.f32 %v1193_v34, %v464_v29  ;;  %v492_v38 = vadd.f32 %v1196_v37, %v465_v60  ;;  %v209_v37 = vadd.f32 %v207_v20, %v182_v61  ;;  %v210_v39 = vadd.f32 %v208_v1, %v183_v55  ;;  %v1618_v55 = vld [vmem:[#allocation14_spill] sm:$0xff] }
  0x3a   :  { %v315_v44 = vmul.f32 %v1036_v47, %v314_v28  ;;  %v341_v9 = vstv %s1243_s19  ;;  %v368_v19 = vstv %s1249_s11  ;;  %v395_v2 = vstv %s1251_s16  ;;  %s1379_s19 = sld [smem:[#allocation2 + $0x37]]  ;;  %s1381_s11 = sld [smem:[#allocation2 + $0x3b]] }
  0x3b   :  { %v518_v34 = vadd.f32 %v1199_v24, %v491_v0  ;;  %v519_v56 = vadd.f32 %v1202_v23, %v492_v38  ;;  %v236_v57 = vadd.f32 %v234_v40, %v209_v37  ;;  %v237_v17 = vadd.f32 %v235_v33, %v210_v39  ;;  %v1620_v37 = vld [vmem:[#allocation16_spill] sm:$0xff]  ;;  %s1387_s16 = sld [smem:[#allocation2 + $0x3f]] }
  0x3c   :  { %v316_v23 = vmul.f32 %v1045_v52, %v314_v28  ;;  %v342_v24 = vmul.f32 %v1050_v53, %v341_v9  ;;  %v343_v20 = vmul.f32 %v1061_v58, %v341_v9  ;;  %v422_v1 = vstv %s1264_s26  ;;  %v1621_v9 = vld [vmem:[#allocation17_spill] sm:$0xff]  ;;  %s1397_s26 = sld [smem:[#allocation2 + $0x4b]] }
  0x3d   :  { %v545_v7 = vadd.f32 %v1205_v14, %v518_v34  ;;  %v546_v45 = vadd.f32 %v1208_v48, %v519_v56  ;;  %v263_v27 = vadd.f32 %v261_v30, %v236_v57  ;;  %v264_v48 = vadd.f32 %v262_v43, %v237_v17  ;;  %v1619_v43 = vld [vmem:[#allocation15_spill] sm:$0xff] }
  0x3e   :  { %v369_v29 = vmul.f32 %v1066_v59, %v368_v19  ;;  %v370_v60 = vmul.f32 %v1075_v4, %v368_v19  ;;  %v396_v10 = vmul.f32 %v1080_v5, %v395_v2  ;;  %v397_v63 = vmul.f32 %v1091_v13, %v395_v2  ;;  %v1622_v2 = vld [vmem:[#allocation18_spill] sm:$0xff] }
  0x3f   :  { %v572_v18 = vadd.f32 %v570_v62, %v545_v7  ;;  %v573_v14 = vadd.f32 %v571_v8, %v546_v45  ;;  %v290_v40 = vadd.f32 %v288_v54, %v263_v27  ;;  %v291_v33 = vadd.f32 %v289_v50, %v264_v48 }
  0x40   :  { %v449_v28 = vstv %s1278_s1  ;;  %v476_v0 = vstv %s1280_s21  ;;  %v423_v30 = vmul.f32 %v1618_v55, %v422_v1  ;;  %v424_v34 = vmul.f32 %v1619_v43, %v422_v1  ;;  %v1623_v1 = vld [vmem:[#allocation19_spill] sm:$0xff]  ;;  %s1403_s1 = sld [smem:[#allocation2 + $0x4f]] }
  0x41   :  { %vm624_vm1 = vcmp.ge.f32.partialorder %v572_v18, 0.0  ;;  %vm625_vm2 = vcmp.ge.f32.partialorder %v573_v14, 0.0  ;;  %v626_v62 = vmul.f32 0.1, %v572_v18  ;;  %v627_v8 = vmul.f32 0.1, %v573_v14 }
  0x42   :  { %v317_v54 = vadd.f32 %v315_v44, %v290_v40  ;;  %v318_v50 = vadd.f32 %v316_v23, %v291_v33  ;;  %v450_v39 = vmul.f32 %v1620_v37, %v449_v28  ;;  %v451_v19 = vmul.f32 %v1621_v9, %v449_v28 }
  0x43   :  { %v628_v38 = vsel %vm624_vm1, %v572_v18, %v626_v62  ;;  %v629_v61 = vsel %vm625_vm2, %v573_v14, %v627_v8  ;;  %v477_v7 = vmul.f32 %v1622_v2, %v476_v0  ;;  %v503_v45 = vstv %s1290_s14  ;;  %v1624_v14 = vld [vmem:[#allocation20_spill] sm:$0xff]  ;;  %v1625_v62 = vld [vmem:[#allocation22_spill] sm:$0xff] }
  0x44   :  { %816 = vst [vmem:[%s1565_s2 + $0x14] sm:$0xf] %v629_v61  ;;  %v633_v56 = vsub.f32 %v628_v38, %v629_v61  ;;  %815 = vst [vmem:[%s1565_s2 + $0x10] sm:$0xf] %v628_v38  ;;  %v530_v57 = vstv %s1292_s20  ;;  %v344_v17 = vadd.f32 %v342_v24, %v317_v54  ;;  %v345_v23 = vadd.f32 %v343_v20, %v318_v50  ;;  %v1626_v50 = vld [vmem:[#allocation8_spill] sm:$0xff] }
  0x45   :  { %v478_v18 = vmul.f32 %v1623_v1, %v476_v0  ;;  %v504_v27 = vmul.f32 %v1624_v14, %v503_v45  ;;  %v505_v48 = vmul.f32 %v1157_v51, %v503_v45  ;;  %v531_v8 = vmul.f32 %v1625_v62, %v530_v57  ;;  %v1627_v62 = vld [vmem:[#allocation9_spill] sm:$0xff] }
  0x46   :  { %v634_v44 = vand.u32 2147483647, %v633_v56  ;;  %v557_v40 = vstv %s1298_s25  ;;  %v371_v28 = vadd.f32 %v369_v29, %v344_v17  ;;  %v372_v38 = vadd.f32 %v370_v60, %v345_v23  ;;  %v1628_v29 = vld [vmem:[#allocation10_spill] sm:$0xff]  ;;  %v1629_v17 = vld [vmem:[#allocation12_spill] sm:$0xff] }
  0x47   :  { %v532_v61 = vmul.f32 %v1182_v12, %v530_v57  ;;  %v40_v56 = vstv %s1300_s28  ;;  %v62_v2 = vstv %s1302_s0  ;;  %v89_v24 = vstv %s1308_s27  ;;  %s1412_s28 = sld [smem:[#allocation2 + $0x51]]  ;;  %s1420_s27 = sld [smem:[#allocation2 + $0x5]] }
  0x48   :  { %v635_v33 = vsel %vm590_vm0, %v634_v44, 0.0  ;;  %v116_v20 = vstv %s1310_s5  ;;  %v398_v0 = vadd.f32 %v396_v10, %v371_v28  ;;  %v399_v54 = vadd.f32 %v397_v63, %v372_v38  ;;  %s1414_s0 = sld [smem:[#allocation2 + $0x1]] }
  0x49   :  { %636 = vadd.xlane.f32.xlu1 %v635_v33  ;;  %v63_v45 = vmul.f32 %v62_v2, %v1626_v50  ;;  %v64_v44 = vmul.f32 %v62_v2, %v1627_v62  ;;  %v90_v60 = vmul.f32 %v1628_v29, %v89_v24  ;;  %v91_v57 = vmul.f32 %v916_v3, %v89_v24  ;;  %v1630_v33 = vld [vmem:[#allocation13_spill] sm:$0xff]  ;;  %s1422_s5 = sld [smem:[#allocation2 + $0x9]] }
  0x4a   :  { %v117_v23 = vmul.f32 %v1629_v17, %v116_v20  ;;  %v118_v12 = vmul.f32 %v1630_v33, %v116_v20  ;;  %v425_v10 = vadd.f32 %v423_v30, %v398_v0  ;;  %v426_v63 = vadd.f32 %v424_v34, %v399_v54 }
  0x4b   :  { %v65_v28 = vadd.f32 %v63_v45, %v40_v56  ;;  %v66_v38 = vadd.f32 %v64_v44, %v40_v56  ;;  %v558_v2 = vmul.f32 %v1236_v49, %v557_v40  ;;  %v143_v62 = vstv %s1323_s30  ;;  %s1461_s30 = sld [smem:[#allocation2 + $0x1d]] }
  0x4c   :  { %v170_v50 = vstv %s1329_s8  ;;  %v197_v51 = vstv %s1331_s12  ;;  %v452_v24 = vadd.f32 %v450_v39, %v425_v10  ;;  %v453_v17 = vadd.f32 %v451_v19, %v426_v63  ;;  %s1467_s8 = sld [smem:[#allocation2 + $0x21]]  ;;  %s1469_s12 = sld [smem:[#allocation2 + $0x25]] }
  0x4d   :  { %v92_v3 = vadd.f32 %v90_v60, %v65_v28  ;;  %v93_v20 = vadd.f32 %v91_v57, %v66_v38  ;;  %v144_v33 = vmul.f32 %v937_v11, %v143_v62  ;;  %v145_v29 = vmul.f32 %v946_v15, %v143_v62 }
  0x4e   :  { %v171_v30 = vmul.f32 %v951_v16, %v170_v50  ;;  %v172_v34 = vmul.f32 %v960_v21, %v170_v50  ;;  %v479_v56 = vadd.f32 %v477_v7, %v452_v24  ;;  %v480_v0 = vadd.f32 %v478_v18, %v453_v17 }
  0x4f   :  { %v119_v54 = vadd.f32 %v117_v23, %v92_v3  ;;  %v120_v45 = vadd.f32 %v118_v12, %v93_v20  ;;  %v559_v39 = vmul.f32 %v1258_v6, %v557_v40  ;;  %v198_v19 = vmul.f32 %v965_v22, %v197_v51 }
  0x50   :  { %v199_v44 = vmul.f32 %v974_v25, %v197_v51  ;;  %v224_v60 = vstv %s1344_s4  ;;  %v506_v62 = vadd.f32 %v504_v27, %v479_v56  ;;  %v507_v57 = vadd.f32 %v505_v48, %v480_v0  ;;  %s1479_s4 = sld [smem:[#allocation2 + $0x29]] }
  0x51   :  { %v146_v10 = vadd.f32 %v144_v33, %v119_v54  ;;  %v147_v50 = vadd.f32 %v145_v29, %v120_v45  ;;  %v251_v7 = vstv %s1348_s7  ;;  %v278_v18 = vstv %s1354_s13  ;;  %s1485_s7 = sld [smem:[#allocation2 + $0x2d]]  ;;  %s1489_s13 = sld [smem:[#allocation2 + $0x31]] }
  0x52   :  { %v305_v3 = vstv %s1356_s10  ;;  %v533_v12 = vadd.f32 %v531_v8, %v506_v62  ;;  %v534_v17 = vadd.f32 %v532_v61, %v507_v57  ;;  %v225_v51 = vmul.f32 %v979_v26, %v224_v60  ;;  %s1493_s10 = sld [smem:[#allocation2 + $0x35]] }
  0x53   :  { %v173_v40 = vadd.f32 %v171_v30, %v146_v10  ;;  %v174_v23 = vadd.f32 %v172_v34, %v147_v50  ;;  %v226_v27 = vmul.f32 %v988_v31, %v224_v60  ;;  %v252_v48 = vmul.f32 %v993_v32, %v251_v7 }
  0x54   :  { %v332_v29 = vstv %s1362_s15  ;;  %v560_v33 = vadd.f32 %v558_v2, %v533_v12  ;;  %v561_v63 = vadd.f32 %v559_v39, %v534_v17  ;;  %v253_v8 = vmul.f32 %v1002_v35, %v251_v7  ;;  %s1499_s15 = sld [smem:[#allocation2 + $0x39]] }
  0x55   :  { %v200_v28 = vadd.f32 %v198_v19, %v173_v40  ;;  %v201_v38 = vadd.f32 %v199_v44, %v174_v23  ;;  %v279_v61 = vmul.f32 %v1007_v36, %v278_v18  ;;  %v280_v24 = vmul.f32 %v1016_v41, %v278_v18 }
  0x56   :  { %v306_v20 = vmul.f32 %v1021_v42, %v305_v3  ;;  %vm580_vm3 = vcmp.ge.f32.partialorder %v560_v33, 0.0  ;;  %vm581_vm4 = vcmp.ge.f32.partialorder %v561_v63, 0.0  ;;  %v582_v2 = vmul.f32 0.1, %v560_v33 }
  0x57   :  { %v583_v30 = vmul.f32 0.1, %v561_v63  ;;  %v227_v34 = vadd.f32 %v225_v51, %v200_v28  ;;  %v228_v56 = vadd.f32 %v226_v27, %v201_v38  ;;  %v307_v0 = vmul.f32 %v1031_v46, %v305_v3 }
  0x58   :  { %v359_v54 = vstv %s1372_s17  ;;  %v584_v45 = vsel %vm580_vm3, %v560_v33, %v582_v2  ;;  %v333_v19 = vmul.f32 %v1036_v47, %v332_v29  ;;  %v386_v44 = vstv %s1374_s18  ;;  %s1505_s17 = sld [smem:[#allocation2 + $0x3d]] }
  0x59   :  { %v585_v39 = vsel %vm581_vm4, %v561_v63, %v583_v30  ;;  %586 = vst [vmem:[%s1565_s2] sm:$0xf] %v584_v45  ;;  %v254_v62 = vadd.f32 %v252_v48, %v227_v34  ;;  %v255_v57 = vadd.f32 %v253_v8, %v228_v56  ;;  %v334_v10 = vmul.f32 %v1045_v52, %v332_v29 }
  0x5a   :  { %587 = vst [vmem:[%s1565_s2 + $0x4] sm:$0xf] %v585_v39  ;;  %v588_v60 = vsub.f32 %v584_v45, %v585_v39  ;;  %v360_v50 = vmul.f32 %v1050_v53, %v359_v54  ;;  %v361_v7 = vmul.f32 %v1061_v58, %v359_v54  ;;  %v413_v18 = vstv %s1379_s19 }
  0x5b   :  { %v440_v3 = vstv %s1381_s11  ;;  %v281_v17 = vadd.f32 %v279_v61, %v254_v62  ;;  %v282_v40 = vadd.f32 %v280_v24, %v255_v57  ;;  %v387_v23 = vmul.f32 %v1066_v59, %v386_v44  ;;  %v1632_v57 = vld [vmem:[#allocation21_spill] sm:$0xff] }
  0x5c   :  { %v589_v12 = vand.u32 2147483647, %v588_v60  ;;  %v388_v51 = vmul.f32 %v1075_v4, %v386_v44  ;;  %v414_v27 = vmul.f32 %v1080_v5, %v413_v18  ;;  %v415_v48 = vmul.f32 %v1091_v13, %v413_v18 }
  0x5d   :  { %v467_v29 = vstv %s1387_s16  ;;  %v308_v63 = vadd.f32 %v306_v20, %v281_v17  ;;  %v309_v28 = vadd.f32 %v307_v0, %v282_v40  ;;  %v441_v38 = vmul.f32 %v1618_v55, %v440_v3  ;;  %v1631_v0 = vld [vmem:[#allocation18_spill] sm:$0xff] }
  0x5e   :  { %v591_v33 = vsel %vm590_vm0, %v589_v12, 0.0  ;;  %v442_v8 = vmul.f32 %v1619_v43, %v440_v3  ;;  %v494_v61 = vstv %s1389_s22  ;;  %v521_v24 = vstv %s1395_s23  ;;  %v1633_v3 = vld [vmem:[#allocation22_spill] sm:$0xff]  ;;  %s1515_s22 = sld [smem:[#allocation2 + $0x41]]  ;;  %s1520_s23 = sld [smem:[#allocation2 + $0x45]] }
  0x5f   :  { %592 = vadd.xlane.f32.xlu0 %v591_v33  ;;  %v548_v2 = vstv %s1397_s26  ;;  %v335_v20 = vadd.f32 %v333_v19, %v308_v63  ;;  %v336_v30 = vadd.f32 %v334_v10, %v309_v28  ;;  %v468_v34 = vmul.f32 %v1620_v37, %v467_v29  ;;  %v1634_v63 = vld [vmem:[#allocation8_spill] sm:$0xff]  ;;  %s804_s26 = sld [smem:[#allocation2 + $0x49]] }
  0x60   :  { %v469_v56 = vmul.f32 %v1621_v9, %v467_v29  ;;  %v495_v54 = vmul.f32 %v1631_v0, %v494_v61  ;;  %v496_v45 = vmul.f32 %v1623_v1, %v494_v61  ;;  %v522_v39 = vmul.f32 %v1624_v14, %v521_v24  ;;  %v1635_v61 = vld [vmem:[#allocation9_spill] sm:$0xff] }
  0x61   :  { %v575_v44 = vstv %s1403_s1  ;;  %v362_v60 = vadd.f32 %v360_v50, %v335_v20  ;;  %v363_v62 = vadd.f32 %v361_v7, %v336_v30  ;;  %v523_v18 = vmul.f32 %v1632_v57, %v521_v24  ;;  %v1636_v50 = vld [vmem:[#allocation10_spill] sm:$0xff]  ;;  %v1637_v20 = vld [vmem:[#allocation11_spill] sm:$0xff]  ;;  %v1638_v30 = vld [vmem:[#allocation12_spill] sm:$0xff]  ;;  %s810_s1 = sld [smem:[#allocation2 + $0x4d]] }
  0x62   :  { %v549_v12 = vmul.f32 %v1633_v3, %v548_v2  ;;  %v36_v17 = vstv %s1412_s28  ;;  %v50_v19 = vstv %s1414_s0  ;;  %v77_v10 = vstv %s1420_s27  ;;  %v1639_v57 = vld [vmem:[#allocation13_spill] sm:$0xff] }
  0x63   :  { %v104_v40 = vstv %s1422_s5  ;;  %v389_v29 = vadd.f32 %v387_v23, %v362_v60  ;;  %v390_v33 = vadd.f32 %v388_v51, %v363_v62  ;;  %v51_v28 = vmul.f32 %v50_v19, %v1634_v63 }
  0x64   :  { %v52_v14 = vmul.f32 %v50_v19, %v1635_v61  ;;  %v78_v7 = vmul.f32 %v1636_v50, %v77_v10  ;;  %v79_v24 = vmul.f32 %v1637_v20, %v77_v10  ;;  %v105_v3 = vmul.f32 %v1638_v30, %v104_v40 }
  0x65   :  { %v106_v1 = vmul.f32 %v1639_v57, %v104_v40  ;;  %v416_v0 = vadd.f32 %v414_v27, %v389_v29  ;;  %v417_v9 = vadd.f32 %v415_v48, %v390_v33  ;;  %v53_v37 = vadd.f32 %v51_v28, %v36_v17  ;;  %v1640_v28 = vld [vmem:[#allocation23_spill] sm:$0xff] }
  0x66   :  { %v54_v23 = vadd.f32 %v52_v14, %v36_v17  ;;  %v131_v60 = vstv %s1431_s6  ;;  %v158_v51 = vstv %s1433_s24  ;;  %v185_v62 = vstv %s1439_s29  ;;  %s870_s29 = smov [#allocation5]  }
  0x67   :  { %v212_v63 = vstv %s1441_s9  ;;  %v443_v19 = vadd.f32 %v441_v38, %v416_v0  ;;  %v444_v10 = vadd.f32 %v442_v8, %v417_v9  ;;  %v80_v61 = vadd.f32 %v78_v7, %v53_v37  ;;  %s681_s9 = sshll.u32 %s870_s29, 4  ;;  %s682_s9 = int_to_ptr.vmem [resolvable:$true] %s681_s9 }
  0x68   :  { %v81_v50 = vadd.f32 %v79_v24, %v54_v23  ;;  %v132_v57 = vmul.f32 %v937_v11, %v131_v60  ;;  %v133_v40 = vmul.f32 %v946_v15, %v131_v60  ;;  %v159_v27 = vmul.f32 %v951_v16, %v158_v51  ;;  %p847_p6 = scmp.lt.s32.totalorder %s682_s9, %s682_s9 }
  0x69   :  { %v160_v14 = vmul.f32 %v960_v21, %v158_v51  ;;  %v470_v48 = vadd.f32 %v468_v34, %v443_v19  ;;  %v471_v17 = vadd.f32 %v469_v56, %v444_v10  ;;  %v107_v29 = vadd.f32 %v105_v3, %v80_v61 }
  0x6a   :  { %v108_v33 = vadd.f32 %v106_v1, %v81_v50  ;;  %v550_v20 = vmul.f32 %v1640_v28, %v548_v2  ;;  %v576_v38 = vmul.f32 %v1236_v49, %v575_v44  ;;  %v186_v37 = vmul.f32 %v965_v22, %v185_v62 }
  0x6b   :  { %v187_v11 = vmul.f32 %v974_v25, %v185_v62  ;;  %v497_v15 = vadd.f32 %v495_v54, %v470_v48  ;;  %v498_v16 = vadd.f32 %v496_v45, %v471_v17  ;;  %v134_v21 = vadd.f32 %v132_v57, %v107_v29 }
  0x6c   :  { %v135_v9 = vadd.f32 %v133_v40, %v108_v33  ;;  %v577_v8 = vmul.f32 %v1258_v6, %v575_v44  ;;  %v213_v1 = vmul.f32 %v979_v26, %v212_v63  ;;  %v214_v2 = vmul.f32 %v988_v31, %v212_v63 }
  0x6d   :  { %v239_v34 = vstv %s1461_s30  ;;  %v524_v22 = vadd.f32 %v522_v39, %v497_v15  ;;  %v525_v56 = vadd.f32 %v523_v18, %v498_v16  ;;  %v161_v0 = vadd.f32 %v159_v27, %v134_v21  ;;  %s842_s30 = scalar_lea.vmem %s682_s9, 16 }
  0x6e   :  { %v162_v25 = vadd.f32 %v160_v14, %v135_v9  ;;  %v266_v3 = vstv %s1467_s8  ;;  %v293_v7 = vstv %s1469_s12  ;;  %v240_v26 = vmul.f32 %v993_v32, %v239_v34  ;;  %p843_p5 = scmp.ne.s32.totalorder %s682_s9, %s842_s30  ;;  %s846_s8 = scalar_lea.vmem %s682_s9, 32 }
  0x6f   :  { %v551_v54 = vadd.f32 %v549_v12, %v524_v22  ;;  %v552_v45 = vadd.f32 %v550_v20, %v525_v56  ;;  %v188_v24 = vadd.f32 %v186_v37, %v161_v0  ;;  %v241_v31 = vmul.f32 %v1002_v35, %v239_v34  ;;  %v1641_v56 = vld [vmem:[#allocation16_spill] sm:$0xff]  ;;  %p848_p7 = scmp.lt.s32.totalorder %s846_s8, %s842_s30 }
  0x70   :  { %v189_v44 = vadd.f32 %v187_v11, %v162_v25  ;;  %v267_v60 = vmul.f32 %v1007_v36, %v266_v3  ;;  %v268_v51 = vmul.f32 %v1016_v41, %v266_v3  ;;  %v294_v12 = vmul.f32 %v1021_v42, %v293_v7  ;;  %v1642_v25 = vld [vmem:[#allocation17_spill] sm:$0xff] }
  0x71   :  { %v578_v30 = vadd.f32 %v576_v38, %v551_v54  ;;  %v579_v23 = vadd.f32 %v577_v8, %v552_v45  ;;  %v215_v39 = vadd.f32 %v213_v1, %v188_v24  ;;  %v320_v62 = vstv %s1479_s4  ;;  %v1643_v45 = vld [vmem:[#allocation18_spill] sm:$0xff]  ;;  %v1644_v24 = vld [vmem:[#allocation19_spill] sm:$0xff]  ;;  %p849_p8 = por %p848_p7, %p847_p6 }
  0x72   :  { %v216_v18 = vadd.f32 %v214_v2, %v189_v44  ;;  %v295_v10 = vmul.f32 %v1031_v46, %v293_v7  ;;  %v347_v61 = vstv %s1485_s7  ;;  %v321_v36 = vmul.f32 %v1036_v47, %v320_v62 }
  0x73   :  { %vm646_vm5 = vcmp.ge.f32.partialorder %v578_v30, 0.0  ;;  %vm647_vm6 = vcmp.ge.f32.partialorder %v579_v23, 0.0  ;;  %v648_v32 = vmul.f32 0.1, %v578_v30  ;;  %v649_v35 = vmul.f32 0.1, %v579_v23  ;;  %p850_p9 = pnand %p849_p8, %p843_p5 }
  0x74   :  { %v242_v63 = vadd.f32 %v240_v26, %v215_v39  ;;  %v243_v19 = vadd.f32 %v241_v31, %v216_v18  ;;  %v322_v41 = vmul.f32 %v1045_v52, %v320_v62  ;;  %v374_v27 = vstv %s1489_s13 }
  0x75   :  { %v650_v50 = vsel %vm646_vm5, %v578_v30, %v648_v32  ;;  %v651_v57 = vsel %vm647_vm6, %v579_v23, %v649_v35  ;;  %v348_v47 = vmul.f32 %v1050_v53, %v347_v61  ;;  %v349_v17 = vmul.f32 %v1061_v58, %v347_v61 }
  0x76   :  { %817 = vst [vmem:[%s1565_s2 + $0x18] sm:$0xf] %v650_v50  ;;  %818 = vst [vmem:[%s1565_s2 + $0x1c] sm:$0xf] %v651_v57  ;;  %v655_v42 = vsub.f32 %v650_v50, %v651_v57  ;;  %v269_v46 = vadd.f32 %v267_v60, %v242_v63  ;;  %v270_v40 = vadd.f32 %v268_v51, %v243_v19  ;;  %v401_v33 = vstv %s1493_s10 }
  0x77   :  { %v375_v29 = vmul.f32 %v1066_v59, %v374_v27  ;;  %v376_v53 = vmul.f32 %v1075_v4, %v374_v27  ;;  %v428_v11 = vstv %s1499_s15  ;;  %v402_v58 = vmul.f32 %v1080_v5, %v401_v33 }
  0x78   :  { %v656_v52 = vand.u32 2147483647, %v655_v42  ;;  %v296_v14 = vadd.f32 %v294_v12, %v269_v46  ;;  %v297_v48 = vadd.f32 %v295_v10, %v270_v40  ;;  %v403_v59 = vmul.f32 %v1091_v13, %v401_v33  ;;  %v1647_v12 = vld [vmem:[#allocation22_spill] sm:$0xff] }
  0x79   :  { %v455_v21 = vstv %s1505_s17  ;;  %v429_v1 = vmul.f32 %v1618_v55, %v428_v11  ;;  %v430_v2 = vmul.f32 %v1619_v43, %v428_v11  ;;  %v482_v34 = vstv %s1515_s22  ;;  %v1645_v55 = vld [vmem:[#allocation20_spill] sm:$0xff]  ;;  %v1646_v43 = vld [vmem:[#allocation21_spill] sm:$0xff] }
  0x7a   :  { %v657_v20 = vsel %vm590_vm0, %v656_v52, 0.0  ;;  %v323_v38 = vadd.f32 %v321_v36, %v296_v14  ;;  %v324_v37 = vadd.f32 %v322_v41, %v297_v48  ;;  %v456_v0 = vmul.f32 %v1641_v56, %v455_v21 }
  0x7b   :  { %658 = vadd.xlane.f32.xlu1 %v657_v20  ;;  %v457_v3 = vmul.f32 %v1642_v25, %v455_v21  ;;  %v509_v7 = vstv %s1520_s23  ;;  %v483_v13 = vmul.f32 %v1643_v45, %v482_v34  ;;  %v484_v44 = vmul.f32 %v1644_v24, %v482_v34 }
  0x7c   :  { %v350_v15 = vadd.f32 %v348_v47, %v323_v38  ;;  %v351_v16 = vadd.f32 %v349_v17, %v324_v37  ;;  %v536_v26 = vstv %s804_s26  ;;  %v510_v23 = vmul.f32 %v1645_v55, %v509_v7 }
  0x7d   :  { %v511_v39 = vmul.f32 %v1646_v43, %v509_v7  ;;  %v563_v18 = vstv %s810_s1  ;;  %v537_v62 = vmul.f32 %v1647_v12, %v536_v26  ;;  %v538_v32 = vmul.f32 %v1640_v28, %v536_v26 }
  0x7e   :  { %v377_v9 = vadd.f32 %v375_v29, %v350_v15  ;;  %v378_v8 = vadd.f32 %v376_v53, %v351_v16  ;;  %v564_v19 = vmul.f32 %v1236_v49, %v563_v18  ;;  %v565_v10 = vmul.f32 %v1258_v6, %v563_v18 }
  0x7f   :  { %v869_v27 = vmov 0.0  }
  0x80   :  { %v404_v4 = vadd.f32 %v402_v58, %v377_v9  ;;  %v405_v22 = vadd.f32 %v403_v59, %v378_v8  ;;  %32 = vst.msk [vmem:[#allocation5] sm:$0x1] %vm31_vm9, %v869_v27 }
  0x82   :  { %v431_v54 = vadd.f32 %v429_v1, %v404_v4  ;;  %v432_v5 = vadd.f32 %v430_v2, %v405_v22 }
  0x84   :  { %v458_v31 = vadd.f32 %v456_v0, %v431_v54  ;;  %v459_v30 = vadd.f32 %v457_v3, %v432_v5 }
  0x86   :  { %v485_v60 = vadd.f32 %v483_v13, %v458_v31  ;;  %v486_v51 = vadd.f32 %v484_v44, %v459_v30 }
  0x87   :  { %v668_v7 = vld [vmem:[#allocation5] sm:$0x1] }
  0x88   :  { %v512_v35 = vadd.f32 %v510_v23, %v485_v60  ;;  %v513_v63 = vadd.f32 %v511_v39, %v486_v51 }
  0x8a   :  { %v539_v61 = vadd.f32 %v537_v62, %v512_v35  ;;  %v540_v50 = vadd.f32 %v538_v32, %v513_v63 }
  0x8c   :  { %v566_v57 = vadd.f32 %v564_v19, %v539_v61  ;;  %v567_v36 = vadd.f32 %v565_v10, %v540_v50 }
  0x8e   :  { %vm602_vm7 = vcmp.ge.f32.partialorder %v566_v57, 0.0  ;;  %vm603_vm8 = vcmp.ge.f32.partialorder %v567_v36, 0.0  ;;  %v604_v41 = vmul.f32 0.1, %v566_v57  ;;  %v605_v42 = vmul.f32 0.1, %v567_v36 }
  0x90   :  { %v606_v46 = vsel %vm602_vm7, %v566_v57, %v604_v41  ;;  %v607_v40 = vsel %vm603_vm8, %v567_v36, %v605_v42 }
  0x91   :  { %813 = vst [vmem:[%s1565_s2 + $0x8] sm:$0xf] %v606_v46  ;;  %814 = vst [vmem:[%s1565_s2 + $0xc] sm:$0xf] %v607_v40  ;;  %v611_v49 = vsub.f32 %v606_v46, %v607_v40 }
  0x93   :  { %v612_v6 = vand.u32 2147483647, %v611_v49 }
  0x95   :  { %v613_v28 = vsel %vm590_vm0, %v612_v6, 0.0 }
  0x96   :  { %614 = vadd.xlane.f32.xlu0 %v613_v28 }
  0xd6   :  { %v637_v20 = vpop.xlane.xlu1 %636 }
  0xd7   :  { %v638_v53 = vrot.slane %v637_v20, 4 }
  0xd9   :  { %v639_v15 = vadd.f32 %v638_v53, %v637_v20 }
  0xdb   :  { %v640_v58 = vrot.slane %v639_v15, 2 }
  0xdd   :  { %v641_v1 = vadd.f32 %v640_v58, %v639_v15 }
  0xdf   :  { %v642_v22 = vrot.slane %v641_v1, 1 }
  0xe1   :  { %v643_v3 = vadd.f32 %v642_v22, %v641_v1 }
  0xec   :  { %v593_v47 = vpop.xlane.xlu0 %592 }
  0xed   :  { %v594_v52 = vrot.slane %v593_v47, 4 }
  0xef   :  { %v595_v14 = vadd.f32 %v594_v52, %v593_v47 }
  0xf1   :  { %v596_v48 = vrot.slane %v595_v14, 2 }
  0xf3   :  { %v597_v17 = vadd.f32 %v596_v48, %v595_v14 }
  0xf5   :  { %v598_v29 = vrot.slane %v597_v17, 1 }
  0xf7   :  { %v599_v33 = vadd.f32 %v598_v29, %v597_v17 }
  0xf9   :  { %819 = vpush %v599_v33 }
 0x108   :  { %v659_v38 = vpop.xlane.xlu1 %658 }
 0x109   :  { %v660_v37 = vrot.slane %v659_v38, 4 }
 0x10b   :  { %v661_v11 = vadd.f32 %v660_v37, %v659_v38 }
 0x10d   :  { %v662_v16 = vrot.slane %v661_v11, 2 }
 0x10f   :  { %v663_v9 = vadd.f32 %v662_v16, %v661_v11 }
 0x111   :  { %v664_v4 = vrot.slane %v663_v9, 1 }
 0x113   :  { %v665_v25 = vadd.f32 %v664_v4, %v663_v9 }
 0x123   :  { %v615_v59 = vpop.xlane.xlu0 %614 }
 0x124   :  { %v616_v21 = vrot.slane %v615_v59, 4 }
 0x126   :  { %v617_v8 = vadd.f32 %v616_v21, %v615_v59 }
 0x128   :  { %v618_v2 = vrot.slane %v617_v8, 2 }
 0x12a   :  { %v619_v34 = vadd.f32 %v618_v2, %v617_v8  ;;  %s820_s2 = spop %819 }
 0x12c   :  { %v620_v56 = vrot.slane %v619_v34, 1 }
 0x12e   :  { %v621_v0 = vadd.f32 %v620_v56, %v619_v34 }
 0x130   :  { %821 = vpush %v621_v0 }
 0x131   :  { %823 = vpush %v643_v3 }
 0x132   :  { %825 = vpush %v665_v25 }
 0x161   :  { %s822_s28 = spop %821 }
 0x162   :  { %s623_s0 = sadd.f32 %s822_s28, %s820_s2  ;;  %s824_s27 = spop %823 }
 0x163   :  { %s826_s6 = spop %825 }
 0x164   :  { %s645_s5 = sadd.f32 %s824_s27, %s623_s0 }
 0x166   :  { %s667_s24 = sadd.f32 %s826_s6, %s645_s5 }
 0x168   :  { %v669_v54 = vstv %s667_s24 }
 0x169   :  { %v670_v5 = vadd.f32 %v669_v54, %v668_v7 }
 0x16b   :  { %672 = vst.msk [vmem:[#allocation5] sm:$0x1] %vm31_vm9, %v670_v5 }
 0x16c   :  { %853 = shalt.err (!%p850_p9)
}
 0x16d   :  { %s854_s7 = scalar_lea.hbm %s1566_s3, 16 }
 0x16e   :  { %p855_p10 = scmp.ne.s32.totalorder %s1566_s3, %s854_s7  ;;  %p858_p11 = scmp.lt.u32.totalorder %s854_s7, %s1566_s3 }
 0x170   :  { %p860_p12 = pnand %p858_p11, %p855_p10 }
 0x172   :  { %863 = shalt.err (!%p860_p12)
}
 0x173   :  { %684 = dma.vmem_to_hbm [thread:$0]  %s682_s9, 16, %s1566_s3, [#allocation3]  }
 0x174   :  { %866 = dma.done.wait [#allocation3], 16  }
 0x175   :  { %867 = vsyncadd [#allocation3], 4294967280 }
 0x176   :  { %690 = vsyncpa [#allocation3], 1 }
 0x177   :  { %691 = vsyncpa [#allocation4], 1 }

// kernel: squeeze.50
= control target key start
LH: loop header
LB: loop body
LE: loop exit
PB: predicated region body
PF: predicated region fallthrough
CT: control target
= control target key end

     0   :  { %vm7_vm0 = vcmask 113664   ;;  %s37_s8 = smov 14   ;;  %s38_s9 = smov 28   ;;  %vm13_vm1 = vcmask 458064   ;;  %vm19_vm2 = vcmask 343264   ;;  %vm25_vm3 = vcmask 228464   ;;  %s55_s0 = inlined_call_operand.vmem [shape: f32[1,1,4,14], index: 0, kind: input, shape index: {}]   ;;  %s56_s1 = inlined_call_operand.vmem [shape: f32[56], index: 1, kind: output, shape index: {}]  }
   0x1   :  { %v4_v0 = vld [vmem:[%s55_s0] sm:$0xf]  ;;  %s36_s0 = smov 42  }
   0x2   :  { %5 = vst [vmem:[#allocation1] sm:$0xf] %v4_v0 }
   0x9   :  { %v10_v1 = vld [vmem:[#allocation1 + $0x3] sm:$0x1]   ;;  %v22_v2 = vld [vmem:[#allocation1 + $0x1] sm:$0x1]   ;;  %v6_v3 = vld [vmem:[#allocation1] sm:$0x1]  }
   0xa   :  { %11 = vrot.lane.b32.xlu0 %v10_v1, %s36_s0  ;;  %23 = vrot.lane.b32.xlu1 %v22_v2, %s37_s8  ;;  %v16_v4 = vld [vmem:[#allocation1 + $0x2] sm:$0x1]   ;;  %8 = vst.msk [vmem:[#allocation0] sm:$0x1] %vm7_vm0, %v6_v3  }
   0xe   :  { %17 = vrot.lane.b32.xlu0 %v16_v4, %s38_s9 }
  0x7c   :  { %v12_v5 = vpop.permute.xlu0 %11   ;;  %v24_v6 = vpop.permute.xlu1 %23  }
  0x7d   :  { %14 = vst.msk [vmem:[#allocation0] sm:$0x1] %vm13_vm1, %v12_v5  }
  0x80   :  { %v18_v7 = vpop.permute.xlu0 %17  }
  0x81   :  { %20 = vst.msk [vmem:[#allocation0] sm:$0x1] %vm19_vm2, %v18_v7  }
  0x82   :  { %26 = vst.msk [vmem:[#allocation0] sm:$0x1] %vm25_vm3, %v24_v6  }
  0x89   :  { %v30_v8 = vld [vmem:[#allocation0] sm:$0x1] }
  0x8a   :  { %32 = vst [vmem:[%s56_s1] sm:$0x1] %v30_v8 }

// kernel: sub.4
= control target key start
LH: loop header
LB: loop body
LE: loop exit
PB: predicated region body
PF: predicated region fallthrough
CT: control target
= control target key end

     0   :  { %s34_s0 = inlined_call_operand.vmem [shape: f32[56], index: 0, kind: input, shape index: {}]   ;;  %s35_s1 = inlined_call_operand.vmem [shape: f32[56], index: 1, kind: input, shape index: {}]   ;;  %s36_s2 = inlined_call_operand.vmem [shape: f32[56], index: 2, kind: output, shape index: {}]  }
   0x1   :  { %v3_v0 = vld [vmem:[%s34_s0] sm:$0x1] }
   0x2   :  { %v4_v1 = vld [vmem:[%s35_s1] sm:$0x1] }
   0x3   :  { %v7_v2 = vsub.f32 %v3_v0, %v4_v1 }
   0x5   :  { %9 = vst [vmem:[%s36_s2] sm:$0x1] %v7_v2 }

// kernel: _lambda_.15
= control target key start
LH: loop header
LB: loop body
LE: loop exit
PB: predicated region body
PF: predicated region fallthrough
CT: control target
= control target key end

     0   :  { %9 = vsyncpa [#allocation4], 0  ;;  %s404_s0 = inlined_call_operand.vmem [shape: f32[13], index: 0, kind: input, shape index: {}]   ;;  %s405_s1 = inlined_call_operand.vmem [shape: f32[12,2,4,128], index: 1, kind: input, shape index: {}]   ;;  %s406_s2 = inlined_call_operand.vmem [shape: f32[1,2,4,128], index: 2, kind: output, shape index: {0}]   ;;  %s407_s3 = inlined_call_operand.hbm [shape: f32[1,1], index: 3, kind: output, shape index: {1}]  }
   0x1   :  { %10 = vsyncpa [#allocation3], 0  ;;  %s17_s14 = sshll.u32 %s404_s0, 4  ;;  %s18_s14 = int_to_ptr.vmem [resolvable:$true] %s17_s14 }
   0x2   :  { %s221_s15 = scalar_lea.vmem %s18_s14, 16  ;;  %p226_p1 = scmp.lt.s32.totalorder %s18_s14, %s18_s14 }
   0x3   :  { %p222_p0 = scmp.ne.s32.totalorder %s18_s14, %s221_s15  ;;  %p227_p2 = scmp.lt.s32.totalorder %s221_s15, %s221_s15 }
   0x5   :  { %p228_p3 = por %p227_p2, %p226_p1 }
   0x7   :  { %p229_p4 = pnand %p228_p3, %p222_p0 }
   0x9   :  { %232 = shalt.err (!%p229_p4)
}
   0xa   :  { %s259_s16 = smov [#allocation2]  }
   0xb   :  { %20 = dma.vmem_to_smem %s18_s14, 16, %s259_s16, [#allocation4]  }
   0xc   :  { %255 = dma.done.wait [#allocation4], 16  }
   0xd   :  { %256 = vsyncadd [#allocation4], 4294967280 }
   0xe   :  { %26 = sfence }
   0xf   :  { %s182_s17 = sld [smem:[#allocation2 + $0xc]]  ;;  %s37_s18 = sld [smem:[#allocation2]]  ;;  %v35_v0 = vld [vmem:[%s405_s1] sm:$0xf]  ;;  %v36_v1 = vld [vmem:[%s405_s1 + $0x4] sm:$0xf] }
  0x10   :  { %s185_s19 = sld [smem:[#allocation2 + $0x1]]  ;;  %s188_s20 = sld [smem:[#allocation2 + $0x2]]  ;;  %v183_v2 = vld [vmem:[%s405_s1 + $0x8] sm:$0xf]  ;;  %v184_v3 = vld [vmem:[%s405_s1 + $0xc] sm:$0xf] }
  0x11   :  { %s285_s21 = sld [smem:[#allocation2 + $0x3]]  ;;  %s293_s25 = sld [smem:[#allocation2 + $0x4]]  ;;  %v186_v6 = vld [vmem:[%s405_s1 + $0x10] sm:$0xf]  ;;  %v187_v7 = vld [vmem:[%s405_s1 + $0x14] sm:$0xf] }
  0x12   :  { %s301_s30 = sld [smem:[#allocation2 + $0x5]]  ;;  %s309_s8 = sld [smem:[#allocation2 + $0x6]]  ;;  %v189_v14 = vld [vmem:[%s405_s1 + $0x18] sm:$0xf]  ;;  %v190_v15 = vld [vmem:[%s405_s1 + $0x1c] sm:$0xf] }
  0x13   :  { %s317_s13 = sld [smem:[#allocation2 + $0x7]]  ;;  %v192_v21 = vld [vmem:[%s405_s1 + $0x20] sm:$0xf]  ;;  %v193_v22 = vld [vmem:[%s405_s1 + $0x24] sm:$0xf]  ;;  %s336_s22 = sld [smem:[#allocation2 + $0x9]] }
  0x14   :  { %v195_v28 = vld [vmem:[%s405_s1 + $0x28] sm:$0xf]  ;;  %v196_v29 = vld [vmem:[%s405_s1 + $0x2c] sm:$0xf]  ;;  %v198_v35 = vld [vmem:[%s405_s1 + $0x30] sm:$0xf] }
  0x15   :  { %v34_v4 = vstv %s182_s17  ;;  %v38_v5 = vstv %s37_s18  ;;  %s327_s18 = sld [smem:[#allocation2 + $0x8]]  ;;  %v199_v36 = vld [vmem:[%s405_s1 + $0x34] sm:$0xf]  ;;  %s345_s27 = sld [smem:[#allocation2 + $0xa]]  ;;  %v201_v42 = vld [vmem:[%s405_s1 + $0x38] sm:$0xf] }
  0x16   :  { %v39_v8 = vmul.f32 %v38_v5, %v35_v0  ;;  %v40_v9 = vmul.f32 %v38_v5, %v36_v1  ;;  %v47_v10 = vstv %s185_s19  ;;  %v56_v13 = vstv %s188_s20  ;;  %v202_v43 = vld [vmem:[%s405_s1 + $0x3c] sm:$0xf]  ;;  %s354_s5 = sld [smem:[#allocation2 + $0xb]]  ;;  %v204_v49 = vld [vmem:[%s405_s1 + $0x40] sm:$0xf] }
  0x17   :  { %v48_v11 = vmul.f32 %v183_v2, %v47_v10  ;;  %v49_v12 = vmul.f32 %v184_v3, %v47_v10  ;;  %v57_v18 = vmul.f32 %v186_v6, %v56_v13  ;;  %v58_v19 = vmul.f32 %v187_v7, %v56_v13  ;;  %v205_v50 = vld [vmem:[%s405_s1 + $0x44] sm:$0xf]  ;;  %v207_v56 = vld [vmem:[%s405_s1 + $0x48] sm:$0xf]  ;;  %v208_v57 = vld [vmem:[%s405_s1 + $0x4c] sm:$0xf] }
  0x18   :  { %v41_v16 = vadd.f32 %v39_v8, %v34_v4  ;;  %v42_v17 = vadd.f32 %v40_v9, %v34_v4  ;;  %v65_v20 = vstv %s285_s21  ;;  %v74_v23 = vstv %s293_s25  ;;  %v210_v63 = vld [vmem:[%s405_s1 + $0x50] sm:$0xf]  ;;  %v211_v0 = vld [vmem:[%s405_s1 + $0x54] sm:$0xf] }
  0x19   :  { %v66_v26 = vmul.f32 %v189_v14, %v65_v20  ;;  %v67_v27 = vmul.f32 %v190_v15, %v65_v20  ;;  %v83_v30 = vstv %s301_s30  ;;  %v75_v33 = vmul.f32 %v192_v21, %v74_v23  ;;  %v213_v6 = vld [vmem:[%s405_s1 + $0x58] sm:$0xf]  ;;  %v214_v7 = vld [vmem:[%s405_s1 + $0x5c] sm:$0xf]  ;;  %s261_s1 = smov [#allocation5]  }
  0x1a   :  { %v50_v24 = vadd.f32 %v48_v11, %v41_v16  ;;  %v51_v25 = vadd.f32 %v49_v12, %v42_v17  ;;  %v76_v34 = vmul.f32 %v193_v22, %v74_v23  ;;  %v92_v37 = vstv %s309_s8 }
  0x1b   :  { %v84_v40 = vmul.f32 %v195_v28, %v83_v30  ;;  %v85_v41 = vmul.f32 %v196_v29, %v83_v30  ;;  %v101_v44 = vstv %s317_s13  ;;  %v93_v47 = vmul.f32 %v198_v35, %v92_v37 }
  0x1c   :  { %v59_v31 = vadd.f32 %v57_v18, %v50_v24  ;;  %v60_v32 = vadd.f32 %v58_v19, %v51_v25  ;;  %v94_v48 = vmul.f32 %v199_v36, %v92_v37  ;;  %v110_v51 = vstv %s327_s18 }
  0x1d   :  { %v102_v54 = vmul.f32 %v201_v42, %v101_v44  ;;  %v103_v55 = vmul.f32 %v202_v43, %v101_v44  ;;  %v119_v58 = vstv %s336_s22  ;;  %v111_v61 = vmul.f32 %v204_v49, %v110_v51 }
  0x1e   :  { %v68_v38 = vadd.f32 %v66_v26, %v59_v31  ;;  %v69_v39 = vadd.f32 %v67_v27, %v60_v32  ;;  %v112_v62 = vmul.f32 %v205_v50, %v110_v51  ;;  %v128_v1 = vstv %s345_s27 }
  0x1f   :  { %v120_v4 = vmul.f32 %v207_v56, %v119_v58  ;;  %v121_v5 = vmul.f32 %v208_v57, %v119_v58  ;;  %v137_v8 = vstv %s354_s5  ;;  %v129_v11 = vmul.f32 %v210_v63, %v128_v1 }
  0x20   :  { %v77_v45 = vadd.f32 %v75_v33, %v68_v38  ;;  %v78_v46 = vadd.f32 %v76_v34, %v69_v39  ;;  %v130_v12 = vmul.f32 %v211_v0, %v128_v1  ;;  %v138_v15 = vmul.f32 %v213_v6, %v137_v8 }
  0x21   :  { %v139_v16 = vmul.f32 %v214_v7, %v137_v8  ;;  %vm146_vm0 = vcmask 1043456   ;;  %vm31_vm1 = vcmask 0   ;;  %v260_v24 = vmov 0.0  }
  0x22   :  { %v86_v52 = vadd.f32 %v84_v40, %v77_v45  ;;  %v87_v53 = vadd.f32 %v85_v41, %v78_v46  ;;  %32 = vst.msk [vmem:[#allocation5] sm:$0x1] %vm31_vm1, %v260_v24 }
  0x24   :  { %v95_v59 = vadd.f32 %v93_v47, %v86_v52  ;;  %v96_v60 = vadd.f32 %v94_v48, %v87_v53 }
  0x26   :  { %v104_v2 = vadd.f32 %v102_v54, %v95_v59  ;;  %v105_v3 = vadd.f32 %v103_v55, %v96_v60 }
  0x28   :  { %v113_v9 = vadd.f32 %v111_v61, %v104_v2  ;;  %v114_v10 = vadd.f32 %v112_v62, %v105_v3 }
  0x29   :  { %v158_v32 = vld [vmem:[#allocation5] sm:$0x1] }
  0x2a   :  { %v122_v13 = vadd.f32 %v120_v4, %v113_v9  ;;  %v123_v14 = vadd.f32 %v121_v5, %v114_v10 }
  0x2c   :  { %v131_v17 = vadd.f32 %v129_v11, %v122_v13  ;;  %v132_v18 = vadd.f32 %v130_v12, %v123_v14 }
  0x2e   :  { %v140_v19 = vadd.f32 %v138_v15, %v131_v17  ;;  %v141_v20 = vadd.f32 %v139_v16, %v132_v18 }
  0x30   :  { %142 = vst [vmem:[%s406_s2] sm:$0xf] %v140_v19  ;;  %143 = vst [vmem:[%s406_s2 + $0x4] sm:$0xf] %v141_v20  ;;  %v144_v21 = vsub.f32 %v140_v19, %v141_v20  ;;  %s171_s2 = sshll.u32 %s261_s1, 4  ;;  %s172_s2 = int_to_ptr.vmem [resolvable:$true] %s171_s2 }
  0x31   :  { %s233_s26 = scalar_lea.vmem %s172_s2, 16  ;;  %s237_s27 = scalar_lea.vmem %s172_s2, 32 }
  0x32   :  { %v145_v22 = vand.u32 2147483647, %v144_v21  ;;  %p234_p5 = scmp.ne.s32.totalorder %s172_s2, %s233_s26  ;;  %p238_p6 = scmp.lt.s32.totalorder %s172_s2, %s172_s2 }
  0x33   :  { %p239_p7 = scmp.lt.s32.totalorder %s237_s27, %s233_s26 }
  0x34   :  { %v147_v23 = vsel %vm146_vm0, %v145_v22, 0.0 }
  0x35   :  { %148 = vadd.xlane.f32.xlu0 %v147_v23  ;;  %p240_p8 = por %p239_p7, %p238_p6 }
  0x37   :  { %p241_p9 = pnand %p240_p8, %p234_p5 }
  0xc2   :  { %v149_v25 = vpop.xlane.xlu0 %148 }
  0xc3   :  { %v150_v26 = vrot.slane %v149_v25, 4 }
  0xc5   :  { %v151_v27 = vadd.f32 %v150_v26, %v149_v25 }
  0xc7   :  { %v152_v28 = vrot.slane %v151_v27, 2 }
  0xc9   :  { %v153_v29 = vadd.f32 %v152_v28, %v151_v27 }
  0xcb   :  { %v154_v30 = vrot.slane %v153_v29, 1 }
  0xcd   :  { %v155_v31 = vadd.f32 %v154_v30, %v153_v29 }
  0xcf   :  { %216 = vpush %v155_v31 }
 0x100   :  { %s217_s25 = spop %216 }
 0x101   :  { %v159_v33 = vstv %s217_s25 }
 0x102   :  { %v160_v34 = vadd.f32 %v159_v33, %v158_v32 }
 0x104   :  { %162 = vst.msk [vmem:[#allocation5] sm:$0x1] %vm31_vm1, %v160_v34 }
 0x105   :  { %244 = shalt.err (!%p241_p9)
}
 0x106   :  { %s245_s30 = scalar_lea.hbm %s407_s3, 16 }
 0x107   :  { %p246_p10 = scmp.ne.s32.totalorder %s407_s3, %s245_s30  ;;  %p249_p11 = scmp.lt.u32.totalorder %s245_s30, %s407_s3 }
 0x109   :  { %p251_p12 = pnand %p249_p11, %p246_p10 }
 0x10b   :  { %254 = shalt.err (!%p251_p12)
}
 0x10c   :  { %174 = dma.vmem_to_hbm [thread:$0]  %s172_s2, 16, %s407_s3, [#allocation3]  }
 0x10d   :  { %257 = dma.done.wait [#allocation3], 16  }
 0x10e   :  { %258 = vsyncadd [#allocation3], 4294967280 }
 0x10f   :  { %180 = vsyncpa [#allocation3], 1 }
 0x110   :  { %181 = vsyncpa [#allocation4], 1 }

// kernel: squeeze.54
= control target key start
LH: loop header
LB: loop body
LE: loop exit
PB: predicated region body
PF: predicated region fallthrough
CT: control target
= control target key end

     0   :  { %vm7_vm0 = vcmask 220160   ;;  %vm13_vm1 = vcmask 441560   ;;  %s39_s0 = inlined_call_operand.vmem [shape: f32[1,1,2,27], index: 0, kind: input, shape index: {}]   ;;  %s40_s1 = inlined_call_operand.vmem [shape: f32[54], index: 1, kind: output, shape index: {}]  }
   0x1   :  { %v4_v0 = vld [vmem:[%s39_s0] sm:$0x3]  ;;  %s22_s0 = smov 27  }
   0x2   :  { %5 = vst [vmem:[#allocation1] sm:$0x3] %v4_v0 }
   0x9   :  { %v10_v1 = vld [vmem:[#allocation1 + $0x1] sm:$0x1]   ;;  %v6_v2 = vld [vmem:[#allocation1] sm:$0x1]  }
   0xa   :  { %11 = vrot.lane.b32.xlu0 %v10_v1, %s22_s0  ;;  %8 = vst.msk [vmem:[#allocation0] sm:$0x1] %vm7_vm0, %v6_v2  }
  0x7c   :  { %v12_v3 = vpop.permute.xlu0 %11  }
  0x7d   :  { %14 = vst.msk [vmem:[#allocation0] sm:$0x1] %vm13_vm1, %v12_v3  }
  0x84   :  { %v18_v4 = vld [vmem:[#allocation0] sm:$0x1] }
  0x85   :  { %20 = vst [vmem:[%s40_s1] sm:$0x1] %v18_v4 }

// kernel: _lambda_.25
= control target key start
LH: loop header
LB: loop body
LE: loop exit
PB: predicated region body
PF: predicated region fallthrough
CT: control target
= control target key end

     0   :  { %11 = vsyncpa [#allocation4], 0  ;;  %s771_s0 = inlined_call_operand.vmem [shape: f32[4], index: 0, kind: input, shape index: {}]   ;;  %s772_s1 = inlined_call_operand.vmem [shape: s32[4], index: 1, kind: input, shape index: {}]   ;;  %s773_s2 = inlined_call_operand.vmem [shape: f32[4,8,128], index: 2, kind: input, shape index: {}]   ;;  %s774_s3 = inlined_call_operand.vmem [shape: f32[4,8,128], index: 3, kind: input, shape index: {}]   ;;  %s775_s4 = inlined_call_operand.hbm [shape: f32[1,1], index: 4, kind: output, shape index: {0}]   ;;  %s776_s5 = inlined_call_operand.hbm [shape: f32[1,1], index: 5, kind: output, shape index: {1}]  }
   0x1   :  { %12 = vsyncpa [#allocation6], 0 }
   0x2   :  { %13 = vsyncpa [#allocation3], 0 }
   0x3   :  { %14 = vsyncpa [#allocation9], 0  ;;  %s656_s18 = smov 0  }
   0x4 LB: > { %s662_s19 = sadd.s32 4294967295, %s616_s18   ;;  %p434_p0 = scmp.ge.s32.totalorder %s616_s18, 1  ;;  %s616_s18 = sphi %s656_s18, %s20_s18  }
   0x5   : > { %p161_p1 = scmp.lt.s32.totalorder %s616_s18, 5  ;;  %s174_s22 = sshll.u32 %s771_s0, 4  ;;  %s175_s22 = int_to_ptr.vmem [resolvable:$true] %s174_s22 }
   0x6   : > { %p777_p4 = scmp.eq.s32.totalorder %s662_s19, 0  ;;  %s185_s26 = sshll.u32 %s772_s1, 4  ;;  %s186_s26 = int_to_ptr.vmem [resolvable:$true] %s185_s26 }
   0x7   : > { %p670_p3 = pnand %p434_p0, %p161_p1  ;;  %s512_s28 = scalar_lea.vmem %s175_s22, 16 }
   0x8   : > { %p513_p7 = scmp.ne.s32.totalorder %s175_s22, %s512_s28  ;;  %p520_p11 = scmp.lt.s32.totalorder %s175_s22, %s175_s22 }
   0x9   : > { %s779_s23 = scalar_select %p670_p3, 1, 0 }
   0xa   : > { %p477_p5 = pneg %p670_p3  ;;  %p521_p12 = scmp.lt.s32.totalorder %s512_s28, %s512_s28 }
   0xc   : > { %p682_p6 = pnand %p777_p4, %p477_p5  ;;  %p522_p13 = por %p521_p12, %p520_p11 }
   0xe   : > { %p514_p8 = pneg %p682_p6 }
  0x10   : > { %p515_p9 = pnand %p514_p8, %p513_p7 }
  0x12   : > { %p516_p10 = pneg %p515_p9 }
  0x14   : > { %p523_p0 = pnand %p522_p13, %p516_p10 }
  0x16   : > { %526 = shalt.err (!%p523_p0)
}
  0x17   : > { %s618_s29 = smov [#allocation2]   ;;  %s527_s30 = scalar_lea.vmem %s186_s26, 16 }
  0x18   : > { %480 = dma.vmem_to_smem (!%p682_p6), %s175_s22, 16, %s618_s29, [#allocation4]  }
  0x19   : > { %p528_p1 = scmp.ne.s32.totalorder %s186_s26, %s527_s30  ;;  %p535_p4 = scmp.lt.s32.totalorder %s186_s26, %s186_s26 }
  0x1a   : > { %p536_p3 = scmp.lt.s32.totalorder %s527_s30, %s527_s30 }
  0x1b   : > { %p530_p5 = pnand %p528_p1, %p514_p8 }
  0x1c   : > { %p537_p7 = por %p536_p3, %p535_p4 }
  0x1d   : > { %p531_p2 = pneg %p530_p5 }
  0x1f   : > { %p538_p9 = pnand %p537_p7, %p531_p2 }
  0x21   : > { %541 = shalt.err (!%p538_p9)
}
  0x22   : > { %s619_s6 = smov [#allocation5]   ;;  %p781_p10 = scmp.ne.s32.totalorder %s779_s23, 0 }
  0x23   : > { %483 = dma.vmem_to_smem (!%p682_p6), %s186_s26, 16, %s619_s6, [#allocation6]  }
  0x24   : > { %212 = sbr.rel (%p781_p10) target bundleno = 372 (0x174), region = 36  ;;  %p782_p11 = scmp.eq.s32.totalorder (!%p781_p10), %s662_s19, 0 }
  0x2b   : > { %599 = dma.done.wait (%p782_p11), [#allocation4], 16   ;;  %p783_p12 = pmov %p782_p11 }
  0x2c   : > { %p784_p8 = pmov %p782_p11 }
  0x2d   : > { %601 = vsyncadd (%p783_p12), [#allocation4], 4294967280 }
  0x2e   : > { %603 = dma.done.wait (%p784_p8), [#allocation6], 16   ;;  %p785_p3 = pmov %p784_p8 }
  0x30   : > { %605 = vsyncadd (%p785_p3), [#allocation6], 4294967280 }
  0x31   : > { %222 = sfence }
  0x32   : > { %p243_p2 = scmp.lt.s32.totalorder %s662_s19, 3  ;;  %p786_p4 = scmp.ne.s32.totalorder %s662_s19, 0 }
  0x33   : > { %vm255_vm0 = vcmask (!%p786_p4), 0   ;;  %v620_v0 = vmov (!%p786_p4), 0.0  }
  0x34   : > { %s244_s7 = scalar_select %p243_p2, %s662_s19, 3 }
  0x35   : > { %254 = sbr.rel (%p786_p4) target bundleno = 60 (0x3c), region = 48  ;;  %256 = vst.msk [vmem:[#allocation7] sm:$0x1] (!%p786_p4), %vm255_vm0, %v620_v0  ;;  %257 = vst.msk [vmem:[#allocation8] sm:$0x1] (!%p786_p4), %vm255_vm0, %v620_v0 }
  0x36   : > { %s441_s8 = sshll.u32 %s244_s7, 3 }
  0x37   : > { %s246_s11 = scalar_lea.vmem %s773_s2, %s441_s8  ;;  %s250_s14 = scalar_lea.vmem %s774_s3, %s441_s8 }
  0x3c PF: > { %s258_s15 = sld [smem:[#allocation5 + %s662_s19]]  ;;  %v260_v1 = vld [vmem:[%s246_s11] sm:$0xff]  ;;  %v262_v2 = vlaneseq  ;;  %v621_v15 = vmov 0.0   ;;  %s622_s23 = smov [#allocation7]   ;;  %vm290_vm4 = vcmask 0  }
  0x3d   : > { %s259_s16 = sld [smem:[#allocation2 + %s662_s19]]  ;;  %v444_v3 = vadd.f32 -1.0, %v260_v1  ;;  %v261_v7 = vld [vmem:[%s250_s14] sm:$0xff]  ;;  %s338_s24 = sshll.u32 %s622_s23, 4  ;;  %s339_s24 = int_to_ptr.vmem [resolvable:$true] %s338_s24 }
  0x3e   : > { %v263_v4 = vshrl.u32 %v262_v2, 7  ;;  %v265_v5 = vand.u32 127, %v262_v2  ;;  %v272_v41 = vld [vmem:[#allocation7] sm:$0x1]  ;;  %p488_p6 = scmp.eq.s32.totalorder %s662_s19, 3  ;;  %s623_s27 = smov 1.0  }
  0x3f   : > { %v273_v8 = vmul.f32 %v444_v3, %v444_v3  ;;  %s542_s29 = scalar_lea.vmem %s339_s24, 16  ;;  %s548_s30 = scalar_lea.vmem %s339_s24, 32 }
  0x40   : > { %v266_v6 = vmul.u32 128, %v263_v4  ;;  %p543_p13 = scmp.ne.s32.totalorder %s339_s24, %s542_s29  ;;  %p549_p5 = scmp.lt.s32.totalorder %s339_s24, %s339_s24 }
  0x41   : > { %p550_p7 = scmp.lt.s32.totalorder %s548_s30, %s542_s29 }
  0x42   : > { %v267_v9 = vadd.s32 %v266_v6, %v265_v5  ;;  %v268_v10 = vstv %s258_s15  ;;  %s270_s17 = scvt.s32.f32 %s258_s15  ;;  %p544_p0 = pnand %p543_p13, %p488_p6 }
  0x43   : > { %v292_v11 = vstv %s259_s16  ;;  %p551_p9 = por %p550_p7, %p549_p5 }
  0x44   : > { %vm293_vm1 = vcmp.lt.f32.partialorder %v261_v7, %v292_v11  ;;  %v295_v12 = vsub.f32 %v261_v7, %v292_v11  ;;  %vm269_vm2 = vcmp.lt.s32.totalorder %v267_v9, %v268_v10  ;;  %v284_v18 = vstv %s270_s17  ;;  %p545_p1 = pneg %p544_p0 }
  0x45   : > { %v274_v13 = vsel %vm269_vm2, %v273_v8, 0.0  ;;  %vm294_vm3 = vmand %vm269_vm2, %vm293_vm1  ;;  %508 = vrcp.f32 %v284_v18 }
  0x46   : > { %v296_v14 = vmul.f32 %v295_v12, %v295_v12  ;;  %275 = vadd.xlane.f32.xlu0 %v274_v13  ;;  %v307_v16 = vsel %vm294_vm3, 1.0, %v621_v15  ;;  %p552_p10 = pnand %p551_p9, %p545_p1 }
  0x47   : > { %308 = vadd.xlane.f32.xlu1 %v307_v16 }
  0x48   : > { %v297_v17 = vsel %vm294_vm3, %v296_v14, 0.0 }
  0x4a   : > { %298 = vadd.xlane.f32.xlu0 %v297_v17 }
  0x4f   : > { %v509_v34 = vpop.eup %508 }
  0xd3   : > { %v276_v19 = vpop.xlane.xlu0 %275 }
  0xd4   : > { %v277_v20 = vrot.slane %v276_v19, 4  ;;  %v309_v21 = vpop.xlane.xlu1 %308 }
  0xd5   : > { %v310_v22 = vrot.slane %v309_v21, 4 }
  0xd6   : > { %v278_v23 = vadd.f32 %v277_v20, %v276_v19 }
  0xd7   : > { %v311_v24 = vadd.f32 %v310_v22, %v309_v21  ;;  %v299_v25 = vpop.xlane.xlu0 %298 }
  0xd8   : > { %v279_v26 = vrot.slane %v278_v23, 2  ;;  %v300_v27 = vrot.slane %v299_v25, 4 }
  0xd9   : > { %v312_v28 = vrot.slane %v311_v24, 2 }
  0xda   : > { %v301_v29 = vadd.f32 %v300_v27, %v299_v25  ;;  %v280_v30 = vadd.f32 %v279_v26, %v278_v23 }
  0xdb   : > { %v313_v31 = vadd.f32 %v312_v28, %v311_v24 }
  0xdc   : > { %v302_v32 = vrot.slane %v301_v29, 2  ;;  %v281_v33 = vrot.slane %v280_v30, 1 }
  0xdd   : > { %v314_v37 = vrot.slane %v313_v31, 1 }
  0xde   : > { %v303_v35 = vadd.f32 %v302_v32, %v301_v29  ;;  %v282_v36 = vadd.f32 %v281_v33, %v280_v30 }
  0xdf   : > { %v315_v40 = vadd.f32 %v314_v37, %v313_v31 }
  0xe0   : > { %451 = vpush %v282_v36  ;;  %v304_v38 = vrot.slane %v303_v35, 1 }
  0xe1   : > { %453 = vpush %v509_v34 }
  0xe2   : > { %v305_v39 = vadd.f32 %v304_v38, %v303_v35 }
  0xe4   : > { %455 = vpush %v305_v39 }
  0xe5   : > { %457 = vpush %v315_v40 }
 0x111   : > { %s452_s20 = spop %451 }
 0x112   : > { %s454_s21 = spop %453 }
 0x113   : > { %s287_s22 = smul.f32 %s454_s21, %s452_s20 }
 0x115   : > { %v288_v42 = vstv %s287_s22  ;;  %s714_s25 = spop %455 }
 0x116   : > { %v289_v43 = vadd.f32 %v288_v42, %v272_v41  ;;  %s717_s26 = spop %457 }
 0x117   : > { %s317_s28 = smax.f32 %s623_s27, %s717_s26 }
 0x118   : > { %v318_v44 = vstv %s317_s28  ;;  %291 = vst.msk [vmem:[#allocation7] sm:$0x1] %vm290_vm4, %v289_v43 }
 0x119   : > { %510 = vrcp.f32 %v318_v44 }
 0x11a   : > { %555 = shalt.err (!%p552_p10)
}
 0x11b   : > { %s556_s8 = scalar_lea.hbm %s775_s4, 16 }
 0x11c   : > { %p557_p11 = scmp.ne.s32.totalorder %s775_s4, %s556_s8  ;;  %p562_p3 = scmp.lt.u32.totalorder %s556_s8, %s775_s4 }
 0x11e   : > { %p558_p12 = pnand %p557_p11, %p488_p6 }
 0x120   : > { %p559_p8 = pneg %p558_p12 }
 0x122   : > { %p564_p2 = pnand %p562_p3, %p559_p8 }
 0x124   : > { %567 = shalt.err (!%p564_p2)
}
 0x125   : > { %470 = dma.vmem_to_hbm [thread:$0]  (%p488_p6), %s339_s24, 16, %s775_s4, [#allocation3]   ;;  %v511_v45 = vpop.eup %510  ;;  %v322_v46 = vld [vmem:[#allocation8] sm:$0x1] }
 0x126   : > { %459 = vpush %v511_v45  ;;  %s624_s20 = smov 0.0   ;;  %p323_p4 = scmp.gt.f32.partialorder %s717_s26, 0.0 }
 0x127   : > { %s625_s23 = smov [#allocation8]  }
 0x128   : > { %s349_s27 = sshll.u32 %s625_s23, 4  ;;  %s350_s27 = int_to_ptr.vmem [resolvable:$true] %s349_s27 }
 0x129   : > { %s568_s24 = scalar_lea.vmem %s350_s27, 16  ;;  %p575_p5 = scmp.lt.s32.totalorder %s350_s27, %s350_s27 }
 0x12a   : > { %p569_p13 = scmp.ne.s32.totalorder %s350_s27, %s568_s24 }
 0x12c   : > { %p570_p0 = pnand %p569_p13, %p488_p6 }
 0x12e   : > { %p571_p1 = pneg %p570_p0 }
 0x157   : > { %s460_s15 = spop %459 }
 0x158   : > { %s321_s16 = smul.f32 %s460_s15, %s714_s25  ;;  %s574_s25 = scalar_lea.vmem %s350_s27, 32 }
 0x159   : > { %p576_p7 = scmp.lt.s32.totalorder %s574_s25, %s568_s24 }
 0x15a   : > { %s324_s17 = ssub.f32 0.04, %s321_s16 }
 0x15b   : > { %p577_p9 = por %p576_p7, %p575_p5 }
 0x15c   : > { %s325_s21 = smax.f32 %s624_s20, %s324_s17 }
 0x15d   : > { %s326_s22 = ssub.f32 0.04, %s325_s21  ;;  %p578_p10 = pnand %p577_p9, %p571_p1 }
 0x15f   : > { %s788_s22 = smov (!%p323_p4, %s326_s22), 0.0 }
 0x160   : > { %v328_v47 = vstv %s788_s22 }
 0x161   : > { %v329_v48 = vadd.f32 %v328_v47, %v322_v46 }
 0x163   : > { %330 = vst.msk [vmem:[#allocation8] sm:$0x1] %vm290_vm4, %v329_v48 }
 0x164   : > { %581 = shalt.err (!%p578_p10)
}
 0x165   : > { %s582_s29 = scalar_lea.hbm %s776_s5, 16 }
 0x166   : > { %p583_p11 = scmp.ne.s32.totalorder %s776_s5, %s582_s29  ;;  %p588_p3 = scmp.lt.u32.totalorder %s582_s29, %s776_s5 }
 0x168   : > { %p584_p12 = pnand %p583_p11, %p488_p6 }
 0x16a   : > { %p585_p8 = pneg %p584_p12 }
 0x16c   : > { %p590_p2 = pnand %p588_p3, %p585_p8 }
 0x16e   : > { %593 = shalt.err (!%p590_p2)
}
 0x16f   : > { %472 = dma.vmem_to_hbm [thread:$0]  (%p488_p6), %s350_s27, 16, %s776_s5, [#allocation9]  }
 0x170   : > { %607 = dma.done.wait (%p488_p6), [#allocation3], 16  }
 0x171   : > { %609 = vsyncadd (%p488_p6), [#allocation3], 4294967280 }
 0x172   : > { %611 = dma.done.wait (%p488_p6), [#allocation9], 16  }
 0x173   : > { %613 = vsyncadd (%p488_p6), [#allocation9], 4294967280 }
 0x174 PF: > { %s20_s18 = sadd.s32 1, %s616_s18  }
 0x175   : > { %p17_p4 = scmp.ge.s32.totalorder %s20_s18, 6  }
 0x177   :  { %19 = sbr.rel (!%p17_p4) target bundleno = 4 (0x4), region = 87 }
 0x17e   :  { %366 = vsyncpa [#allocation3], 1 }
 0x17f   :  { %368 = vsyncpa [#allocation3 + $0x1], 1 }
 0x180   :  { %369 = vsyncpa [#allocation9], 1 }
 0x181   :  { %370 = vsyncpa [#allocation4], 1 }
 0x182   :  { %372 = vsyncpa [#allocation4 + $0x1], 1 }
 0x183   :  { %373 = vsyncpa [#allocation6], 1 }

</bundles_post_ra>
